<compile_context>
chip_gen: v7x
topology: tpu7x:2x2x1
jax: 0.10.0
libtpu: 0.0.40
codegen_flags: <defaults>
</compile_context>

<pallas_src>
import functools
import math

import jax
import jax.numpy as jnp
from jax.experimental import pallas as pl
from jax.experimental.pallas import tpu as pltpu

_VMEM = pl.BlockSpec(memory_space=pltpu.MemorySpace.VMEM)
_EPS = 1e-12


# --------------------------------- Pallas kernels ---------------------------------

def _affinity_kernel(pf_ref, pft_ref, su_ref, a_ref, asum_ref, st_ref, *, scale):
    """Per super-token: affinity softmax + pixel-sum + pixel^T @ affinity, fused.

    pf  : (BS, P, C)  pixel features            (P = h*w pixels per super token)
    pft : (BS, C, P)  same, pre-transposed in the wrapper (avoids in-kernel transpose)
    su  : (BS, C, 9)  3x3-unfolded super-token features
    """
    pf = pf_ref[...]
    su = su_ref[...]
    logits = jnp.einsum('spc,sck->spk', pf, su,
                        preferred_element_type=jnp.float32) * scale        # (BS, P, 9)
    logits = logits - jnp.max(logits, axis=-1, keepdims=True)
    e = jnp.exp(logits)
    a = e / jnp.sum(e, axis=-1, keepdims=True)                             # softmax over 9 taps
    a_ref[...] = a.astype(a_ref.dtype)
    asum_ref[...] = jnp.sum(a, axis=1, keepdims=True).astype(asum_ref.dtype)   # (BS, 1, 9)
    st_ref[...] = jnp.einsum('scp,spk->sck', pft_ref[...], a,
                             preferred_element_type=jnp.float32).astype(st_ref.dtype)


def _affinity_call(pf, pf_t, su, scale):
    bs, p, c = pf.shape
    kern = functools.partial(_affinity_kernel, scale=scale)
    return pl.pallas_call(
        kern,
        out_shape=(jax.ShapeDtypeStruct((bs, p, 9), jnp.float32),
                   jax.ShapeDtypeStruct((bs, 1, 9), jnp.float32),
                   jax.ShapeDtypeStruct((bs, c, 9), jnp.float32)),
        in_specs=[_VMEM, _VMEM, _VMEM],
        out_specs=(_VMEM, _VMEM, _VMEM),
    )(pf, pf_t, su)


def _attention_kernel(x_ref, wq_ref, wk_ref, wv_ref, bq_ref, bk_ref, bv_ref,
                      wp_ref, bp_ref, o_ref, *, num_heads, scale):
    """Full Attention refine for one batch element: qkv -> per-head attn -> proj."""
    x = x_ref[0]                                                            # (N, C)
    q = jnp.dot(x, wq_ref[...], preferred_element_type=jnp.float32) + bq_ref[...]
    k = jnp.dot(x, wk_ref[...], preferred_element_type=jnp.float32) + bk_ref[...]
    v = jnp.dot(x, wv_ref[...], preferred_element_type=jnp.float32) + bv_ref[...]
    c = q.shape[-1]
    hd = c // num_heads
    heads = []
    for h in range(num_heads):
        lo, hi = h * hd, (h + 1) * hd
        qh, kh, vh = q[:, lo:hi], k[:, lo:hi], v[:, lo:hi]                  # (N, hd)
        # logits[j, i] = <q_j, k_i> * scale  (== torch attn[i, j]); softmax over keys i.
        logits = jnp.einsum('jd,id->ji', qh, kh,
                            preferred_element_type=jnp.float32) * scale     # (N, N)
        logits = logits - jnp.max(logits, axis=-1, keepdims=True)
        e = jnp.exp(logits)
        attn = e / jnp.sum(e, axis=-1, keepdims=True)
        heads.append(jnp.dot(attn, vh, preferred_element_type=jnp.float32))  # (N, hd)
    out = jnp.concatenate(heads, axis=-1)                                    # (N, C), ch = h*hd+d
    y = jnp.dot(out, wp_ref[...], preferred_element_type=jnp.float32) + bp_ref[...]
    o_ref[0] = y.astype(o_ref.dtype)


def _attention_call(x_bnc, ap, num_heads):
    b, n, c = x_bnc.shape
    scale = float((c // num_heads) ** -0.5)
    kern = functools.partial(_attention_kernel, num_heads=num_heads, scale=scale)
    x_spec = pl.BlockSpec((1, n, c), lambda i: (i, 0, 0))
    w_spec = pl.BlockSpec((c, c), lambda i: (0, 0))
    b_spec = pl.BlockSpec((1, c), lambda i: (0, 0))
    return pl.pallas_call(
        kern,
        out_shape=jax.ShapeDtypeStruct((b, n, c), jnp.float32),
        grid=(b,),
        in_specs=[x_spec, w_spec, w_spec, w_spec, b_spec, b_spec, b_spec, w_spec, b_spec],
        out_specs=x_spec,
        compiler_params=pltpu.CompilerParams(dimension_semantics=("parallel",)),
    )(x_bnc, ap["wq"], ap["wk"], ap["wv"], ap["bq"], ap["bk"], ap["bv"],
      ap["wp"], ap["bp"])


def _upsample_kernel(su_ref, a_ref, o_ref):
    # out[s, c, p] = sum_k su[s, c, k] * affinity[s, p, k]   (stoken @ affinity^T)
    o_ref[...] = jnp.einsum('sck,spk->scp', su_ref[...], a_ref[...],
                            preferred_element_type=jnp.float32).astype(o_ref.dtype)


def _upsample_call(su, aff):
    bs, c, _ = su.shape
    p = aff.shape[1]
    return pl.pallas_call(
        _upsample_kernel,
        out_shape=jax.ShapeDtypeStruct((bs, c, p), jnp.float32),
        in_specs=[_VMEM, _VMEM],
        out_specs=_VMEM,
    )(su, aff)


# ------------------------- identity 3x3 unfold / fold (glue) -------------------------

def _unfold3x3(x):
    """x: (B, hh, ww, ...) -> (B, hh, ww, ..., 9); tap k=3*di+dj reads x[y+di-1, x+dj-1] (zero pad)."""
    hh, ww = x.shape[1], x.shape[2]
    pad = [(0, 0), (1, 1), (1, 1)] + [(0, 0)] * (x.ndim - 3)
    xp = jnp.pad(x, pad)
    taps = [xp[:, di:di + hh, dj:dj + ww] for di in range(3) for dj in range(3)]
    return jnp.stack(taps, axis=-1)


def _fold3x3(y):
    """Adjoint of _unfold3x3 (== conv_transpose2d with identity taps, pad 1)."""
    hh, ww = y.shape[1], y.shape[2]
    pad = [(0, 0), (1, 1), (1, 1)] + [(0, 0)] * (y.ndim - 3)
    yp = jnp.pad(y, pad)
    out = jnp.zeros(y.shape[:-1], y.dtype)
    for kk in range(9):
        di, dj = kk // 3, kk % 3
        tap = yp[..., kk]
        out = out + tap[:, 2 - di:2 - di + hh, 2 - dj:2 - dj + ww]
    return out


# ------------------------------------ forward ------------------------------------

def _stoken_forward(params, x_nhwc, *, dim, stoken_size, n_iter, num_heads):
    b, h0, w0, c = x_nhwc.shape
    h, w = stoken_size
    pad_b = (h - h0 % h) % h
    pad_r = (w - w0 % w) % w
    x = x_nhwc
    if pad_b or pad_r:
        x = jnp.pad(x, ((0, 0), (0, pad_b), (0, pad_r), (0, 0)))
    H, W = h0 + pad_b, w0 + pad_r
    hh, ww = H // h, W // w
    S, P = hh * ww, h * w
    scale = float(dim ** -0.5)

    xb = x.reshape(b, hh, h, ww, w, c)
    stoken = xb.mean(axis=(2, 4))                                         # adaptive_avg_pool2d
    pixel = xb.transpose(0, 1, 3, 2, 4, 5).reshape(b * S, P, c)           # (BS, P, C)
    pixel_t = jnp.swapaxes(pixel, 1, 2)                                   # (BS, C, P)

    aff = aff_sum_map = st_raw = None
    for it in range(n_iter):
        su = _unfold3x3(stoken).reshape(b * S, c, 9)
        aff, aff_sum, st_raw = _affinity_call(pixel, pixel_t, su, scale)
        aff_sum_map = _fold3x3(aff_sum.reshape(b, hh, ww, 9))             # (B, hh, ww)
        if it < n_iter - 1:
            st_map = _fold3x3(st_raw.reshape(b, hh, ww, c, 9))
            stoken = st_map / (aff_sum_map[..., None] + _EPS)

    st_map = _fold3x3(st_raw.reshape(b, hh, ww, c, 9))                    # (B, hh, ww, C)
    stoken = st_map / (aff_sum_map[..., None] + _EPS)

    refined = _attention_call(stoken.reshape(b, S, c), params["attn"], num_heads)
    su2 = _unfold3x3(refined.reshape(b, hh, ww, c)).reshape(b * S, c, 9)
    up = _upsample_call(su2, aff)                                         # (BS, C, P)

    out = up.reshape(b, hh, ww, c, h, w).transpose(0, 3, 1, 4, 2, 5).reshape(b, c, H, W)
    if pad_b or pad_r:
        out = out[:, :, :h0, :w0]
    return out


def _direct_forward(params, x_nhwc, *, num_heads):
    b, hgt, wid, c = x_nhwc.shape
    y = _attention_call(x_nhwc.reshape(b, hgt * wid, c), params["attn"], num_heads)
    return jnp.transpose(y.reshape(b, hgt, wid, c), (0, 3, 1, 2))


def stab_forward(params, x_nchw, *, dim, stoken_size, n_iter=1, num_heads=8):
    """Equivalent of STAB.forward. x_nchw: (B, C, H, W) with C == dim; returns (B, C, H, W)."""
    x = jnp.transpose(x_nchw, (0, 2, 3, 1)).astype(jnp.float32)           # NCHW -> NHWC
    if stoken_size[0] > 1 or stoken_size[1] > 1:
        return _stoken_forward(params, x, dim=dim, stoken_size=stoken_size,
                               n_iter=n_iter, num_heads=num_heads)
    return _direct_forward(params, x, num_heads=num_heads)


# ---------------------------- deterministic parameter init ----------------------------

def init_stab_params(key, dim, num_heads=8, qkv_bias=False):
    """nn.Conv2d-style init; qkv/proj weights pre-split & transposed once (perf feedback)."""
    hd = dim // num_heads
    k1, k2, k3 = jax.random.split(key, 3)
    bound = 1.0 / math.sqrt(dim)
    w_qkv = jax.random.uniform(k1, (3 * dim, dim), jnp.float32, -bound, bound)
    w_proj = jax.random.uniform(k2, (dim, dim), jnp.float32, -bound, bound)
    b_proj = jax.random.uniform(k3, (dim,), jnp.float32, -bound, bound)

    # torch layout: qkv out-channel = head*(3*hd) + {q:0..hd, k:hd..2hd, v:2hd..3hd}.
    # Split into per-head-contiguous right-multiply matrices: column index = head*hd + d.
    w3 = w_qkv.reshape(num_heads, 3, hd, dim)
    wq = w3[:, 0].transpose(2, 0, 1).reshape(dim, dim)
    wk = w3[:, 1].transpose(2, 0, 1).reshape(dim, dim)
    wv = w3[:, 2].transpose(2, 0, 1).reshape(dim, dim)
    zero_b = jnp.zeros((1, dim), jnp.float32)       # qkv_bias=False (module default)
    attn = {
        "wq": wq, "wk": wk, "wv": wv,
        "bq": zero_b, "bk": zero_b, "bv": zero_b,
        "wp": w_proj.T,                              # (Cin, Cout) for right-multiply
        "bp": b_proj.reshape(1, dim),
    }
    del qkv_bias  # TODO(synk): qkv_bias=True would need real bias init; default path is False.
    return {"attn": attn}


# ----------------------------------------- main ---------------------------------------

if __name__ == "__main__":
    dim = 32
    num_heads = 8
    stoken_size = (4, 4)

    key = jax.random.PRNGKey(0)
    pkey, xkey = jax.random.split(key)
    params = init_stab_params(pkey, dim, num_heads=num_heads)
    x = jax.random.normal(xkey, (2, dim, 16, 16), jnp.float32)            # (B, C, H, W)

    fwd = jax.jit(functools.partial(stab_forward, dim=dim, stoken_size=stoken_size,
                                    n_iter=1, num_heads=num_heads))
    out = jax.block_until_ready(fwd(params, x))

    assert out.shape == x.shape, out.shape
    assert out.dtype == jnp.float32
    assert bool(jnp.all(jnp.isfinite(out)))
    print("KERNEL_OK")
</pallas_src>

<mosaic_0001>
module attributes {stable_mosaic.version = 11 : i64} {
  func.func @_affinity_kernel(%arg0: memref<32x16x32xf32, #tpu.memory_space<vmem>>, %arg1: memref<32x32x16xf32, #tpu.memory_space<vmem>>, %arg2: memref<32x32x9xf32, #tpu.memory_space<vmem>>, %arg3: memref<32x16x9xf32, #tpu.memory_space<vmem>>, %arg4: memref<32x1x9xf32, #tpu.memory_space<vmem>>, %arg5: memref<32x32x9xf32, #tpu.memory_space<vmem>>) attributes {dimension_semantics = [], scalar_prefetch = 0 : i64, scratch_operands = 0 : i64, tpu.core_type = #tpu.core_type<tc>} {
    %c0 = arith.constant 0 : index
    %c0_0 = arith.constant 0 : index
    %c0_1 = arith.constant 0 : index
    %0 = vector.load %arg0[%c0, %c0_0, %c0_1] : memref<32x16x32xf32, #tpu.memory_space<vmem>>, vector<32x16x32xf32>
    %c0_2 = arith.constant 0 : index
    %c0_3 = arith.constant 0 : index
    %c0_4 = arith.constant 0 : index
    %1 = vector.load %arg2[%c0_2, %c0_3, %c0_4] : memref<32x32x9xf32, #tpu.memory_space<vmem>>, vector<32x32x9xf32>
    "tpu.trace_start"() <{level = 10 : i32, message = "spc,sck->spk"}> : () -> ()
    %cst = arith.constant dense<0.000000e+00> : vector<32x16x9xf32>
    %2 = tpu.matmul %0, %1, %cst {dimension_numbers = #tpu.dot_dimension_numbers<[2], [1], [1], [2], [0, 0, 0, 1, 1, 2], [0], [0]>} : vector<32x16x32xf32>, vector<32x32x9xf32>, vector<32x16x9xf32> -> vector<32x16x9xf32>
    "tpu.trace_stop"() : () -> ()
    %cst_5 = arith.constant 0.176776692 : f32
    %3 = vector.broadcast %cst_5 : f32 to vector<32x16x9xf32>
    %4 = arith.mulf %2, %3 : vector<32x16x9xf32>
    %cst_6 = arith.constant dense<0xFF800000> : vector<32x16xf32>
    %5 = vector.multi_reduction <maximumf>, %4, %cst_6 [2] : vector<32x16x9xf32> to vector<32x16xf32>
    %6 = vector.shape_cast %5 : vector<32x16xf32> to vector<32x16x1xf32>
    %7 = vector.broadcast %6 : vector<32x16x1xf32> to vector<32x16x9xf32>
    %8 = arith.subf %4, %7 : vector<32x16x9xf32>
    %9 = math.exp %8 : vector<32x16x9xf32>
    %cst_7 = arith.constant dense<0.000000e+00> : vector<32x16xf32>
    %10 = vector.multi_reduction <add>, %9, %cst_7 [2] : vector<32x16x9xf32> to vector<32x16xf32>
    %11 = vector.shape_cast %10 : vector<32x16xf32> to vector<32x16x1xf32>
    %12 = vector.broadcast %11 : vector<32x16x1xf32> to vector<32x16x9xf32>
    %13 = arith.divf %9, %12 : vector<32x16x9xf32>
    %c0_8 = arith.constant 0 : index
    %c0_9 = arith.constant 0 : index
    %c0_10 = arith.constant 0 : index
    %14 = vector.load %arg3[%c0_8, %c0_9, %c0_10] : memref<32x16x9xf32, #tpu.memory_space<vmem>>, vector<32x16x9xf32>
    tpu.vector_store %arg3[%c0_8, %c0_9, %c0_10], %13 {strides = array<i32>} : memref<32x16x9xf32, #tpu.memory_space<vmem>>, vector<32x16x9xf32>,
    %cst_11 = arith.constant dense<0.000000e+00> : vector<32x9xf32>
    %15 = vector.multi_reduction <add>, %13, %cst_11 [1] : vector<32x16x9xf32> to vector<32x9xf32>
    %16 = vector.shape_cast %15 : vector<32x9xf32> to vector<32x1x9xf32>
    %c0_12 = arith.constant 0 : index
    %c0_13 = arith.constant 0 : index
    %c0_14 = arith.constant 0 : index
    %17 = vector.load %arg4[%c0_12, %c0_13, %c0_14] : memref<32x1x9xf32, #tpu.memory_space<vmem>>, vector<32x1x9xf32>
    tpu.vector_store %arg4[%c0_12, %c0_13, %c0_14], %16 {strides = array<i32>} : memref<32x1x9xf32, #tpu.memory_space<vmem>>, vector<32x1x9xf32>,
    %c0_15 = arith.constant 0 : index
    %c0_16 = arith.constant 0 : index
    %c0_17 = arith.constant 0 : index
    %18 = vector.load %arg1[%c0_15, %c0_16, %c0_17] : memref<32x32x16xf32, #tpu.memory_space<vmem>>, vector<32x32x16xf32>
    "tpu.trace_start"() <{level = 10 : i32, message = "scp,spk->sck"}> : () -> ()
    %cst_18 = arith.constant dense<0.000000e+00> : vector<32x32x9xf32>
    %19 = tpu.matmul %18, %13, %cst_18 {dimension_numbers = #tpu.dot_dimension_numbers<[2], [1], [1], [2], [0, 0, 0, 1, 1, 2], [0], [0]>} : vector<32x32x16xf32>, vector<32x16x9xf32>, vector<32x32x9xf32> -> vector<32x32x9xf32>
    "tpu.trace_stop"() : () -> ()
    %c0_19 = arith.constant 0 : index
    %c0_20 = arith.constant 0 : index
    %c0_21 = arith.constant 0 : index
    %20 = vector.load %arg5[%c0_19, %c0_20, %c0_21] : memref<32x32x9xf32, #tpu.memory_space<vmem>>, vector<32x32x9xf32>
    tpu.vector_store %arg5[%c0_19, %c0_20, %c0_21], %19 {strides = array<i32>} : memref<32x32x9xf32, #tpu.memory_space<vmem>>, vector<32x32x9xf32>,
    return
  }
}

module attributes {stable_mosaic.version = 11 : i64} {
  func.func @_attention_kernel(%arg0: i32, %arg1: memref<1x16x32xf32, #tpu.memory_space<vmem>>, %arg2: memref<32x32xf32, #tpu.memory_space<vmem>>, %arg3: memref<32x32xf32, #tpu.memory_space<vmem>>, %arg4: memref<32x32xf32, #tpu.memory_space<vmem>>, %arg5: memref<1x32xf32, #tpu.memory_space<vmem>>, %arg6: memref<1x32xf32, #tpu.memory_space<vmem>>, %arg7: memref<1x32xf32, #tpu.memory_space<vmem>>, %arg8: memref<32x32xf32, #tpu.memory_space<vmem>>, %arg9: memref<1x32xf32, #tpu.memory_space<vmem>>, %arg10: memref<1x16x32xf32, #tpu.memory_space<vmem>>) attributes {dimension_semantics = [#tpu.dimension_semantics<parallel>], iteration_bounds = array<i64: 2>, scalar_prefetch = 0 : i64, scratch_operands = 0 : i64, tpu.core_type = #tpu.core_type<tc>, window_params = [{transform_indices = @transform_0, window_bounds = array<i64: 1, 16, 32>}, {pipeline_mode = #tpu.pipeline_mode<synchronous>, transform_indices = @transform_1, window_bounds = array<i64: 32, 32>}, {pipeline_mode = #tpu.pipeline_mode<synchronous>, transform_indices = @transform_2, window_bounds = array<i64: 32, 32>}, {pipeline_mode = #tpu.pipeline_mode<synchronous>, transform_indices = @transform_3, window_bounds = array<i64: 32, 32>}, {pipeline_mode = #tpu.pipeline_mode<synchronous>, transform_indices = @transform_4, window_bounds = array<i64: 1, 32>}, {pipeline_mode = #tpu.pipeline_mode<synchronous>, transform_indices = @transform_5, window_bounds = array<i64: 1, 32>}, {pipeline_mode = #tpu.pipeline_mode<synchronous>, transform_indices = @transform_6, window_bounds = array<i64: 1, 32>}, {pipeline_mode = #tpu.pipeline_mode<synchronous>, transform_indices = @transform_7, window_bounds = array<i64: 32, 32>}, {pipeline_mode = #tpu.pipeline_mode<synchronous>, transform_indices = @transform_8, window_bounds = array<i64: 1, 32>}, {transform_indices = @transform_9, window_bounds = array<i64: 1, 16, 32>}]} {
    %c0 = arith.constant 0 : index
    %c0_0 = arith.constant 0 : index
    %c0_1 = arith.constant 0 : index
    %0 = vector.load %arg1[%c0, %c0_0, %c0_1] : memref<1x16x32xf32, #tpu.memory_space<vmem>>, vector<1x16x32xf32>
    %1 = vector.shape_cast %0 : vector<1x16x32xf32> to vector<16x32xf32>
    %c0_2 = arith.constant 0 : index
    %c0_3 = arith.constant 0 : index
    %2 = vector.load %arg2[%c0_2, %c0_3] : memref<32x32xf32, #tpu.memory_space<vmem>>, vector<32x32xf32>
    %cst = arith.constant dense<0.000000e+00> : vector<16x32xf32>
    %3 = tpu.matmul %1, %2, %cst {dimension_numbers = #tpu.dot_dimension_numbers<[1], [0], [0], [1], [0, 0, 1, 1], [], []>} : vector<16x32xf32>, vector<32x32xf32>, vector<16x32xf32> -> vector<16x32xf32>
    %c0_4 = arith.constant 0 : index
    %c0_5 = arith.constant 0 : index
    %4 = vector.load %arg5[%c0_4, %c0_5] : memref<1x32xf32, #tpu.memory_space<vmem>>, vector<1x32xf32>
    %5 = vector.broadcast %4 : vector<1x32xf32> to vector<16x32xf32>
    %6 = arith.addf %3, %5 : vector<16x32xf32>
    %c0_6 = arith.constant 0 : index
    %c0_7 = arith.constant 0 : index
    %7 = vector.load %arg3[%c0_6, %c0_7] : memref<32x32xf32, #tpu.memory_space<vmem>>, vector<32x32xf32>
    %cst_8 = arith.constant dense<0.000000e+00> : vector<16x32xf32>
    %8 = tpu.matmul %1, %7, %cst_8 {dimension_numbers = #tpu.dot_dimension_numbers<[1], [0], [0], [1], [0, 0, 1, 1], [], []>} : vector<16x32xf32>, vector<32x32xf32>, vector<16x32xf32> -> vector<16x32xf32>
    %c0_9 = arith.constant 0 : index
    %c0_10 = arith.constant 0 : index
    %9 = vector.load %arg6[%c0_9, %c0_10] : memref<1x32xf32, #tpu.memory_space<vmem>>, vector<1x32xf32>
    %10 = vector.broadcast %9 : vector<1x32xf32> to vector<16x32xf32>
    %11 = arith.addf %8, %10 : vector<16x32xf32>
    %c0_11 = arith.constant 0 : index
    %c0_12 = arith.constant 0 : index
    %12 = vector.load %arg4[%c0_11, %c0_12] : memref<32x32xf32, #tpu.memory_space<vmem>>, vector<32x32xf32>
    %cst_13 = arith.constant dense<0.000000e+00> : vector<16x32xf32>
    %13 = tpu.matmul %1, %12, %cst_13 {dimension_numbers = #tpu.dot_dimension_numbers<[1], [0], [0], [1], [0, 0, 1, 1], [], []>} : vector<16x32xf32>, vector<32x32xf32>, vector<16x32xf32> -> vector<16x32xf32>
    %c0_14 = arith.constant 0 : index
    %c0_15 = arith.constant 0 : index
    %14 = vector.load %arg7[%c0_14, %c0_15] : memref<1x32xf32, #tpu.memory_space<vmem>>, vector<1x32xf32>
    %15 = vector.broadcast %14 : vector<1x32xf32> to vector<16x32xf32>
    %16 = arith.addf %13, %15 : vector<16x32xf32>
    %17 = vector.extract_strided_slice %6 {offsets = [0, 0], sizes = [16, 4], strides = [1, 1]} : vector<16x32xf32> to vector<16x4xf32>
    %18 = vector.extract_strided_slice %11 {offsets = [0, 0], sizes = [16, 4], strides = [1, 1]} : vector<16x32xf32> to vector<16x4xf32>
    %19 = vector.extract_strided_slice %16 {offsets = [0, 0], sizes = [16, 4], strides = [1, 1]} : vector<16x32xf32> to vector<16x4xf32>
    "tpu.trace_start"() <{level = 10 : i32, message = "jd,id->ji"}> : () -> ()
    %cst_16 = arith.constant dense<0.000000e+00> : vector<16x16xf32>
    %20 = tpu.matmul %17, %18, %cst_16 {dimension_numbers = #tpu.dot_dimension_numbers<[1], [1], [0], [0], [0, 0, 1, 0], [], []>} : vector<16x4xf32>, vector<16x4xf32>, vector<16x16xf32> -> vector<16x16xf32>
    "tpu.trace_stop"() : () -> ()
    %cst_17 = arith.constant 5.000000e-01 : f32
    %21 = vector.broadcast %cst_17 : f32 to vector<16x16xf32>
    %22 = arith.mulf %20, %21 : vector<16x16xf32>
    %cst_18 = arith.constant dense<0xFF800000> : vector<16xf32>
    %23 = vector.multi_reduction <maximumf>, %22, %cst_18 [1] : vector<16x16xf32> to vector<16xf32>
    %24 = vector.shape_cast %23 : vector<16xf32> to vector<16x1xf32>
    %25 = vector.broadcast %24 : vector<16x1xf32> to vector<16x16xf32>
    %26 = arith.subf %22, %25 : vector<16x16xf32>
    %27 = math.exp %26 : vector<16x16xf32>
    %cst_19 = arith.constant dense<0.000000e+00> : vector<16xf32>
    %28 = vector.multi_reduction <add>, %27, %cst_19 [1] : vector<16x16xf32> to vector<16xf32>
    %29 = vector.shape_cast %28 : vector<16xf32> to vector<16x1xf32>
    %30 = vector.broadcast %29 : vector<16x1xf32> to vector<16x16xf32>
    %31 = arith.divf %27, %30 : vector<16x16xf32>
    %cst_20 = arith.constant dense<0.000000e+00> : vector<16x4xf32>
    %32 = tpu.matmul %31, %19, %cst_20 {dimension_numbers = #tpu.dot_dimension_numbers<[1], [0], [0], [1], [0, 0, 1, 1], [], []>} : vector<16x16xf32>, vector<16x4xf32>, vector<16x4xf32> -> vector<16x4xf32>
    %33 = vector.extract_strided_slice %6 {offsets = [0, 4], sizes = [16, 4], strides = [1, 1]} : vector<16x32xf32> to vector<16x4xf32>
    %34 = vector.extract_strided_slice %11 {offsets = [0, 4], sizes = [16, 4], strides = [1, 1]} : vector<16x32xf32> to vector<16x4xf32>
    %35 = vector.extract_strided_slice %16 {offsets = [0, 4], sizes = [16, 4], strides = [1, 1]} : vector<16x32xf32> to vector<16x4xf32>
    "tpu.trace_start"() <{level = 10 : i32, message = "jd,id->ji"}> : () -> ()
    %cst_21 = arith.constant dense<0.000000e+00> : vector<16x16xf32>
    %36 = tpu.matmul %33, %34, %cst_21 {dimension_numbers = #tpu.dot_dimension_numbers<[1], [1], [0], [0], [0, 0, 1, 0], [], []>} : vector<16x4xf32>, vector<16x4xf32>, vector<16x16xf32> -> vector<16x16xf32>
    "tpu.trace_stop"() : () -> ()
    %cst_22 = arith.constant 5.000000e-01 : f32
    %37 = vector.broadcast %cst_22 : f32 to vector<16x16xf32>
    %38 = arith.mulf %36, %37 : vector<16x16xf32>
    %cst_23 = arith.constant dense<0xFF800000> : vector<16xf32>
    %39 = vector.multi_reduction <maximumf>, %38, %cst_23 [1] : vector<16x16xf32> to vector<16xf32>
    %40 = vector.shape_cast %39 : vector<16xf32> to vector<16x1xf32>
    %41 = vector.broadcast %40 : vector<16x1xf32> to vector<16x16xf32>
    %42 = arith.subf %38, %41 : vector<16x16xf32>
    %43 = math.exp %42 : vector<16x16xf32>
    %cst_24 = arith.constant dense<0.000000e+00> : vector<16xf32>
    %44 = vector.multi_reduction <add>, %43, %cst_24 [1] : vector<16x16xf32> to vector<16xf32>
    %45 = vector.shape_cast %44 : vector<16xf32> to vector<16x1xf32>
    %46 = vector.broadcast %45 : vector<16x1xf32> to vector<16x16xf32>
    %47 = arith.divf %43, %46 : vector<16x16xf32>
    %cst_25 = arith.constant dense<0.000000e+00> : vector<16x4xf32>
    %48 = tpu.matmul %47, %35, %cst_25 {dimension_numbers = #tpu.dot_dimension_numbers<[1], [0], [0], [1], [0, 0, 1, 1], [], []>} : vector<16x16xf32>, vector<16x4xf32>, vector<16x4xf32> -> vector<16x4xf32>
    %49 = vector.extract_strided_slice %6 {offsets = [0, 8], sizes = [16, 4], strides = [1, 1]} : vector<16x32xf32> to vector<16x4xf32>
    %50 = vector.extract_strided_slice %11 {offsets = [0, 8], sizes = [16, 4], strides = [1, 1]} : vector<16x32xf32> to vector<16x4xf32>
    %51 = vector.extract_strided_slice %16 {offsets = [0, 8], sizes = [16, 4], strides = [1, 1]} : vector<16x32xf32> to vector<16x4xf32>
    "tpu.trace_start"() <{level = 10 : i32, message = "jd,id->ji"}> : () -> ()
    %cst_26 = arith.constant dense<0.000000e+00> : vector<16x16xf32>
    %52 = tpu.matmul %49, %50, %cst_26 {dimension_numbers = #tpu.dot_dimension_numbers<[1], [1], [0], [0], [0, 0, 1, 0], [], []>} : vector<16x4xf32>, vector<16x4xf32>, vector<16x16xf32> -> vector<16x16xf32>
    "tpu.trace_stop"() : () -> ()
    %cst_27 = arith.constant 5.000000e-01 : f32
    %53 = vector.broadcast %cst_27 : f32 to vector<16x16xf32>
    %54 = arith.mulf %52, %53 : vector<16x16xf32>
    %cst_28 = arith.constant dense<0xFF800000> : vector<16xf32>
    %55 = vector.multi_reduction <maximumf>, %54, %cst_28 [1] : vector<16x16xf32> to vector<16xf32>
    %56 = vector.shape_cast %55 : vector<16xf32> to vector<16x1xf32>
    %57 = vector.broadcast %56 : vector<16x1xf32> to vector<16x16xf32>
    %58 = arith.subf %54, %57 : vector<16x16xf32>
    %59 = math.exp %58 : vector<16x16xf32>
    %cst_29 = arith.constant dense<0.000000e+00> : vector<16xf32>
    %60 = vector.multi_reduction <add>, %59, %cst_29 [1] : vector<16x16xf32> to vector<16xf32>
    %61 = vector.shape_cast %60 : vector<16xf32> to vector<16x1xf32>
    %62 = vector.broadcast %61 : vector<16x1xf32> to vector<16x16xf32>
    %63 = arith.divf %59, %62 : vector<16x16xf32>
    %cst_30 = arith.constant dense<0.000000e+00> : vector<16x4xf32>
    %64 = tpu.matmul %63, %51, %cst_30 {dimension_numbers = #tpu.dot_dimension_numbers<[1], [0], [0], [1], [0, 0, 1, 1], [], []>} : vector<16x16xf32>, vector<16x4xf32>, vector<16x4xf32> -> vector<16x4xf32>
    %65 = vector.extract_strided_slice %6 {offsets = [0, 12], sizes = [16, 4], strides = [1, 1]} : vector<16x32xf32> to vector<16x4xf32>
    %66 = vector.extract_strided_slice %11 {offsets = [0, 12], sizes = [16, 4], strides = [1, 1]} : vector<16x32xf32> to vector<16x4xf32>
    %67 = vector.extract_strided_slice %16 {offsets = [0, 12], sizes = [16, 4], strides = [1, 1]} : vector<16x32xf32> to vector<16x4xf32>
    "tpu.trace_start"() <{level = 10 : i32, message = "jd,id->ji"}> : () -> ()
    %cst_31 = arith.constant dense<0.000000e+00> : vector<16x16xf32>
    %68 = tpu.matmul %65, %66, %cst_31 {dimension_numbers = #tpu.dot_dimension_numbers<[1], [1], [0], [0], [0, 0, 1, 0], [], []>} : vector<16x4xf32>, vector<16x4xf32>, vector<16x16xf32> -> vector<16x16xf32>
    "tpu.trace_stop"() : () -> ()
    %cst_32 = arith.constant 5.000000e-01 : f32
    %69 = vector.broadcast %cst_32 : f32 to vector<16x16xf32>
    %70 = arith.mulf %68, %69 : vector<16x16xf32>
    %cst_33 = arith.constant dense<0xFF800000> : vector<16xf32>
    %71 = vector.multi_reduction <maximumf>, %70, %cst_33 [1] : vector<16x16xf32> to vector<16xf32>
    %72 = vector.shape_cast %71 : vector<16xf32> to vector<16x1xf32>
    %73 = vector.broadcast %72 : vector<16x1xf32> to vector<16x16xf32>
    %74 = arith.subf %70, %73 : vector<16x16xf32>
    %75 = math.exp %74 : vector<16x16xf32>
    %cst_34 = arith.constant dense<0.000000e+00> : vector<16xf32>
    %76 = vector.multi_reduction <add>, %75, %cst_34 [1] : vector<16x16xf32> to vector<16xf32>
    %77 = vector.shape_cast %76 : vector<16xf32> to vector<16x1xf32>
    %78 = vector.broadcast %77 : vector<16x1xf32> to vector<16x16xf32>
    %79 = arith.divf %75, %78 : vector<16x16xf32>
    %cst_35 = arith.constant dense<0.000000e+00> : vector<16x4xf32>
    %80 = tpu.matmul %79, %67, %cst_35 {dimension_numbers = #tpu.dot_dimension_numbers<[1], [0], [0], [1], [0, 0, 1, 1], [], []>} : vector<16x16xf32>, vector<16x4xf32>, vector<16x4xf32> -> vector<16x4xf32>
    %81 = vector.extract_strided_slice %6 {offsets = [0, 16], sizes = [16, 4], strides = [1, 1]} : vector<16x32xf32> to vector<16x4xf32>
    %82 = vector.extract_strided_slice %11 {offsets = [0, 16], sizes = [16, 4], strides = [1, 1]} : vector<16x32xf32> to vector<16x4xf32>
    %83 = vector.extract_strided_slice %16 {offsets = [0, 16], sizes = [16, 4], strides = [1, 1]} : vector<16x32xf32> to vector<16x4xf32>
    "tpu.trace_start"() <{level = 10 : i32, message = "jd,id->ji"}> : () -> ()
    %cst_36 = arith.constant dense<0.000000e+00> : vector<16x16xf32>
    %84 = tpu.matmul %81, %82, %cst_36 {dimension_numbers = #tpu.dot_dimension_numbers<[1], [1], [0], [0], [0, 0, 1, 0], [], []>} : vector<16x4xf32>, vector<16x4xf32>, vector<16x16xf32> -> vector<16x16xf32>
    "tpu.trace_stop"() : () -> ()
    %cst_37 = arith.constant 5.000000e-01 : f32
    %85 = vector.broadcast %cst_37 : f32 to vector<16x16xf32>
    %86 = arith.mulf %84, %85 : vector<16x16xf32>
    %cst_38 = arith.constant dense<0xFF800000> : vector<16xf32>
    %87 = vector.multi_reduction <maximumf>, %86, %cst_38 [1] : vector<16x16xf32> to vector<16xf32>
    %88 = vector.shape_cast %87 : vector<16xf32> to vector<16x1xf32>
    %89 = vector.broadcast %88 : vector<16x1xf32> to vector<16x16xf32>
    %90 = arith.subf %86, %89 : vector<16x16xf32>
    %91 = math.exp %90 : vector<16x16xf32>
    %cst_39 = arith.constant dense<0.000000e+00> : vector<16xf32>
    %92 = vector.multi_reduction <add>, %91, %cst_39 [1] : vector<16x16xf32> to vector<16xf32>
    %93 = vector.shape_cast %92 : vector<16xf32> to vector<16x1xf32>
    %94 = vector.broadcast %93 : vector<16x1xf32> to vector<16x16xf32>
    %95 = arith.divf %91, %94 : vector<16x16xf32>
    %cst_40 = arith.constant dense<0.000000e+00> : vector<16x4xf32>
    %96 = tpu.matmul %95, %83, %cst_40 {dimension_numbers = #tpu.dot_dimension_numbers<[1], [0], [0], [1], [0, 0, 1, 1], [], []>} : vector<16x16xf32>, vector<16x4xf32>, vector<16x4xf32> -> vector<16x4xf32>
    %97 = vector.extract_strided_slice %6 {offsets = [0, 20], sizes = [16, 4], strides = [1, 1]} : vector<16x32xf32> to vector<16x4xf32>
    %98 = vector.extract_strided_slice %11 {offsets = [0, 20], sizes = [16, 4], strides = [1, 1]} : vector<16x32xf32> to vector<16x4xf32>
    %99 = vector.extract_strided_slice %16 {offsets = [0, 20], sizes = [16, 4], strides = [1, 1]} : vector<16x32xf32> to vector<16x4xf32>
    "tpu.trace_start"() <{level = 10 : i32, message = "jd,id->ji"}> : () -> ()
    %cst_41 = arith.constant dense<0.000000e+00> : vector<16x16xf32>
    %100 = tpu.matmul %97, %98, %cst_41 {dimension_numbers = #tpu.dot_dimension_numbers<[1], [1], [0], [0], [0, 0, 1, 0], [], []>} : vector<16x4xf32>, vector<16x4xf32>, vector<16x16xf32> -> vector<16x16xf32>
    "tpu.trace_stop"() : () -> ()
    %cst_42 = arith.constant 5.000000e-01 : f32
    %101 = vector.broadcast %cst_42 : f32 to vector<16x16xf32>
    %102 = arith.mulf %100, %101 : vector<16x16xf32>
    %cst_43 = arith.constant dense<0xFF800000> : vector<16xf32>
    %103 = vector.multi_reduction <maximumf>, %102, %cst_43 [1] : vector<16x16xf32> to vector<16xf32>
    %104 = vector.shape_cast %103 : vector<16xf32> to vector<16x1xf32>
    %105 = vector.broadcast %104 : vector<16x1xf32> to vector<16x16xf32>
    %106 = arith.subf %102, %105 : vector<16x16xf32>
    %107 = math.exp %106 : vector<16x16xf32>
    %cst_44 = arith.constant dense<0.000000e+00> : vector<16xf32>
    %108 = vector.multi_reduction <add>, %107, %cst_44 [1] : vector<16x16xf32> to vector<16xf32>
    %109 = vector.shape_cast %108 : vector<16xf32> to vector<16x1xf32>
    %110 = vector.broadcast %109 : vector<16x1xf32> to vector<16x16xf32>
    %111 = arith.divf %107, %110 : vector<16x16xf32>
    %cst_45 = arith.constant dense<0.000000e+00> : vector<16x4xf32>
    %112 = tpu.matmul %111, %99, %cst_45 {dimension_numbers = #tpu.dot_dimension_numbers<[1], [0], [0], [1], [0, 0, 1, 1], [], []>} : vector<16x16xf32>, vector<16x4xf32>, vector<16x4xf32> -> vector<16x4xf32>
    %113 = vector.extract_strided_slice %6 {offsets = [0, 24], sizes = [16, 4], strides = [1, 1]} : vector<16x32xf32> to vector<16x4xf32>
    %114 = vector.extract_strided_slice %11 {offsets = [0, 24], sizes = [16, 4], strides = [1, 1]} : vector<16x32xf32> to vector<16x4xf32>
    %115 = vector.extract_strided_slice %16 {offsets = [0, 24], sizes = [16, 4], strides = [1, 1]} : vector<16x32xf32> to vector<16x4xf32>
    "tpu.trace_start"() <{level = 10 : i32, message = "jd,id->ji"}> : () -> ()
    %cst_46 = arith.constant dense<0.000000e+00> : vector<16x16xf32>
    %116 = tpu.matmul %113, %114, %cst_46 {dimension_numbers = #tpu.dot_dimension_numbers<[1], [1], [0], [0], [0, 0, 1, 0], [], []>} : vector<16x4xf32>, vector<16x4xf32>, vector<16x16xf32> -> vector<16x16xf32>
    "tpu.trace_stop"() : () -> ()
    %cst_47 = arith.constant 5.000000e-01 : f32
    %117 = vector.broadcast %cst_47 : f32 to vector<16x16xf32>
    %118 = arith.mulf %116, %117 : vector<16x16xf32>
    %cst_48 = arith.constant dense<0xFF800000> : vector<16xf32>
    %119 = vector.multi_reduction <maximumf>, %118, %cst_48 [1] : vector<16x16xf32> to vector<16xf32>
    %120 = vector.shape_cast %119 : vector<16xf32> to vector<16x1xf32>
    %121 = vector.broadcast %120 : vector<16x1xf32> to vector<16x16xf32>
    %122 = arith.subf %118, %121 : vector<16x16xf32>
    %123 = math.exp %122 : vector<16x16xf32>
    %cst_49 = arith.constant dense<0.000000e+00> : vector<16xf32>
    %124 = vector.multi_reduction <add>, %123, %cst_49 [1] : vector<16x16xf32> to vector<16xf32>
    %125 = vector.shape_cast %124 : vector<16xf32> to vector<16x1xf32>
    %126 = vector.broadcast %125 : vector<16x1xf32> to vector<16x16xf32>
    %127 = arith.divf %123, %126 : vector<16x16xf32>
    %cst_50 = arith.constant dense<0.000000e+00> : vector<16x4xf32>
    %128 = tpu.matmul %127, %115, %cst_50 {dimension_numbers = #tpu.dot_dimension_numbers<[1], [0], [0], [1], [0, 0, 1, 1], [], []>} : vector<16x16xf32>, vector<16x4xf32>, vector<16x4xf32> -> vector<16x4xf32>
    %129 = vector.extract_strided_slice %6 {offsets = [0, 28], sizes = [16, 4], strides = [1, 1]} : vector<16x32xf32> to vector<16x4xf32>
    %130 = vector.extract_strided_slice %11 {offsets = [0, 28], sizes = [16, 4], strides = [1, 1]} : vector<16x32xf32> to vector<16x4xf32>
    %131 = vector.extract_strided_slice %16 {offsets = [0, 28], sizes = [16, 4], strides = [1, 1]} : vector<16x32xf32> to vector<16x4xf32>
    "tpu.trace_start"() <{level = 10 : i32, message = "jd,id->ji"}> : () -> ()
    %cst_51 = arith.constant dense<0.000000e+00> : vector<16x16xf32>
    %132 = tpu.matmul %129, %130, %cst_51 {dimension_numbers = #tpu.dot_dimension_numbers<[1], [1], [0], [0], [0, 0, 1, 0], [], []>} : vector<16x4xf32>, vector<16x4xf32>, vector<16x16xf32> -> vector<16x16xf32>
    "tpu.trace_stop"() : () -> ()
    %cst_52 = arith.constant 5.000000e-01 : f32
    %133 = vector.broadcast %cst_52 : f32 to vector<16x16xf32>
    %134 = arith.mulf %132, %133 : vector<16x16xf32>
    %cst_53 = arith.constant dense<0xFF800000> : vector<16xf32>
    %135 = vector.multi_reduction <maximumf>, %134, %cst_53 [1] : vector<16x16xf32> to vector<16xf32>
    %136 = vector.shape_cast %135 : vector<16xf32> to vector<16x1xf32>
    %137 = vector.broadcast %136 : vector<16x1xf32> to vector<16x16xf32>
    %138 = arith.subf %134, %137 : vector<16x16xf32>
    %139 = math.exp %138 : vector<16x16xf32>
    %cst_54 = arith.constant dense<0.000000e+00> : vector<16xf32>
    %140 = vector.multi_reduction <add>, %139, %cst_54 [1] : vector<16x16xf32> to vector<16xf32>
    %141 = vector.shape_cast %140 : vector<16xf32> to vector<16x1xf32>
    %142 = vector.broadcast %141 : vector<16x1xf32> to vector<16x16xf32>
    %143 = arith.divf %139, %142 : vector<16x16xf32>
    %cst_55 = arith.constant dense<0.000000e+00> : vector<16x4xf32>
    %144 = tpu.matmul %143, %131, %cst_55 {dimension_numbers = #tpu.dot_dimension_numbers<[1], [0], [0], [1], [0, 0, 1, 1], [], []>} : vector<16x16xf32>, vector<16x4xf32>, vector<16x4xf32> -> vector<16x4xf32>
    %145 = tpu.concatenate %32, %48, %64, %80, %96, %112, %128, %144 in 1 : vector<16x4xf32>, vector<16x4xf32>, vector<16x4xf32>, vector<16x4xf32>, vector<16x4xf32>, vector<16x4xf32>, vector<16x4xf32>, vector<16x4xf32> -> vector<16x32xf32>
    %c0_56 = arith.constant 0 : index
    %c0_57 = arith.constant 0 : index
    %146 = vector.load %arg8[%c0_56, %c0_57] : memref<32x32xf32, #tpu.memory_space<vmem>>, vector<32x32xf32>
    %cst_58 = arith.constant dense<0.000000e+00> : vector<16x32xf32>
    %147 = tpu.matmul %145, %146, %cst_58 {dimension_numbers = #tpu.dot_dimension_numbers<[1], [0], [0], [1], [0, 0, 1, 1], [], []>} : vector<16x32xf32>, vector<32x32xf32>, vector<16x32xf32> -> vector<16x32xf32>
    %c0_59 = arith.constant 0 : index
    %c0_60 = arith.constant 0 : index
    %148 = vector.load %arg9[%c0_59, %c0_60] : memref<1x32xf32, #tpu.memory_space<vmem>>, vector<1x32xf32>
    %149 = vector.broadcast %148 : vector<1x32xf32> to vector<16x32xf32>
    %150 = arith.addf %147, %149 : vector<16x32xf32>
    %c0_61 = arith.constant 0 : index
    %c0_62 = arith.constant 0 : index
    %c0_63 = arith.constant 0 : index
    %151 = vector.load %arg10[%c0_61, %c0_62, %c0_63] : memref<1x16x32xf32, #tpu.memory_space<vmem>>, vector<1x16x32xf32>
    %152 = vector.shape_cast %151 : vector<1x16x32xf32> to vector<16x32xf32>
    %153 = vector.shape_cast %150 : vector<16x32xf32> to vector<1x16x32xf32>
    tpu.vector_store %arg10[%c0_61, %c0_62, %c0_63], %153 {strides = array<i32>} : memref<1x16x32xf32, #tpu.memory_space<vmem>>, vector<1x16x32xf32>,
    return
  }
  func.func @transform_0(%arg0: i32) -> (i32, i32, i32) {
    %c0_i32 = arith.constant 0 : i32
    %c0_i32_0 = arith.constant 0 : i32
    %c0_i32_1 = arith.constant 0 : i32
    return %arg0, %c0_i32, %c0_i32_0 : i32, i32, i32
  }
  func.func @transform_1(%arg0: i32) -> (i32, i32) {
    %c0_i32 = arith.constant 0 : i32
    %c0_i32_0 = arith.constant 0 : i32
    %c0_i32_1 = arith.constant 0 : i32
    return %c0_i32, %c0_i32_0 : i32, i32
  }
  func.func @transform_2(%arg0: i32) -> (i32, i32) {
    %c0_i32 = arith.constant 0 : i32
    %c0_i32_0 = arith.constant 0 : i32
    %c0_i32_1 = arith.constant 0 : i32
    return %c0_i32, %c0_i32_0 : i32, i32
  }
  func.func @transform_3(%arg0: i32) -> (i32, i32) {
    %c0_i32 = arith.constant 0 : i32
    %c0_i32_0 = arith.constant 0 : i32
    %c0_i32_1 = arith.constant 0 : i32
    return %c0_i32, %c0_i32_0 : i32, i32
  }
  func.func @transform_4(%arg0: i32) -> (i32, i32) {
    %c0_i32 = arith.constant 0 : i32
    %c0_i32_0 = arith.constant 0 : i32
    %c0_i32_1 = arith.constant 0 : i32
    return %c0_i32, %c0_i32_0 : i32, i32
  }
  func.func @transform_5(%arg0: i32) -> (i32, i32) {
    %c0_i32 = arith.constant 0 : i32
    %c0_i32_0 = arith.constant 0 : i32
    %c0_i32_1 = arith.constant 0 : i32
    return %c0_i32, %c0_i32_0 : i32, i32
  }
  func.func @transform_6(%arg0: i32) -> (i32, i32) {
    %c0_i32 = arith.constant 0 : i32
    %c0_i32_0 = arith.constant 0 : i32
    %c0_i32_1 = arith.constant 0 : i32
    return %c0_i32, %c0_i32_0 : i32, i32
  }
  func.func @transform_7(%arg0: i32) -> (i32, i32) {
    %c0_i32 = arith.constant 0 : i32
    %c0_i32_0 = arith.constant 0 : i32
    %c0_i32_1 = arith.constant 0 : i32
    return %c0_i32, %c0_i32_0 : i32, i32
  }
  func.func @transform_8(%arg0: i32) -> (i32, i32) {
    %c0_i32 = arith.constant 0 : i32
    %c0_i32_0 = arith.constant 0 : i32
    %c0_i32_1 = arith.constant 0 : i32
    return %c0_i32, %c0_i32_0 : i32, i32
  }
  func.func @transform_9(%arg0: i32) -> (i32, i32, i32) {
    %c0_i32 = arith.constant 0 : i32
    %c0_i32_0 = arith.constant 0 : i32
    %c0_i32_1 = arith.constant 0 : i32
    return %arg0, %c0_i32, %c0_i32_0 : i32, i32, i32
  }
}

module attributes {stable_mosaic.version = 11 : i64} {
  func.func @_upsample_kernel(%arg0: memref<32x32x9xf32, #tpu.memory_space<vmem>>, %arg1: memref<32x16x9xf32, #tpu.memory_space<vmem>>, %arg2: memref<32x32x16xf32, #tpu.memory_space<vmem>>) attributes {dimension_semantics = [], scalar_prefetch = 0 : i64, scratch_operands = 0 : i64, tpu.core_type = #tpu.core_type<tc>} {
    %c0 = arith.constant 0 : index
    %c0_0 = arith.constant 0 : index
    %c0_1 = arith.constant 0 : index
    %0 = vector.load %arg0[%c0, %c0_0, %c0_1] : memref<32x32x9xf32, #tpu.memory_space<vmem>>, vector<32x32x9xf32>
    %c0_2 = arith.constant 0 : index
    %c0_3 = arith.constant 0 : index
    %c0_4 = arith.constant 0 : index
    %1 = vector.load %arg1[%c0_2, %c0_3, %c0_4] : memref<32x16x9xf32, #tpu.memory_space<vmem>>, vector<32x16x9xf32>
    "tpu.trace_start"() <{level = 10 : i32, message = "sck,spk->scp"}> : () -> ()
    %cst = arith.constant dense<0.000000e+00> : vector<32x32x16xf32>
    %2 = tpu.matmul %0, %1, %cst {dimension_numbers = #tpu.dot_dimension_numbers<[2], [2], [1], [1], [0, 0, 0, 1, 1, 1], [0], [0]>} : vector<32x32x9xf32>, vector<32x16x9xf32>, vector<32x32x16xf32> -> vector<32x32x16xf32>
    "tpu.trace_stop"() : () -> ()
    %c0_5 = arith.constant 0 : index
    %c0_6 = arith.constant 0 : index
    %c0_7 = arith.constant 0 : index
    %3 = vector.load %arg2[%c0_5, %c0_6, %c0_7] : memref<32x32x16xf32, #tpu.memory_space<vmem>>, vector<32x32x16xf32>
    tpu.vector_store %arg2[%c0_5, %c0_6, %c0_7], %2 {strides = array<i32>} : memref<32x32x16xf32, #tpu.memory_space<vmem>>, vector<32x32x16xf32>,
    return
  }
}

</mosaic_0001>

<bundles_post_ra>
// kernel: stab_forward.4
= control target key start
LH: loop header
LB: loop body
LE: loop exit
PB: predicated region body
PF: predicated region fallthrough
CT: control target
= control target key end

     0   :  { %s3091_s30 = smov 0   ;;  %s3395_s0 = inlined_call_operand.vmem [shape: f32[2,16,32], index: 0, kind: input, shape index: {}]   ;;  %s3396_s1 = inlined_call_operand.vmem [shape: f32[32,32], index: 1, kind: input, shape index: {}]   ;;  %s3397_s2 = inlined_call_operand.vmem [shape: f32[32,32], index: 2, kind: input, shape index: {}]   ;;  %s3398_s3 = inlined_call_operand.vmem [shape: f32[32,32], index: 3, kind: input, shape index: {}]   ;;  %s3399_s4 = inlined_call_operand.vmem [shape: f32[1,32], index: 4, kind: input, shape index: {}]   ;;  %s3400_s5 = inlined_call_operand.vmem [shape: f32[1,32], index: 5, kind: input, shape index: {}]   ;;  %s3401_s6 = inlined_call_operand.vmem [shape: f32[1,32], index: 6, kind: input, shape index: {}]   ;;  %s3402_s7 = inlined_call_operand.vmem [shape: f32[32,32], index: 7, kind: input, shape index: {}]   ;;  %s3403_s8 = inlined_call_operand.vmem [shape: f32[1,32], index: 8, kind: input, shape index: {}]   ;;  %s3404_s9 = inlined_call_operand.vmem [shape: f32[2,16,32], index: 9, kind: output, shape index: {}]  }
   0x1 LB: > { %s2434_s10 = sadd.s32 4294967295, %s3025_s30   ;;  %p2438_p0 = scmp.ge.s32.totalorder %s3025_s30, 1  ;;  %s3025_s30 = sphi %s3091_s30, %s19_s30  }
   0x2   : > { %p287_p1 = scmp.lt.s32.totalorder %s3025_s30, 3 }
   0x4   : > { %p288_p2 = pnand %p2438_p0, %p287_p1 }
   0x5   : > { %v428_v0 = vld [vmem:[%s3397_s2] sm:$0xff] (!%p288_p2)  ;;  %v429_v1 = vld [vmem:[%s3397_s2 + $0x8] sm:$0xff] (!%p288_p2)  ;;  %v430_v2 = vld [vmem:[%s3397_s2 + $0x10] sm:$0xff] (!%p288_p2)  ;;  %p323_p3 = scmp.lt.s32.totalorder (!%p288_p2), %s2434_s10, 1  ;;  %vm346_vm0 = vcmask (!%p288_p2), 261120   ;;  %vm600_vm1 = vcmask (!%p288_p2), 31744  }
   0x6   : > { %291 = sbr.rel (%p288_p2) target bundleno = 5114 (0x13fa), region = 56  ;;  %v2759_v3 = vpack.c.bf16 (!%p288_p2), %v429_v1, %v428_v0  ;;  %v431_v4 = vld [vmem:[%s3397_s2 + $0x18] sm:$0xff] (!%p288_p2)  ;;  %v335_v5 = vld [vmem:[%s3396_s1] sm:$0xff] (!%p288_p2)  ;;  %v336_v6 = vld [vmem:[%s3396_s1 + $0x8] sm:$0xff] (!%p288_p2)  ;;  %s3027_s24 = smov (!%p288_p2), 124   ;;  %vm690_vm3 = vcmask (!%p288_p2), 130048  }
   0x7   : > { %v2763_v7 = vpack.c.bf16 (!%p288_p2), %v431_v4, %v430_v2  ;;  %v2751_v8 = vpack.c.bf16 (!%p288_p2), %v336_v6, %v335_v5  ;;  %v337_v9 = vld [vmem:[%s3396_s1 + $0x10] sm:$0xff] (!%p288_p2)  ;;  %v338_v10 = vld [vmem:[%s3396_s1 + $0x18] sm:$0xff] (!%p288_p2)  ;;  %v514_v14 = vld [vmem:[%s3398_s3] sm:$0xff] (!%p288_p2)  ;;  %s3028_s28 = smov (!%p288_p2), 120   ;;  %s3029_s29 = smov (!%p288_p2), 116   ;;  %vm2268_vm4 = vcmask (!%p288_p2), 64512  }
   0x8   : > { %2760 = vmatprep.subr.bf16.mxu1 (!%p288_p2), %v2759_v3  ;;  %v2755_v11 = vpack.c.bf16 (!%p288_p2), %v338_v10, %v337_v9  ;;  %v515_v15 = vld [vmem:[%s3398_s3 + $0x8] sm:$0xff] (!%p288_p2)  ;;  %v516_v16 = vld [vmem:[%s3398_s3 + $0x10] sm:$0xff] (!%p288_p2)  ;;  %v517_v18 = vld [vmem:[%s3398_s3 + $0x18] sm:$0xff] (!%p288_p2)  ;;  %s3031_s12 = smov (!%p288_p2), 108   ;;  %s3032_s13 = smov (!%p288_p2), 104   ;;  %vm2271_vm5 = vcmask (!%p288_p2), 97280  }
   0x9   : > { %2762 = vmatpush3.bf16.msra.mxu1 (!%p288_p2), %v2759_v3  ;;  %2752 = vmatprep.subr.bf16.mxu0 (!%p288_p2), %v2751_v8  ;;  %v2767_v17 = vpack.c.bf16 (!%p288_p2), %v515_v15, %v514_v14  ;;  %v2771_v19 = vpack.c.bf16 (!%p288_p2), %v517_v18, %v516_v16  ;;  %v2446_v20 = vld [vmem:[%s3400_s5] ss:$0 sm:$0xff] (!%p288_p2)  ;;  %vm3157_vm2 = vmpackc.low (!%p288_p2), %vm600_vm1, %vm600_vm1  ;;  %s3033_s14 = smov (!%p288_p2), 100   ;;  %s3034_s15 = smov (!%p288_p2), 4   ;;  %vm2276_vm6 = vcmask (!%p288_p2), 162816   ;;  %vm2279_vm7 = vcmask (!%p288_p2), 195584  }
   0xa   : > { %2764 = vmatprep.subr.bf16.mxu1 (!%p288_p2), %v2763_v7  ;;  %2754 = vmatpush3.bf16.msra.mxu0 (!%p288_p2), %v2751_v8  ;;  %v2443_v22 = vld [vmem:[%s3399_s4] ss:$0 sm:$0xff] (!%p288_p2)  ;;  %s3035_s16 = smov (!%p288_p2), 8   ;;  %s3036_s17 = smov (!%p288_p2), 12   ;;  %vm2282_vm8 = vcmask (!%p288_p2), 228352  }
   0xb   : > { %2756 = vmatprep.subr.bf16.mxu0 (!%p288_p2), %v2755_v11  ;;  %v2449_v40 = vld [vmem:[%s3401_s6] ss:$0 sm:$0xff] (!%p288_p2)  ;;  %s3037_s18 = smov (!%p288_p2), 16   ;;  %s3038_s19 = smov (!%p288_p2), 20  }
   0xc   : > { %s3039_s20 = smov (!%p288_p2), 24  }
   0xd   : > { %s3408_s10 = smov (!%p323_p3, %s2434_s10), 1  ;;  %2766 = vmatpush3.bf16.msra.mxu1 %v2763_v7 }
   0xe   : > { %s2505_s27 = sshll.u32 %s3408_s10, 4  ;;  %2758 = vmatpush3.bf16.msra.mxu0 %v2755_v11 }
   0xf   : > { %s327_s11 = scalar_lea.vmem %s3395_s0, %s2505_s27  ;;  %2768 = vmatprep.subr.bf16.mxu0 %v2767_v17 }
  0x10   : > { %v333_v12 = vld [vmem:[%s327_s11] sm:$0xff]  ;;  %v334_v13 = vld [vmem:[%s327_s11 + $0x8] sm:$0xff]  ;;  %s3030_s11 = smov 112  }
  0x11   : > { %2614 = vmatprep.mubr.msk.f32.mxu1 %vm346_vm0, %v333_v12  ;;  %2603 = vmatprep.mubr.msk.f32.mxu0 %vm346_vm0, %v333_v12 }
  0x12   : > { %2615 = vmatmul.mubr.msk.f32.vlgmr.msra.gmra.mrb[0].mxu1 %vm346_vm0, %v334_v13  ;;  %2604 = vmatmul.mubr.msk.f32.vlgmr.msra.gmra.mrb[0].mxu0 %vm346_vm0, %v334_v13 }
  0x13   : > { %2625 = vmatprep.mubr.msk.f32.mxu0 %vm346_vm0, %v333_v12  ;;  %2770 = vmatpush3.bf16.msra.mxu0 %v2767_v17 }
  0x14   : > { %2772 = vmatprep.subr.bf16.mxu0 %v2771_v19 }
  0x17   : > { %2774 = vmatpush3.bf16.msra.mxu0 %v2771_v19 }
  0x1a   : > { %2626 = vmatmul.mubr.msk.f32.vlgmr.msra.gmra.mrb[2].mxu0 %vm346_vm0, %v334_v13 }
  0xe5   : > { %v2616_v21 = vpop.f32.mrb[0].mxu1  ;;  %v2605_v25 = vpop.f32.mrb[0].mxu0 }
  0xe6   : > { %v511_v23 = vadd.f32 %v2616_v21, %v2446_v20  ;;  %v505_v24 = vpop.f32.mrb[1].mxu1  ;;  %v419_v27 = vpop.f32.mrb[1].mxu0  ;;  %v3173_v32 = vadd.f32 %v2605_v25, %v2443_v22 }
  0xe7   : > { %v506_v26 = vadd.f32 %v2446_v20, %v505_v24  ;;  %v3161_v29 = vadd.f32 %v2443_v22, %v419_v27 }
  0xe9   : > { %v2775_v30 = vpack.c.bf16 %v511_v23, %v506_v26  ;;  %v3163_v31 = vpack.i.bf16 %v511_v23, %v506_v26  ;;  %794 = vrot.lane.b32.xlu1 %v3161_v29, %s3027_s24  ;;  %2632 = vmatprep.mubr.msk.f32.mxu1 %vm600_vm1, %v3161_v29 }
  0xeb   : > { %2777 = vmatprep.subr.msk.bf16.mxu1 %vm3157_vm2, %v2775_v30 }
  0xec   : > { %2780 = vmatpush3.bf16.xpose.msk.msra.mxu1 %vm3157_vm2, %v2775_v30 }
  0xed   : > { %v2627_v39 = vpop.f32.mrb[2].mxu0 }
  0xee   : > { %v591_v41 = vpop.f32.mrb[3].mxu0  ;;  %v597_v42 = vadd.f32 %v2627_v39, %v2449_v40 }
  0xef   : > { %v592_v43 = vadd.f32 %v2449_v40, %v591_v41 }
  0xf1   : > { %v2781_v44 = vpack.c.bf16 %v597_v42, %v592_v43  ;;  %v3202_v11 = vpack.i.bf16 %v597_v42, %v592_v43 }
  0xf3   : > { %2633 = vmatmul.mubr.msk.f32.vlgmr.msra.gmra.mrb[2].mxu1 %vm600_vm1, %v3173_v32  ;;  %2782 = vmatprep.subr.bf16.mxu1 %v2781_v44 }
  0xf4   : > { %2784 = vmatpush3.bf16.msra.mxu1 %v2781_v44 }
 0x15b   : > { %v795_v59 = vpop.permute.xlu1 %794 }
 0x1c6   : > { %v2634_v33 = vpop.f32.mrb[2].mxu1 }
 0x1c7   : > { %v679_v34 = vpop.f32.mrb[3].mxu1  ;;  %v689_v36 = vmul.f32 0.5, %v2634_v33 }
 0x1c8   : > { %v688_v35 = vmul.f32 0.5, %v679_v34 }
 0x1c9   : > { %v694_v38 = vsel %vm690_vm3, %v689_v36, -inf }
 0x1ca   : > { %v691_v37 = vsel %vm690_vm3, %v688_v35, -inf }
 0x1cb   : > { %692 = vmax.xlane.f32.xlu0 %v691_v37 }
 0x1cf   : > { %695 = vmax.xlane.f32.xlu0 %v694_v38 }
 0x1e5   : > { %2886 = vrot.lane.b32.xlu0 %v3163_v31, %s3027_s24 }
 0x258   : > { %v693_v45 = vpop.xlane.xlu0 %692 }
 0x259   : > { %v697_v46 = vsub.f32 %v688_v35, %v693_v45 }
 0x25b   : > { %v699_v49 = vmul.f32 1.442695, %v697_v46 }
 0x25c   : > { %v696_v47 = vpop.xlane.xlu0 %695 }
 0x25d   : > { %v698_v48 = vsub.f32 %v689_v36, %v696_v47 }
 0x25f   : > { %v701_v50 = vmul.f32 1.442695, %v698_v48 }
 0x260   : > { %v2887_v51 = vpop.permute.xlu0 %2886 }
 0x261   : > { %2955 = vpow2.f32 %v701_v50  ;;  %v2889_v52 = vunpack.i.h.bf16 %v2887_v51  ;;  %v2888_v53 = vunpack.i.l.bf16 %v2887_v51 }
 0x262   : > { %2957 = vpow2.f32 %v699_v49 }
 0x263   : > { %v2785_v54 = vpack.c.bf16 %v2889_v52, %v2888_v53 }
 0x265   : > { %2787 = vmatprep.subr.msk.bf16.mxu1 %vm3157_vm2, %v2785_v54 }
 0x26b   : > { %v2956_v55 = vpop.eup %2955 }
 0x26c   : > { %v706_v56 = vsel %vm690_vm3, %v2956_v55, 0.0  ;;  %v2958_v57 = vpop.eup %2957 }
 0x26d   : > { %707 = vadd.xlane.f32.xlu1 %v706_v56  ;;  %v703_v58 = vsel %vm690_vm3, %v2958_v57, 0.0 }
 0x271   : > { %704 = vadd.xlane.f32.xlu1 %v703_v58 }
 0x282   : > { %796 = vrot.lane.b32.xlu1 %v3173_v32, %s3027_s24 }
 0x2fa   : > { %v708_v60 = vpop.xlane.xlu1 %707 }
 0x2fb   : > { %2959 = vrcp.f32 %v708_v60 }
 0x2fe   : > { %v705_v61 = vpop.xlane.xlu1 %704 }
 0x2ff   : > { %2961 = vrcp.f32 %v705_v61 }
 0x302   : > { %v797_v2 = vpop.permute.xlu1 %796 }
 0x305   : > { %v2960_v62 = vpop.eup %2959 }
 0x306   : > { %v712_v1 = vmul.f32 %v2960_v62, %v2956_v55 }
 0x309   : > { %v2962_v63 = vpop.eup %2961 }
 0x30a   : > { %v710_v0 = vmul.f32 %v2962_v63, %v2958_v57 }
 0x30c   : > { %2639 = vmatprep.mubr.msk.f32.mxu1 %vm690_vm3, %v710_v0 }
 0x30d   : > { %2640 = vmatmul.mubr.msk.f32.vlgmr.msra.gmra.mrb[4].mxu1 %vm690_vm3, %v712_v1 }
 0x30e   : > { %2790 = vmatpush3.bf16.xpose.msk.msra.mxu1 %vm3157_vm2, %v2785_v54  ;;  %2646 = vmatprep.mubr.msk.f32.mxu1 %vm600_vm1, %v795_v59 }
 0x315   : > { %2647 = vmatmul.mubr.msk.f32.vlgmr.msra.gmra.mrb[6].mxu1 %vm600_vm1, %v797_v2 }
 0x3e0   : > { %v3196_v3 = vpop.f32.mrb[4].mxu1 }
 0x3e1   : > { %v3198_v4 = vpop.f32.mrb[5].mxu1 }
 0x3e8   : > { %v2648_v5 = vpop.f32.mrb[6].mxu1 }
 0x3e9   : > { %v886_v6 = vmul.f32 0.5, %v2648_v5  ;;  %v876_v7 = vpop.f32.mrb[7].mxu1 }
 0x3ea   : > { %v885_v8 = vmul.f32 0.5, %v876_v7 }
 0x3eb   : > { %v890_v9 = vsel %vm690_vm3, %v886_v6, -inf }
 0x3ec   : > { %891 = vmax.xlane.f32.xlu0 %v890_v9  ;;  %v887_v10 = vsel %vm690_vm3, %v885_v8, -inf }
 0x3ed   : > { %888 = vmax.xlane.f32.xlu1 %v887_v10 }
 0x3fe   : > { %2891 = vrot.lane.b32.xlu1 %v3202_v11, %s3027_s24 }
 0x402   : > { %998 = vrot.lane.b32.xlu1 %v3161_v29, %s3028_s28 }
 0x406   : > { %1000 = vrot.lane.b32.xlu1 %v3173_v32, %s3028_s28 }
 0x479   : > { %v892_v12 = vpop.xlane.xlu0 %891 }
 0x47a   : > { %v894_v13 = vsub.f32 %v886_v6, %v892_v12  ;;  %v889_v14 = vpop.xlane.xlu1 %888 }
 0x47b   : > { %v893_v15 = vsub.f32 %v885_v8, %v889_v14 }
 0x47c   : > { %v897_v16 = vmul.f32 1.442695, %v894_v13 }
 0x47d   : > { %v895_v17 = vmul.f32 1.442695, %v893_v15 }
 0x47e   : > { %2963 = vpow2.f32 %v897_v16  ;;  %v2892_v18 = vpop.permute.xlu1 %2891 }
 0x47f   : > { %v2894_v19 = vunpack.i.h.bf16 %v2892_v18  ;;  %v2893_v20 = vunpack.i.l.bf16 %v2892_v18  ;;  %2965 = vpow2.f32 %v895_v17 }
 0x481   : > { %v2791_v21 = vpack.c.bf16 %v2894_v19, %v2893_v20 }
 0x482   : > { %v999_v40 = vpop.permute.xlu1 %998 }
 0x483   : > { %2792 = vmatprep.subr.bf16.mxu0 %v2791_v21 }
 0x484   : > { %2794 = vmatpush3.bf16.msra.mxu0 %v2791_v21 }
 0x486   : > { %v1001_v41 = vpop.permute.xlu1 %1000 }
 0x488   : > { %v2964_v22 = vpop.eup %2963 }
 0x489   : > { %v902_v23 = vsel %vm690_vm3, %v2964_v22, 0.0  ;;  %v2966_v24 = vpop.eup %2965 }
 0x48a   : > { %903 = vadd.xlane.f32.xlu0 %v902_v23  ;;  %v899_v25 = vsel %vm690_vm3, %v2966_v24, 0.0 }
 0x48e   : > { %900 = vadd.xlane.f32.xlu0 %v899_v25 }
 0x4a4   : > { %2896 = vrot.lane.b32.xlu0 %v3163_v31, %s3028_s28 }
 0x517   : > { %v904_v26 = vpop.xlane.xlu0 %903 }
 0x518   : > { %2967 = vrcp.f32 %v904_v26 }
 0x51b   : > { %v901_v27 = vpop.xlane.xlu0 %900 }
 0x51c   : > { %2969 = vrcp.f32 %v901_v27 }
 0x51f   : > { %v2897_v30 = vpop.permute.xlu0 %2896 }
 0x520   : > { %v2899_v33 = vunpack.i.h.bf16 %v2897_v30  ;;  %v2898_v34 = vunpack.i.l.bf16 %v2897_v30 }
 0x522   : > { %v2795_v35 = vpack.c.bf16 %v2899_v33, %v2898_v34  ;;  %v2968_v36 = vpop.eup %2967 }
 0x523   : > { %v908_v39 = vmul.f32 %v2968_v36, %v2964_v22 }
 0x524   : > { %2797 = vmatprep.subr.msk.bf16.mxu0 %vm3157_vm2, %v2795_v35 }
 0x526   : > { %v2970_v37 = vpop.eup %2969 }
 0x527   : > { %v906_v38 = vmul.f32 %v2970_v37, %v2966_v24 }
 0x529   : > { %2653 = vmatprep.mubr.msk.f32.mxu0 %vm690_vm3, %v906_v38 }
 0x52a   : > { %2654 = vmatmul.mubr.msk.f32.vlgmr.msra.gmra.mrb[4].mxu0 %vm690_vm3, %v908_v39 }
 0x52b   : > { %2800 = vmatpush3.bf16.xpose.msk.msra.mxu0 %vm3157_vm2, %v2795_v35  ;;  %2660 = vmatprep.mubr.msk.f32.mxu0 %vm600_vm1, %v999_v40 }
 0x532   : > { %2661 = vmatmul.mubr.msk.f32.vlgmr.msra.gmra.mrb[6].mxu0 %vm600_vm1, %v1001_v41 }
 0x5fd   : > { %v3222_v42 = vpop.f32.mrb[4].mxu0 }
 0x5fe   : > { %v3224_v43 = vpop.f32.mrb[5].mxu0 }
 0x605   : > { %v2662_v44 = vpop.f32.mrb[6].mxu0 }
 0x606   : > { %v1090_v45 = vmul.f32 0.5, %v2662_v44  ;;  %v1080_v46 = vpop.f32.mrb[7].mxu0 }
 0x607   : > { %v1089_v47 = vmul.f32 0.5, %v1080_v46 }
 0x608   : > { %v1094_v48 = vsel %vm690_vm3, %v1090_v45, -inf }
 0x609   : > { %1095 = vmax.xlane.f32.xlu0 %v1094_v48  ;;  %v1091_v49 = vsel %vm690_vm3, %v1089_v47, -inf }
 0x60a   : > { %1092 = vmax.xlane.f32.xlu1 %v1091_v49 }
 0x61b   : > { %2901 = vrot.lane.b32.xlu1 %v3202_v11, %s3028_s28 }
 0x61f   : > { %1200 = vrot.lane.b32.xlu1 %v3161_v29, %s3029_s29 }
 0x623   : > { %1202 = vrot.lane.b32.xlu1 %v3173_v32, %s3029_s29 }
 0x696   : > { %v1096_v50 = vpop.xlane.xlu0 %1095 }
 0x697   : > { %v1098_v51 = vsub.f32 %v1090_v45, %v1096_v50  ;;  %v1093_v52 = vpop.xlane.xlu1 %1092 }
 0x698   : > { %v1097_v53 = vsub.f32 %v1089_v47, %v1093_v52 }
 0x699   : > { %v1101_v54 = vmul.f32 1.442695, %v1098_v51 }
 0x69a   : > { %v1099_v55 = vmul.f32 1.442695, %v1097_v53 }
 0x69b   : > { %2971 = vpow2.f32 %v1101_v54  ;;  %v2902_v56 = vpop.permute.xlu1 %2901 }
 0x69c   : > { %v2904_v57 = vunpack.i.h.bf16 %v2902_v56  ;;  %v2903_v58 = vunpack.i.l.bf16 %v2902_v56  ;;  %2973 = vpow2.f32 %v1099_v55 }
 0x69e   : > { %v2801_v59 = vpack.c.bf16 %v2904_v57, %v2903_v58 }
 0x69f   : > { %v1201_v13 = vpop.permute.xlu1 %1200 }
 0x6a0   : > { %2802 = vmatprep.subr.bf16.mxu1 %v2801_v59 }
 0x6a1   : > { %2804 = vmatpush3.bf16.msra.mxu1 %v2801_v59 }
 0x6a3   : > { %v1203_v14 = vpop.permute.xlu1 %1202 }
 0x6a5   : > { %v2972_v60 = vpop.eup %2971 }
 0x6a6   : > { %v1106_v61 = vsel %vm690_vm3, %v2972_v60, 0.0  ;;  %v2974_v62 = vpop.eup %2973 }
 0x6a7   : > { %1107 = vadd.xlane.f32.xlu0 %v1106_v61  ;;  %v1103_v63 = vsel %vm690_vm3, %v2974_v62, 0.0 }
 0x6ab   : > { %1104 = vadd.xlane.f32.xlu0 %v1103_v63 }
 0x6c1   : > { %2906 = vrot.lane.b32.xlu0 %v3163_v31, %s3029_s29 }
 0x734   : > { %v1108_v0 = vpop.xlane.xlu0 %1107 }
 0x735   : > { %2975 = vrcp.f32 %v1108_v0 }
 0x738   : > { %v1105_v1 = vpop.xlane.xlu0 %1104 }
 0x739   : > { %2977 = vrcp.f32 %v1105_v1 }
 0x73c   : > { %v2907_v2 = vpop.permute.xlu0 %2906 }
 0x73d   : > { %v2909_v5 = vunpack.i.h.bf16 %v2907_v2  ;;  %v2908_v6 = vunpack.i.l.bf16 %v2907_v2 }
 0x73f   : > { %v2805_v7 = vpack.c.bf16 %v2909_v5, %v2908_v6  ;;  %v2976_v8 = vpop.eup %2975 }
 0x740   : > { %v1112_v12 = vmul.f32 %v2976_v8, %v2972_v60 }
 0x741   : > { %2807 = vmatprep.subr.msk.bf16.mxu1 %vm3157_vm2, %v2805_v7 }
 0x743   : > { %v2978_v9 = vpop.eup %2977 }
 0x744   : > { %v1110_v10 = vmul.f32 %v2978_v9, %v2974_v62 }
 0x746   : > { %2667 = vmatprep.mubr.msk.f32.mxu1 %vm690_vm3, %v1110_v10 }
 0x747   : > { %2668 = vmatmul.mubr.msk.f32.vlgmr.msra.gmra.mrb[8].mxu1 %vm690_vm3, %v1112_v12 }
 0x748   : > { %2810 = vmatpush3.bf16.xpose.msk.msra.mxu1 %vm3157_vm2, %v2805_v7  ;;  %2674 = vmatprep.mubr.msk.f32.mxu1 %vm600_vm1, %v1201_v13 }
 0x74f   : > { %2675 = vmatmul.mubr.msk.f32.vlgmr.msra.gmra.mrb[10].mxu1 %vm600_vm1, %v1203_v14 }
 0x81a   : > { %v3246_v15 = vpop.f32.mrb[8].mxu1 }
 0x81b   : > { %v3248_v16 = vpop.f32.mrb[9].mxu1 }
 0x822   : > { %v2676_v17 = vpop.f32.mrb[10].mxu1 }
 0x823   : > { %v1292_v18 = vmul.f32 0.5, %v2676_v17  ;;  %v1282_v19 = vpop.f32.mrb[11].mxu1 }
 0x824   : > { %v1291_v20 = vmul.f32 0.5, %v1282_v19 }
 0x825   : > { %v1296_v21 = vsel %vm690_vm3, %v1292_v18, -inf }
 0x826   : > { %1297 = vmax.xlane.f32.xlu0 %v1296_v21  ;;  %v1293_v22 = vsel %vm690_vm3, %v1291_v20, -inf }
 0x827   : > { %1294 = vmax.xlane.f32.xlu1 %v1293_v22 }
 0x838   : > { %2911 = vrot.lane.b32.xlu1 %v3202_v11, %s3029_s29 }
 0x83c   : > { %1402 = vrot.lane.b32.xlu1 %v3161_v29, %s3030_s11 }
 0x840   : > { %1404 = vrot.lane.b32.xlu1 %v3173_v32, %s3030_s11 }
 0x8b3   : > { %v1298_v23 = vpop.xlane.xlu0 %1297 }
 0x8b4   : > { %v1300_v24 = vsub.f32 %v1292_v18, %v1298_v23  ;;  %v1295_v25 = vpop.xlane.xlu1 %1294 }
 0x8b5   : > { %v1299_v26 = vsub.f32 %v1291_v20, %v1295_v25 }
 0x8b6   : > { %v1303_v27 = vmul.f32 1.442695, %v1300_v24 }
 0x8b7   : > { %v1301_v30 = vmul.f32 1.442695, %v1299_v26 }
 0x8b8   : > { %2979 = vpow2.f32 %v1303_v27  ;;  %v2912_v33 = vpop.permute.xlu1 %2911 }
 0x8b9   : > { %v2914_v34 = vunpack.i.h.bf16 %v2912_v33  ;;  %v2913_v35 = vunpack.i.l.bf16 %v2912_v33  ;;  %2981 = vpow2.f32 %v1301_v30 }
 0x8bb   : > { %v2811_v36 = vpack.c.bf16 %v2914_v34, %v2913_v35 }
 0x8bc   : > { %v1403_v53 = vpop.permute.xlu1 %1402 }
 0x8bd   : > { %2812 = vmatprep.subr.bf16.mxu0 %v2811_v36 }
 0x8be   : > { %2814 = vmatpush3.bf16.msra.mxu0 %v2811_v36 }
 0x8c0   : > { %v1405_v54 = vpop.permute.xlu1 %1404 }
 0x8c2   : > { %v2980_v37 = vpop.eup %2979 }
 0x8c3   : > { %v1308_v38 = vsel %vm690_vm3, %v2980_v37, 0.0  ;;  %v2982_v39 = vpop.eup %2981 }
 0x8c4   : > { %1309 = vadd.xlane.f32.xlu0 %v1308_v38  ;;  %v1305_v40 = vsel %vm690_vm3, %v2982_v39, 0.0 }
 0x8c8   : > { %1306 = vadd.xlane.f32.xlu0 %v1305_v40 }
 0x8de   : > { %2916 = vrot.lane.b32.xlu0 %v3163_v31, %s3030_s11 }
 0x951   : > { %v1310_v41 = vpop.xlane.xlu0 %1309 }
 0x952   : > { %2983 = vrcp.f32 %v1310_v41 }
 0x955   : > { %v1307_v44 = vpop.xlane.xlu0 %1306 }
 0x956   : > { %2985 = vrcp.f32 %v1307_v44 }
 0x959   : > { %v2917_v45 = vpop.permute.xlu0 %2916 }
 0x95a   : > { %v2919_v46 = vunpack.i.h.bf16 %v2917_v45  ;;  %v2918_v47 = vunpack.i.l.bf16 %v2917_v45 }
 0x95c   : > { %v2815_v48 = vpack.c.bf16 %v2919_v46, %v2918_v47  ;;  %v2984_v49 = vpop.eup %2983 }
 0x95d   : > { %v1314_v52 = vmul.f32 %v2984_v49, %v2980_v37 }
 0x95e   : > { %2817 = vmatprep.subr.msk.bf16.mxu0 %vm3157_vm2, %v2815_v48 }
 0x960   : > { %v2986_v50 = vpop.eup %2985 }
 0x961   : > { %v1312_v51 = vmul.f32 %v2986_v50, %v2982_v39 }
 0x963   : > { %2681 = vmatprep.mubr.msk.f32.mxu0 %vm690_vm3, %v1312_v51 }
 0x964   : > { %2682 = vmatmul.mubr.msk.f32.vlgmr.msra.gmra.mrb[8].mxu0 %vm690_vm3, %v1314_v52 }
 0x965   : > { %2820 = vmatpush3.bf16.xpose.msk.msra.mxu0 %vm3157_vm2, %v2815_v48  ;;  %2688 = vmatprep.mubr.msk.f32.mxu0 %vm600_vm1, %v1403_v53 }
 0x96c   : > { %2689 = vmatmul.mubr.msk.f32.vlgmr.msra.gmra.mrb[10].mxu0 %vm600_vm1, %v1405_v54 }
 0xa37   : > { %v3270_v55 = vpop.f32.mrb[8].mxu0 }
 0xa38   : > { %v3272_v56 = vpop.f32.mrb[9].mxu0 }
 0xa3f   : > { %v2690_v57 = vpop.f32.mrb[10].mxu0 }
 0xa40   : > { %v1494_v58 = vmul.f32 0.5, %v2690_v57  ;;  %v1484_v59 = vpop.f32.mrb[11].mxu0 }
 0xa41   : > { %v1493_v60 = vmul.f32 0.5, %v1484_v59 }
 0xa42   : > { %v1498_v61 = vsel %vm690_vm3, %v1494_v58, -inf }
 0xa43   : > { %1499 = vmax.xlane.f32.xlu0 %v1498_v61  ;;  %v1495_v62 = vsel %vm690_vm3, %v1493_v60, -inf }
 0xa44   : > { %1496 = vmax.xlane.f32.xlu1 %v1495_v62 }
 0xa55   : > { %2921 = vrot.lane.b32.xlu1 %v3202_v11, %s3030_s11  ;;  %s3040_s11 = smov 28  }
 0xa59   : > { %1604 = vrot.lane.b32.xlu1 %v3161_v29, %s3031_s12 }
 0xa5d   : > { %1606 = vrot.lane.b32.xlu1 %v3173_v32, %s3031_s12 }
 0xad0   : > { %v1500_v63 = vpop.xlane.xlu0 %1499 }
 0xad1   : > { %v1502_v0 = vsub.f32 %v1494_v58, %v1500_v63  ;;  %v1497_v1 = vpop.xlane.xlu1 %1496 }
 0xad2   : > { %v1501_v2 = vsub.f32 %v1493_v60, %v1497_v1 }
 0xad3   : > { %v1505_v5 = vmul.f32 1.442695, %v1502_v0 }
 0xad4   : > { %v1503_v6 = vmul.f32 1.442695, %v1501_v2 }
 0xad5   : > { %2987 = vpow2.f32 %v1505_v5  ;;  %v2922_v7 = vpop.permute.xlu1 %2921 }
 0xad6   : > { %v2924_v8 = vunpack.i.h.bf16 %v2922_v7  ;;  %v2923_v9 = vunpack.i.l.bf16 %v2922_v7  ;;  %2989 = vpow2.f32 %v1503_v6 }
 0xad8   : > { %v2821_v10 = vpack.c.bf16 %v2924_v8, %v2923_v9 }
 0xad9   : > { %v1605_v30 = vpop.permute.xlu1 %1604 }
 0xada   : > { %2822 = vmatprep.subr.bf16.mxu1 %v2821_v10 }
 0xadb   : > { %2824 = vmatpush3.bf16.msra.mxu1 %v2821_v10 }
 0xadd   : > { %v1607_v33 = vpop.permute.xlu1 %1606 }
 0xadf   : > { %v2988_v12 = vpop.eup %2987 }
 0xae0   : > { %v1510_v13 = vsel %vm690_vm3, %v2988_v12, 0.0  ;;  %v2990_v14 = vpop.eup %2989 }
 0xae1   : > { %1511 = vadd.xlane.f32.xlu0 %v1510_v13  ;;  %v1507_v17 = vsel %vm690_vm3, %v2990_v14, 0.0 }
 0xae5   : > { %1508 = vadd.xlane.f32.xlu0 %v1507_v17 }
 0xafb   : > { %2926 = vrot.lane.b32.xlu0 %v3163_v31, %s3031_s12 }
 0xb6e   : > { %v1512_v18 = vpop.xlane.xlu0 %1511 }
 0xb6f   : > { %2991 = vrcp.f32 %v1512_v18 }
 0xb72   : > { %v1509_v19 = vpop.xlane.xlu0 %1508 }
 0xb73   : > { %2993 = vrcp.f32 %v1509_v19 }
 0xb76   : > { %v2927_v20 = vpop.permute.xlu0 %2926 }
 0xb77   : > { %v2929_v21 = vunpack.i.h.bf16 %v2927_v20  ;;  %v2928_v22 = vunpack.i.l.bf16 %v2927_v20 }
 0xb79   : > { %v2825_v23 = vpack.c.bf16 %v2929_v21, %v2928_v22  ;;  %v2992_v24 = vpop.eup %2991 }
 0xb7a   : > { %v1516_v27 = vmul.f32 %v2992_v24, %v2988_v12 }
 0xb7b   : > { %2827 = vmatprep.subr.msk.bf16.mxu1 %vm3157_vm2, %v2825_v23 }
 0xb7d   : > { %v2994_v25 = vpop.eup %2993 }
 0xb7e   : > { %v1514_v26 = vmul.f32 %v2994_v25, %v2990_v14 }
 0xb80   : > { %2695 = vmatprep.mubr.msk.f32.mxu1 %vm690_vm3, %v1514_v26 }
 0xb81   : > { %2696 = vmatmul.mubr.msk.f32.vlgmr.msra.gmra.mrb[12].mxu1 %vm690_vm3, %v1516_v27 }
 0xb82   : > { %2830 = vmatpush3.bf16.xpose.msk.msra.mxu1 %vm3157_vm2, %v2825_v23  ;;  %2702 = vmatprep.mubr.msk.f32.mxu1 %vm600_vm1, %v1605_v30 }
 0xb89   : > { %2703 = vmatmul.mubr.msk.f32.vlgmr.msra.gmra.mrb[14].mxu1 %vm600_vm1, %v1607_v33 }
 0xc54   : > { %v3294_v34 = vpop.f32.mrb[12].mxu1 }
 0xc55   : > { %v3296_v35 = vpop.f32.mrb[13].mxu1 }
 0xc5c   : > { %v2704_v36 = vpop.f32.mrb[14].mxu1 }
 0xc5d   : > { %v1696_v37 = vmul.f32 0.5, %v2704_v36  ;;  %v1686_v38 = vpop.f32.mrb[15].mxu1 }
 0xc5e   : > { %v1695_v39 = vmul.f32 0.5, %v1686_v38 }
 0xc5f   : > { %v1700_v40 = vsel %vm690_vm3, %v1696_v37, -inf }
 0xc60   : > { %1701 = vmax.xlane.f32.xlu0 %v1700_v40  ;;  %v1697_v41 = vsel %vm690_vm3, %v1695_v39, -inf }
 0xc61   : > { %1698 = vmax.xlane.f32.xlu1 %v1697_v41 }
 0xc72   : > { %2931 = vrot.lane.b32.xlu1 %v3202_v11, %s3031_s12 }
 0xc76   : > { %1806 = vrot.lane.b32.xlu1 %v3161_v29, %s3032_s13 }
 0xc7a   : > { %1808 = vrot.lane.b32.xlu1 %v3173_v32, %s3032_s13 }
 0xced   : > { %v1702_v44 = vpop.xlane.xlu0 %1701 }
 0xcee   : > { %v1704_v45 = vsub.f32 %v1696_v37, %v1702_v44  ;;  %v1699_v46 = vpop.xlane.xlu1 %1698 }
 0xcef   : > { %v1703_v47 = vsub.f32 %v1695_v39, %v1699_v46 }
 0xcf0   : > { %v1707_v48 = vmul.f32 1.442695, %v1704_v45 }
 0xcf1   : > { %v1705_v49 = vmul.f32 1.442695, %v1703_v47 }
 0xcf2   : > { %2995 = vpow2.f32 %v1707_v48  ;;  %v2932_v50 = vpop.permute.xlu1 %2931 }
 0xcf3   : > { %v2934_v51 = vunpack.i.h.bf16 %v2932_v50  ;;  %v2933_v52 = vunpack.i.l.bf16 %v2932_v50  ;;  %2997 = vpow2.f32 %v1705_v49 }
 0xcf5   : > { %v2831_v53 = vpack.c.bf16 %v2934_v51, %v2933_v52 }
 0xcf6   : > { %v1807_v8 = vpop.permute.xlu1 %1806 }
 0xcf7   : > { %2832 = vmatprep.subr.bf16.mxu0 %v2831_v53 }
 0xcf8   : > { %2834 = vmatpush3.bf16.msra.mxu0 %v2831_v53 }
 0xcfa   : > { %v1809_v9 = vpop.permute.xlu1 %1808 }
 0xcfc   : > { %v2996_v54 = vpop.eup %2995 }
 0xcfd   : > { %v1712_v57 = vsel %vm690_vm3, %v2996_v54, 0.0  ;;  %v2998_v58 = vpop.eup %2997 }
 0xcfe   : > { %1713 = vadd.xlane.f32.xlu0 %v1712_v57  ;;  %v1709_v59 = vsel %vm690_vm3, %v2998_v58, 0.0 }
 0xd02   : > { %1710 = vadd.xlane.f32.xlu0 %v1709_v59 }
 0xd18   : > { %2936 = vrot.lane.b32.xlu0 %v3163_v31, %s3032_s13 }
 0xd8b   : > { %v1714_v60 = vpop.xlane.xlu0 %1713 }
 0xd8c   : > { %2999 = vrcp.f32 %v1714_v60 }
 0xd8f   : > { %v1711_v61 = vpop.xlane.xlu0 %1710 }
 0xd90   : > { %3001 = vrcp.f32 %v1711_v61 }
 0xd93   : > { %v2937_v62 = vpop.permute.xlu0 %2936 }
 0xd94   : > { %v2939_v63 = vunpack.i.h.bf16 %v2937_v62  ;;  %v2938_v0 = vunpack.i.l.bf16 %v2937_v62 }
 0xd96   : > { %v2835_v1 = vpack.c.bf16 %v2939_v63, %v2938_v0  ;;  %v3000_v2 = vpop.eup %2999 }
 0xd97   : > { %v1718_v7 = vmul.f32 %v3000_v2, %v2996_v54 }
 0xd98   : > { %2837 = vmatprep.subr.msk.bf16.mxu0 %vm3157_vm2, %v2835_v1 }
 0xd9a   : > { %v3002_v5 = vpop.eup %3001 }
 0xd9b   : > { %v1716_v6 = vmul.f32 %v3002_v5, %v2998_v58 }
 0xd9d   : > { %2709 = vmatprep.mubr.msk.f32.mxu0 %vm690_vm3, %v1716_v6 }
 0xd9e   : > { %2710 = vmatmul.mubr.msk.f32.vlgmr.msra.gmra.mrb[12].mxu0 %vm690_vm3, %v1718_v7 }
 0xd9f   : > { %2840 = vmatpush3.bf16.xpose.msk.msra.mxu0 %vm3157_vm2, %v2835_v1  ;;  %2716 = vmatprep.mubr.msk.f32.mxu0 %vm600_vm1, %v1807_v8 }
 0xda6   : > { %2717 = vmatmul.mubr.msk.f32.vlgmr.msra.gmra.mrb[14].mxu0 %vm600_vm1, %v1809_v9 }
 0xe71   : > { %v3318_v10 = vpop.f32.mrb[12].mxu0 }
 0xe72   : > { %v3320_v12 = vpop.f32.mrb[13].mxu0 }
 0xe79   : > { %v2718_v13 = vpop.f32.mrb[14].mxu0 }
 0xe7a   : > { %v1898_v14 = vmul.f32 0.5, %v2718_v13  ;;  %v1888_v17 = vpop.f32.mrb[15].mxu0 }
 0xe7b   : > { %v1897_v18 = vmul.f32 0.5, %v1888_v17  ;;  %v2288_v17 = vld [vmem:[%s3402_s7 + $0x18] sm:$0xff] }
 0xe7c   : > { %v1902_v19 = vsel %vm690_vm3, %v1898_v14, -inf }
 0xe7d   : > { %1903 = vmax.xlane.f32.xlu0 %v1902_v19  ;;  %v1899_v20 = vsel %vm690_vm3, %v1897_v18, -inf }
 0xe7e   : > { %1900 = vmax.xlane.f32.xlu1 %v1899_v20 }
 0xe8f   : > { %2941 = vrot.lane.b32.xlu1 %v3202_v11, %s3032_s13 }
 0xe93   : > { %2008 = vrot.lane.b32.xlu1 %v3161_v29, %s3033_s14 }
 0xe97   : > { %2010 = vrot.lane.b32.xlu1 %v3173_v32, %s3033_s14 }
 0xf0a   : > { %v1904_v21 = vpop.xlane.xlu0 %1903 }
 0xf0b   : > { %v1906_v22 = vsub.f32 %v1898_v14, %v1904_v21  ;;  %v1901_v23 = vpop.xlane.xlu1 %1900 }
 0xf0c   : > { %v1905_v24 = vsub.f32 %v1897_v18, %v1901_v23 }
 0xf0d   : > { %v1909_v25 = vmul.f32 1.442695, %v1906_v22 }
 0xf0e   : > { %v1907_v26 = vmul.f32 1.442695, %v1905_v24 }
 0xf0f   : > { %3003 = vpow2.f32 %v1909_v25  ;;  %v2942_v27 = vpop.permute.xlu1 %2941 }
 0xf10   : > { %v2944_v30 = vunpack.i.h.bf16 %v2942_v27  ;;  %v2943_v33 = vunpack.i.l.bf16 %v2942_v27  ;;  %3005 = vpow2.f32 %v1907_v26 }
 0xf12   : > { %v2841_v36 = vpack.c.bf16 %v2944_v30, %v2943_v33 }
 0xf13   : > { %v2009_v51 = vpop.permute.xlu1 %2008 }
 0xf14   : > { %2842 = vmatprep.subr.bf16.mxu1 %v2841_v36 }
 0xf15   : > { %2844 = vmatpush3.bf16.msra.mxu1 %v2841_v36 }
 0xf19   : > { %v3004_v37 = vpop.eup %3003 }
 0xf1a   : > { %v1914_v29 = vsel %vm690_vm3, %v3004_v37, 0.0  ;;  %v3006_v38 = vpop.eup %3005 }
 0xf1b   : > { %1915 = vadd.xlane.f32.xlu0 %v1914_v29  ;;  %v1911_v32 = vsel %vm690_vm3, %v3006_v38, 0.0 }
 0xf1f   : > { %1912 = vadd.xlane.f32.xlu0 %v1911_v32 }
 0xf35   : > { %2946 = vrot.lane.b32.xlu0 %v3163_v31, %s3033_s14  ;;  %v2011_v31 = vpop.permute.xlu1 %2010 }
 0xfa8   : > { %v1916_v39 = vpop.xlane.xlu0 %1915 }
 0xfa9   : > { %3007 = vrcp.f32 %v1916_v39 }
 0xfac   : > { %v1913_v40 = vpop.xlane.xlu0 %1912 }
 0xfad   : > { %3009 = vrcp.f32 %v1913_v40 }
 0xfb0   : > { %v2947_v41 = vpop.permute.xlu0 %2946 }
 0xfb1   : > { %v2949_v44 = vunpack.i.h.bf16 %v2947_v41  ;;  %v2948_v45 = vunpack.i.l.bf16 %v2947_v41 }
 0xfb3   : > { %v2845_v46 = vpack.c.bf16 %v2949_v44, %v2948_v45  ;;  %v3008_v47 = vpop.eup %3007 }
 0xfb4   : > { %v1920_v50 = vmul.f32 %v3008_v47, %v3004_v37 }
 0xfb5   : > { %2847 = vmatprep.subr.msk.bf16.mxu1 %vm3157_vm2, %v2845_v46 }
 0xfb7   : > { %v3010_v48 = vpop.eup %3009 }
 0xfb8   : > { %v1918_v49 = vmul.f32 %v3010_v48, %v3006_v38 }
 0xfba   : > { %2723 = vmatprep.mubr.msk.f32.mxu1 %vm690_vm3, %v1918_v49 }
 0xfbb   : > { %2724 = vmatmul.mubr.msk.f32.vlgmr.msra.gmra.mrb[16].mxu1 %vm690_vm3, %v1920_v50 }
 0xfbc   : > { %2850 = vmatpush3.bf16.xpose.msk.msra.mxu1 %vm3157_vm2, %v2845_v46  ;;  %2730 = vmatprep.mubr.msk.f32.mxu1 %vm600_vm1, %v2009_v51 }
 0xfc3   : > { %2731 = vmatmul.mubr.msk.f32.vlgmr.msra.gmra.mrb[18].mxu1 %vm600_vm1, %v2011_v31 }
0x108e   : > { %v2725_v52 = vpop.f32.mrb[16].mxu1 }
0x108f   : > { %v1999_v53 = vpop.f32.mrb[17].mxu1 }
0x1096   : > { %v2732_v54 = vpop.f32.mrb[18].mxu1 }
0x1097   : > { %v2100_v57 = vmul.f32 0.5, %v2732_v54  ;;  %v2090_v58 = vpop.f32.mrb[19].mxu1 }
0x1098   : > { %v2099_v59 = vmul.f32 0.5, %v2090_v58 }
0x1099   : > { %v2104_v60 = vsel %vm690_vm3, %v2100_v57, -inf }
0x109a   : > { %2105 = vmax.xlane.f32.xlu0 %v2104_v60  ;;  %v2101_v61 = vsel %vm690_vm3, %v2099_v59, -inf }
0x109b   : > { %2102 = vmax.xlane.f32.xlu1 %v2101_v61 }
0x10ac   : > { %2951 = vrot.lane.b32.xlu1 %v3202_v11, %s3033_s14 }
0x10b0   : > { %2214 = vrot.lane.b32.xlu1 %v3222_v42, %s3034_s15 }
0x10b4   : > { %2220 = vrot.lane.b32.xlu1 %v3248_v16, %s3035_s16 }
0x10b8   : > { %2222 = vrot.lane.b32.xlu1 %v3246_v15, %s3035_s16  ;;  %s332_s16 = scalar_lea.vmem %s3404_s9, %s2505_s27 }
0x10bc   : > { %2230 = vrot.lane.b32.xlu1 %v3270_v55, %s3036_s17 }
0x10c0   : > { %2238 = vrot.lane.b32.xlu1 %v3294_v34, %s3037_s18 }
0x10c4   : > { %2246 = vrot.lane.b32.xlu1 %v3318_v10, %s3038_s19 }
0x10c8   : > { %2254 = vrot.lane.b32.xlu1 %v2725_v52, %s3039_s20  ;;  %v2500_v52 = vld [vmem:[%s3403_s8] ss:$0 sm:$0xff] }
0x1127   : > { %v2106_v28 = vpop.xlane.xlu0 %2105 }
0x1128   : > { %v2108_v11 = vsub.f32 %v2100_v57, %v2106_v28  ;;  %v2103_v62 = vpop.xlane.xlu1 %2102 }
0x1129   : > { %v2107_v42 = vsub.f32 %v2099_v59, %v2103_v62 }
0x112a   : > { %v2111_v63 = vmul.f32 1.442695, %v2108_v11 }
0x112b   : > { %v2109_v0 = vmul.f32 1.442695, %v2107_v42 }
0x112c   : > { %v2952_v16 = vpop.permute.xlu1 %2951 }
0x112d   : > { %3011 = vpow2.f32 %v2109_v0  ;;  %v2954_v15 = vunpack.i.h.bf16 %v2952_v16  ;;  %v2953_v1 = vunpack.i.l.bf16 %v2952_v16 }
0x112e   : > { %3013 = vpow2.f32 %v2111_v63 }
0x112f   : > { %v2851_v55 = vpack.c.bf16 %v2954_v15, %v2953_v1 }
0x1130   : > { %v2215_v21 = vpop.permute.xlu1 %2214 }
0x1131   : > { %2852 = vmatprep.subr.bf16.mxu0 %v2851_v55  ;;  %v2267_v38 = vsel %vm600_vm1, %v3196_v3, %v2215_v21 }
0x1132   : > { %2854 = vmatpush3.bf16.msra.mxu0 %v2851_v55 }
0x1134   : > { %v2221_v22 = vpop.permute.xlu1 %2220 }
0x1137   : > { %v3012_v34 = vpop.eup %3011 }
0x1138   : > { %v2113_v2 = vsel %vm690_vm3, %v3012_v34, 0.0  ;;  %v3014_v5 = vpop.eup %3013  ;;  %v2223_v23 = vpop.permute.xlu1 %2222 }
0x1139   : > { %2114 = vadd.xlane.f32.xlu0 %v2113_v2  ;;  %v2116_v6 = vsel %vm690_vm3, %v3014_v5, 0.0  ;;  %v2270_v40 = vsel %vm2268_vm4, %v2267_v38, %v2223_v23 }
0x113c   : > { %v2231_v25 = vpop.permute.xlu1 %2230 }
0x113d   : > { %2117 = vadd.xlane.f32.xlu0 %v2116_v6  ;;  %v2273_v44 = vsel %vm2271_vm5, %v2270_v40, %v2231_v25 }
0x1140   : > { %v2239_v27 = vpop.permute.xlu1 %2238 }
0x1141   : > { %v2275_v46 = vsel %vm690_vm3, %v2273_v44, %v2239_v27 }
0x1144   : > { %v2247_v33 = vpop.permute.xlu1 %2246 }
0x1145   : > { %v2278_v48 = vsel %vm2276_vm6, %v2275_v46, %v2247_v33 }
0x1148   : > { %v2255_v29 = vpop.permute.xlu1 %2254 }
0x1149   : > { %v2281_v51 = vsel %vm2279_vm7, %v2278_v48, %v2255_v29 }
0x1153   : > { %2212 = vrot.lane.b32.xlu0 %v3224_v43, %s3034_s15  ;;  %v2285_v43 = vld [vmem:[%s3402_s7] sm:$0xff] }
0x1157   : > { %2228 = vrot.lane.b32.xlu0 %v3272_v56, %s3036_s17  ;;  %v2286_v56 = vld [vmem:[%s3402_s7 + $0x8] sm:$0xff] }
0x115b   : > { %2236 = vrot.lane.b32.xlu0 %v3296_v35, %s3037_s18  ;;  %v2287_v35 = vld [vmem:[%s3402_s7 + $0x10] sm:$0xff] }
0x115c   : > { %v2859_v18 = vpack.c.bf16 %v2288_v17, %v2287_v35 }
0x115f   : > { %2244 = vrot.lane.b32.xlu0 %v3320_v12, %s3038_s19  ;;  %v2855_v12 = vpack.c.bf16 %v2286_v56, %v2285_v43 }
0x1161   : > { %2856 = vmatprep.subr.bf16.mxu0 %v2855_v12 }
0x1163   : > { %2252 = vrot.lane.b32.xlu0 %v1999_v53, %s3039_s20 }
0x11c6   : > { %v2115_v7 = vpop.xlane.xlu0 %2114 }
0x11c7   : > { %3015 = vrcp.f32 %v2115_v7 }
0x11ca   : > { %v2118_v8 = vpop.xlane.xlu0 %2117 }
0x11cb   : > { %3017 = vrcp.f32 %v2118_v8 }
0x11ce   : > { %v2213_v24 = vpop.permute.xlu0 %2212 }
0x11cf   : > { %v2266_v37 = vsel %vm600_vm1, %v3198_v4, %v2213_v24 }
0x11d0   : > { %v2269_v32 = vsel %vm2268_vm4, %v2266_v37, %v2221_v22 }
0x11d1   : > { %v3016_v9 = vpop.eup %3015 }
0x11d2   : > { %v2120_v10 = vmul.f32 %v3016_v9, %v3012_v34  ;;  %v2229_v26 = vpop.permute.xlu0 %2228 }
0x11d3   : > { %v2272_v41 = vsel %vm2271_vm5, %v2269_v32, %v2229_v26 }
0x11d4   : > { %2737 = vmatprep.mubr.msk.f32.mxu0 %vm690_vm3, %v2120_v10 }
0x11d5   : > { %v3018_v13 = vpop.eup %3017 }
0x11d6   : > { %v2122_v14 = vmul.f32 %v3018_v13, %v3014_v5  ;;  %v2237_v30 = vpop.permute.xlu0 %2236 }
0x11d7   : > { %v2274_v45 = vsel %vm690_vm3, %v2272_v41, %v2237_v30 }
0x11d8   : > { %2738 = vmatmul.mubr.msk.f32.vlgmr.msra.gmra.mrb[16].mxu0 %vm690_vm3, %v2122_v14 }
0x11d9   : > { %2858 = vmatpush3.bf16.msra.mxu0 %v2855_v12 }
0x11da   : > { %2860 = vmatprep.subr.bf16.mxu0 %v2859_v18  ;;  %v2245_v36 = vpop.permute.xlu0 %2244 }
0x11db   : > { %v2277_v4 = vsel %vm2276_vm6, %v2274_v45, %v2245_v36 }
0x11dd   : > { %2862 = vmatpush3.bf16.msra.mxu0 %v2859_v18 }
0x11de   : > { %v2253_v39 = vpop.permute.xlu0 %2252 }
0x11df   : > { %v2280_v49 = vsel %vm2279_vm7, %v2277_v4, %v2253_v39 }
0x12ab   : > { %v2739_v19 = vpop.f32.mrb[16].mxu0 }
0x12ac   : > { %2262 = vrot.lane.b32.xlu1 %v2739_v19, %s3040_s11  ;;  %v2201_v20 = vpop.f32.mrb[17].mxu0 }
0x12ad   : > { %2260 = vrot.lane.b32.xlu0 %v2201_v20, %s3040_s11 }
0x131e   : > { %v2263_v47 = vpop.permute.xlu1 %2262 }
0x131f   : > { %v2261_v50 = vpop.permute.xlu0 %2260  ;;  %v2284_v31 = vsel %vm2282_vm8, %v2281_v51, %v2263_v47 }
0x1320   : > { %v2283_v3 = vsel %vm2282_vm8, %v2280_v49, %v2261_v50 }
0x1321   : > { %2748 = vmatprep.mubr.msk.f32.mxu0 %vm346_vm0, %v2283_v3 }
0x1322   : > { %2749 = vmatmul.mubr.msk.f32.vlgmr.msra.gmra.mrb[18].mxu0 %vm346_vm0, %v2284_v31 }
0x13f5   : > { %v2750_v53 = vpop.f32.mrb[18].mxu0 }
0x13f6   : > { %v2374_v54 = vadd.f32 %v2750_v53, %v2500_v52  ;;  %v2368_v57 = vpop.f32.mrb[19].mxu0 }
0x13f7   : > { %v2369_v58 = vadd.f32 %v2500_v52, %v2368_v57 }
0x13f8   : > { %2378 = vst.msk [vmem:[%s332_s16 + $0x8] sm:$0xff] %vm346_vm0, %v2374_v54 }
0x13f9   : > { %2377 = vst.msk [vmem:[%s332_s16] sm:$0xff] %vm346_vm0, %v2369_v58 }
0x13fa PF: > { %s19_s30 = sadd.s32 1, %s3025_s30  }
0x13fb   : > { %p16_p4 = scmp.ge.s32.totalorder %s19_s30, 4  }
0x13fd   :  { %18 = sbr.rel (!%p16_p4) target bundleno = 1 (0x1), region = 86 }

// kernel: stab_forward.5
= control target key start
LH: loop header
LB: loop body
LE: loop exit
PB: predicated region body
PF: predicated region fallthrough
CT: control target
= control target key end

     0   :  { %vm203_vm0 = vcmask 72704   ;;  %vm3500_vm2 = vcmask 130048   ;;  %s5894_s1 = inlined_call_operand.vmem [shape: f32[32,16,9], index: 1, kind: input, shape index: {}]   ;;  %s5895_s0 = inlined_call_operand.vmem [shape: f32[32,32,9], index: 0, kind: input, shape index: {}]   ;;  %s5896_s2 = inlined_call_operand.vmem [shape: f32[32,32,16], index: 2, kind: output, shape index: {}]  }
   0x1   :  { %v139_v0 = vld [vmem:[%s5894_s1] sm:$0xff]  ;;  %v140_v1 = vld [vmem:[%s5894_s1 + $0x8] sm:$0xff]  ;;  %vm4552_vm1 = vmpackc.low %vm203_vm0, %vm203_vm0 }
   0x2   :  { %v4337_v3 = vpack.c.bf16 %v140_v1, %v139_v0  ;;  %v141_v4 = vld [vmem:[%s5894_s1 + $0x10] sm:$0xff]  ;;  %v142_v5 = vld [vmem:[%s5894_s1 + $0x18] sm:$0xff]  ;;  %v11_v6 = vld [vmem:[%s5895_s0] sm:$0xff] }
   0x3   :  { %v4343_v7 = vpack.c.bf16 %v142_v5, %v141_v4  ;;  %4021 = vmatprep.mubr.msk.f32.mxu0 %vm203_vm0, %v11_v6  ;;  %v15_v8 = vld [vmem:[%s5895_s0 + $0x20] sm:$0xff]  ;;  %v144_v10 = vld [vmem:[%s5894_s1 + $0x28] sm:$0xff]  ;;  %v145_v11 = vld [vmem:[%s5894_s1 + $0x30] sm:$0xff] }
   0x4   :  { %4339 = vmatprep.subr.msk.bf16.mxu0 %vm4552_vm1, %v4337_v3  ;;  %4031 = vmatprep.mubr.msk.f32.mxu1 %vm203_vm0, %v15_v8  ;;  %v143_v9 = vld [vmem:[%s5894_s1 + $0x20] sm:$0xff]  ;;  %v146_v13 = vld [vmem:[%s5894_s1 + $0x38] sm:$0xff]  ;;  %v148_v16 = vld [vmem:[%s5894_s1 + $0x48] sm:$0xff] }
   0x5   :  { %4345 = vmatprep.subr.msk.bf16.mxu1 %vm4552_vm1, %v4343_v7  ;;  %4342 = vmatpush3.bf16.xpose.msk.msra.mxu0 %vm4552_vm1, %v4337_v3  ;;  %v4349_v12 = vpack.c.bf16 %v144_v10, %v143_v9  ;;  %v4355_v14 = vpack.c.bf16 %v146_v13, %v145_v11  ;;  %v147_v15 = vld [vmem:[%s5894_s1 + $0x40] sm:$0xff]  ;;  %v12_v17 = vld [vmem:[%s5895_s0 + $0x8] sm:$0xff]  ;;  %v149_v18 = vld [vmem:[%s5894_s1 + $0x50] sm:$0xff] }
   0x6   :  { %4348 = vmatpush3.bf16.xpose.msk.msra.mxu1 %vm4552_vm1, %v4343_v7  ;;  %v150_v19 = vld [vmem:[%s5894_s1 + $0x58] sm:$0xff]  ;;  %v16_v20 = vld [vmem:[%s5895_s0 + $0x28] sm:$0xff]  ;;  %v13_v21 = vld [vmem:[%s5895_s0 + $0x10] sm:$0xff]  ;;  %v4361_v22 = vpack.c.bf16 %v148_v16, %v147_v15 }
   0x7   :  { %4351 = vmatprep.subr.msk.bf16.mxu0 %vm4552_vm1, %v4349_v12  ;;  %4357 = vmatprep.subr.msk.bf16.mxu1 %vm4552_vm1, %v4355_v14  ;;  %v17_v23 = vld [vmem:[%s5895_s0 + $0x30] sm:$0xff]  ;;  %v4367_v24 = vpack.c.bf16 %v150_v19, %v149_v18  ;;  %v14_v25 = vld [vmem:[%s5895_s0 + $0x18] sm:$0xff]  ;;  %v19_v27 = vld [vmem:[%s5895_s0 + $0x40] sm:$0xff] }
   0x8   :  { %v18_v26 = vld [vmem:[%s5895_s0 + $0x38] sm:$0xff]  ;;  %v23_v28 = vld [vmem:[%s5895_s0 + $0x60] sm:$0xff]  ;;  %v152_v30 = vld [vmem:[%s5894_s1 + $0x68] sm:$0xff] }
   0x9   :  { %v151_v29 = vld [vmem:[%s5894_s1 + $0x60] sm:$0xff]  ;;  %v20_v31 = vld [vmem:[%s5895_s0 + $0x48] sm:$0xff]  ;;  %v153_v32 = vld [vmem:[%s5894_s1 + $0x70] sm:$0xff] }
   0xa   :  { %v154_v33 = vld [vmem:[%s5894_s1 + $0x78] sm:$0xff]  ;;  %v24_v34 = vld [vmem:[%s5895_s0 + $0x68] sm:$0xff]  ;;  %v21_v35 = vld [vmem:[%s5895_s0 + $0x50] sm:$0xff]  ;;  %v4373_v36 = vpack.c.bf16 %v152_v30, %v151_v29 }
   0xb   :  { %v25_v37 = vld [vmem:[%s5895_s0 + $0x70] sm:$0xff]  ;;  %v4379_v38 = vpack.c.bf16 %v154_v33, %v153_v32  ;;  %v22_v39 = vld [vmem:[%s5895_s0 + $0x58] sm:$0xff]  ;;  %v27_v41 = vld [vmem:[%s5895_s0 + $0x80] sm:$0xff] }
   0xc   :  { %4022 = vmatmul.mubr.msk.f32.vlgmr.msra.gmra.mrb[0].mxu0 %vm203_vm0, %v12_v17  ;;  %v26_v40 = vld [vmem:[%s5895_s0 + $0x78] sm:$0xff]  ;;  %v31_v42 = vld [vmem:[%s5895_s0 + $0xa0] sm:$0xff]  ;;  %v156_v44 = vld [vmem:[%s5894_s1 + $0x88] sm:$0xff] }
   0xd   :  { %4032 = vmatmul.mubr.msk.f32.vlgmr.msra.gmra.mrb[0].mxu1 %vm203_vm0, %v16_v20  ;;  %4354 = vmatpush3.bf16.xpose.msk.msra.mxu0 %vm4552_vm1, %v4349_v12  ;;  %v155_v43 = vld [vmem:[%s5894_s1 + $0x80] sm:$0xff]  ;;  %v28_v45 = vld [vmem:[%s5895_s0 + $0x88] sm:$0xff]  ;;  %v157_v46 = vld [vmem:[%s5894_s1 + $0x90] sm:$0xff] }
   0xe   :  { %4360 = vmatpush3.bf16.xpose.msk.msra.mxu1 %vm4552_vm1, %v4355_v14  ;;  %4024 = vmatprep.mubr.msk.f32.mxu0 %vm203_vm0, %v13_v21  ;;  %v158_v47 = vld [vmem:[%s5894_s1 + $0x98] sm:$0xff]  ;;  %v32_v48 = vld [vmem:[%s5895_s0 + $0xa8] sm:$0xff]  ;;  %v29_v49 = vld [vmem:[%s5895_s0 + $0x90] sm:$0xff]  ;;  %v4385_v50 = vpack.c.bf16 %v156_v44, %v155_v43 }
   0xf   :  { %4034 = vmatprep.mubr.msk.f32.mxu1 %vm203_vm0, %v17_v23  ;;  %4363 = vmatprep.subr.msk.bf16.mxu0 %vm4552_vm1, %v4361_v22  ;;  %v33_v51 = vld [vmem:[%s5895_s0 + $0xb0] sm:$0xff]  ;;  %v4391_v52 = vpack.c.bf16 %v158_v47, %v157_v46  ;;  %v30_v53 = vld [vmem:[%s5895_s0 + $0x98] sm:$0xff]  ;;  %v35_v55 = vld [vmem:[%s5895_s0 + $0xc0] sm:$0xff] }
  0x10   :  { %4025 = vmatmul.mubr.msk.f32.gmra.mrb[2].mxu0 %vm203_vm0, %v14_v25  ;;  %4369 = vmatprep.subr.msk.bf16.mxu1 %vm4552_vm1, %v4367_v24  ;;  %v34_v54 = vld [vmem:[%s5895_s0 + $0xb8] sm:$0xff]  ;;  %v39_v56 = vld [vmem:[%s5895_s0 + $0xe0] sm:$0xff]  ;;  %v160_v58 = vld [vmem:[%s5894_s1 + $0xa8] sm:$0xff] }
  0x11   :  { %4035 = vmatmul.mubr.msk.f32.gmra.mrb[2].mxu1 %vm203_vm0, %v18_v26  ;;  %4041 = vmatprep.mubr.msk.f32.mxu0 %vm203_vm0, %v19_v27  ;;  %v159_v57 = vld [vmem:[%s5894_s1 + $0xa0] sm:$0xff]  ;;  %v36_v59 = vld [vmem:[%s5895_s0 + $0xc8] sm:$0xff]  ;;  %v161_v60 = vld [vmem:[%s5894_s1 + $0xb0] sm:$0xff] }
  0x12   :  { %4051 = vmatprep.mubr.msk.f32.mxu1 %vm203_vm0, %v23_v28  ;;  %v162_v61 = vld [vmem:[%s5894_s1 + $0xb8] sm:$0xff]  ;;  %v40_v62 = vld [vmem:[%s5895_s0 + $0xe8] sm:$0xff]  ;;  %v37_v63 = vld [vmem:[%s5895_s0 + $0xd0] sm:$0xff]  ;;  %v4397_v0 = vpack.c.bf16 %v160_v58, %v159_v57 }
  0x13   :  { %v41_v1 = vld [vmem:[%s5895_s0 + $0xf0] sm:$0xff]  ;;  %v4403_v3 = vpack.c.bf16 %v162_v61, %v161_v60  ;;  %v38_v4 = vld [vmem:[%s5895_s0 + $0xd8] sm:$0xff]  ;;  %v43_v6 = vld [vmem:[%s5895_s0 + $0x100] sm:$0xff] }
  0x14   :  { %4042 = vmatmul.mubr.msk.f32.vlgmr.msra.gmra.mrb[4].mxu0 %vm203_vm0, %v20_v31  ;;  %v42_v5 = vld [vmem:[%s5895_s0 + $0xf8] sm:$0xff]  ;;  %v47_v7 = vld [vmem:[%s5895_s0 + $0x120] sm:$0xff]  ;;  %v164_v9 = vld [vmem:[%s5894_s1 + $0xc8] sm:$0xff] }
  0x15   :  { %4052 = vmatmul.mubr.msk.f32.vlgmr.msra.gmra.mrb[4].mxu1 %vm203_vm0, %v24_v34  ;;  %4366 = vmatpush3.bf16.xpose.msk.msra.mxu0 %vm4552_vm1, %v4361_v22  ;;  %v163_v8 = vld [vmem:[%s5894_s1 + $0xc0] sm:$0xff]  ;;  %v44_v10 = vld [vmem:[%s5895_s0 + $0x108] sm:$0xff]  ;;  %v165_v11 = vld [vmem:[%s5894_s1 + $0xd0] sm:$0xff] }
  0x16   :  { %4372 = vmatpush3.bf16.xpose.msk.msra.mxu1 %vm4552_vm1, %v4367_v24  ;;  %4044 = vmatprep.mubr.msk.f32.mxu0 %vm203_vm0, %v21_v35  ;;  %v166_v12 = vld [vmem:[%s5894_s1 + $0xd8] sm:$0xff]  ;;  %v48_v13 = vld [vmem:[%s5895_s0 + $0x128] sm:$0xff]  ;;  %v45_v14 = vld [vmem:[%s5895_s0 + $0x110] sm:$0xff]  ;;  %v4409_v15 = vpack.c.bf16 %v164_v9, %v163_v8 }
  0x17   :  { %4054 = vmatprep.mubr.msk.f32.mxu1 %vm203_vm0, %v25_v37  ;;  %4375 = vmatprep.subr.msk.bf16.mxu0 %vm4552_vm1, %v4373_v36  ;;  %v49_v16 = vld [vmem:[%s5895_s0 + $0x130] sm:$0xff]  ;;  %v4415_v17 = vpack.c.bf16 %v166_v12, %v165_v11  ;;  %v46_v18 = vld [vmem:[%s5895_s0 + $0x118] sm:$0xff]  ;;  %v51_v20 = vld [vmem:[%s5895_s0 + $0x140] sm:$0xff] }
  0x18   :  { %4045 = vmatmul.mubr.msk.f32.gmra.mrb[6].mxu0 %vm203_vm0, %v22_v39  ;;  %4381 = vmatprep.subr.msk.bf16.mxu1 %vm4552_vm1, %v4379_v38  ;;  %v50_v19 = vld [vmem:[%s5895_s0 + $0x138] sm:$0xff]  ;;  %v55_v21 = vld [vmem:[%s5895_s0 + $0x160] sm:$0xff]  ;;  %v168_v23 = vld [vmem:[%s5894_s1 + $0xe8] sm:$0xff] }
  0x19   :  { %4055 = vmatmul.mubr.msk.f32.gmra.mrb[6].mxu1 %vm203_vm0, %v26_v40  ;;  %4061 = vmatprep.mubr.msk.f32.mxu0 %vm203_vm0, %v27_v41  ;;  %v167_v22 = vld [vmem:[%s5894_s1 + $0xe0] sm:$0xff]  ;;  %v52_v24 = vld [vmem:[%s5895_s0 + $0x148] sm:$0xff]  ;;  %v169_v25 = vld [vmem:[%s5894_s1 + $0xf0] sm:$0xff] }
  0x1a   :  { %4071 = vmatprep.mubr.msk.f32.mxu1 %vm203_vm0, %v31_v42  ;;  %v170_v26 = vld [vmem:[%s5894_s1 + $0xf8] sm:$0xff]  ;;  %v56_v27 = vld [vmem:[%s5895_s0 + $0x168] sm:$0xff]  ;;  %v53_v28 = vld [vmem:[%s5895_s0 + $0x150] sm:$0xff]  ;;  %v4421_v29 = vpack.c.bf16 %v168_v23, %v167_v22 }
  0x1b   :  { %v57_v30 = vld [vmem:[%s5895_s0 + $0x170] sm:$0xff]  ;;  %v4427_v31 = vpack.c.bf16 %v170_v26, %v169_v25  ;;  %v54_v32 = vld [vmem:[%s5895_s0 + $0x158] sm:$0xff]  ;;  %v59_v34 = vld [vmem:[%s5895_s0 + $0x180] sm:$0xff] }
  0x1c   :  { %4062 = vmatmul.mubr.msk.f32.vlgmr.msra.gmra.mrb[8].mxu0 %vm203_vm0, %v28_v45  ;;  %v58_v33 = vld [vmem:[%s5895_s0 + $0x178] sm:$0xff]  ;;  %v63_v35 = vld [vmem:[%s5895_s0 + $0x1a0] sm:$0xff]  ;;  %v172_v37 = vld [vmem:[%s5894_s1 + $0x108] sm:$0xff] }
  0x1d   :  { %4072 = vmatmul.mubr.msk.f32.vlgmr.msra.gmra.mrb[8].mxu1 %vm203_vm0, %v32_v48  ;;  %4378 = vmatpush3.bf16.xpose.msk.msra.mxu0 %vm4552_vm1, %v4373_v36  ;;  %v171_v36 = vld [vmem:[%s5894_s1 + $0x100] sm:$0xff]  ;;  %v173_v39 = vld [vmem:[%s5894_s1 + $0x110] sm:$0xff]  ;;  %v174_v40 = vld [vmem:[%s5894_s1 + $0x118] sm:$0xff] }
  0x1e   :  { %4384 = vmatpush3.bf16.xpose.msk.msra.mxu1 %vm4552_vm1, %v4379_v38  ;;  %4064 = vmatprep.mubr.msk.f32.mxu0 %vm203_vm0, %v29_v49  ;;  %v60_v38 = vld [vmem:[%s5895_s0 + $0x188] sm:$0xff]  ;;  %v61_v42 = vld [vmem:[%s5895_s0 + $0x190] sm:$0xff]  ;;  %v4433_v43 = vpack.c.bf16 %v172_v37, %v171_v36  ;;  %v4439_v45 = vpack.c.bf16 %v174_v40, %v173_v39  ;;  %v62_v46 = vld [vmem:[%s5895_s0 + $0x198] sm:$0xff] }
  0x1f   :  { %4074 = vmatprep.mubr.msk.f32.mxu1 %vm203_vm0, %v33_v51  ;;  %4387 = vmatprep.subr.msk.bf16.mxu0 %vm4552_vm1, %v4385_v50  ;;  %v64_v41 = vld [vmem:[%s5895_s0 + $0x1a8] sm:$0xff]  ;;  %v65_v44 = vld [vmem:[%s5895_s0 + $0x1b0] sm:$0xff]  ;;  %v66_v47 = vld [vmem:[%s5895_s0 + $0x1b8] sm:$0xff] }
  0x20   :  { %4065 = vmatmul.mubr.msk.f32.gmra.mrb[10].mxu0 %vm203_vm0, %v30_v53  ;;  %4393 = vmatprep.subr.msk.bf16.mxu1 %vm4552_vm1, %v4391_v52  ;;  %v67_v48 = vld [vmem:[%s5895_s0 + $0x1c0] sm:$0xff]  ;;  %v176_v51 = vld [vmem:[%s5894_s1 + $0x128] sm:$0xff]  ;;  %v177_v53 = vld [vmem:[%s5894_s1 + $0x130] sm:$0xff] }
  0x21   :  { %4075 = vmatmul.mubr.msk.f32.gmra.mrb[10].mxu1 %vm203_vm0, %v34_v54  ;;  %4081 = vmatprep.mubr.msk.f32.mxu0 %vm203_vm0, %v35_v55  ;;  %v71_v49 = vld [vmem:[%s5895_s0 + $0x1e0] sm:$0xff]  ;;  %v178_v54 = vld [vmem:[%s5894_s1 + $0x138] sm:$0xff]  ;;  %v72_v55 = vld [vmem:[%s5895_s0 + $0x1e8] sm:$0xff] }
  0x22   :  { %4091 = vmatprep.mubr.msk.f32.mxu1 %vm203_vm0, %v39_v56  ;;  %v69_v56 = vld [vmem:[%s5895_s0 + $0x1d0] sm:$0xff]  ;;  %v70_v60 = vld [vmem:[%s5895_s0 + $0x1d8] sm:$0xff]  ;;  %v132_v2 = vld [vmem:[%s5895_s0 + $0x3c8] sm:$0xff] }
  0x23   :  { %v73_v58 = vld [vmem:[%s5895_s0 + $0x1f0] sm:$0xff]  ;;  %v74_v61 = vld [vmem:[%s5895_s0 + $0x1f8] sm:$0xff] }
  0x24   :  { %4082 = vmatmul.mubr.msk.f32.vlgmr.msra.gmra.mrb[12].mxu0 %vm203_vm0, %v36_v59  ;;  %v4451_v59 = vpack.c.bf16 %v178_v54, %v177_v53  ;;  %v81_v9 = vld [vmem:[%s5895_s0 + $0x230] sm:$0xff]  ;;  %v78_v11 = vld [vmem:[%s5895_s0 + $0x218] sm:$0xff] }
  0x25   :  { %4092 = vmatmul.mubr.msk.f32.vlgmr.msra.gmra.mrb[12].mxu1 %vm203_vm0, %v40_v62  ;;  %4390 = vmatpush3.bf16.xpose.msk.msra.mxu0 %vm4552_vm1, %v4385_v50  ;;  %v175_v50 = vld [vmem:[%s5894_s1 + $0x120] sm:$0xff]  ;;  %v82_v12 = vld [vmem:[%s5895_s0 + $0x238] sm:$0xff]  ;;  %v89_v23 = vld [vmem:[%s5895_s0 + $0x270] sm:$0xff] }
  0x26   :  { %4396 = vmatpush3.bf16.xpose.msk.msra.mxu1 %vm4552_vm1, %v4391_v52  ;;  %4084 = vmatprep.mubr.msk.f32.mxu0 %vm203_vm0, %v37_v63  ;;  %v68_v52 = vld [vmem:[%s5895_s0 + $0x1c8] sm:$0xff]  ;;  %v4445_v57 = vpack.c.bf16 %v176_v51, %v175_v50  ;;  %v75_v62 = vld [vmem:[%s5895_s0 + $0x200] sm:$0xff]  ;;  %v86_v25 = vld [vmem:[%s5895_s0 + $0x258] sm:$0xff] }
  0x27   :  { %4094 = vmatprep.mubr.msk.f32.mxu1 %vm203_vm0, %v41_v1  ;;  %4399 = vmatprep.subr.msk.bf16.mxu0 %vm4552_vm1, %v4397_v0  ;;  %v79_v63 = vld [vmem:[%s5895_s0 + $0x220] sm:$0xff]  ;;  %v180_v1 = vld [vmem:[%s5894_s1 + $0x148] sm:$0xff]  ;;  %v90_v26 = vld [vmem:[%s5895_s0 + $0x278] sm:$0xff] }
  0x28   :  { %4085 = vmatmul.mubr.msk.f32.gmra.mrb[14].mxu0 %vm203_vm0, %v38_v4  ;;  %4405 = vmatprep.subr.msk.bf16.mxu1 %vm4552_vm1, %v4403_v3  ;;  %v181_v4 = vld [vmem:[%s5894_s1 + $0x150] sm:$0xff]  ;;  %v94_v39 = vld [vmem:[%s5895_s0 + $0x298] sm:$0xff] }
  0x29   :  { %4095 = vmatmul.mubr.msk.f32.gmra.mrb[14].mxu1 %vm203_vm0, %v42_v5  ;;  %4101 = vmatprep.mubr.msk.f32.mxu0 %vm203_vm0, %v43_v6  ;;  %v182_v5 = vld [vmem:[%s5894_s1 + $0x158] sm:$0xff]  ;;  %v80_v6 = vld [vmem:[%s5895_s0 + $0x228] sm:$0xff]  ;;  %v97_v37 = vld [vmem:[%s5895_s0 + $0x2b0] sm:$0xff] }
  0x2a   :  { %4111 = vmatprep.mubr.msk.f32.mxu1 %vm203_vm0, %v47_v7  ;;  %v77_v7 = vld [vmem:[%s5895_s0 + $0x210] sm:$0xff]  ;;  %v98_v40 = vld [vmem:[%s5895_s0 + $0x2b8] sm:$0xff] }
  0x2b   :  { %v105_v51 = vld [vmem:[%s5895_s0 + $0x2f0] sm:$0xff]  ;;  %v102_v53 = vld [vmem:[%s5895_s0 + $0x2d8] sm:$0xff] }
  0x2c   :  { %4102 = vmatmul.mubr.msk.f32.vlgmr.msra.gmra.mrb[16].mxu0 %vm203_vm0, %v44_v10  ;;  %v4463_v10 = vpack.c.bf16 %v182_v5, %v181_v4  ;;  %v106_v54 = vld [vmem:[%s5895_s0 + $0x2f8] sm:$0xff] }
  0x2d   :  { %4112 = vmatmul.mubr.msk.f32.vlgmr.msra.gmra.mrb[16].mxu1 %vm203_vm0, %v48_v13  ;;  %4402 = vmatpush3.bf16.xpose.msk.msra.mxu0 %vm4552_vm1, %v4397_v0  ;;  %v179_v0 = vld [vmem:[%s5894_s1 + $0x140] sm:$0xff]  ;;  %v110_v4 = vld [vmem:[%s5895_s0 + $0x318] sm:$0xff] }
  0x2e   :  { %4408 = vmatpush3.bf16.xpose.msk.msra.mxu1 %vm4552_vm1, %v4403_v3  ;;  %4104 = vmatprep.mubr.msk.f32.mxu0 %vm203_vm0, %v45_v14  ;;  %v76_v3 = vld [vmem:[%s5895_s0 + $0x208] sm:$0xff]  ;;  %v4457_v8 = vpack.c.bf16 %v180_v1, %v179_v0  ;;  %v83_v13 = vld [vmem:[%s5895_s0 + $0x240] sm:$0xff]  ;;  %v113_v1 = vld [vmem:[%s5895_s0 + $0x330] sm:$0xff] }
  0x2f   :  { %4114 = vmatprep.mubr.msk.f32.mxu1 %vm203_vm0, %v49_v16  ;;  %4411 = vmatprep.subr.msk.bf16.mxu0 %vm4552_vm1, %v4409_v15  ;;  %v87_v14 = vld [vmem:[%s5895_s0 + $0x260] sm:$0xff]  ;;  %v184_v16 = vld [vmem:[%s5894_s1 + $0x168] sm:$0xff]  ;;  %v114_v5 = vld [vmem:[%s5895_s0 + $0x338] sm:$0xff] }
  0x30   :  { %4105 = vmatmul.mubr.msk.f32.gmra.mrb[18].mxu0 %vm203_vm0, %v46_v18  ;;  %4417 = vmatprep.subr.msk.bf16.mxu1 %vm4552_vm1, %v4415_v17  ;;  %v185_v18 = vld [vmem:[%s5894_s1 + $0x170] sm:$0xff] }
  0x31   :  { %4115 = vmatmul.mubr.msk.f32.gmra.mrb[18].mxu1 %vm203_vm0, %v50_v19  ;;  %4121 = vmatprep.mubr.msk.f32.mxu0 %vm203_vm0, %v51_v20  ;;  %v186_v19 = vld [vmem:[%s5894_s1 + $0x178] sm:$0xff]  ;;  %v88_v20 = vld [vmem:[%s5895_s0 + $0x268] sm:$0xff] }
  0x32   :  { %4131 = vmatprep.mubr.msk.f32.mxu1 %vm203_vm0, %v55_v21  ;;  %v85_v21 = vld [vmem:[%s5895_s0 + $0x250] sm:$0xff] }
  0x34   :  { %4122 = vmatmul.mubr.msk.f32.vlgmr.msra.gmra.mrb[20].mxu0 %vm203_vm0, %v52_v24  ;;  %v4475_v24 = vpack.c.bf16 %v186_v19, %v185_v18  ;;  %v118_v18 = vld [vmem:[%s5895_s0 + $0x358] sm:$0xff] }
  0x35   :  { %4132 = vmatmul.mubr.msk.f32.vlgmr.msra.gmra.mrb[20].mxu1 %vm203_vm0, %v56_v27  ;;  %4414 = vmatpush3.bf16.xpose.msk.msra.mxu0 %vm4552_vm1, %v4409_v15  ;;  %v183_v15 = vld [vmem:[%s5894_s1 + $0x160] sm:$0xff]  ;;  %v122_v19 = vld [vmem:[%s5895_s0 + $0x378] sm:$0xff] }
  0x36   :  { %4420 = vmatpush3.bf16.xpose.msk.msra.mxu1 %vm4552_vm1, %v4415_v17  ;;  %4124 = vmatprep.mubr.msk.f32.mxu0 %vm203_vm0, %v53_v28  ;;  %v84_v17 = vld [vmem:[%s5895_s0 + $0x248] sm:$0xff]  ;;  %v4469_v22 = vpack.c.bf16 %v184_v16, %v183_v15  ;;  %v91_v27 = vld [vmem:[%s5895_s0 + $0x280] sm:$0xff]  ;;  %v121_v16 = vld [vmem:[%s5895_s0 + $0x370] sm:$0xff] }
  0x37   :  { %4134 = vmatprep.mubr.msk.f32.mxu1 %vm203_vm0, %v57_v30  ;;  %4423 = vmatprep.subr.msk.bf16.mxu0 %vm4552_vm1, %v4421_v29  ;;  %v95_v28 = vld [vmem:[%s5895_s0 + $0x2a0] sm:$0xff]  ;;  %v188_v30 = vld [vmem:[%s5894_s1 + $0x188] sm:$0xff] }
  0x38   :  { %4125 = vmatmul.mubr.msk.f32.gmra.mrb[22].mxu0 %vm203_vm0, %v54_v32  ;;  %4429 = vmatprep.subr.msk.bf16.mxu1 %vm4552_vm1, %v4427_v31  ;;  %v189_v32 = vld [vmem:[%s5894_s1 + $0x190] sm:$0xff] }
  0x39   :  { %4135 = vmatmul.mubr.msk.f32.gmra.mrb[22].mxu1 %vm203_vm0, %v58_v33  ;;  %4141 = vmatprep.mubr.msk.f32.mxu0 %vm203_vm0, %v59_v34  ;;  %v190_v33 = vld [vmem:[%s5894_s1 + $0x198] sm:$0xff]  ;;  %v96_v34 = vld [vmem:[%s5895_s0 + $0x2a8] sm:$0xff] }
  0x3a   :  { %4151 = vmatprep.mubr.msk.f32.mxu1 %vm203_vm0, %v63_v35  ;;  %v93_v35 = vld [vmem:[%s5895_s0 + $0x290] sm:$0xff] }
  0x3c   :  { %4142 = vmatmul.mubr.msk.f32.vlgmr.msra.gmra.mrb[24].mxu0 %vm203_vm0, %v60_v38  ;;  %v4487_v38 = vpack.c.bf16 %v190_v33, %v189_v32  ;;  %v137_v32 = vld [vmem:[%s5895_s0 + $0x3f0] sm:$0xff]  ;;  %v134_v33 = vld [vmem:[%s5895_s0 + $0x3d8] sm:$0xff] }
  0x3d   :  { %4152 = vmatmul.mubr.msk.f32.vlgmr.msra.gmra.mrb[24].mxu1 %vm203_vm0, %v64_v41  ;;  %4426 = vmatpush3.bf16.xpose.msk.msra.mxu0 %vm4552_vm1, %v4421_v29  ;;  %v187_v29 = vld [vmem:[%s5894_s1 + $0x180] sm:$0xff] }
  0x3e   :  { %4432 = vmatpush3.bf16.xpose.msk.msra.mxu1 %vm4552_vm1, %v4427_v31  ;;  %4144 = vmatprep.mubr.msk.f32.mxu0 %vm203_vm0, %v61_v42  ;;  %v92_v31 = vld [vmem:[%s5895_s0 + $0x288] sm:$0xff]  ;;  %v4481_v36 = vpack.c.bf16 %v188_v30, %v187_v29  ;;  %v99_v41 = vld [vmem:[%s5895_s0 + $0x2c0] sm:$0xff] }
  0x3f   :  { %4154 = vmatprep.mubr.msk.f32.mxu1 %vm203_vm0, %v65_v44  ;;  %4435 = vmatprep.subr.msk.bf16.mxu0 %vm4552_vm1, %v4433_v43  ;;  %v103_v42 = vld [vmem:[%s5895_s0 + $0x2e0] sm:$0xff]  ;;  %v192_v44 = vld [vmem:[%s5894_s1 + $0x1a8] sm:$0xff] }
  0x40   :  { %4145 = vmatmul.mubr.msk.f32.gmra.mrb[26].mxu0 %vm203_vm0, %v62_v46  ;;  %4441 = vmatprep.subr.msk.bf16.mxu1 %vm4552_vm1, %v4439_v45  ;;  %v193_v46 = vld [vmem:[%s5894_s1 + $0x1b0] sm:$0xff]  ;;  %v135_v29 = vld [vmem:[%s5895_s0 + $0x3e0] sm:$0xff]  ;;  %v136_v30 = vld [vmem:[%s5895_s0 + $0x3e8] sm:$0xff] }
  0x41   :  { %4155 = vmatmul.mubr.msk.f32.gmra.mrb[26].mxu1 %vm203_vm0, %v66_v47  ;;  %4161 = vmatprep.mubr.msk.f32.mxu0 %vm203_vm0, %v67_v48  ;;  %v194_v47 = vld [vmem:[%s5894_s1 + $0x1b8] sm:$0xff]  ;;  %v104_v48 = vld [vmem:[%s5895_s0 + $0x2e8] sm:$0xff] }
  0x42   :  { %4171 = vmatprep.mubr.msk.f32.mxu1 %vm203_vm0, %v71_v49  ;;  %v101_v49 = vld [vmem:[%s5895_s0 + $0x2d0] sm:$0xff] }
  0x44   :  { %4162 = vmatmul.mubr.msk.f32.vlgmr.msra.gmra.mrb[28].mxu0 %vm203_vm0, %v68_v52  ;;  %v4499_v52 = vpack.c.bf16 %v194_v47, %v193_v46 }
  0x45   :  { %4172 = vmatmul.mubr.msk.f32.vlgmr.msra.gmra.mrb[28].mxu1 %vm203_vm0, %v72_v55  ;;  %4438 = vmatpush3.bf16.xpose.msk.msra.mxu0 %vm4552_vm1, %v4433_v43  ;;  %v191_v43 = vld [vmem:[%s5894_s1 + $0x1a0] sm:$0xff] }
  0x46   :  { %4444 = vmatpush3.bf16.xpose.msk.msra.mxu1 %vm4552_vm1, %v4439_v45  ;;  %4164 = vmatprep.mubr.msk.f32.mxu0 %vm203_vm0, %v69_v56  ;;  %v100_v45 = vld [vmem:[%s5895_s0 + $0x2c8] sm:$0xff]  ;;  %v4493_v50 = vpack.c.bf16 %v192_v44, %v191_v43  ;;  %v107_v55 = vld [vmem:[%s5895_s0 + $0x300] sm:$0xff] }
  0x47   :  { %4174 = vmatprep.mubr.msk.f32.mxu1 %vm203_vm0, %v73_v58  ;;  %4447 = vmatprep.subr.msk.bf16.mxu0 %vm4552_vm1, %v4445_v57  ;;  %v111_v56 = vld [vmem:[%s5895_s0 + $0x320] sm:$0xff]  ;;  %v196_v58 = vld [vmem:[%s5894_s1 + $0x1c8] sm:$0xff] }
  0x48   :  { %4165 = vmatmul.mubr.msk.f32.gmra.mrb[30].mxu0 %vm203_vm0, %v70_v60  ;;  %4453 = vmatprep.subr.msk.bf16.mxu1 %vm4552_vm1, %v4451_v59  ;;  %v197_v60 = vld [vmem:[%s5894_s1 + $0x1d0] sm:$0xff] }
  0x49   :  { %4175 = vmatmul.mubr.msk.f32.gmra.mrb[30].mxu1 %vm203_vm0, %v74_v61  ;;  %4181 = vmatprep.mubr.msk.f32.mxu0 %vm203_vm0, %v75_v62  ;;  %v198_v61 = vld [vmem:[%s5894_s1 + $0x1d8] sm:$0xff]  ;;  %v112_v62 = vld [vmem:[%s5895_s0 + $0x328] sm:$0xff] }
  0x4a   :  { %4191 = vmatprep.mubr.msk.f32.mxu1 %vm203_vm0, %v79_v63  ;;  %v109_v63 = vld [vmem:[%s5895_s0 + $0x310] sm:$0xff] }
  0x4c   :  { %4182 = vmatmul.mubr.msk.f32.vlgmr.msra.gmra.mrb[32].mxu0 %vm203_vm0, %v76_v3  ;;  %v4511_v3 = vpack.c.bf16 %v198_v61, %v197_v60 }
  0x4d   :  { %4192 = vmatmul.mubr.msk.f32.vlgmr.msra.gmra.mrb[32].mxu1 %vm203_vm0, %v80_v6  ;;  %4450 = vmatpush3.bf16.xpose.msk.msra.mxu0 %vm4552_vm1, %v4445_v57  ;;  %v195_v57 = vld [vmem:[%s5894_s1 + $0x1c0] sm:$0xff] }
  0x4e   :  { %4456 = vmatpush3.bf16.xpose.msk.msra.mxu1 %vm4552_vm1, %v4451_v59  ;;  %4184 = vmatprep.mubr.msk.f32.mxu0 %vm203_vm0, %v77_v7  ;;  %v108_v59 = vld [vmem:[%s5895_s0 + $0x308] sm:$0xff]  ;;  %v4505_v0 = vpack.c.bf16 %v196_v58, %v195_v57  ;;  %v115_v6 = vld [vmem:[%s5895_s0 + $0x340] sm:$0xff] }
  0x4f   :  { %4194 = vmatprep.mubr.msk.f32.mxu1 %vm203_vm0, %v81_v9  ;;  %4459 = vmatprep.subr.msk.bf16.mxu0 %vm4552_vm1, %v4457_v8  ;;  %v119_v7 = vld [vmem:[%s5895_s0 + $0x360] sm:$0xff]  ;;  %v200_v9 = vld [vmem:[%s5894_s1 + $0x1e8] sm:$0xff] }
  0x50   :  { %4185 = vmatmul.mubr.msk.f32.gmra.mrb[34].mxu0 %vm203_vm0, %v78_v11  ;;  %4465 = vmatprep.subr.msk.bf16.mxu1 %vm4552_vm1, %v4463_v10  ;;  %v201_v11 = vld [vmem:[%s5894_s1 + $0x1f0] sm:$0xff] }
  0x51   :  { %4195 = vmatmul.mubr.msk.f32.gmra.mrb[34].mxu1 %vm203_vm0, %v82_v12  ;;  %4201 = vmatprep.mubr.msk.f32.mxu0 %vm203_vm0, %v83_v13  ;;  %v202_v12 = vld [vmem:[%s5894_s1 + $0x1f8] sm:$0xff]  ;;  %v120_v13 = vld [vmem:[%s5895_s0 + $0x368] sm:$0xff] }
  0x52   :  { %4211 = vmatprep.mubr.msk.f32.mxu1 %vm203_vm0, %v87_v14  ;;  %v117_v14 = vld [vmem:[%s5895_s0 + $0x350] sm:$0xff] }
  0x54   :  { %4202 = vmatmul.mubr.msk.f32.vlgmr.msra.gmra.mrb[36].mxu0 %vm203_vm0, %v84_v17  ;;  %v4523_v17 = vpack.c.bf16 %v202_v12, %v201_v11 }
  0x55   :  { %4212 = vmatmul.mubr.msk.f32.vlgmr.msra.gmra.mrb[36].mxu1 %vm203_vm0, %v88_v20  ;;  %4462 = vmatpush3.bf16.xpose.msk.msra.mxu0 %vm4552_vm1, %v4457_v8  ;;  %v199_v8 = vld [vmem:[%s5894_s1 + $0x1e0] sm:$0xff] }
  0x56   :  { %4468 = vmatpush3.bf16.xpose.msk.msra.mxu1 %vm4552_vm1, %v4463_v10  ;;  %4204 = vmatprep.mubr.msk.f32.mxu0 %vm203_vm0, %v85_v21  ;;  %v116_v10 = vld [vmem:[%s5895_s0 + $0x348] sm:$0xff]  ;;  %v4517_v15 = vpack.c.bf16 %v200_v9, %v199_v8  ;;  %v123_v20 = vld [vmem:[%s5895_s0 + $0x380] sm:$0xff] }
  0x57   :  { %4214 = vmatprep.mubr.msk.f32.mxu1 %vm203_vm0, %v89_v23  ;;  %4471 = vmatprep.subr.msk.bf16.mxu0 %vm4552_vm1, %v4469_v22  ;;  %v127_v21 = vld [vmem:[%s5895_s0 + $0x3a0] sm:$0xff]  ;;  %v128_v23 = vld [vmem:[%s5895_s0 + $0x3a8] sm:$0xff] }
  0x58   :  { %4205 = vmatmul.mubr.msk.f32.gmra.mrb[38].mxu0 %vm203_vm0, %v86_v25  ;;  %4477 = vmatprep.subr.msk.bf16.mxu1 %vm4552_vm1, %v4475_v24  ;;  %v129_v25 = vld [vmem:[%s5895_s0 + $0x3b0] sm:$0xff] }
  0x59   :  { %4215 = vmatmul.mubr.msk.f32.gmra.mrb[38].mxu1 %vm203_vm0, %v90_v26  ;;  %4221 = vmatprep.mubr.msk.f32.mxu0 %vm203_vm0, %v91_v27  ;;  %v126_v26 = vld [vmem:[%s5895_s0 + $0x398] sm:$0xff] }
  0x5a   :  { %4231 = vmatprep.mubr.msk.f32.mxu1 %vm203_vm0, %v95_v28  ;;  %v130_v27 = vld [vmem:[%s5895_s0 + $0x3b8] sm:$0xff]  ;;  %v131_v28 = vld [vmem:[%s5895_s0 + $0x3c0] sm:$0xff] }
  0x5c   :  { %4222 = vmatmul.mubr.msk.f32.vlgmr.msra.gmra.mrb[40].mxu0 %vm203_vm0, %v92_v31  ;;  %v133_v31 = vld [vmem:[%s5895_s0 + $0x3d0] sm:$0xff] }
  0x5d   :  { %4232 = vmatmul.mubr.msk.f32.vlgmr.msra.gmra.mrb[40].mxu1 %vm203_vm0, %v96_v34  ;;  %4474 = vmatpush3.bf16.xpose.msk.msra.mxu0 %vm4552_vm1, %v4469_v22  ;;  %v124_v22 = vld [vmem:[%s5895_s0 + $0x388] sm:$0xff]  ;;  %v138_v34 = vld [vmem:[%s5895_s0 + $0x3f8] sm:$0xff] }
  0x5e   :  { %4480 = vmatpush3.bf16.xpose.msk.msra.mxu1 %vm4552_vm1, %v4475_v24  ;;  %4224 = vmatprep.mubr.msk.f32.mxu0 %vm203_vm0, %v93_v35  ;;  %v125_v24 = vld [vmem:[%s5895_s0 + $0x390] sm:$0xff] }
  0x5f   :  { %4234 = vmatprep.mubr.msk.f32.mxu1 %vm203_vm0, %v97_v37  ;;  %4483 = vmatprep.subr.msk.bf16.mxu0 %vm4552_vm1, %v4481_v36 }
  0x60   :  { %4225 = vmatmul.mubr.msk.f32.gmra.mrb[42].mxu0 %vm203_vm0, %v94_v39  ;;  %4489 = vmatprep.subr.msk.bf16.mxu1 %vm4552_vm1, %v4487_v38 }
  0x61   :  { %4235 = vmatmul.mubr.msk.f32.gmra.mrb[42].mxu1 %vm203_vm0, %v98_v40  ;;  %4241 = vmatprep.mubr.msk.f32.mxu0 %vm203_vm0, %v99_v41 }
  0x62   :  { %4251 = vmatprep.mubr.msk.f32.mxu1 %vm203_vm0, %v103_v42 }
  0x64   :  { %4242 = vmatmul.mubr.msk.f32.vlgmr.msra.gmra.mrb[44].mxu0 %vm203_vm0, %v100_v45 }
  0x65   :  { %4252 = vmatmul.mubr.msk.f32.vlgmr.msra.gmra.mrb[44].mxu1 %vm203_vm0, %v104_v48  ;;  %4486 = vmatpush3.bf16.xpose.msk.msra.mxu0 %vm4552_vm1, %v4481_v36 }
  0x66   :  { %4492 = vmatpush3.bf16.xpose.msk.msra.mxu1 %vm4552_vm1, %v4487_v38  ;;  %4244 = vmatprep.mubr.msk.f32.mxu0 %vm203_vm0, %v101_v49 }
  0x67   :  { %4254 = vmatprep.mubr.msk.f32.mxu1 %vm203_vm0, %v105_v51  ;;  %4495 = vmatprep.subr.msk.bf16.mxu0 %vm4552_vm1, %v4493_v50 }
  0x68   :  { %4245 = vmatmul.mubr.msk.f32.gmra.mrb[46].mxu0 %vm203_vm0, %v102_v53  ;;  %4501 = vmatprep.subr.msk.bf16.mxu1 %vm4552_vm1, %v4499_v52 }
  0x69   :  { %4255 = vmatmul.mubr.msk.f32.gmra.mrb[46].mxu1 %vm203_vm0, %v106_v54  ;;  %4261 = vmatprep.mubr.msk.f32.mxu0 %vm203_vm0, %v107_v55 }
  0x6a   :  { %4271 = vmatprep.mubr.msk.f32.mxu1 %vm203_vm0, %v111_v56 }
  0x6c   :  { %4262 = vmatmul.mubr.msk.f32.vlgmr.msra.gmra.mrb[48].mxu0 %vm203_vm0, %v108_v59 }
  0x6d   :  { %4272 = vmatmul.mubr.msk.f32.vlgmr.msra.gmra.mrb[48].mxu1 %vm203_vm0, %v112_v62  ;;  %4498 = vmatpush3.bf16.xpose.msk.msra.mxu0 %vm4552_vm1, %v4493_v50 }
  0x6e   :  { %4504 = vmatpush3.bf16.xpose.msk.msra.mxu1 %vm4552_vm1, %v4499_v52  ;;  %4264 = vmatprep.mubr.msk.f32.mxu0 %vm203_vm0, %v109_v63 }
  0x6f   :  { %4274 = vmatprep.mubr.msk.f32.mxu1 %vm203_vm0, %v113_v1  ;;  %4507 = vmatprep.subr.msk.bf16.mxu0 %vm4552_vm1, %v4505_v0 }
  0x70   :  { %4265 = vmatmul.mubr.msk.f32.gmra.mrb[50].mxu0 %vm203_vm0, %v110_v4  ;;  %4513 = vmatprep.subr.msk.bf16.mxu1 %vm4552_vm1, %v4511_v3 }
  0x71   :  { %4275 = vmatmul.mubr.msk.f32.gmra.mrb[50].mxu1 %vm203_vm0, %v114_v5  ;;  %4281 = vmatprep.mubr.msk.f32.mxu0 %vm203_vm0, %v115_v6 }
  0x72   :  { %4291 = vmatprep.mubr.msk.f32.mxu1 %vm203_vm0, %v119_v7 }
  0x74   :  { %4282 = vmatmul.mubr.msk.f32.vlgmr.msra.gmra.mrb[52].mxu0 %vm203_vm0, %v116_v10 }
  0x75   :  { %4292 = vmatmul.mubr.msk.f32.vlgmr.msra.gmra.mrb[52].mxu1 %vm203_vm0, %v120_v13  ;;  %4510 = vmatpush3.bf16.xpose.msk.msra.mxu0 %vm4552_vm1, %v4505_v0 }
  0x76   :  { %4516 = vmatpush3.bf16.xpose.msk.msra.mxu1 %vm4552_vm1, %v4511_v3  ;;  %4284 = vmatprep.mubr.msk.f32.mxu0 %vm203_vm0, %v117_v14 }
  0x77   :  { %4294 = vmatprep.mubr.msk.f32.mxu1 %vm203_vm0, %v121_v16  ;;  %4519 = vmatprep.subr.msk.bf16.mxu0 %vm4552_vm1, %v4517_v15 }
  0x78   :  { %4285 = vmatmul.mubr.msk.f32.gmra.mrb[54].mxu0 %vm203_vm0, %v118_v18  ;;  %4525 = vmatprep.subr.msk.bf16.mxu1 %vm4552_vm1, %v4523_v17 }
  0x79   :  { %4295 = vmatmul.mubr.msk.f32.gmra.mrb[54].mxu1 %vm203_vm0, %v122_v19  ;;  %4301 = vmatprep.mubr.msk.f32.mxu0 %vm203_vm0, %v123_v20 }
  0x7a   :  { %4311 = vmatprep.mubr.msk.f32.mxu1 %vm203_vm0, %v127_v21 }
  0x7c   :  { %4302 = vmatmul.mubr.msk.f32.vlgmr.msra.gmra.mrb[56].mxu0 %vm203_vm0, %v124_v22 }
  0x7d   :  { %4312 = vmatmul.mubr.msk.f32.vlgmr.msra.gmra.mrb[56].mxu1 %vm203_vm0, %v128_v23  ;;  %4522 = vmatpush3.bf16.xpose.msk.msra.mxu0 %vm4552_vm1, %v4517_v15 }
  0x7e   :  { %4528 = vmatpush3.bf16.xpose.msk.msra.mxu1 %vm4552_vm1, %v4523_v17  ;;  %4304 = vmatprep.mubr.msk.f32.mxu0 %vm203_vm0, %v125_v24 }
  0x7f   :  { %4314 = vmatprep.mubr.msk.f32.mxu1 %vm203_vm0, %v129_v25 }
  0x80   :  { %4305 = vmatmul.mubr.msk.f32.gmra.mrb[58].mxu0 %vm203_vm0, %v126_v26 }
  0x81   :  { %4315 = vmatmul.mubr.msk.f32.gmra.mrb[58].mxu1 %vm203_vm0, %v130_v27  ;;  %4321 = vmatprep.mubr.msk.f32.mxu0 %vm203_vm0, %v131_v28 }
  0x82   :  { %4331 = vmatprep.mubr.msk.f32.mxu1 %vm203_vm0, %v135_v29 }
  0x84   :  { %4322 = vmatmul.mubr.msk.f32.vlgmr.msra.gmra.mrb[60].mxu0 %vm203_vm0, %v132_v2 }
  0x85   :  { %4332 = vmatmul.mubr.msk.f32.vlgmr.msra.gmra.mrb[60].mxu1 %vm203_vm0, %v136_v30  ;;  %4324 = vmatprep.mubr.msk.f32.mxu0 %vm203_vm0, %v133_v31 }
  0x86   :  { %4334 = vmatprep.mubr.msk.f32.mxu1 %vm203_vm0, %v137_v32 }
  0x88   :  { %4325 = vmatmul.mubr.msk.f32.gmra.mrb[62].mxu0 %vm203_vm0, %v134_v33 }
  0x89   :  { %4335 = vmatmul.mubr.msk.f32.gmra.mrb[62].mxu1 %vm203_vm0, %v138_v34 }
  0xdf   :  { %v4023_v35 = vpop.f32.mrb[0].mxu0 }
  0xe0   :  { %3502 = vst.msk [vmem:[%s5896_s2 + $0x8] sm:$0xff] %vm3500_vm2, %v4023_v35  ;;  %v4033_v36 = vpop.f32.mrb[0].mxu1  ;;  %v288_v37 = vpop.f32.mrb[1].mxu0 }
  0xe1   :  { %3506 = vst.msk [vmem:[%s5896_s2 + $0x28] sm:$0xff] %vm3500_vm2, %v4033_v36  ;;  %3501 = vst.msk [vmem:[%s5896_s2] sm:$0xff] %vm3500_vm2, %v288_v37  ;;  %v391_v38 = vpop.f32.mrb[1].mxu1 }
  0xe2   :  { %3505 = vst.msk [vmem:[%s5896_s2 + $0x20] sm:$0xff] %vm3500_vm2, %v391_v38 }
  0xe3   :  { %v4026_v39 = vpop.f32.mrb[2].mxu0 }
  0xe4   :  { %3504 = vst.msk [vmem:[%s5896_s2 + $0x18] sm:$0xff] %vm3500_vm2, %v4026_v39  ;;  %v4036_v40 = vpop.f32.mrb[2].mxu1  ;;  %v298_v41 = vpop.f32.mrb[3].mxu0 }
  0xe5   :  { %3508 = vst.msk [vmem:[%s5896_s2 + $0x38] sm:$0xff] %vm3500_vm2, %v4036_v40  ;;  %3503 = vst.msk [vmem:[%s5896_s2 + $0x10] sm:$0xff] %vm3500_vm2, %v298_v41  ;;  %v401_v42 = vpop.f32.mrb[3].mxu1 }
  0xe6   :  { %3507 = vst.msk [vmem:[%s5896_s2 + $0x30] sm:$0xff] %vm3500_vm2, %v401_v42 }
  0xe7   :  { %v4043_v43 = vpop.f32.mrb[4].mxu0 }
  0xe8   :  { %3510 = vst.msk [vmem:[%s5896_s2 + $0x48] sm:$0xff] %vm3500_vm2, %v4043_v43  ;;  %v4053_v44 = vpop.f32.mrb[4].mxu1  ;;  %v494_v45 = vpop.f32.mrb[5].mxu0 }
  0xe9   :  { %3514 = vst.msk [vmem:[%s5896_s2 + $0x68] sm:$0xff] %vm3500_vm2, %v4053_v44  ;;  %3509 = vst.msk [vmem:[%s5896_s2 + $0x40] sm:$0xff] %vm3500_vm2, %v494_v45  ;;  %v597_v46 = vpop.f32.mrb[5].mxu1 }
  0xea   :  { %3513 = vst.msk [vmem:[%s5896_s2 + $0x60] sm:$0xff] %vm3500_vm2, %v597_v46 }
  0xeb   :  { %v4046_v47 = vpop.f32.mrb[6].mxu0 }
  0xec   :  { %3512 = vst.msk [vmem:[%s5896_s2 + $0x58] sm:$0xff] %vm3500_vm2, %v4046_v47  ;;  %v4056_v48 = vpop.f32.mrb[6].mxu1  ;;  %v504_v49 = vpop.f32.mrb[7].mxu0 }
  0xed   :  { %3516 = vst.msk [vmem:[%s5896_s2 + $0x78] sm:$0xff] %vm3500_vm2, %v4056_v48  ;;  %3511 = vst.msk [vmem:[%s5896_s2 + $0x50] sm:$0xff] %vm3500_vm2, %v504_v49  ;;  %v607_v50 = vpop.f32.mrb[7].mxu1 }
  0xee   :  { %3515 = vst.msk [vmem:[%s5896_s2 + $0x70] sm:$0xff] %vm3500_vm2, %v607_v50 }
  0xef   :  { %v4063_v51 = vpop.f32.mrb[8].mxu0 }
  0xf0   :  { %3518 = vst.msk [vmem:[%s5896_s2 + $0x88] sm:$0xff] %vm3500_vm2, %v4063_v51  ;;  %v4073_v52 = vpop.f32.mrb[8].mxu1  ;;  %v700_v53 = vpop.f32.mrb[9].mxu0 }
  0xf1   :  { %3522 = vst.msk [vmem:[%s5896_s2 + $0xa8] sm:$0xff] %vm3500_vm2, %v4073_v52  ;;  %3517 = vst.msk [vmem:[%s5896_s2 + $0x80] sm:$0xff] %vm3500_vm2, %v700_v53  ;;  %v803_v54 = vpop.f32.mrb[9].mxu1 }
  0xf2   :  { %3521 = vst.msk [vmem:[%s5896_s2 + $0xa0] sm:$0xff] %vm3500_vm2, %v803_v54 }
  0xf3   :  { %v4066_v55 = vpop.f32.mrb[10].mxu0 }
  0xf4   :  { %3520 = vst.msk [vmem:[%s5896_s2 + $0x98] sm:$0xff] %vm3500_vm2, %v4066_v55  ;;  %v4076_v56 = vpop.f32.mrb[10].mxu1  ;;  %v710_v57 = vpop.f32.mrb[11].mxu0 }
  0xf5   :  { %3524 = vst.msk [vmem:[%s5896_s2 + $0xb8] sm:$0xff] %vm3500_vm2, %v4076_v56  ;;  %3519 = vst.msk [vmem:[%s5896_s2 + $0x90] sm:$0xff] %vm3500_vm2, %v710_v57  ;;  %v813_v58 = vpop.f32.mrb[11].mxu1 }
  0xf6   :  { %3523 = vst.msk [vmem:[%s5896_s2 + $0xb0] sm:$0xff] %vm3500_vm2, %v813_v58 }
  0xf7   :  { %v4083_v59 = vpop.f32.mrb[12].mxu0 }
  0xf8   :  { %3526 = vst.msk [vmem:[%s5896_s2 + $0xc8] sm:$0xff] %vm3500_vm2, %v4083_v59  ;;  %v4093_v60 = vpop.f32.mrb[12].mxu1  ;;  %v906_v61 = vpop.f32.mrb[13].mxu0 }
  0xf9   :  { %3530 = vst.msk [vmem:[%s5896_s2 + $0xe8] sm:$0xff] %vm3500_vm2, %v4093_v60  ;;  %3525 = vst.msk [vmem:[%s5896_s2 + $0xc0] sm:$0xff] %vm3500_vm2, %v906_v61  ;;  %v1009_v62 = vpop.f32.mrb[13].mxu1 }
  0xfa   :  { %3529 = vst.msk [vmem:[%s5896_s2 + $0xe0] sm:$0xff] %vm3500_vm2, %v1009_v62 }
  0xfb   :  { %v4086_v63 = vpop.f32.mrb[14].mxu0 }
  0xfc   :  { %3528 = vst.msk [vmem:[%s5896_s2 + $0xd8] sm:$0xff] %vm3500_vm2, %v4086_v63  ;;  %v4096_v0 = vpop.f32.mrb[14].mxu1  ;;  %v916_v1 = vpop.f32.mrb[15].mxu0 }
  0xfd   :  { %3532 = vst.msk [vmem:[%s5896_s2 + $0xf8] sm:$0xff] %vm3500_vm2, %v4096_v0  ;;  %3527 = vst.msk [vmem:[%s5896_s2 + $0xd0] sm:$0xff] %vm3500_vm2, %v916_v1  ;;  %v1019_v3 = vpop.f32.mrb[15].mxu1 }
  0xfe   :  { %3531 = vst.msk [vmem:[%s5896_s2 + $0xf0] sm:$0xff] %vm3500_vm2, %v1019_v3 }
  0xff   :  { %v4103_v4 = vpop.f32.mrb[16].mxu0 }
 0x100   :  { %3534 = vst.msk [vmem:[%s5896_s2 + $0x108] sm:$0xff] %vm3500_vm2, %v4103_v4  ;;  %v4113_v5 = vpop.f32.mrb[16].mxu1  ;;  %v1112_v6 = vpop.f32.mrb[17].mxu0 }
 0x101   :  { %3538 = vst.msk [vmem:[%s5896_s2 + $0x128] sm:$0xff] %vm3500_vm2, %v4113_v5  ;;  %3533 = vst.msk [vmem:[%s5896_s2 + $0x100] sm:$0xff] %vm3500_vm2, %v1112_v6  ;;  %v1215_v7 = vpop.f32.mrb[17].mxu1 }
 0x102   :  { %3537 = vst.msk [vmem:[%s5896_s2 + $0x120] sm:$0xff] %vm3500_vm2, %v1215_v7 }
 0x103   :  { %v4106_v8 = vpop.f32.mrb[18].mxu0 }
 0x104   :  { %3536 = vst.msk [vmem:[%s5896_s2 + $0x118] sm:$0xff] %vm3500_vm2, %v4106_v8  ;;  %v4116_v9 = vpop.f32.mrb[18].mxu1  ;;  %v1122_v10 = vpop.f32.mrb[19].mxu0 }
 0x105   :  { %3540 = vst.msk [vmem:[%s5896_s2 + $0x138] sm:$0xff] %vm3500_vm2, %v4116_v9  ;;  %3535 = vst.msk [vmem:[%s5896_s2 + $0x110] sm:$0xff] %vm3500_vm2, %v1122_v10  ;;  %v1225_v11 = vpop.f32.mrb[19].mxu1 }
 0x106   :  { %3539 = vst.msk [vmem:[%s5896_s2 + $0x130] sm:$0xff] %vm3500_vm2, %v1225_v11 }
 0x107   :  { %v4123_v12 = vpop.f32.mrb[20].mxu0 }
 0x108   :  { %3542 = vst.msk [vmem:[%s5896_s2 + $0x148] sm:$0xff] %vm3500_vm2, %v4123_v12  ;;  %v4133_v13 = vpop.f32.mrb[20].mxu1  ;;  %v1318_v14 = vpop.f32.mrb[21].mxu0 }
 0x109   :  { %3546 = vst.msk [vmem:[%s5896_s2 + $0x168] sm:$0xff] %vm3500_vm2, %v4133_v13  ;;  %3541 = vst.msk [vmem:[%s5896_s2 + $0x140] sm:$0xff] %vm3500_vm2, %v1318_v14  ;;  %v1421_v15 = vpop.f32.mrb[21].mxu1 }
 0x10a   :  { %3545 = vst.msk [vmem:[%s5896_s2 + $0x160] sm:$0xff] %vm3500_vm2, %v1421_v15 }
 0x10b   :  { %v4126_v16 = vpop.f32.mrb[22].mxu0 }
 0x10c   :  { %3544 = vst.msk [vmem:[%s5896_s2 + $0x158] sm:$0xff] %vm3500_vm2, %v4126_v16  ;;  %v4136_v17 = vpop.f32.mrb[22].mxu1  ;;  %v1328_v18 = vpop.f32.mrb[23].mxu0 }
 0x10d   :  { %3548 = vst.msk [vmem:[%s5896_s2 + $0x178] sm:$0xff] %vm3500_vm2, %v4136_v17  ;;  %3543 = vst.msk [vmem:[%s5896_s2 + $0x150] sm:$0xff] %vm3500_vm2, %v1328_v18  ;;  %v1431_v19 = vpop.f32.mrb[23].mxu1 }
 0x10e   :  { %3547 = vst.msk [vmem:[%s5896_s2 + $0x170] sm:$0xff] %vm3500_vm2, %v1431_v19 }
 0x10f   :  { %v4143_v20 = vpop.f32.mrb[24].mxu0 }
 0x110   :  { %3550 = vst.msk [vmem:[%s5896_s2 + $0x188] sm:$0xff] %vm3500_vm2, %v4143_v20  ;;  %v4153_v21 = vpop.f32.mrb[24].mxu1  ;;  %v1524_v22 = vpop.f32.mrb[25].mxu0 }
 0x111   :  { %3554 = vst.msk [vmem:[%s5896_s2 + $0x1a8] sm:$0xff] %vm3500_vm2, %v4153_v21  ;;  %3549 = vst.msk [vmem:[%s5896_s2 + $0x180] sm:$0xff] %vm3500_vm2, %v1524_v22  ;;  %v1627_v23 = vpop.f32.mrb[25].mxu1 }
 0x112   :  { %3553 = vst.msk [vmem:[%s5896_s2 + $0x1a0] sm:$0xff] %vm3500_vm2, %v1627_v23 }
 0x113   :  { %v4146_v24 = vpop.f32.mrb[26].mxu0 }
 0x114   :  { %3552 = vst.msk [vmem:[%s5896_s2 + $0x198] sm:$0xff] %vm3500_vm2, %v4146_v24  ;;  %v4156_v25 = vpop.f32.mrb[26].mxu1  ;;  %v1534_v26 = vpop.f32.mrb[27].mxu0 }
 0x115   :  { %3556 = vst.msk [vmem:[%s5896_s2 + $0x1b8] sm:$0xff] %vm3500_vm2, %v4156_v25  ;;  %3551 = vst.msk [vmem:[%s5896_s2 + $0x190] sm:$0xff] %vm3500_vm2, %v1534_v26  ;;  %v1637_v27 = vpop.f32.mrb[27].mxu1 }
 0x116   :  { %3555 = vst.msk [vmem:[%s5896_s2 + $0x1b0] sm:$0xff] %vm3500_vm2, %v1637_v27 }
 0x117   :  { %v4163_v28 = vpop.f32.mrb[28].mxu0 }
 0x118   :  { %3558 = vst.msk [vmem:[%s5896_s2 + $0x1c8] sm:$0xff] %vm3500_vm2, %v4163_v28  ;;  %v4173_v29 = vpop.f32.mrb[28].mxu1  ;;  %v1730_v2 = vpop.f32.mrb[29].mxu0 }
 0x119   :  { %3562 = vst.msk [vmem:[%s5896_s2 + $0x1e8] sm:$0xff] %vm3500_vm2, %v4173_v29  ;;  %3557 = vst.msk [vmem:[%s5896_s2 + $0x1c0] sm:$0xff] %vm3500_vm2, %v1730_v2  ;;  %v1833_v30 = vpop.f32.mrb[29].mxu1 }
 0x11a   :  { %3561 = vst.msk [vmem:[%s5896_s2 + $0x1e0] sm:$0xff] %vm3500_vm2, %v1833_v30 }
 0x11b   :  { %v4166_v31 = vpop.f32.mrb[30].mxu0 }
 0x11c   :  { %3560 = vst.msk [vmem:[%s5896_s2 + $0x1d8] sm:$0xff] %vm3500_vm2, %v4166_v31  ;;  %v4176_v32 = vpop.f32.mrb[30].mxu1  ;;  %v1740_v33 = vpop.f32.mrb[31].mxu0 }
 0x11d   :  { %3564 = vst.msk [vmem:[%s5896_s2 + $0x1f8] sm:$0xff] %vm3500_vm2, %v4176_v32  ;;  %3559 = vst.msk [vmem:[%s5896_s2 + $0x1d0] sm:$0xff] %vm3500_vm2, %v1740_v33  ;;  %v1843_v34 = vpop.f32.mrb[31].mxu1 }
 0x11e   :  { %3563 = vst.msk [vmem:[%s5896_s2 + $0x1f0] sm:$0xff] %vm3500_vm2, %v1843_v34 }
 0x11f   :  { %v4183_v35 = vpop.f32.mrb[32].mxu0 }
 0x120   :  { %3566 = vst.msk [vmem:[%s5896_s2 + $0x208] sm:$0xff] %vm3500_vm2, %v4183_v35  ;;  %v4193_v36 = vpop.f32.mrb[32].mxu1  ;;  %v1936_v37 = vpop.f32.mrb[33].mxu0 }
 0x121   :  { %3570 = vst.msk [vmem:[%s5896_s2 + $0x228] sm:$0xff] %vm3500_vm2, %v4193_v36  ;;  %3565 = vst.msk [vmem:[%s5896_s2 + $0x200] sm:$0xff] %vm3500_vm2, %v1936_v37  ;;  %v2039_v38 = vpop.f32.mrb[33].mxu1 }
 0x122   :  { %3569 = vst.msk [vmem:[%s5896_s2 + $0x220] sm:$0xff] %vm3500_vm2, %v2039_v38 }
 0x123   :  { %v4186_v39 = vpop.f32.mrb[34].mxu0 }
 0x124   :  { %3568 = vst.msk [vmem:[%s5896_s2 + $0x218] sm:$0xff] %vm3500_vm2, %v4186_v39  ;;  %v4196_v40 = vpop.f32.mrb[34].mxu1  ;;  %v1946_v41 = vpop.f32.mrb[35].mxu0 }
 0x125   :  { %3572 = vst.msk [vmem:[%s5896_s2 + $0x238] sm:$0xff] %vm3500_vm2, %v4196_v40  ;;  %3567 = vst.msk [vmem:[%s5896_s2 + $0x210] sm:$0xff] %vm3500_vm2, %v1946_v41  ;;  %v2049_v42 = vpop.f32.mrb[35].mxu1 }
 0x126   :  { %3571 = vst.msk [vmem:[%s5896_s2 + $0x230] sm:$0xff] %vm3500_vm2, %v2049_v42 }
 0x127   :  { %v4203_v43 = vpop.f32.mrb[36].mxu0 }
 0x128   :  { %3574 = vst.msk [vmem:[%s5896_s2 + $0x248] sm:$0xff] %vm3500_vm2, %v4203_v43  ;;  %v4213_v44 = vpop.f32.mrb[36].mxu1  ;;  %v2142_v45 = vpop.f32.mrb[37].mxu0 }
 0x129   :  { %3578 = vst.msk [vmem:[%s5896_s2 + $0x268] sm:$0xff] %vm3500_vm2, %v4213_v44  ;;  %3573 = vst.msk [vmem:[%s5896_s2 + $0x240] sm:$0xff] %vm3500_vm2, %v2142_v45  ;;  %v2245_v46 = vpop.f32.mrb[37].mxu1 }
 0x12a   :  { %3577 = vst.msk [vmem:[%s5896_s2 + $0x260] sm:$0xff] %vm3500_vm2, %v2245_v46 }
 0x12b   :  { %v4206_v47 = vpop.f32.mrb[38].mxu0 }
 0x12c   :  { %3576 = vst.msk [vmem:[%s5896_s2 + $0x258] sm:$0xff] %vm3500_vm2, %v4206_v47  ;;  %v4216_v48 = vpop.f32.mrb[38].mxu1  ;;  %v2152_v49 = vpop.f32.mrb[39].mxu0 }
 0x12d   :  { %3580 = vst.msk [vmem:[%s5896_s2 + $0x278] sm:$0xff] %vm3500_vm2, %v4216_v48  ;;  %3575 = vst.msk [vmem:[%s5896_s2 + $0x250] sm:$0xff] %vm3500_vm2, %v2152_v49  ;;  %v2255_v50 = vpop.f32.mrb[39].mxu1 }
 0x12e   :  { %3579 = vst.msk [vmem:[%s5896_s2 + $0x270] sm:$0xff] %vm3500_vm2, %v2255_v50 }
 0x12f   :  { %v4223_v51 = vpop.f32.mrb[40].mxu0 }
 0x130   :  { %3582 = vst.msk [vmem:[%s5896_s2 + $0x288] sm:$0xff] %vm3500_vm2, %v4223_v51  ;;  %v4233_v52 = vpop.f32.mrb[40].mxu1  ;;  %v2348_v53 = vpop.f32.mrb[41].mxu0 }
 0x131   :  { %3586 = vst.msk [vmem:[%s5896_s2 + $0x2a8] sm:$0xff] %vm3500_vm2, %v4233_v52  ;;  %3581 = vst.msk [vmem:[%s5896_s2 + $0x280] sm:$0xff] %vm3500_vm2, %v2348_v53  ;;  %v2451_v54 = vpop.f32.mrb[41].mxu1 }
 0x132   :  { %3585 = vst.msk [vmem:[%s5896_s2 + $0x2a0] sm:$0xff] %vm3500_vm2, %v2451_v54 }
 0x133   :  { %v4226_v55 = vpop.f32.mrb[42].mxu0 }
 0x134   :  { %3584 = vst.msk [vmem:[%s5896_s2 + $0x298] sm:$0xff] %vm3500_vm2, %v4226_v55  ;;  %v4236_v56 = vpop.f32.mrb[42].mxu1  ;;  %v2358_v57 = vpop.f32.mrb[43].mxu0 }
 0x135   :  { %3588 = vst.msk [vmem:[%s5896_s2 + $0x2b8] sm:$0xff] %vm3500_vm2, %v4236_v56  ;;  %3583 = vst.msk [vmem:[%s5896_s2 + $0x290] sm:$0xff] %vm3500_vm2, %v2358_v57  ;;  %v2461_v58 = vpop.f32.mrb[43].mxu1 }
 0x136   :  { %3587 = vst.msk [vmem:[%s5896_s2 + $0x2b0] sm:$0xff] %vm3500_vm2, %v2461_v58 }
 0x137   :  { %v4243_v59 = vpop.f32.mrb[44].mxu0 }
 0x138   :  { %3590 = vst.msk [vmem:[%s5896_s2 + $0x2c8] sm:$0xff] %vm3500_vm2, %v4243_v59  ;;  %v4253_v60 = vpop.f32.mrb[44].mxu1  ;;  %v2554_v61 = vpop.f32.mrb[45].mxu0 }
 0x139   :  { %3594 = vst.msk [vmem:[%s5896_s2 + $0x2e8] sm:$0xff] %vm3500_vm2, %v4253_v60  ;;  %3589 = vst.msk [vmem:[%s5896_s2 + $0x2c0] sm:$0xff] %vm3500_vm2, %v2554_v61  ;;  %v2657_v62 = vpop.f32.mrb[45].mxu1 }
 0x13a   :  { %3593 = vst.msk [vmem:[%s5896_s2 + $0x2e0] sm:$0xff] %vm3500_vm2, %v2657_v62 }
 0x13b   :  { %v4246_v63 = vpop.f32.mrb[46].mxu0 }
 0x13c   :  { %3592 = vst.msk [vmem:[%s5896_s2 + $0x2d8] sm:$0xff] %vm3500_vm2, %v4246_v63  ;;  %v4256_v0 = vpop.f32.mrb[46].mxu1  ;;  %v2564_v1 = vpop.f32.mrb[47].mxu0 }
 0x13d   :  { %3596 = vst.msk [vmem:[%s5896_s2 + $0x2f8] sm:$0xff] %vm3500_vm2, %v4256_v0  ;;  %3591 = vst.msk [vmem:[%s5896_s2 + $0x2d0] sm:$0xff] %vm3500_vm2, %v2564_v1  ;;  %v2667_v3 = vpop.f32.mrb[47].mxu1 }
 0x13e   :  { %3595 = vst.msk [vmem:[%s5896_s2 + $0x2f0] sm:$0xff] %vm3500_vm2, %v2667_v3 }
 0x13f   :  { %v4263_v4 = vpop.f32.mrb[48].mxu0 }
 0x140   :  { %3598 = vst.msk [vmem:[%s5896_s2 + $0x308] sm:$0xff] %vm3500_vm2, %v4263_v4  ;;  %v4273_v5 = vpop.f32.mrb[48].mxu1  ;;  %v2760_v6 = vpop.f32.mrb[49].mxu0 }
 0x141   :  { %3602 = vst.msk [vmem:[%s5896_s2 + $0x328] sm:$0xff] %vm3500_vm2, %v4273_v5  ;;  %3597 = vst.msk [vmem:[%s5896_s2 + $0x300] sm:$0xff] %vm3500_vm2, %v2760_v6  ;;  %v2863_v7 = vpop.f32.mrb[49].mxu1 }
 0x142   :  { %3601 = vst.msk [vmem:[%s5896_s2 + $0x320] sm:$0xff] %vm3500_vm2, %v2863_v7 }
 0x143   :  { %v4266_v8 = vpop.f32.mrb[50].mxu0 }
 0x144   :  { %3600 = vst.msk [vmem:[%s5896_s2 + $0x318] sm:$0xff] %vm3500_vm2, %v4266_v8  ;;  %v4276_v9 = vpop.f32.mrb[50].mxu1  ;;  %v2770_v10 = vpop.f32.mrb[51].mxu0 }
 0x145   :  { %3604 = vst.msk [vmem:[%s5896_s2 + $0x338] sm:$0xff] %vm3500_vm2, %v4276_v9  ;;  %3599 = vst.msk [vmem:[%s5896_s2 + $0x310] sm:$0xff] %vm3500_vm2, %v2770_v10  ;;  %v2873_v11 = vpop.f32.mrb[51].mxu1 }
 0x146   :  { %3603 = vst.msk [vmem:[%s5896_s2 + $0x330] sm:$0xff] %vm3500_vm2, %v2873_v11 }
 0x147   :  { %v4283_v12 = vpop.f32.mrb[52].mxu0 }
 0x148   :  { %3606 = vst.msk [vmem:[%s5896_s2 + $0x348] sm:$0xff] %vm3500_vm2, %v4283_v12  ;;  %v4293_v13 = vpop.f32.mrb[52].mxu1  ;;  %v2966_v14 = vpop.f32.mrb[53].mxu0 }
 0x149   :  { %3610 = vst.msk [vmem:[%s5896_s2 + $0x368] sm:$0xff] %vm3500_vm2, %v4293_v13  ;;  %3605 = vst.msk [vmem:[%s5896_s2 + $0x340] sm:$0xff] %vm3500_vm2, %v2966_v14  ;;  %v3069_v15 = vpop.f32.mrb[53].mxu1 }
 0x14a   :  { %3609 = vst.msk [vmem:[%s5896_s2 + $0x360] sm:$0xff] %vm3500_vm2, %v3069_v15 }
 0x14b   :  { %v4286_v16 = vpop.f32.mrb[54].mxu0 }
 0x14c   :  { %3608 = vst.msk [vmem:[%s5896_s2 + $0x358] sm:$0xff] %vm3500_vm2, %v4286_v16  ;;  %v4296_v17 = vpop.f32.mrb[54].mxu1  ;;  %v2976_v18 = vpop.f32.mrb[55].mxu0 }
 0x14d   :  { %3612 = vst.msk [vmem:[%s5896_s2 + $0x378] sm:$0xff] %vm3500_vm2, %v4296_v17  ;;  %3607 = vst.msk [vmem:[%s5896_s2 + $0x350] sm:$0xff] %vm3500_vm2, %v2976_v18  ;;  %v3079_v19 = vpop.f32.mrb[55].mxu1 }
 0x14e   :  { %3611 = vst.msk [vmem:[%s5896_s2 + $0x370] sm:$0xff] %vm3500_vm2, %v3079_v19 }
 0x14f   :  { %v4303_v20 = vpop.f32.mrb[56].mxu0 }
 0x150   :  { %3614 = vst.msk [vmem:[%s5896_s2 + $0x388] sm:$0xff] %vm3500_vm2, %v4303_v20  ;;  %v4313_v21 = vpop.f32.mrb[56].mxu1  ;;  %v3172_v22 = vpop.f32.mrb[57].mxu0 }
 0x151   :  { %3618 = vst.msk [vmem:[%s5896_s2 + $0x3a8] sm:$0xff] %vm3500_vm2, %v4313_v21  ;;  %3613 = vst.msk [vmem:[%s5896_s2 + $0x380] sm:$0xff] %vm3500_vm2, %v3172_v22  ;;  %v3275_v23 = vpop.f32.mrb[57].mxu1 }
 0x152   :  { %3617 = vst.msk [vmem:[%s5896_s2 + $0x3a0] sm:$0xff] %vm3500_vm2, %v3275_v23 }
 0x153   :  { %v4306_v24 = vpop.f32.mrb[58].mxu0 }
 0x154   :  { %3616 = vst.msk [vmem:[%s5896_s2 + $0x398] sm:$0xff] %vm3500_vm2, %v4306_v24  ;;  %v4316_v25 = vpop.f32.mrb[58].mxu1  ;;  %v3182_v26 = vpop.f32.mrb[59].mxu0 }
 0x155   :  { %3620 = vst.msk [vmem:[%s5896_s2 + $0x3b8] sm:$0xff] %vm3500_vm2, %v4316_v25  ;;  %3615 = vst.msk [vmem:[%s5896_s2 + $0x390] sm:$0xff] %vm3500_vm2, %v3182_v26  ;;  %v3285_v27 = vpop.f32.mrb[59].mxu1 }
 0x156   :  { %3619 = vst.msk [vmem:[%s5896_s2 + $0x3b0] sm:$0xff] %vm3500_vm2, %v3285_v27 }
 0x157   :  { %v4323_v28 = vpop.f32.mrb[60].mxu0 }
 0x158   :  { %3622 = vst.msk [vmem:[%s5896_s2 + $0x3c8] sm:$0xff] %vm3500_vm2, %v4323_v28  ;;  %v4333_v29 = vpop.f32.mrb[60].mxu1  ;;  %v3378_v2 = vpop.f32.mrb[61].mxu0 }
 0x159   :  { %3626 = vst.msk [vmem:[%s5896_s2 + $0x3e8] sm:$0xff] %vm3500_vm2, %v4333_v29  ;;  %3621 = vst.msk [vmem:[%s5896_s2 + $0x3c0] sm:$0xff] %vm3500_vm2, %v3378_v2  ;;  %v3481_v30 = vpop.f32.mrb[61].mxu1 }
 0x15a   :  { %3625 = vst.msk [vmem:[%s5896_s2 + $0x3e0] sm:$0xff] %vm3500_vm2, %v3481_v30 }
 0x15b   :  { %v4326_v31 = vpop.f32.mrb[62].mxu0 }
 0x15c   :  { %3624 = vst.msk [vmem:[%s5896_s2 + $0x3d8] sm:$0xff] %vm3500_vm2, %v4326_v31  ;;  %v4336_v32 = vpop.f32.mrb[62].mxu1  ;;  %v3388_v33 = vpop.f32.mrb[63].mxu0 }
 0x15d   :  { %3628 = vst.msk [vmem:[%s5896_s2 + $0x3f8] sm:$0xff] %vm3500_vm2, %v4336_v32  ;;  %3623 = vst.msk [vmem:[%s5896_s2 + $0x3d0] sm:$0xff] %vm3500_vm2, %v3388_v33  ;;  %v3491_v34 = vpop.f32.mrb[63].mxu1 }
 0x15e   :  { %3627 = vst.msk [vmem:[%s5896_s2 + $0x3f0] sm:$0xff] %vm3500_vm2, %v3491_v34 }

// kernel: stab_forward.3
= control target key start
LH: loop header
LB: loop body
LE: loop exit
PB: predicated region body
PF: predicated region fallthrough
CT: control target
= control target key end

     0   :  { %vm209_vm0 = vcmask 261120   ;;  %vm2866_vm1 = vcmask 72704   ;;  %vm4084_vm2 = vcmask 130048   ;;  %vm3923_vm3 = vcmask 65536   ;;  %s11999_s2 = inlined_call_operand.vmem [shape: f32[32,32,9], index: 2, kind: input, shape index: {}]   ;;  %s12000_s0 = inlined_call_operand.vmem [shape: f32[32,16,32], index: 0, kind: input, shape index: {}]   ;;  %s12001_s1 = inlined_call_operand.vmem [shape: f32[32,32,16], index: 1, kind: input, shape index: {}]   ;;  %s12002_s3 = inlined_call_operand.vmem [shape: f32[32,16,9], index: 3, kind: output, shape index: {0}]   ;;  %s12003_s4 = inlined_call_operand.vmem [shape: f32[32,1,9], index: 4, kind: output, shape index: {1}]   ;;  %s12004_s5 = inlined_call_operand.vmem [shape: f32[32,32,9], index: 5, kind: output, shape index: {2}]  }
   0x1   :  { %v81_v0 = vld [vmem:[%s11999_s2] sm:$0xff]  ;;  %v82_v1 = vld [vmem:[%s11999_s2 + $0x8] sm:$0xff]  ;;  %v83_v5 = vld [vmem:[%s11999_s2 + $0x10] sm:$0xff] }
   0x2   :  { %v85_v2 = vld [vmem:[%s11999_s2 + $0x20] sm:$0xff]  ;;  %v8577_v3 = vpack.c.bf16 %v82_v1, %v81_v0  ;;  %v86_v4 = vld [vmem:[%s11999_s2 + $0x28] sm:$0xff]  ;;  %v84_v6 = vld [vmem:[%s11999_s2 + $0x18] sm:$0xff] }
   0x3   :  { %v8585_v7 = vpack.c.bf16 %v86_v4, %v85_v2  ;;  %v8581_v8 = vpack.c.bf16 %v84_v6, %v83_v5  ;;  %v87_v9 = vld [vmem:[%s11999_s2 + $0x30] sm:$0xff]  ;;  %v88_v10 = vld [vmem:[%s11999_s2 + $0x38] sm:$0xff]  ;;  %v17_v11 = vld [vmem:[%s12000_s0] sm:$0xff] }
   0x4   :  { %8578 = vmatprep.subr.bf16.mxu0 %v8577_v3  ;;  %v8589_v12 = vpack.c.bf16 %v88_v10, %v87_v9  ;;  %7913 = vmatprep.mubr.msk.f32.mxu0 %vm209_vm0, %v17_v11  ;;  %v19_v13 = vld [vmem:[%s12000_s0 + $0x10] sm:$0xff]  ;;  %v89_v14 = vld [vmem:[%s11999_s2 + $0x40] sm:$0xff]  ;;  %v90_v15 = vld [vmem:[%s11999_s2 + $0x48] sm:$0xff] }
   0x5   :  { %8586 = vmatprep.subr.bf16.mxu1 %v8585_v7  ;;  %8580 = vmatpush3.bf16.msra.mxu0 %v8577_v3  ;;  %v8593_v16 = vpack.c.bf16 %v90_v15, %v89_v14  ;;  %v93_v17 = vld [vmem:[%s11999_s2 + $0x60] sm:$0xff]  ;;  %v94_v18 = vld [vmem:[%s11999_s2 + $0x68] sm:$0xff]  ;;  %v91_v19 = vld [vmem:[%s11999_s2 + $0x50] sm:$0xff] }
   0x6   :  { %8588 = vmatpush3.bf16.msra.mxu1 %v8585_v7  ;;  %8582 = vmatprep.subr.bf16.mxu0 %v8581_v8  ;;  %v92_v20 = vld [vmem:[%s11999_s2 + $0x58] sm:$0xff]  ;;  %v8601_v21 = vpack.c.bf16 %v94_v18, %v93_v17  ;;  %v95_v22 = vld [vmem:[%s11999_s2 + $0x70] sm:$0xff]  ;;  %v18_v24 = vld [vmem:[%s12000_s0 + $0x8] sm:$0xff] }
   0x7   :  { %8590 = vmatprep.subr.bf16.mxu1 %v8589_v12  ;;  %7924 = vmatprep.mubr.msk.f32.mxu1 %vm209_vm0, %v19_v13  ;;  %v96_v23 = vld [vmem:[%s11999_s2 + $0x78] sm:$0xff]  ;;  %v8597_v26 = vpack.c.bf16 %v92_v20, %v91_v19  ;;  %v97_v28 = vld [vmem:[%s11999_s2 + $0x80] sm:$0xff]  ;;  %v98_v29 = vld [vmem:[%s11999_s2 + $0x88] sm:$0xff] }
   0x8   :  { %v20_v25 = vld [vmem:[%s12000_s0 + $0x18] sm:$0xff]  ;;  %v8605_v27 = vpack.c.bf16 %v96_v23, %v95_v22  ;;  %v21_v30 = vld [vmem:[%s12000_s0 + $0x20] sm:$0xff]  ;;  %v102_v32 = vld [vmem:[%s11999_s2 + $0xa8] sm:$0xff]  ;;  %v8609_v34 = vpack.c.bf16 %v98_v29, %v97_v28 }
   0x9   :  { %8584 = vmatpush3.bf16.msra.mxu0 %v8581_v8  ;;  %v101_v31 = vld [vmem:[%s11999_s2 + $0xa0] sm:$0xff]  ;;  %v23_v33 = vld [vmem:[%s12000_s0 + $0x30] sm:$0xff]  ;;  %v100_v36 = vld [vmem:[%s11999_s2 + $0x98] sm:$0xff] }
   0xa   :  { %8592 = vmatpush3.bf16.msra.mxu1 %v8589_v12  ;;  %8594 = vmatprep.subr.bf16.mxu0 %v8593_v16  ;;  %v99_v35 = vld [vmem:[%s11999_s2 + $0x90] sm:$0xff]  ;;  %v8617_v37 = vpack.c.bf16 %v102_v32, %v101_v31  ;;  %v104_v39 = vld [vmem:[%s11999_s2 + $0xb8] sm:$0xff]  ;;  %v22_v40 = vld [vmem:[%s12000_s0 + $0x28] sm:$0xff] }
   0xb   :  { %8602 = vmatprep.subr.bf16.mxu1 %v8601_v21  ;;  %v103_v38 = vld [vmem:[%s11999_s2 + $0xb0] sm:$0xff]  ;;  %v24_v41 = vld [vmem:[%s12000_s0 + $0x38] sm:$0xff]  ;;  %v8613_v42 = vpack.c.bf16 %v100_v36, %v99_v35  ;;  %v105_v44 = vld [vmem:[%s11999_s2 + $0xc0] sm:$0xff] }
   0xc   :  { %7914 = vmatmul.mubr.msk.f32.vlgmr.msra.gmra.mrb[0].mxu0 %vm209_vm0, %v18_v24  ;;  %v8621_v43 = vpack.c.bf16 %v104_v39, %v103_v38  ;;  %v106_v45 = vld [vmem:[%s11999_s2 + $0xc8] sm:$0xff]  ;;  %v25_v46 = vld [vmem:[%s12000_s0 + $0x40] sm:$0xff]  ;;  %v27_v49 = vld [vmem:[%s12000_s0 + $0x50] sm:$0xff] }
   0xd   :  { %7925 = vmatmul.mubr.msk.f32.vlgmr.msra.gmra.mrb[0].mxu1 %vm209_vm0, %v20_v25  ;;  %8596 = vmatpush3.bf16.msra.mxu0 %v8593_v16  ;;  %v109_v47 = vld [vmem:[%s11999_s2 + $0xe0] sm:$0xff]  ;;  %v110_v48 = vld [vmem:[%s11999_s2 + $0xe8] sm:$0xff]  ;;  %v8625_v50 = vpack.c.bf16 %v106_v45, %v105_v44  ;;  %v107_v51 = vld [vmem:[%s11999_s2 + $0xd0] sm:$0xff] }
   0xe   :  { %8598 = vmatprep.subr.bf16.mxu0 %v8597_v26  ;;  %8604 = vmatpush3.bf16.msra.mxu1 %v8601_v21  ;;  %v108_v52 = vld [vmem:[%s11999_s2 + $0xd8] sm:$0xff]  ;;  %v8633_v53 = vpack.c.bf16 %v110_v48, %v109_v47  ;;  %v111_v54 = vld [vmem:[%s11999_s2 + $0xf0] sm:$0xff]  ;;  %v26_v56 = vld [vmem:[%s12000_s0 + $0x48] sm:$0xff] }
   0xf   :  { %7935 = vmatprep.mubr.msk.f32.mxu0 %vm209_vm0, %v21_v30  ;;  %8606 = vmatprep.subr.bf16.mxu1 %v8605_v27  ;;  %v112_v55 = vld [vmem:[%s11999_s2 + $0xf8] sm:$0xff]  ;;  %v8629_v58 = vpack.c.bf16 %v108_v52, %v107_v51  ;;  %v113_v60 = vld [vmem:[%s11999_s2 + $0x100] sm:$0xff]  ;;  %v114_v61 = vld [vmem:[%s11999_s2 + $0x108] sm:$0xff] }
  0x10   :  { %7946 = vmatprep.mubr.msk.f32.mxu1 %vm209_vm0, %v23_v33  ;;  %v28_v57 = vld [vmem:[%s12000_s0 + $0x58] sm:$0xff]  ;;  %v8637_v59 = vpack.c.bf16 %v112_v55, %v111_v54  ;;  %v29_v62 = vld [vmem:[%s12000_s0 + $0x60] sm:$0xff]  ;;  %v118_v0 = vld [vmem:[%s11999_s2 + $0x128] sm:$0xff]  ;;  %v8641_v2 = vpack.c.bf16 %v114_v61, %v113_v60 }
  0x11   :  { %8600 = vmatpush3.bf16.msra.mxu0 %v8597_v26  ;;  %v117_v63 = vld [vmem:[%s11999_s2 + $0x120] sm:$0xff]  ;;  %v31_v1 = vld [vmem:[%s12000_s0 + $0x70] sm:$0xff]  ;;  %v116_v4 = vld [vmem:[%s11999_s2 + $0x118] sm:$0xff] }
  0x12   :  { %8610 = vmatprep.subr.bf16.mxu0 %v8609_v34  ;;  %8608 = vmatpush3.bf16.msra.mxu1 %v8605_v27  ;;  %v115_v3 = vld [vmem:[%s11999_s2 + $0x110] sm:$0xff]  ;;  %v8649_v5 = vpack.c.bf16 %v118_v0, %v117_v63  ;;  %v120_v7 = vld [vmem:[%s11999_s2 + $0x138] sm:$0xff]  ;;  %v30_v8 = vld [vmem:[%s12000_s0 + $0x68] sm:$0xff] }
  0x13   :  { %8618 = vmatprep.subr.bf16.mxu1 %v8617_v37  ;;  %v119_v6 = vld [vmem:[%s11999_s2 + $0x130] sm:$0xff]  ;;  %v32_v9 = vld [vmem:[%s12000_s0 + $0x78] sm:$0xff]  ;;  %v8645_v10 = vpack.c.bf16 %v116_v4, %v115_v3  ;;  %v121_v12 = vld [vmem:[%s11999_s2 + $0x140] sm:$0xff] }
  0x14   :  { %7936 = vmatmul.mubr.msk.f32.vlgmr.msra.gmra.mrb[2].mxu0 %vm209_vm0, %v22_v40  ;;  %v8653_v11 = vpack.c.bf16 %v120_v7, %v119_v6  ;;  %v122_v13 = vld [vmem:[%s11999_s2 + $0x148] sm:$0xff]  ;;  %v33_v14 = vld [vmem:[%s12000_s0 + $0x80] sm:$0xff]  ;;  %v35_v17 = vld [vmem:[%s12000_s0 + $0x90] sm:$0xff] }
  0x15   :  { %8612 = vmatpush3.bf16.msra.mxu0 %v8609_v34  ;;  %7947 = vmatmul.mubr.msk.f32.vlgmr.msra.gmra.mrb[2].mxu1 %vm209_vm0, %v24_v41  ;;  %v125_v15 = vld [vmem:[%s11999_s2 + $0x160] sm:$0xff]  ;;  %v126_v16 = vld [vmem:[%s11999_s2 + $0x168] sm:$0xff]  ;;  %v8657_v18 = vpack.c.bf16 %v122_v13, %v121_v12  ;;  %v123_v19 = vld [vmem:[%s11999_s2 + $0x150] sm:$0xff] }
  0x16   :  { %8614 = vmatprep.subr.bf16.mxu0 %v8613_v42  ;;  %8620 = vmatpush3.bf16.msra.mxu1 %v8617_v37  ;;  %v124_v20 = vld [vmem:[%s11999_s2 + $0x158] sm:$0xff]  ;;  %v8665_v21 = vpack.c.bf16 %v126_v16, %v125_v15  ;;  %v127_v22 = vld [vmem:[%s11999_s2 + $0x170] sm:$0xff]  ;;  %v34_v24 = vld [vmem:[%s12000_s0 + $0x88] sm:$0xff] }
  0x17   :  { %7957 = vmatprep.mubr.msk.f32.mxu0 %vm209_vm0, %v25_v46  ;;  %8622 = vmatprep.subr.bf16.mxu1 %v8621_v43  ;;  %v128_v23 = vld [vmem:[%s11999_s2 + $0x178] sm:$0xff]  ;;  %v8661_v26 = vpack.c.bf16 %v124_v20, %v123_v19  ;;  %v129_v28 = vld [vmem:[%s11999_s2 + $0x180] sm:$0xff]  ;;  %v130_v29 = vld [vmem:[%s11999_s2 + $0x188] sm:$0xff] }
  0x18   :  { %7968 = vmatprep.mubr.msk.f32.mxu1 %vm209_vm0, %v27_v49  ;;  %v36_v25 = vld [vmem:[%s12000_s0 + $0x98] sm:$0xff]  ;;  %v8669_v27 = vpack.c.bf16 %v128_v23, %v127_v22  ;;  %v37_v30 = vld [vmem:[%s12000_s0 + $0xa0] sm:$0xff]  ;;  %v134_v32 = vld [vmem:[%s11999_s2 + $0x1a8] sm:$0xff]  ;;  %v8673_v34 = vpack.c.bf16 %v130_v29, %v129_v28 }
  0x19   :  { %8616 = vmatpush3.bf16.msra.mxu0 %v8613_v42  ;;  %v133_v31 = vld [vmem:[%s11999_s2 + $0x1a0] sm:$0xff]  ;;  %v39_v33 = vld [vmem:[%s12000_s0 + $0xb0] sm:$0xff]  ;;  %v132_v36 = vld [vmem:[%s11999_s2 + $0x198] sm:$0xff] }
  0x1a   :  { %8626 = vmatprep.subr.bf16.mxu0 %v8625_v50  ;;  %8624 = vmatpush3.bf16.msra.mxu1 %v8621_v43  ;;  %v131_v35 = vld [vmem:[%s11999_s2 + $0x190] sm:$0xff]  ;;  %v8681_v37 = vpack.c.bf16 %v134_v32, %v133_v31  ;;  %v136_v39 = vld [vmem:[%s11999_s2 + $0x1b8] sm:$0xff]  ;;  %v38_v40 = vld [vmem:[%s12000_s0 + $0xa8] sm:$0xff] }
  0x1b   :  { %8634 = vmatprep.subr.bf16.mxu1 %v8633_v53  ;;  %v135_v38 = vld [vmem:[%s11999_s2 + $0x1b0] sm:$0xff]  ;;  %v40_v41 = vld [vmem:[%s12000_s0 + $0xb8] sm:$0xff]  ;;  %v8677_v42 = vpack.c.bf16 %v132_v36, %v131_v35  ;;  %v137_v44 = vld [vmem:[%s11999_s2 + $0x1c0] sm:$0xff] }
  0x1c   :  { %7958 = vmatmul.mubr.msk.f32.vlgmr.msra.gmra.mrb[4].mxu0 %vm209_vm0, %v26_v56  ;;  %v8685_v43 = vpack.c.bf16 %v136_v39, %v135_v38  ;;  %v138_v45 = vld [vmem:[%s11999_s2 + $0x1c8] sm:$0xff]  ;;  %v41_v46 = vld [vmem:[%s12000_s0 + $0xc0] sm:$0xff]  ;;  %v43_v49 = vld [vmem:[%s12000_s0 + $0xd0] sm:$0xff] }
  0x1d   :  { %8628 = vmatpush3.bf16.msra.mxu0 %v8625_v50  ;;  %7969 = vmatmul.mubr.msk.f32.vlgmr.msra.gmra.mrb[4].mxu1 %vm209_vm0, %v28_v57  ;;  %v141_v47 = vld [vmem:[%s11999_s2 + $0x1e0] sm:$0xff]  ;;  %v142_v48 = vld [vmem:[%s11999_s2 + $0x1e8] sm:$0xff]  ;;  %v8689_v50 = vpack.c.bf16 %v138_v45, %v137_v44  ;;  %v139_v51 = vld [vmem:[%s11999_s2 + $0x1d0] sm:$0xff] }
  0x1e   :  { %8630 = vmatprep.subr.bf16.mxu0 %v8629_v58  ;;  %8636 = vmatpush3.bf16.msra.mxu1 %v8633_v53  ;;  %v140_v52 = vld [vmem:[%s11999_s2 + $0x1d8] sm:$0xff]  ;;  %v8697_v53 = vpack.c.bf16 %v142_v48, %v141_v47  ;;  %v143_v54 = vld [vmem:[%s11999_s2 + $0x1f0] sm:$0xff]  ;;  %v42_v56 = vld [vmem:[%s12000_s0 + $0xc8] sm:$0xff] }
  0x1f   :  { %7979 = vmatprep.mubr.msk.f32.mxu0 %vm209_vm0, %v29_v62  ;;  %8638 = vmatprep.subr.bf16.mxu1 %v8637_v59  ;;  %v144_v55 = vld [vmem:[%s11999_s2 + $0x1f8] sm:$0xff]  ;;  %v145_v60 = vld [vmem:[%s11999_s2 + $0x200] sm:$0xff]  ;;  %v146_v61 = vld [vmem:[%s11999_s2 + $0x208] sm:$0xff] }
  0x20   :  { %7990 = vmatprep.mubr.msk.f32.mxu1 %vm209_vm0, %v31_v1  ;;  %v44_v57 = vld [vmem:[%s12000_s0 + $0xd8] sm:$0xff]  ;;  %v45_v62 = vld [vmem:[%s12000_s0 + $0xe0] sm:$0xff]  ;;  %v150_v0 = vld [vmem:[%s11999_s2 + $0x228] sm:$0xff] }
  0x21   :  { %8632 = vmatpush3.bf16.msra.mxu0 %v8629_v58  ;;  %v8693_v58 = vpack.c.bf16 %v140_v52, %v139_v51  ;;  %v149_v63 = vld [vmem:[%s11999_s2 + $0x220] sm:$0xff]  ;;  %v47_v1 = vld [vmem:[%s12000_s0 + $0xf0] sm:$0xff]  ;;  %v148_v4 = vld [vmem:[%s11999_s2 + $0x218] sm:$0xff] }
  0x22   :  { %8642 = vmatprep.subr.bf16.mxu0 %v8641_v2  ;;  %8640 = vmatpush3.bf16.msra.mxu1 %v8637_v59  ;;  %v8701_v59 = vpack.c.bf16 %v144_v55, %v143_v54  ;;  %v147_v3 = vld [vmem:[%s11999_s2 + $0x210] sm:$0xff]  ;;  %v152_v7 = vld [vmem:[%s11999_s2 + $0x238] sm:$0xff]  ;;  %v153_v12 = vld [vmem:[%s11999_s2 + $0x240] sm:$0xff] }
  0x23   :  { %8650 = vmatprep.subr.bf16.mxu1 %v8649_v5  ;;  %v151_v6 = vld [vmem:[%s11999_s2 + $0x230] sm:$0xff]  ;;  %v154_v13 = vld [vmem:[%s11999_s2 + $0x248] sm:$0xff]  ;;  %v157_v15 = vld [vmem:[%s11999_s2 + $0x260] sm:$0xff] }
  0x24   :  { %7980 = vmatmul.mubr.msk.f32.vlgmr.msra.gmra.mrb[6].mxu0 %vm209_vm0, %v30_v8  ;;  %v46_v8 = vld [vmem:[%s12000_s0 + $0xe8] sm:$0xff]  ;;  %v155_v19 = vld [vmem:[%s11999_s2 + $0x250] sm:$0xff]  ;;  %v156_v20 = vld [vmem:[%s11999_s2 + $0x258] sm:$0xff] }
  0x25   :  { %8644 = vmatpush3.bf16.msra.mxu0 %v8641_v2  ;;  %7991 = vmatmul.mubr.msk.f32.vlgmr.msra.gmra.mrb[6].mxu1 %vm209_vm0, %v32_v9  ;;  %v8705_v2 = vpack.c.bf16 %v146_v61, %v145_v60  ;;  %v48_v9 = vld [vmem:[%s12000_s0 + $0xf8] sm:$0xff]  ;;  %v158_v16 = vld [vmem:[%s11999_s2 + $0x268] sm:$0xff]  ;;  %v159_v22 = vld [vmem:[%s11999_s2 + $0x270] sm:$0xff] }
  0x26   :  { %8646 = vmatprep.subr.bf16.mxu0 %v8645_v10  ;;  %8652 = vmatpush3.bf16.msra.mxu1 %v8649_v5  ;;  %v8713_v5 = vpack.c.bf16 %v150_v0, %v149_v63  ;;  %v160_v23 = vld [vmem:[%s11999_s2 + $0x278] sm:$0xff]  ;;  %v161_v28 = vld [vmem:[%s11999_s2 + $0x280] sm:$0xff]  ;;  %v162_v29 = vld [vmem:[%s11999_s2 + $0x288] sm:$0xff] }
  0x27   :  { %8001 = vmatprep.mubr.msk.f32.mxu0 %vm209_vm0, %v33_v14  ;;  %8654 = vmatprep.subr.bf16.mxu1 %v8653_v11  ;;  %v49_v14 = vld [vmem:[%s12000_s0 + $0x100] sm:$0xff]  ;;  %v166_v32 = vld [vmem:[%s11999_s2 + $0x2a8] sm:$0xff]  ;;  %v163_v35 = vld [vmem:[%s11999_s2 + $0x290] sm:$0xff] }
  0x28   :  { %8012 = vmatprep.mubr.msk.f32.mxu1 %vm209_vm0, %v35_v17  ;;  %v51_v17 = vld [vmem:[%s12000_s0 + $0x110] sm:$0xff]  ;;  %v165_v31 = vld [vmem:[%s11999_s2 + $0x2a0] sm:$0xff]  ;;  %v164_v36 = vld [vmem:[%s11999_s2 + $0x298] sm:$0xff] }
  0x29   :  { %8648 = vmatpush3.bf16.msra.mxu0 %v8645_v10  ;;  %v8709_v10 = vpack.c.bf16 %v148_v4, %v147_v3  ;;  %v167_v38 = vld [vmem:[%s11999_s2 + $0x2b0] sm:$0xff]  ;;  %v168_v39 = vld [vmem:[%s11999_s2 + $0x2b8] sm:$0xff]  ;;  %v169_v44 = vld [vmem:[%s11999_s2 + $0x2c0] sm:$0xff] }
  0x2a   :  { %8658 = vmatprep.subr.bf16.mxu0 %v8657_v18  ;;  %8656 = vmatpush3.bf16.msra.mxu1 %v8653_v11  ;;  %v8717_v11 = vpack.c.bf16 %v152_v7, %v151_v6  ;;  %v170_v45 = vld [vmem:[%s11999_s2 + $0x2c8] sm:$0xff]  ;;  %v173_v47 = vld [vmem:[%s11999_s2 + $0x2e0] sm:$0xff]  ;;  %v171_v51 = vld [vmem:[%s11999_s2 + $0x2d0] sm:$0xff] }
  0x2b   :  { %8666 = vmatprep.subr.bf16.mxu1 %v8665_v21  ;;  %v174_v48 = vld [vmem:[%s11999_s2 + $0x2e8] sm:$0xff]  ;;  %v172_v52 = vld [vmem:[%s11999_s2 + $0x2d8] sm:$0xff]  ;;  %v175_v54 = vld [vmem:[%s11999_s2 + $0x2f0] sm:$0xff] }
  0x2c   :  { %8002 = vmatmul.mubr.msk.f32.vlgmr.msra.gmra.mrb[8].mxu0 %vm209_vm0, %v34_v24  ;;  %v50_v24 = vld [vmem:[%s12000_s0 + $0x108] sm:$0xff]  ;;  %v176_v55 = vld [vmem:[%s11999_s2 + $0x2f8] sm:$0xff]  ;;  %v177_v60 = vld [vmem:[%s11999_s2 + $0x300] sm:$0xff] }
  0x2d   :  { %8660 = vmatpush3.bf16.msra.mxu0 %v8657_v18  ;;  %8013 = vmatmul.mubr.msk.f32.vlgmr.msra.gmra.mrb[8].mxu1 %vm209_vm0, %v36_v25  ;;  %v8721_v18 = vpack.c.bf16 %v154_v13, %v153_v12  ;;  %v52_v25 = vld [vmem:[%s12000_s0 + $0x118] sm:$0xff]  ;;  %v178_v61 = vld [vmem:[%s11999_s2 + $0x308] sm:$0xff]  ;;  %v181_v63 = vld [vmem:[%s11999_s2 + $0x320] sm:$0xff] }
  0x2e   :  { %8662 = vmatprep.subr.bf16.mxu0 %v8661_v26  ;;  %8668 = vmatpush3.bf16.msra.mxu1 %v8665_v21  ;;  %v8729_v21 = vpack.c.bf16 %v158_v16, %v157_v15  ;;  %v182_v0 = vld [vmem:[%s11999_s2 + $0x328] sm:$0xff]  ;;  %v179_v3 = vld [vmem:[%s11999_s2 + $0x310] sm:$0xff]  ;;  %v180_v4 = vld [vmem:[%s11999_s2 + $0x318] sm:$0xff] }
  0x2f   :  { %8023 = vmatprep.mubr.msk.f32.mxu0 %vm209_vm0, %v37_v30  ;;  %8670 = vmatprep.subr.bf16.mxu1 %v8669_v27  ;;  %v53_v30 = vld [vmem:[%s12000_s0 + $0x120] sm:$0xff]  ;;  %v183_v6 = vld [vmem:[%s11999_s2 + $0x330] sm:$0xff]  ;;  %v184_v7 = vld [vmem:[%s11999_s2 + $0x338] sm:$0xff] }
  0x30   :  { %8034 = vmatprep.mubr.msk.f32.mxu1 %vm209_vm0, %v39_v33  ;;  %v55_v33 = vld [vmem:[%s12000_s0 + $0x130] sm:$0xff]  ;;  %v185_v12 = vld [vmem:[%s11999_s2 + $0x340] sm:$0xff]  ;;  %v186_v13 = vld [vmem:[%s11999_s2 + $0x348] sm:$0xff] }
  0x31   :  { %8664 = vmatpush3.bf16.msra.mxu0 %v8661_v26  ;;  %v8725_v26 = vpack.c.bf16 %v156_v20, %v155_v19  ;;  %v189_v15 = vld [vmem:[%s11999_s2 + $0x360] sm:$0xff]  ;;  %v190_v16 = vld [vmem:[%s11999_s2 + $0x368] sm:$0xff]  ;;  %v187_v19 = vld [vmem:[%s11999_s2 + $0x350] sm:$0xff] }
  0x32   :  { %8674 = vmatprep.subr.bf16.mxu0 %v8673_v34  ;;  %8672 = vmatpush3.bf16.msra.mxu1 %v8669_v27  ;;  %v8733_v27 = vpack.c.bf16 %v160_v23, %v159_v22  ;;  %v188_v20 = vld [vmem:[%s11999_s2 + $0x358] sm:$0xff]  ;;  %v191_v22 = vld [vmem:[%s11999_s2 + $0x370] sm:$0xff] }
  0x33   :  { %8682 = vmatprep.subr.bf16.mxu1 %v8681_v37  ;;  %v192_v23 = vld [vmem:[%s11999_s2 + $0x378] sm:$0xff] }
  0x34   :  { %8024 = vmatmul.mubr.msk.f32.vlgmr.msra.gmra.mrb[10].mxu0 %vm209_vm0, %v38_v40  ;;  %v54_v40 = vld [vmem:[%s12000_s0 + $0x128] sm:$0xff] }
  0x35   :  { %8676 = vmatpush3.bf16.msra.mxu0 %v8673_v34  ;;  %8035 = vmatmul.mubr.msk.f32.vlgmr.msra.gmra.mrb[10].mxu1 %vm209_vm0, %v40_v41  ;;  %v8737_v34 = vpack.c.bf16 %v162_v29, %v161_v28  ;;  %v56_v41 = vld [vmem:[%s12000_s0 + $0x138] sm:$0xff]  ;;  %v193_v28 = vld [vmem:[%s11999_s2 + $0x380] sm:$0xff]  ;;  %v194_v29 = vld [vmem:[%s11999_s2 + $0x388] sm:$0xff] }
  0x36   :  { %8678 = vmatprep.subr.bf16.mxu0 %v8677_v42  ;;  %8684 = vmatpush3.bf16.msra.mxu1 %v8681_v37  ;;  %v8745_v37 = vpack.c.bf16 %v166_v32, %v165_v31  ;;  %v197_v31 = vld [vmem:[%s11999_s2 + $0x3a0] sm:$0xff]  ;;  %v198_v32 = vld [vmem:[%s11999_s2 + $0x3a8] sm:$0xff] }
  0x37   :  { %8045 = vmatprep.mubr.msk.f32.mxu0 %vm209_vm0, %v41_v46  ;;  %8686 = vmatprep.subr.bf16.mxu1 %v8685_v43  ;;  %v57_v46 = vld [vmem:[%s12000_s0 + $0x140] sm:$0xff] }
  0x38   :  { %8056 = vmatprep.mubr.msk.f32.mxu1 %vm209_vm0, %v43_v49  ;;  %v59_v49 = vld [vmem:[%s12000_s0 + $0x150] sm:$0xff] }
  0x39   :  { %8680 = vmatpush3.bf16.msra.mxu0 %v8677_v42  ;;  %v8741_v42 = vpack.c.bf16 %v164_v36, %v163_v35  ;;  %v195_v35 = vld [vmem:[%s11999_s2 + $0x390] sm:$0xff]  ;;  %v196_v36 = vld [vmem:[%s11999_s2 + $0x398] sm:$0xff] }
  0x3a   :  { %8690 = vmatprep.subr.bf16.mxu0 %v8689_v50  ;;  %8688 = vmatpush3.bf16.msra.mxu1 %v8685_v43  ;;  %v8749_v43 = vpack.c.bf16 %v168_v39, %v167_v38  ;;  %v199_v38 = vld [vmem:[%s11999_s2 + $0x3b0] sm:$0xff]  ;;  %v200_v39 = vld [vmem:[%s11999_s2 + $0x3b8] sm:$0xff] }
  0x3b   :  { %8698 = vmatprep.subr.bf16.mxu1 %v8697_v53 }
  0x3c   :  { %8046 = vmatmul.mubr.msk.f32.vlgmr.msra.gmra.mrb[12].mxu0 %vm209_vm0, %v42_v56  ;;  %v58_v56 = vld [vmem:[%s12000_s0 + $0x148] sm:$0xff] }
  0x3d   :  { %8692 = vmatpush3.bf16.msra.mxu0 %v8689_v50  ;;  %8057 = vmatmul.mubr.msk.f32.vlgmr.msra.gmra.mrb[12].mxu1 %vm209_vm0, %v44_v57  ;;  %v8753_v50 = vpack.c.bf16 %v170_v45, %v169_v44  ;;  %v60_v57 = vld [vmem:[%s12000_s0 + $0x158] sm:$0xff]  ;;  %v201_v44 = vld [vmem:[%s11999_s2 + $0x3c0] sm:$0xff]  ;;  %v202_v45 = vld [vmem:[%s11999_s2 + $0x3c8] sm:$0xff] }
  0x3e   :  { %8694 = vmatprep.subr.bf16.mxu0 %v8693_v58  ;;  %8700 = vmatpush3.bf16.msra.mxu1 %v8697_v53  ;;  %v8761_v53 = vpack.c.bf16 %v174_v48, %v173_v47  ;;  %v205_v47 = vld [vmem:[%s11999_s2 + $0x3e0] sm:$0xff]  ;;  %v206_v48 = vld [vmem:[%s11999_s2 + $0x3e8] sm:$0xff] }
  0x3f   :  { %8067 = vmatprep.mubr.msk.f32.mxu0 %vm209_vm0, %v45_v62  ;;  %8702 = vmatprep.subr.bf16.mxu1 %v8701_v59  ;;  %v61_v62 = vld [vmem:[%s12000_s0 + $0x160] sm:$0xff] }
  0x40   :  { %8078 = vmatprep.mubr.msk.f32.mxu1 %vm209_vm0, %v47_v1  ;;  %v63_v1 = vld [vmem:[%s12000_s0 + $0x170] sm:$0xff] }
  0x41   :  { %8696 = vmatpush3.bf16.msra.mxu0 %v8693_v58  ;;  %v8757_v58 = vpack.c.bf16 %v172_v52, %v171_v51  ;;  %v203_v51 = vld [vmem:[%s11999_s2 + $0x3d0] sm:$0xff]  ;;  %v204_v52 = vld [vmem:[%s11999_s2 + $0x3d8] sm:$0xff] }
  0x42   :  { %8706 = vmatprep.subr.bf16.mxu0 %v8705_v2  ;;  %8704 = vmatpush3.bf16.msra.mxu1 %v8701_v59  ;;  %v8765_v59 = vpack.c.bf16 %v176_v55, %v175_v54  ;;  %v207_v54 = vld [vmem:[%s11999_s2 + $0x3f0] sm:$0xff]  ;;  %v208_v55 = vld [vmem:[%s11999_s2 + $0x3f8] sm:$0xff] }
  0x43   :  { %8714 = vmatprep.subr.bf16.mxu1 %v8713_v5 }
  0x44   :  { %8068 = vmatmul.mubr.msk.f32.vlgmr.msra.gmra.mrb[14].mxu0 %vm209_vm0, %v46_v8  ;;  %v62_v8 = vld [vmem:[%s12000_s0 + $0x168] sm:$0xff] }
  0x45   :  { %8708 = vmatpush3.bf16.msra.mxu0 %v8705_v2  ;;  %8079 = vmatmul.mubr.msk.f32.vlgmr.msra.gmra.mrb[14].mxu1 %vm209_vm0, %v48_v9  ;;  %v8769_v2 = vpack.c.bf16 %v178_v61, %v177_v60  ;;  %v64_v9 = vld [vmem:[%s12000_s0 + $0x178] sm:$0xff]  ;;  %v77_v60 = vld [vmem:[%s12000_s0 + $0x1e0] sm:$0xff]  ;;  %v79_v61 = vld [vmem:[%s12000_s0 + $0x1f0] sm:$0xff] }
  0x46   :  { %8710 = vmatprep.subr.bf16.mxu0 %v8709_v10  ;;  %8716 = vmatpush3.bf16.msra.mxu1 %v8713_v5  ;;  %v8777_v5 = vpack.c.bf16 %v182_v0, %v181_v63  ;;  %v80_v63 = vld [vmem:[%s12000_s0 + $0x1f8] sm:$0xff] }
  0x47   :  { %8089 = vmatprep.mubr.msk.f32.mxu0 %vm209_vm0, %v49_v14  ;;  %8718 = vmatprep.subr.bf16.mxu1 %v8717_v11  ;;  %v65_v14 = vld [vmem:[%s12000_s0 + $0x180] sm:$0xff] }
  0x48   :  { %8100 = vmatprep.mubr.msk.f32.mxu1 %vm209_vm0, %v51_v17  ;;  %v67_v17 = vld [vmem:[%s12000_s0 + $0x190] sm:$0xff] }
  0x49   :  { %8712 = vmatpush3.bf16.msra.mxu0 %v8709_v10  ;;  %v8773_v10 = vpack.c.bf16 %v180_v4, %v179_v3 }
  0x4a   :  { %8722 = vmatprep.subr.bf16.mxu0 %v8721_v18  ;;  %8720 = vmatpush3.bf16.msra.mxu1 %v8717_v11  ;;  %v8781_v11 = vpack.c.bf16 %v184_v7, %v183_v6 }
  0x4b   :  { %8730 = vmatprep.subr.bf16.mxu1 %v8729_v21 }
  0x4c   :  { %8090 = vmatmul.mubr.msk.f32.vlgmr.msra.gmra.mrb[16].mxu0 %vm209_vm0, %v50_v24  ;;  %v66_v24 = vld [vmem:[%s12000_s0 + $0x188] sm:$0xff] }
  0x4d   :  { %8724 = vmatpush3.bf16.msra.mxu0 %v8721_v18  ;;  %8101 = vmatmul.mubr.msk.f32.vlgmr.msra.gmra.mrb[16].mxu1 %vm209_vm0, %v52_v25  ;;  %v8785_v18 = vpack.c.bf16 %v186_v13, %v185_v12  ;;  %v68_v25 = vld [vmem:[%s12000_s0 + $0x198] sm:$0xff] }
  0x4e   :  { %8726 = vmatprep.subr.bf16.mxu0 %v8725_v26  ;;  %8732 = vmatpush3.bf16.msra.mxu1 %v8729_v21  ;;  %v8793_v21 = vpack.c.bf16 %v190_v16, %v189_v15 }
  0x4f   :  { %8111 = vmatprep.mubr.msk.f32.mxu0 %vm209_vm0, %v53_v30  ;;  %8734 = vmatprep.subr.bf16.mxu1 %v8733_v27  ;;  %v69_v30 = vld [vmem:[%s12000_s0 + $0x1a0] sm:$0xff] }
  0x50   :  { %8122 = vmatprep.mubr.msk.f32.mxu1 %vm209_vm0, %v55_v33  ;;  %v71_v33 = vld [vmem:[%s12000_s0 + $0x1b0] sm:$0xff] }
  0x51   :  { %8728 = vmatpush3.bf16.msra.mxu0 %v8725_v26  ;;  %v8789_v26 = vpack.c.bf16 %v188_v20, %v187_v19 }
  0x52   :  { %8738 = vmatprep.subr.bf16.mxu0 %v8737_v34  ;;  %8736 = vmatpush3.bf16.msra.mxu1 %v8733_v27  ;;  %v8797_v27 = vpack.c.bf16 %v192_v23, %v191_v22 }
  0x53   :  { %8746 = vmatprep.subr.bf16.mxu1 %v8745_v37 }
  0x54   :  { %8112 = vmatmul.mubr.msk.f32.vlgmr.msra.gmra.mrb[18].mxu0 %vm209_vm0, %v54_v40  ;;  %v70_v40 = vld [vmem:[%s12000_s0 + $0x1a8] sm:$0xff] }
  0x55   :  { %8740 = vmatpush3.bf16.msra.mxu0 %v8737_v34  ;;  %8123 = vmatmul.mubr.msk.f32.vlgmr.msra.gmra.mrb[18].mxu1 %vm209_vm0, %v56_v41  ;;  %v8801_v34 = vpack.c.bf16 %v194_v29, %v193_v28  ;;  %v72_v41 = vld [vmem:[%s12000_s0 + $0x1b8] sm:$0xff] }
  0x56   :  { %8742 = vmatprep.subr.bf16.mxu0 %v8741_v42  ;;  %8748 = vmatpush3.bf16.msra.mxu1 %v8745_v37  ;;  %v8809_v37 = vpack.c.bf16 %v198_v32, %v197_v31 }
  0x57   :  { %8133 = vmatprep.mubr.msk.f32.mxu0 %vm209_vm0, %v57_v46  ;;  %8750 = vmatprep.subr.bf16.mxu1 %v8749_v43  ;;  %v73_v46 = vld [vmem:[%s12000_s0 + $0x1c0] sm:$0xff] }
  0x58   :  { %8144 = vmatprep.mubr.msk.f32.mxu1 %vm209_vm0, %v59_v49  ;;  %v75_v49 = vld [vmem:[%s12000_s0 + $0x1d0] sm:$0xff] }
  0x59   :  { %8744 = vmatpush3.bf16.msra.mxu0 %v8741_v42  ;;  %v8805_v42 = vpack.c.bf16 %v196_v36, %v195_v35 }
  0x5a   :  { %8754 = vmatprep.subr.bf16.mxu0 %v8753_v50  ;;  %8752 = vmatpush3.bf16.msra.mxu1 %v8749_v43  ;;  %v8813_v43 = vpack.c.bf16 %v200_v39, %v199_v38 }
  0x5b   :  { %8762 = vmatprep.subr.bf16.mxu1 %v8761_v53 }
  0x5c   :  { %8134 = vmatmul.mubr.msk.f32.vlgmr.msra.gmra.mrb[20].mxu0 %vm209_vm0, %v58_v56  ;;  %v74_v56 = vld [vmem:[%s12000_s0 + $0x1c8] sm:$0xff] }
  0x5d   :  { %8756 = vmatpush3.bf16.msra.mxu0 %v8753_v50  ;;  %8145 = vmatmul.mubr.msk.f32.vlgmr.msra.gmra.mrb[20].mxu1 %vm209_vm0, %v60_v57  ;;  %v8817_v50 = vpack.c.bf16 %v202_v45, %v201_v44  ;;  %v76_v57 = vld [vmem:[%s12000_s0 + $0x1d8] sm:$0xff] }
  0x5e   :  { %8758 = vmatprep.subr.bf16.mxu0 %v8757_v58  ;;  %8764 = vmatpush3.bf16.msra.mxu1 %v8761_v53  ;;  %v8825_v53 = vpack.c.bf16 %v206_v48, %v205_v47 }
  0x5f   :  { %8155 = vmatprep.mubr.msk.f32.mxu0 %vm209_vm0, %v61_v62  ;;  %8766 = vmatprep.subr.bf16.mxu1 %v8765_v59  ;;  %v78_v62 = vld [vmem:[%s12000_s0 + $0x1e8] sm:$0xff] }
  0x60   :  { %8166 = vmatprep.mubr.msk.f32.mxu1 %vm209_vm0, %v63_v1 }
  0x61   :  { %8760 = vmatpush3.bf16.msra.mxu0 %v8757_v58  ;;  %v8821_v58 = vpack.c.bf16 %v204_v52, %v203_v51 }
  0x62   :  { %8770 = vmatprep.subr.bf16.mxu0 %v8769_v2  ;;  %8768 = vmatpush3.bf16.msra.mxu1 %v8765_v59  ;;  %v8829_v59 = vpack.c.bf16 %v208_v55, %v207_v54 }
  0x63   :  { %8778 = vmatprep.subr.bf16.mxu1 %v8777_v5 }
  0x64   :  { %8156 = vmatmul.mubr.msk.f32.vlgmr.msra.gmra.mrb[22].mxu0 %vm209_vm0, %v62_v8 }
  0x65   :  { %8772 = vmatpush3.bf16.msra.mxu0 %v8769_v2  ;;  %8167 = vmatmul.mubr.msk.f32.vlgmr.msra.gmra.mrb[22].mxu1 %vm209_vm0, %v64_v9 }
  0x66   :  { %8774 = vmatprep.subr.bf16.mxu0 %v8773_v10  ;;  %8780 = vmatpush3.bf16.msra.mxu1 %v8777_v5 }
  0x67   :  { %8177 = vmatprep.mubr.msk.f32.mxu0 %vm209_vm0, %v65_v14  ;;  %8782 = vmatprep.subr.bf16.mxu1 %v8781_v11 }
  0x68   :  { %8188 = vmatprep.mubr.msk.f32.mxu1 %vm209_vm0, %v67_v17 }
  0x69   :  { %8776 = vmatpush3.bf16.msra.mxu0 %v8773_v10 }
  0x6a   :  { %8786 = vmatprep.subr.bf16.mxu0 %v8785_v18  ;;  %8784 = vmatpush3.bf16.msra.mxu1 %v8781_v11 }
  0x6b   :  { %8794 = vmatprep.subr.bf16.mxu1 %v8793_v21 }
  0x6c   :  { %8178 = vmatmul.mubr.msk.f32.vlgmr.msra.gmra.mrb[24].mxu0 %vm209_vm0, %v66_v24 }
  0x6d   :  { %8788 = vmatpush3.bf16.msra.mxu0 %v8785_v18  ;;  %8189 = vmatmul.mubr.msk.f32.vlgmr.msra.gmra.mrb[24].mxu1 %vm209_vm0, %v68_v25 }
  0x6e   :  { %8790 = vmatprep.subr.bf16.mxu0 %v8789_v26  ;;  %8796 = vmatpush3.bf16.msra.mxu1 %v8793_v21 }
  0x6f   :  { %8199 = vmatprep.mubr.msk.f32.mxu0 %vm209_vm0, %v69_v30  ;;  %8798 = vmatprep.subr.bf16.mxu1 %v8797_v27 }
  0x70   :  { %8210 = vmatprep.mubr.msk.f32.mxu1 %vm209_vm0, %v71_v33 }
  0x71   :  { %8792 = vmatpush3.bf16.msra.mxu0 %v8789_v26 }
  0x72   :  { %8802 = vmatprep.subr.bf16.mxu0 %v8801_v34  ;;  %8800 = vmatpush3.bf16.msra.mxu1 %v8797_v27 }
  0x73   :  { %8810 = vmatprep.subr.bf16.mxu1 %v8809_v37 }
  0x74   :  { %8200 = vmatmul.mubr.msk.f32.vlgmr.msra.gmra.mrb[26].mxu0 %vm209_vm0, %v70_v40 }
  0x75   :  { %8804 = vmatpush3.bf16.msra.mxu0 %v8801_v34  ;;  %8211 = vmatmul.mubr.msk.f32.vlgmr.msra.gmra.mrb[26].mxu1 %vm209_vm0, %v72_v41 }
  0x76   :  { %8806 = vmatprep.subr.bf16.mxu0 %v8805_v42  ;;  %8812 = vmatpush3.bf16.msra.mxu1 %v8809_v37 }
  0x77   :  { %8221 = vmatprep.mubr.msk.f32.mxu0 %vm209_vm0, %v73_v46  ;;  %8814 = vmatprep.subr.bf16.mxu1 %v8813_v43 }
  0x78   :  { %8232 = vmatprep.mubr.msk.f32.mxu1 %vm209_vm0, %v75_v49 }
  0x79   :  { %8808 = vmatpush3.bf16.msra.mxu0 %v8805_v42 }
  0x7a   :  { %8818 = vmatprep.subr.bf16.mxu0 %v8817_v50  ;;  %8816 = vmatpush3.bf16.msra.mxu1 %v8813_v43 }
  0x7b   :  { %8826 = vmatprep.subr.bf16.mxu1 %v8825_v53 }
  0x7c   :  { %8222 = vmatmul.mubr.msk.f32.vlgmr.msra.gmra.mrb[28].mxu0 %vm209_vm0, %v74_v56 }
  0x7d   :  { %8820 = vmatpush3.bf16.msra.mxu0 %v8817_v50  ;;  %8233 = vmatmul.mubr.msk.f32.vlgmr.msra.gmra.mrb[28].mxu1 %vm209_vm0, %v76_v57 }
  0x7e   :  { %8822 = vmatprep.subr.bf16.mxu0 %v8821_v58  ;;  %8828 = vmatpush3.bf16.msra.mxu1 %v8825_v53 }
  0x7f   :  { %8243 = vmatprep.mubr.msk.f32.mxu0 %vm209_vm0, %v77_v60  ;;  %8830 = vmatprep.subr.bf16.mxu1 %v8829_v59 }
  0x80   :  { %8254 = vmatprep.mubr.msk.f32.mxu1 %vm209_vm0, %v79_v61 }
  0x81   :  { %8824 = vmatpush3.bf16.msra.mxu0 %v8821_v58 }
  0x82   :  { %8832 = vmatpush3.bf16.msra.mxu1 %v8829_v59 }
  0x84   :  { %8244 = vmatmul.mubr.msk.f32.vlgmr.msra.gmra.mrb[30].mxu0 %vm209_vm0, %v78_v62 }
  0x85   :  { %8255 = vmatmul.mubr.msk.f32.vlgmr.msra.gmra.mrb[30].mxu1 %vm209_vm0, %v80_v63 }
  0xdf   :  { %v7915_v0 = vpop.f32.mrb[0].mxu0 }
  0xe0   :  { %v9887_v1 = vmul.f32 0.17677669, %v7915_v0  ;;  %v7926_v2 = vpop.f32.mrb[0].mxu1  ;;  %v282_v3 = vpop.f32.mrb[1].mxu0 }
  0xe1   :  { %v9889_v4 = vmul.f32 0.17677669, %v7926_v2  ;;  %v363_v5 = vpop.f32.mrb[1].mxu1  ;;  %v9891_v6 = vmul.f32 0.17677669, %v282_v3 }
  0xe2   :  { %v9893_v7 = vmul.f32 0.17677669, %v363_v5  ;;  %v2870_v8 = vsel %vm2866_vm1, %v9887_v1, -inf }
  0xe3   :  { %v2876_v9 = vsel %vm2866_vm1, %v9889_v4, -inf  ;;  %2871 = vmax.xlane.f32.xlu0 %v2870_v8  ;;  %v2867_v11 = vsel %vm2866_vm1, %v9891_v6, -inf }
  0xe4   :  { %2877 = vmax.xlane.f32.xlu1 %v2876_v9  ;;  %v2873_v10 = vsel %vm2866_vm1, %v9893_v7, -inf }
  0xe7   :  { %2868 = vmax.xlane.f32.xlu0 %v2867_v11  ;;  %v7937_v12 = vpop.f32.mrb[2].mxu0 }
  0xe8   :  { %2874 = vmax.xlane.f32.xlu1 %v2873_v10  ;;  %v9903_v13 = vmul.f32 0.17677669, %v7937_v12  ;;  %v444_v14 = vpop.f32.mrb[3].mxu0  ;;  %v7948_v15 = vpop.f32.mrb[2].mxu1 }
  0xe9   :  { %v9905_v16 = vmul.f32 0.17677669, %v444_v14  ;;  %v9907_v17 = vmul.f32 0.17677669, %v7948_v15  ;;  %v525_v18 = vpop.f32.mrb[3].mxu1 }
  0xea   :  { %v2882_v19 = vsel %vm2866_vm1, %v9903_v13, -inf  ;;  %v9911_v20 = vmul.f32 0.17677669, %v525_v18 }
  0xeb   :  { %v2879_v21 = vsel %vm2866_vm1, %v9905_v16, -inf  ;;  %v2888_v22 = vsel %vm2866_vm1, %v9907_v17, -inf }
  0xec   :  { %2883 = vmax.xlane.f32.xlu1 %v2882_v19  ;;  %2880 = vmax.xlane.f32.xlu0 %v2879_v21  ;;  %v2885_v23 = vsel %vm2866_vm1, %v9911_v20, -inf }
  0xef   :  { %v7959_v24 = vpop.f32.mrb[4].mxu0 }
  0xf0   :  { %2889 = vmax.xlane.f32.xlu1 %v2888_v22  ;;  %v9919_v25 = vmul.f32 0.17677669, %v7959_v24  ;;  %2886 = vmax.xlane.f32.xlu0 %v2885_v23  ;;  %v606_v26 = vpop.f32.mrb[5].mxu0  ;;  %v7970_v27 = vpop.f32.mrb[4].mxu1 }
  0xf1   :  { %v9921_v28 = vmul.f32 0.17677669, %v606_v26  ;;  %v9923_v29 = vmul.f32 0.17677669, %v7970_v27  ;;  %v687_v30 = vpop.f32.mrb[5].mxu1 }
  0xf2   :  { %v2894_v31 = vsel %vm2866_vm1, %v9919_v25, -inf  ;;  %v9927_v32 = vmul.f32 0.17677669, %v687_v30 }
  0xf3   :  { %v2891_v33 = vsel %vm2866_vm1, %v9921_v28, -inf  ;;  %v2900_v34 = vsel %vm2866_vm1, %v9923_v29, -inf }
  0xf4   :  { %2895 = vmax.xlane.f32.xlu1 %v2894_v31  ;;  %2892 = vmax.xlane.f32.xlu0 %v2891_v33  ;;  %v2897_v35 = vsel %vm2866_vm1, %v9927_v32, -inf }
  0xf7   :  { %v7981_v36 = vpop.f32.mrb[6].mxu0 }
  0xf8   :  { %2901 = vmax.xlane.f32.xlu1 %v2900_v34  ;;  %v9935_v37 = vmul.f32 0.17677669, %v7981_v36  ;;  %2898 = vmax.xlane.f32.xlu0 %v2897_v35  ;;  %v768_v38 = vpop.f32.mrb[7].mxu0  ;;  %v7992_v39 = vpop.f32.mrb[6].mxu1 }
  0xf9   :  { %v9937_v40 = vmul.f32 0.17677669, %v768_v38  ;;  %v9939_v41 = vmul.f32 0.17677669, %v7992_v39  ;;  %v849_v42 = vpop.f32.mrb[7].mxu1 }
  0xfa   :  { %v2906_v43 = vsel %vm2866_vm1, %v9935_v37, -inf  ;;  %v9943_v44 = vmul.f32 0.17677669, %v849_v42 }
  0xfb   :  { %v2903_v45 = vsel %vm2866_vm1, %v9937_v40, -inf  ;;  %v2912_v46 = vsel %vm2866_vm1, %v9939_v41, -inf }
  0xfc   :  { %2907 = vmax.xlane.f32.xlu1 %v2906_v43  ;;  %2904 = vmax.xlane.f32.xlu0 %v2903_v45  ;;  %v2909_v47 = vsel %vm2866_vm1, %v9943_v44, -inf }
  0xff   :  { %v8003_v48 = vpop.f32.mrb[8].mxu0 }
 0x100   :  { %2913 = vmax.xlane.f32.xlu1 %v2912_v46  ;;  %v9951_v49 = vmul.f32 0.17677669, %v8003_v48  ;;  %2910 = vmax.xlane.f32.xlu0 %v2909_v47  ;;  %v930_v50 = vpop.f32.mrb[9].mxu0  ;;  %v8014_v51 = vpop.f32.mrb[8].mxu1 }
 0x101   :  { %v9953_v52 = vmul.f32 0.17677669, %v930_v50  ;;  %v9955_v53 = vmul.f32 0.17677669, %v8014_v51  ;;  %v1011_v54 = vpop.f32.mrb[9].mxu1 }
 0x102   :  { %v2918_v55 = vsel %vm2866_vm1, %v9951_v49, -inf  ;;  %v9959_v56 = vmul.f32 0.17677669, %v1011_v54 }
 0x103   :  { %v2915_v57 = vsel %vm2866_vm1, %v9953_v52, -inf  ;;  %v2924_v58 = vsel %vm2866_vm1, %v9955_v53, -inf }
 0x104   :  { %2919 = vmax.xlane.f32.xlu1 %v2918_v55  ;;  %2916 = vmax.xlane.f32.xlu0 %v2915_v57  ;;  %v2921_v59 = vsel %vm2866_vm1, %v9959_v56, -inf }
 0x107   :  { %v8025_v60 = vpop.f32.mrb[10].mxu0 }
 0x108   :  { %2925 = vmax.xlane.f32.xlu1 %v2924_v58  ;;  %v9967_v61 = vmul.f32 0.17677669, %v8025_v60  ;;  %2922 = vmax.xlane.f32.xlu0 %v2921_v59  ;;  %v1092_v62 = vpop.f32.mrb[11].mxu0  ;;  %v8036_v63 = vpop.f32.mrb[10].mxu1 }
 0x109   :  { %v9969_v0 = vmul.f32 0.17677669, %v1092_v62  ;;  %v9971_v2 = vmul.f32 0.17677669, %v8036_v63  ;;  %v1173_v3 = vpop.f32.mrb[11].mxu1 }
 0x10a   :  { %v2930_v5 = vsel %vm2866_vm1, %v9967_v61, -inf  ;;  %v9975_v8 = vmul.f32 0.17677669, %v1173_v3 }
 0x10b   :  { %v2927_v9 = vsel %vm2866_vm1, %v9969_v0, -inf  ;;  %v2936_v10 = vsel %vm2866_vm1, %v9971_v2, -inf }
 0x10c   :  { %2931 = vmax.xlane.f32.xlu1 %v2930_v5  ;;  %2928 = vmax.xlane.f32.xlu0 %v2927_v9  ;;  %v2933_v11 = vsel %vm2866_vm1, %v9975_v8, -inf }
 0x10f   :  { %v8047_v12 = vpop.f32.mrb[12].mxu0 }
 0x110   :  { %2937 = vmax.xlane.f32.xlu1 %v2936_v10  ;;  %v9983_v14 = vmul.f32 0.17677669, %v8047_v12  ;;  %2934 = vmax.xlane.f32.xlu0 %v2933_v11  ;;  %v1254_v15 = vpop.f32.mrb[13].mxu0  ;;  %v8058_v18 = vpop.f32.mrb[12].mxu1 }
 0x111   :  { %v9985_v19 = vmul.f32 0.17677669, %v1254_v15  ;;  %v9987_v21 = vmul.f32 0.17677669, %v8058_v18  ;;  %v1335_v22 = vpop.f32.mrb[13].mxu1 }
 0x112   :  { %v2942_v23 = vsel %vm2866_vm1, %v9983_v14, -inf  ;;  %v9991_v24 = vmul.f32 0.17677669, %v1335_v22 }
 0x113   :  { %v2939_v26 = vsel %vm2866_vm1, %v9985_v19, -inf  ;;  %v2948_v27 = vsel %vm2866_vm1, %v9987_v21, -inf }
 0x114   :  { %2943 = vmax.xlane.f32.xlu1 %v2942_v23  ;;  %2940 = vmax.xlane.f32.xlu0 %v2939_v26  ;;  %v2945_v30 = vsel %vm2866_vm1, %v9991_v24, -inf }
 0x117   :  { %v8069_v31 = vpop.f32.mrb[14].mxu0 }
 0x118   :  { %2949 = vmax.xlane.f32.xlu1 %v2948_v27  ;;  %v9999_v33 = vmul.f32 0.17677669, %v8069_v31  ;;  %2946 = vmax.xlane.f32.xlu0 %v2945_v30  ;;  %v1416_v34 = vpop.f32.mrb[15].mxu0  ;;  %v8080_v35 = vpop.f32.mrb[14].mxu1 }
 0x119   :  { %v10001_v36 = vmul.f32 0.17677669, %v1416_v34  ;;  %v10003_v38 = vmul.f32 0.17677669, %v8080_v35  ;;  %v1497_v39 = vpop.f32.mrb[15].mxu1 }
 0x11a   :  { %v2954_v42 = vsel %vm2866_vm1, %v9999_v33, -inf  ;;  %v10007_v43 = vmul.f32 0.17677669, %v1497_v39 }
 0x11b   :  { %v2951_v45 = vsel %vm2866_vm1, %v10001_v36, -inf  ;;  %v2960_v46 = vsel %vm2866_vm1, %v10003_v38, -inf }
 0x11c   :  { %2955 = vmax.xlane.f32.xlu1 %v2954_v42  ;;  %2952 = vmax.xlane.f32.xlu0 %v2951_v45  ;;  %v2957_v47 = vsel %vm2866_vm1, %v10007_v43, -inf }
 0x11f   :  { %v8091_v48 = vpop.f32.mrb[16].mxu0 }
 0x120   :  { %2961 = vmax.xlane.f32.xlu1 %v2960_v46  ;;  %v10015_v50 = vmul.f32 0.17677669, %v8091_v48  ;;  %2958 = vmax.xlane.f32.xlu0 %v2957_v47  ;;  %v1578_v51 = vpop.f32.mrb[17].mxu0  ;;  %v8102_v54 = vpop.f32.mrb[16].mxu1 }
 0x121   :  { %v10017_v55 = vmul.f32 0.17677669, %v1578_v51  ;;  %v10019_v57 = vmul.f32 0.17677669, %v8102_v54  ;;  %v1659_v58 = vpop.f32.mrb[17].mxu1 }
 0x122   :  { %v2966_v59 = vsel %vm2866_vm1, %v10015_v50, -inf  ;;  %v10023_v60 = vmul.f32 0.17677669, %v1659_v58 }
 0x123   :  { %v2963_v62 = vsel %vm2866_vm1, %v10017_v55, -inf  ;;  %v2972_v63 = vsel %vm2866_vm1, %v10019_v57, -inf }
 0x124   :  { %2967 = vmax.xlane.f32.xlu1 %v2966_v59  ;;  %2964 = vmax.xlane.f32.xlu0 %v2963_v62  ;;  %v2969_v3 = vsel %vm2866_vm1, %v10023_v60, -inf }
 0x127   :  { %v8113_v5 = vpop.f32.mrb[18].mxu0 }
 0x128   :  { %2973 = vmax.xlane.f32.xlu1 %v2972_v63  ;;  %v10031_v9 = vmul.f32 0.17677669, %v8113_v5  ;;  %2970 = vmax.xlane.f32.xlu0 %v2969_v3  ;;  %v1740_v10 = vpop.f32.mrb[19].mxu0  ;;  %v8124_v11 = vpop.f32.mrb[18].mxu1 }
 0x129   :  { %v10033_v12 = vmul.f32 0.17677669, %v1740_v10  ;;  %v10035_v15 = vmul.f32 0.17677669, %v8124_v11  ;;  %v1821_v18 = vpop.f32.mrb[19].mxu1 }
 0x12a   :  { %v2978_v22 = vsel %vm2866_vm1, %v10031_v9, -inf  ;;  %v10039_v23 = vmul.f32 0.17677669, %v1821_v18 }
 0x12b   :  { %v2975_v26 = vsel %vm2866_vm1, %v10033_v12, -inf  ;;  %v2984_v27 = vsel %vm2866_vm1, %v10035_v15, -inf }
 0x12c   :  { %2979 = vmax.xlane.f32.xlu1 %v2978_v22  ;;  %2976 = vmax.xlane.f32.xlu0 %v2975_v26  ;;  %v2981_v30 = vsel %vm2866_vm1, %v10039_v23, -inf }
 0x12f   :  { %v8135_v31 = vpop.f32.mrb[20].mxu0 }
 0x130   :  { %2985 = vmax.xlane.f32.xlu1 %v2984_v27  ;;  %v10047_v34 = vmul.f32 0.17677669, %v8135_v31  ;;  %2982 = vmax.xlane.f32.xlu0 %v2981_v30  ;;  %v1902_v35 = vpop.f32.mrb[21].mxu0  ;;  %v8146_v39 = vpop.f32.mrb[20].mxu1 }
 0x131   :  { %v10049_v42 = vmul.f32 0.17677669, %v1902_v35  ;;  %v10051_v45 = vmul.f32 0.17677669, %v8146_v39  ;;  %v1983_v46 = vpop.f32.mrb[21].mxu1 }
 0x132   :  { %v2990_v47 = vsel %vm2866_vm1, %v10047_v34, -inf  ;;  %v10055_v48 = vmul.f32 0.17677669, %v1983_v46 }
 0x133   :  { %v2987_v51 = vsel %vm2866_vm1, %v10049_v42, -inf  ;;  %v2996_v54 = vsel %vm2866_vm1, %v10051_v45, -inf }
 0x134   :  { %2991 = vmax.xlane.f32.xlu1 %v2990_v47  ;;  %2988 = vmax.xlane.f32.xlu0 %v2987_v51  ;;  %v2993_v58 = vsel %vm2866_vm1, %v10055_v48, -inf }
 0x137   :  { %v8157_v59 = vpop.f32.mrb[22].mxu0 }
 0x138   :  { %2997 = vmax.xlane.f32.xlu1 %v2996_v54  ;;  %v10063_v62 = vmul.f32 0.17677669, %v8157_v59  ;;  %2994 = vmax.xlane.f32.xlu0 %v2993_v58  ;;  %v2064_v63 = vpop.f32.mrb[23].mxu0  ;;  %v8168_v3 = vpop.f32.mrb[22].mxu1 }
 0x139   :  { %v10065_v5 = vmul.f32 0.17677669, %v2064_v63  ;;  %v10067_v10 = vmul.f32 0.17677669, %v8168_v3  ;;  %v2145_v11 = vpop.f32.mrb[23].mxu1 }
 0x13a   :  { %v3002_v18 = vsel %vm2866_vm1, %v10063_v62, -inf  ;;  %v10071_v22 = vmul.f32 0.17677669, %v2145_v11 }
 0x13b   :  { %v2999_v26 = vsel %vm2866_vm1, %v10065_v5, -inf  ;;  %v3008_v27 = vsel %vm2866_vm1, %v10067_v10, -inf }
 0x13c   :  { %3003 = vmax.xlane.f32.xlu1 %v3002_v18  ;;  %3000 = vmax.xlane.f32.xlu0 %v2999_v26  ;;  %v3005_v30 = vsel %vm2866_vm1, %v10071_v22, -inf }
 0x13f   :  { %v8179_v31 = vpop.f32.mrb[24].mxu0 }
 0x140   :  { %3009 = vmax.xlane.f32.xlu1 %v3008_v27  ;;  %v10079_v35 = vmul.f32 0.17677669, %v8179_v31  ;;  %3006 = vmax.xlane.f32.xlu0 %v3005_v30  ;;  %v2226_v39 = vpop.f32.mrb[25].mxu0  ;;  %v8190_v46 = vpop.f32.mrb[24].mxu1 }
 0x141   :  { %v10081_v47 = vmul.f32 0.17677669, %v2226_v39  ;;  %v10083_v51 = vmul.f32 0.17677669, %v8190_v46  ;;  %v2307_v54 = vpop.f32.mrb[25].mxu1 }
 0x142   :  { %v3014_v58 = vsel %vm2866_vm1, %v10079_v35, -inf  ;;  %v10087_v59 = vmul.f32 0.17677669, %v2307_v54 }
 0x143   :  { %12033 = vst [vmem:[#allocation2_spill] sm:$0xff] %v10081_v47  ;;  %12034 = vst [vmem:[#allocation3_spill] sm:$0xff] %v10083_v51  ;;  %v3011_v63 = vsel %vm2866_vm1, %v10081_v47, -inf  ;;  %v3020_v3 = vsel %vm2866_vm1, %v10083_v51, -inf }
 0x144   :  { %12035 = vst [vmem:[#allocation4_spill] sm:$0xff] %v10087_v59  ;;  %3015 = vmax.xlane.f32.xlu1 %v3014_v58  ;;  %3012 = vmax.xlane.f32.xlu0 %v3011_v63  ;;  %v3017_v11 = vsel %vm2866_vm1, %v10087_v59, -inf }
 0x147   :  { %v8201_v18 = vpop.f32.mrb[26].mxu0 }
 0x148   :  { %3021 = vmax.xlane.f32.xlu1 %v3020_v3  ;;  %v10095_v26 = vmul.f32 0.17677669, %v8201_v18  ;;  %3018 = vmax.xlane.f32.xlu0 %v3017_v11  ;;  %v2388_v27 = vpop.f32.mrb[27].mxu0  ;;  %v8212_v30 = vpop.f32.mrb[26].mxu1 }
 0x149   :  { %v10097_v31 = vmul.f32 0.17677669, %v2388_v27  ;;  %v10099_v39 = vmul.f32 0.17677669, %v8212_v30  ;;  %v2469_v46 = vpop.f32.mrb[27].mxu1 }
 0x14a   :  { %12036 = vst [vmem:[#allocation5_spill] sm:$0xff] %v10095_v26  ;;  %v3026_v54 = vsel %vm2866_vm1, %v10095_v26, -inf  ;;  %v10103_v58 = vmul.f32 0.17677669, %v2469_v46 }
 0x14b   :  { %12037 = vst [vmem:[#allocation6_spill] sm:$0xff] %v10097_v31  ;;  %12038 = vst [vmem:[#allocation7_spill] sm:$0xff] %v10099_v39  ;;  %v3023_v63 = vsel %vm2866_vm1, %v10097_v31, -inf  ;;  %v3032_v3 = vsel %vm2866_vm1, %v10099_v39, -inf }
 0x14c   :  { %12039 = vst [vmem:[#allocation8_spill] sm:$0xff] %v10103_v58  ;;  %3027 = vmax.xlane.f32.xlu1 %v3026_v54  ;;  %3024 = vmax.xlane.f32.xlu0 %v3023_v63  ;;  %v3029_v11 = vsel %vm2866_vm1, %v10103_v58, -inf }
 0x14f   :  { %v8223_v18 = vpop.f32.mrb[28].mxu0 }
 0x150   :  { %3033 = vmax.xlane.f32.xlu1 %v3032_v3  ;;  %v10111_v27 = vmul.f32 0.17677669, %v8223_v18  ;;  %3030 = vmax.xlane.f32.xlu0 %v3029_v11  ;;  %v2550_v30 = vpop.f32.mrb[29].mxu0  ;;  %v8234_v26 = vpop.f32.mrb[28].mxu1 }
 0x151   :  { %v10113_v46 = vmul.f32 0.17677669, %v2550_v30  ;;  %v10115_v59 = vmul.f32 0.17677669, %v8234_v26  ;;  %v2631_v31 = vpop.f32.mrb[29].mxu1 }
 0x152   :  { %12040 = vst [vmem:[#allocation9_spill] sm:$0xff] %v10111_v27  ;;  %v3038_v54 = vsel %vm2866_vm1, %v10111_v27, -inf  ;;  %v10119_v63 = vmul.f32 0.17677669, %v2631_v31 }
 0x153   :  { %12041 = vst [vmem:[#allocation10_spill] sm:$0xff] %v10113_v46  ;;  %12042 = vst [vmem:[#allocation11_spill] sm:$0xff] %v10115_v59  ;;  %v3035_v58 = vsel %vm2866_vm1, %v10113_v46, -inf  ;;  %v3044_v3 = vsel %vm2866_vm1, %v10115_v59, -inf }
 0x154   :  { %12043 = vst [vmem:[#allocation12_spill] sm:$0xff] %v10119_v63  ;;  %3039 = vmax.xlane.f32.xlu1 %v3038_v54  ;;  %3036 = vmax.xlane.f32.xlu0 %v3035_v58  ;;  %v3041_v11 = vsel %vm2866_vm1, %v10119_v63, -inf }
 0x157   :  { %v8245_v18 = vpop.f32.mrb[30].mxu0 }
 0x158   :  { %3045 = vmax.xlane.f32.xlu1 %v3044_v3  ;;  %v10127_v26 = vmul.f32 0.17677669, %v8245_v18  ;;  %3042 = vmax.xlane.f32.xlu0 %v3041_v11  ;;  %v2712_v30 = vpop.f32.mrb[31].mxu0  ;;  %v8256_v27 = vpop.f32.mrb[30].mxu1 }
 0x159   :  { %v10129_v31 = vmul.f32 0.17677669, %v2712_v30  ;;  %v10131_v39 = vmul.f32 0.17677669, %v8256_v27  ;;  %v2793_v46 = vpop.f32.mrb[31].mxu1 }
 0x15a   :  { %12044 = vst [vmem:[#allocation13_spill] sm:$0xff] %v10127_v26  ;;  %v3050_v58 = vsel %vm2866_vm1, %v10127_v26, -inf  ;;  %v10135_v54 = vmul.f32 0.17677669, %v2793_v46 }
 0x15b   :  { %12045 = vst [vmem:[#allocation14_spill] sm:$0xff] %v10129_v31  ;;  %12046 = vst [vmem:[#allocation15_spill] sm:$0xff] %v10131_v39  ;;  %v3047_v63 = vsel %vm2866_vm1, %v10129_v31, -inf  ;;  %v3056_v3 = vsel %vm2866_vm1, %v10131_v39, -inf }
 0x15c   :  { %12047 = vst [vmem:[#allocation16_spill] sm:$0xff] %v10135_v54  ;;  %3051 = vmax.xlane.f32.xlu1 %v3050_v58  ;;  %3048 = vmax.xlane.f32.xlu0 %v3047_v63  ;;  %v3053_v11 = vsel %vm2866_vm1, %v10135_v54, -inf }
 0x160   :  { %3057 = vmax.xlane.f32.xlu1 %v3056_v3  ;;  %3054 = vmax.xlane.f32.xlu0 %v3053_v11 }
 0x170   :  { %v2872_v27 = vpop.xlane.xlu0 %2871 }
 0x171   :  { %v2878_v18 = vpop.xlane.xlu1 %2877  ;;  %v3060_v30 = vsub.f32 %v9887_v1, %v2872_v27 }
 0x172   :  { %v3062_v46 = vsub.f32 %v9889_v4, %v2878_v18 }
 0x173   :  { %v3125_v26 = vmul.f32 1.442695, %v3060_v30 }
 0x174   :  { %v3129_v59 = vmul.f32 1.442695, %v3062_v46  ;;  %v2869_v51 = vpop.xlane.xlu0 %2868 }
 0x175   :  { %8961 = vpow2.f32 %v3125_v26  ;;  %v2875_v58 = vpop.xlane.xlu1 %2874  ;;  %v3059_v63 = vsub.f32 %v9891_v6, %v2869_v51 }
 0x176   :  { %v3061_v39 = vsub.f32 %v9893_v7, %v2875_v58  ;;  %8963 = vpow2.f32 %v3129_v59 }
 0x177   :  { %v3123_v31 = vmul.f32 1.442695, %v3059_v63 }
 0x178   :  { %v3127_v54 = vmul.f32 1.442695, %v3061_v39 }
 0x179   :  { %8965 = vpow2.f32 %v3123_v31  ;;  %v2884_v3 = vpop.xlane.xlu1 %2883  ;;  %v2881_v11 = vpop.xlane.xlu0 %2880 }
 0x17a   :  { %v3064_v47 = vsub.f32 %v9903_v13, %v2884_v3  ;;  %v3063_v1 = vsub.f32 %v9905_v16, %v2881_v11  ;;  %8967 = vpow2.f32 %v3127_v54 }
 0x17c   :  { %v3133_v4 = vmul.f32 1.442695, %v3064_v47  ;;  %v3131_v27 = vmul.f32 1.442695, %v3063_v1 }
 0x17d   :  { %v2890_v18 = vpop.xlane.xlu1 %2889  ;;  %v2887_v26 = vpop.xlane.xlu0 %2886 }
 0x17e   :  { %8969 = vpow2.f32 %v3133_v4  ;;  %v3066_v6 = vsub.f32 %v9907_v17, %v2890_v18  ;;  %v3065_v7 = vsub.f32 %v9911_v20, %v2887_v26 }
 0x17f   :  { %v10151_v51 = vpop.eup %8961  ;;  %8971 = vpow2.f32 %v3131_v27 }
 0x180   :  { %v3137_v59 = vmul.f32 1.442695, %v3066_v6  ;;  %v3135_v39 = vmul.f32 1.442695, %v3065_v7  ;;  %v3254_v13 = vsel %vm2866_vm1, %v10151_v51, 0.0  ;;  %v10155_v31 = vpop.eup %8963 }
 0x181   :  { %v2896_v16 = vpop.xlane.xlu1 %2895  ;;  %v2893_v47 = vpop.xlane.xlu0 %2892  ;;  %3255 = vadd.xlane.f32.xlu1 %v3254_v13  ;;  %v3260_v58 = vsel %vm2866_vm1, %v10155_v31, 0.0 }
 0x182   :  { %8973 = vpow2.f32 %v3137_v59  ;;  %v3068_v54 = vsub.f32 %v9919_v25, %v2896_v16  ;;  %v3067_v17 = vsub.f32 %v9921_v28, %v2893_v47 }
 0x183   :  { %v10159_v30 = vpop.eup %8965  ;;  %8975 = vpow2.f32 %v3135_v39 }
 0x184   :  { %v3141_v20 = vmul.f32 1.442695, %v3068_v54  ;;  %v3139_v46 = vmul.f32 1.442695, %v3067_v17  ;;  %v3251_v63 = vsel %vm2866_vm1, %v10159_v30, 0.0  ;;  %v10165_v3 = vpop.eup %8967 }
 0x185   :  { %v2902_v11 = vpop.xlane.xlu1 %2901  ;;  %v2899_v1 = vpop.xlane.xlu0 %2898  ;;  %3261 = vadd.xlane.f32.xlu1 %v3260_v58  ;;  %3252 = vadd.xlane.f32.xlu0 %v3251_v63  ;;  %v3257_v26 = vsel %vm2866_vm1, %v10165_v3, 0.0 }
 0x186   :  { %8977 = vpow2.f32 %v3141_v20  ;;  %v3070_v25 = vsub.f32 %v9923_v29, %v2902_v11  ;;  %v3069_v28 = vsub.f32 %v9927_v32, %v2899_v1 }
 0x187   :  { %8979 = vpow2.f32 %v3139_v46 }
 0x188   :  { %v10169_v4 = vpop.eup %8969  ;;  %v3145_v27 = vmul.f32 1.442695, %v3070_v25  ;;  %v3143_v18 = vmul.f32 1.442695, %v3069_v28 }
 0x189   :  { %v10173_v6 = vpop.eup %8971  ;;  %v2908_v7 = vpop.xlane.xlu1 %2907  ;;  %v3266_v39 = vsel %vm2866_vm1, %v10169_v4, 0.0  ;;  %3258 = vadd.xlane.f32.xlu0 %v3257_v26 }
 0x18a   :  { %v2905_v59 = vpop.xlane.xlu0 %2904  ;;  %8981 = vpow2.f32 %v3145_v27  ;;  %v3072_v29 = vsub.f32 %v9935_v37, %v2908_v7  ;;  %3267 = vadd.xlane.f32.xlu1 %v3266_v39  ;;  %v3263_v54 = vsel %vm2866_vm1, %v10173_v6, 0.0 }
 0x18b   :  { %v3071_v32 = vsub.f32 %v9937_v40, %v2905_v59  ;;  %8983 = vpow2.f32 %v3143_v18 }
 0x18c   :  { %v10179_v13 = vpop.eup %8973  ;;  %v3149_v16 = vmul.f32 1.442695, %v3072_v29 }
 0x18d   :  { %v3147_v47 = vmul.f32 1.442695, %v3071_v32  ;;  %v10183_v17 = vpop.eup %8975  ;;  %v2914_v20 = vpop.xlane.xlu1 %2913  ;;  %v3272_v58 = vsel %vm2866_vm1, %v10179_v13, 0.0  ;;  %3264 = vadd.xlane.f32.xlu0 %v3263_v54 }
 0x18e   :  { %v2911_v46 = vpop.xlane.xlu0 %2910  ;;  %8985 = vpow2.f32 %v3149_v16  ;;  %v3074_v37 = vsub.f32 %v9939_v41, %v2914_v20  ;;  %3273 = vadd.xlane.f32.xlu1 %v3272_v58  ;;  %v3269_v25 = vsel %vm2866_vm1, %v10183_v17, 0.0 }
 0x18f   :  { %v3073_v40 = vsub.f32 %v9943_v44, %v2911_v46  ;;  %8987 = vpow2.f32 %v3147_v47 }
 0x190   :  { %v10189_v63 = vpop.eup %8977  ;;  %v3153_v11 = vmul.f32 1.442695, %v3074_v37 }
 0x191   :  { %v3151_v1 = vmul.f32 1.442695, %v3073_v40  ;;  %v10193_v28 = vpop.eup %8979  ;;  %v2920_v27 = vpop.xlane.xlu1 %2919  ;;  %v3278_v26 = vsel %vm2866_vm1, %v10189_v63, 0.0  ;;  %3270 = vadd.xlane.f32.xlu0 %v3269_v25 }
 0x192   :  { %v2917_v18 = vpop.xlane.xlu0 %2916  ;;  %8989 = vpow2.f32 %v3153_v11  ;;  %v3076_v41 = vsub.f32 %v9951_v49, %v2920_v27  ;;  %3279 = vadd.xlane.f32.xlu1 %v3278_v26  ;;  %v3275_v29 = vsel %vm2866_vm1, %v10193_v28, 0.0 }
 0x193   :  { %v3075_v44 = vsub.f32 %v9953_v52, %v2917_v18  ;;  %8991 = vpow2.f32 %v3151_v1 }
 0x194   :  { %v10199_v7 = vpop.eup %8981  ;;  %v3157_v59 = vmul.f32 1.442695, %v3076_v41 }
 0x195   :  { %v3155_v39 = vmul.f32 1.442695, %v3075_v44  ;;  %v10203_v32 = vpop.eup %8983  ;;  %v2926_v16 = vpop.xlane.xlu1 %2925  ;;  %v3284_v54 = vsel %vm2866_vm1, %v10199_v7, 0.0  ;;  %3276 = vadd.xlane.f32.xlu0 %v3275_v29 }
 0x196   :  { %v2923_v47 = vpop.xlane.xlu0 %2922  ;;  %8993 = vpow2.f32 %v3157_v59  ;;  %v3078_v49 = vsub.f32 %v9955_v53, %v2926_v16  ;;  %3285 = vadd.xlane.f32.xlu1 %v3284_v54  ;;  %v3281_v37 = vsel %vm2866_vm1, %v10203_v32, 0.0 }
 0x197   :  { %v3077_v52 = vsub.f32 %v9959_v56, %v2923_v47  ;;  %8995 = vpow2.f32 %v3155_v39 }
 0x198   :  { %v10209_v20 = vpop.eup %8985  ;;  %v3161_v46 = vmul.f32 1.442695, %v3078_v49 }
 0x199   :  { %v3159_v58 = vmul.f32 1.442695, %v3077_v52  ;;  %v10213_v40 = vpop.eup %8987  ;;  %v2932_v11 = vpop.xlane.xlu1 %2931  ;;  %v3290_v25 = vsel %vm2866_vm1, %v10209_v20, 0.0  ;;  %3282 = vadd.xlane.f32.xlu0 %v3281_v37 }
 0x19a   :  { %v2929_v1 = vpop.xlane.xlu0 %2928  ;;  %8997 = vpow2.f32 %v3161_v46  ;;  %v3080_v53 = vsub.f32 %v9967_v61, %v2932_v11  ;;  %3291 = vadd.xlane.f32.xlu1 %v3290_v25  ;;  %v3287_v41 = vsel %vm2866_vm1, %v10213_v40, 0.0 }
 0x19b   :  { %v3079_v56 = vsub.f32 %v9969_v0, %v2929_v1  ;;  %8999 = vpow2.f32 %v3159_v58 }
 0x19c   :  { %v10219_v27 = vpop.eup %8989  ;;  %v3165_v18 = vmul.f32 1.442695, %v3080_v53 }
 0x19d   :  { %v3163_v26 = vmul.f32 1.442695, %v3079_v56  ;;  %v10223_v44 = vpop.eup %8991  ;;  %v2938_v59 = vpop.xlane.xlu1 %2937  ;;  %v3296_v29 = vsel %vm2866_vm1, %v10219_v27, 0.0  ;;  %3288 = vadd.xlane.f32.xlu0 %v3287_v41 }
 0x19e   :  { %v2935_v39 = vpop.xlane.xlu0 %2934  ;;  %9001 = vpow2.f32 %v3165_v18  ;;  %v3082_v61 = vsub.f32 %v9971_v2, %v2938_v59  ;;  %3297 = vadd.xlane.f32.xlu1 %v3296_v29  ;;  %v3293_v49 = vsel %vm2866_vm1, %v10223_v44, 0.0 }
 0x19f   :  { %v3081_v0 = vsub.f32 %v9975_v8, %v2935_v39  ;;  %9003 = vpow2.f32 %v3163_v26 }
 0x1a0   :  { %v10229_v16 = vpop.eup %8993  ;;  %v3169_v47 = vmul.f32 1.442695, %v3082_v61 }
 0x1a1   :  { %v3167_v54 = vmul.f32 1.442695, %v3081_v0  ;;  %v10233_v52 = vpop.eup %8995  ;;  %v2944_v46 = vpop.xlane.xlu1 %2943  ;;  %v3302_v37 = vsel %vm2866_vm1, %v10229_v16, 0.0  ;;  %3294 = vadd.xlane.f32.xlu0 %v3293_v49  ;;  %v3956_v0 = vld [vmem:[%s12001_s1] sm:$0xff] }
 0x1a2   :  { %v2941_v58 = vpop.xlane.xlu0 %2940  ;;  %9005 = vpow2.f32 %v3169_v47  ;;  %v3084_v2 = vsub.f32 %v9983_v14, %v2944_v46  ;;  %3303 = vadd.xlane.f32.xlu1 %v3302_v37  ;;  %v3299_v53 = vsel %vm2866_vm1, %v10233_v52, 0.0  ;;  %8261 = vmatprep.mubr.msk.f32.mxu0 %vm4084_vm2, %v3956_v0  ;;  %v3960_v49 = vld [vmem:[%s12001_s1 + $0x20] sm:$0xff] }
 0x1a3   :  { %v3083_v8 = vsub.f32 %v9985_v19, %v2941_v58  ;;  %9007 = vpow2.f32 %v3167_v54  ;;  %8271 = vmatprep.mubr.msk.f32.mxu1 %vm4084_vm2, %v3960_v49 }
 0x1a4   :  { %v10239_v11 = vpop.eup %8997  ;;  %v3173_v1 = vmul.f32 1.442695, %v3084_v2 }
 0x1a5   :  { %v3171_v25 = vmul.f32 1.442695, %v3083_v8  ;;  %v10243_v56 = vpop.eup %8999  ;;  %v2950_v18 = vpop.xlane.xlu1 %2949  ;;  %v3308_v41 = vsel %vm2866_vm1, %v10239_v11, 0.0  ;;  %3300 = vadd.xlane.f32.xlu0 %v3299_v53 }
 0x1a6   :  { %v2947_v26 = vpop.xlane.xlu0 %2946  ;;  %9009 = vpow2.f32 %v3173_v1  ;;  %v3086_v14 = vsub.f32 %v9987_v21, %v2950_v18  ;;  %3309 = vadd.xlane.f32.xlu1 %v3308_v41  ;;  %v3305_v59 = vsel %vm2866_vm1, %v10243_v56, 0.0 }
 0x1a7   :  { %v3085_v19 = vsub.f32 %v9991_v24, %v2947_v26  ;;  %9011 = vpow2.f32 %v3171_v25 }
 0x1a8   :  { %v10251_v39 = vpop.eup %9001  ;;  %v3177_v29 = vmul.f32 1.442695, %v3086_v14 }
 0x1a9   :  { %v3175_v61 = vmul.f32 1.442695, %v3085_v19  ;;  %v10256_v47 = vpop.eup %9003  ;;  %v2956_v54 = vpop.xlane.xlu1 %2955  ;;  %v3314_v24 = vsel %vm2866_vm1, %v10251_v39, 0.0  ;;  %3306 = vadd.xlane.f32.xlu0 %v3305_v59 }
 0x1aa   :  { %v2953_v21 = vpop.xlane.xlu0 %2952  ;;  %9013 = vpow2.f32 %v3177_v29  ;;  %v3088_v46 = vsub.f32 %v9999_v33, %v2956_v54  ;;  %3315 = vadd.xlane.f32.xlu1 %v3314_v24  ;;  %v3311_v1 = vsel %vm2866_vm1, %v10256_v47, 0.0 }
 0x1ab   :  { %v3087_v58 = vsub.f32 %v10001_v36, %v2953_v21  ;;  %9015 = vpow2.f32 %v3175_v61 }
 0x1ac   :  { %v10267_v37 = vpop.eup %9005  ;;  %v3181_v2 = vmul.f32 1.442695, %v3088_v46 }
 0x1ad   :  { %v3179_v8 = vmul.f32 1.442695, %v3087_v58  ;;  %v10271_v25 = vpop.eup %9007  ;;  %v2962_v53 = vpop.xlane.xlu1 %2961  ;;  %v3320_v33 = vsel %vm2866_vm1, %v10267_v37, 0.0  ;;  %3312 = vadd.xlane.f32.xlu0 %v3311_v1 }
 0x1ae   :  { %v2959_v18 = vpop.xlane.xlu0 %2958  ;;  %9017 = vpow2.f32 %v3181_v2  ;;  %v3090_v36 = vsub.f32 %v10003_v38, %v2962_v53  ;;  %3321 = vadd.xlane.f32.xlu1 %v3320_v33  ;;  %v3317_v59 = vsel %vm2866_vm1, %v10271_v25, 0.0 }
 0x1af   :  { %v3089_v26 = vsub.f32 %v10007_v43, %v2959_v18  ;;  %9019 = vpow2.f32 %v3179_v8 }
 0x1b0   :  { %v10277_v41 = vpop.eup %9009  ;;  %v3185_v14 = vmul.f32 1.442695, %v3090_v36 }
 0x1b1   :  { %v3183_v19 = vmul.f32 1.442695, %v3089_v26  ;;  %v10281_v29 = vpop.eup %9011  ;;  %v2968_v61 = vpop.xlane.xlu1 %2967  ;;  %v3326_v54 = vsel %vm2866_vm1, %v10277_v41, 0.0  ;;  %3318 = vadd.xlane.f32.xlu0 %v3317_v59 }
 0x1b2   :  { %v2965_v0 = vpop.xlane.xlu0 %2964  ;;  %9021 = vpow2.f32 %v3185_v14  ;;  %v3092_v38 = vsub.f32 %v10015_v50, %v2968_v61  ;;  %3327 = vadd.xlane.f32.xlu1 %v3326_v54  ;;  %v3323_v46 = vsel %vm2866_vm1, %v10281_v29, 0.0 }
 0x1b3   :  { %v3091_v43 = vsub.f32 %v10017_v55, %v2965_v0  ;;  %9023 = vpow2.f32 %v3183_v19 }
 0x1b4   :  { %v10287_v21 = vpop.eup %9013  ;;  %v3189_v24 = vmul.f32 1.442695, %v3092_v38 }
 0x1b5   :  { %v3187_v49 = vmul.f32 1.442695, %v3091_v43  ;;  %v10291_v58 = vpop.eup %9015  ;;  %v2974_v2 = vpop.xlane.xlu1 %2973  ;;  %v3332_v1 = vsel %vm2866_vm1, %v10287_v21, 0.0  ;;  %3324 = vadd.xlane.f32.xlu0 %v3323_v46 }
 0x1b6   :  { %v2971_v8 = vpop.xlane.xlu0 %2970  ;;  %9025 = vpow2.f32 %v3189_v24  ;;  %v3094_v50 = vsub.f32 %v10019_v57, %v2974_v2  ;;  %3333 = vadd.xlane.f32.xlu1 %v3332_v1  ;;  %v3329_v36 = vsel %vm2866_vm1, %v10291_v58, 0.0 }
 0x1b7   :  { %v3093_v55 = vsub.f32 %v10023_v60, %v2971_v8  ;;  %9027 = vpow2.f32 %v3187_v49 }
 0x1b8   :  { %v10297_v53 = vpop.eup %9017  ;;  %v3193_v18 = vmul.f32 1.442695, %v3094_v50 }
 0x1b9   :  { %v3191_v33 = vmul.f32 1.442695, %v3093_v55  ;;  %v10301_v26 = vpop.eup %9019  ;;  %v2980_v14 = vpop.xlane.xlu1 %2979  ;;  %v3338_v59 = vsel %vm2866_vm1, %v10297_v53, 0.0  ;;  %3330 = vadd.xlane.f32.xlu0 %v3329_v36 }
 0x1ba   :  { %v2977_v19 = vpop.xlane.xlu0 %2976  ;;  %9029 = vpow2.f32 %v3193_v18  ;;  %v3096_v57 = vsub.f32 %v10031_v9, %v2980_v14  ;;  %3339 = vadd.xlane.f32.xlu1 %v3338_v59  ;;  %v3335_v38 = vsel %vm2866_vm1, %v10301_v26, 0.0 }
 0x1bb   :  { %v3095_v60 = vsub.f32 %v10033_v12, %v2977_v19  ;;  %9031 = vpow2.f32 %v3191_v33 }
 0x1bc   :  { %v10307_v61 = vpop.eup %9021  ;;  %v3197_v0 = vmul.f32 1.442695, %v3096_v57 }
 0x1bd   :  { %v3195_v54 = vmul.f32 1.442695, %v3095_v60  ;;  %v10311_v43 = vpop.eup %9023  ;;  %v2986_v24 = vpop.xlane.xlu1 %2985  ;;  %v3344_v46 = vsel %vm2866_vm1, %v10307_v61, 0.0  ;;  %3336 = vadd.xlane.f32.xlu0 %v3335_v38 }
 0x1be   :  { %v2983_v49 = vpop.xlane.xlu0 %2982  ;;  %9033 = vpow2.f32 %v3197_v0  ;;  %v3098_v9 = vsub.f32 %v10035_v15, %v2986_v24  ;;  %3345 = vadd.xlane.f32.xlu1 %v3344_v46  ;;  %v3341_v50 = vsel %vm2866_vm1, %v10311_v43, 0.0 }
 0x1bf   :  { %v3097_v12 = vsub.f32 %v10039_v23, %v2983_v49  ;;  %9035 = vpow2.f32 %v3195_v54 }
 0x1c0   :  { %v10317_v2 = vpop.eup %9025  ;;  %v3201_v8 = vmul.f32 1.442695, %v3098_v9 }
 0x1c1   :  { %v3199_v1 = vmul.f32 1.442695, %v3097_v12  ;;  %v10321_v55 = vpop.eup %9027  ;;  %v2992_v18 = vpop.xlane.xlu1 %2991  ;;  %v3350_v36 = vsel %vm2866_vm1, %v10317_v2, 0.0  ;;  %3342 = vadd.xlane.f32.xlu0 %v3341_v50 }
 0x1c2   :  { %v2989_v33 = vpop.xlane.xlu0 %2988  ;;  %9037 = vpow2.f32 %v3201_v8  ;;  %v3100_v15 = vsub.f32 %v10047_v34, %v2992_v18  ;;  %3351 = vadd.xlane.f32.xlu1 %v3350_v36  ;;  %v3347_v57 = vsel %vm2866_vm1, %v10321_v55, 0.0 }
 0x1c3   :  { %v3099_v23 = vsub.f32 %v10049_v42, %v2989_v33  ;;  %9039 = vpow2.f32 %v3199_v1 }
 0x1c4   :  { %v10327_v14 = vpop.eup %9029  ;;  %v3205_v19 = vmul.f32 1.442695, %v3100_v15 }
 0x1c5   :  { %v3203_v59 = vmul.f32 1.442695, %v3099_v23  ;;  %v10331_v60 = vpop.eup %9031  ;;  %v2998_v0 = vpop.xlane.xlu1 %2997  ;;  %v3356_v38 = vsel %vm2866_vm1, %v10327_v14, 0.0  ;;  %3348 = vadd.xlane.f32.xlu0 %v3347_v57 }
 0x1c6   :  { %v2995_v54 = vpop.xlane.xlu0 %2994  ;;  %9041 = vpow2.f32 %v3205_v19  ;;  %v3102_v34 = vsub.f32 %v10051_v45, %v2998_v0  ;;  %3357 = vadd.xlane.f32.xlu1 %v3356_v38  ;;  %v3353_v9 = vsel %vm2866_vm1, %v10331_v60, 0.0 }
 0x1c7   :  { %v3101_v42 = vsub.f32 %v10055_v48, %v2995_v54  ;;  %9043 = vpow2.f32 %v3203_v59 }
 0x1c8   :  { %v10337_v24 = vpop.eup %9033  ;;  %v3209_v49 = vmul.f32 1.442695, %v3102_v34 }
 0x1c9   :  { %v3207_v46 = vmul.f32 1.442695, %v3101_v42  ;;  %v10341_v12 = vpop.eup %9035  ;;  %v3004_v8 = vpop.xlane.xlu1 %3003  ;;  %v3362_v50 = vsel %vm2866_vm1, %v10337_v24, 0.0  ;;  %3354 = vadd.xlane.f32.xlu0 %v3353_v9 }
 0x1ca   :  { %v3001_v1 = vpop.xlane.xlu0 %3000  ;;  %9045 = vpow2.f32 %v3209_v49  ;;  %v3104_v45 = vsub.f32 %v10063_v62, %v3004_v8  ;;  %3363 = vadd.xlane.f32.xlu1 %v3362_v50  ;;  %v3359_v15 = vsel %vm2866_vm1, %v10341_v12, 0.0 }
 0x1cb   :  { %v3103_v48 = vsub.f32 %v10065_v5, %v3001_v1  ;;  %9047 = vpow2.f32 %v3207_v46 }
 0x1cc   :  { %v10347_v18 = vpop.eup %9037  ;;  %v3213_v33 = vmul.f32 1.442695, %v3104_v45 }
 0x1cd   :  { %v3211_v36 = vmul.f32 1.442695, %v3103_v48  ;;  %v10351_v23 = vpop.eup %9039  ;;  %v3010_v19 = vpop.xlane.xlu1 %3009  ;;  %v3368_v57 = vsel %vm2866_vm1, %v10347_v18, 0.0  ;;  %3360 = vadd.xlane.f32.xlu0 %v3359_v15 }
 0x1ce   :  { %v3007_v59 = vpop.xlane.xlu0 %3006  ;;  %9049 = vpow2.f32 %v3213_v33  ;;  %v3106_v62 = vsub.f32 %v10067_v10, %v3010_v19  ;;  %3369 = vadd.xlane.f32.xlu1 %v3368_v57  ;;  %v3365_v34 = vsel %vm2866_vm1, %v10351_v23, 0.0  ;;  %v12050_v57 = vld [vmem:[#allocation4_spill] sm:$0xff] }
 0x1cf   :  { %v3105_v5 = vsub.f32 %v10071_v22, %v3007_v59  ;;  %9051 = vpow2.f32 %v3211_v36  ;;  %v12048_v22 = vld [vmem:[#allocation2_spill] sm:$0xff] }
 0x1d0   :  { %v10357_v0 = vpop.eup %9041  ;;  %v3217_v54 = vmul.f32 1.442695, %v3106_v62 }
 0x1d1   :  { %v3215_v38 = vmul.f32 1.442695, %v3105_v5  ;;  %v10361_v42 = vpop.eup %9043  ;;  %v3016_v49 = vpop.xlane.xlu1 %3015  ;;  %v3374_v9 = vsel %vm2866_vm1, %v10357_v0, 0.0  ;;  %3366 = vadd.xlane.f32.xlu0 %v3365_v34 }
 0x1d2   :  { %v3013_v46 = vpop.xlane.xlu0 %3012  ;;  %9053 = vpow2.f32 %v3217_v54  ;;  %v3108_v10 = vsub.f32 %v10079_v35, %v3016_v49  ;;  %3375 = vadd.xlane.f32.xlu1 %v3374_v9  ;;  %v3371_v48 = vsel %vm2866_vm1, %v10361_v42, 0.0  ;;  %v12049_v35 = vld [vmem:[#allocation3_spill] sm:$0xff] }
 0x1d3   :  { %v3107_v8 = vsub.f32 %v12048_v22, %v3013_v46  ;;  %9055 = vpow2.f32 %v3215_v38  ;;  %v12052_v22 = vld [vmem:[#allocation5_spill] sm:$0xff] }
 0x1d4   :  { %v10367_v1 = vpop.eup %9045  ;;  %v3221_v50 = vmul.f32 1.442695, %v3108_v10 }
 0x1d5   :  { %v3219_v45 = vmul.f32 1.442695, %v3107_v8  ;;  %v10371_v33 = vpop.eup %9047  ;;  %v3022_v36 = vpop.xlane.xlu1 %3021  ;;  %v3380_v19 = vsel %vm2866_vm1, %v10367_v1, 0.0  ;;  %3372 = vadd.xlane.f32.xlu0 %v3371_v48 }
 0x1d6   :  { %v3019_v15 = vpop.xlane.xlu0 %3018  ;;  %9057 = vpow2.f32 %v3221_v50  ;;  %v3110_v59 = vsub.f32 %v12049_v35, %v3022_v36  ;;  %3381 = vadd.xlane.f32.xlu1 %v3380_v19  ;;  %v3377_v34 = vsel %vm2866_vm1, %v10371_v33, 0.0  ;;  %v12053_v50 = vld [vmem:[#allocation6_spill] sm:$0xff] }
 0x1d7   :  { %v3109_v62 = vsub.f32 %v12050_v57, %v3019_v15  ;;  %9059 = vpow2.f32 %v3219_v45 }
 0x1d8   :  { %v10377_v5 = vpop.eup %9049  ;;  %v3225_v54 = vmul.f32 1.442695, %v3110_v59 }
 0x1d9   :  { %v3223_v38 = vmul.f32 1.442695, %v3109_v62  ;;  %v10381_v49 = vpop.eup %9051  ;;  %v3028_v46 = vpop.xlane.xlu1 %3027  ;;  %v3386_v10 = vsel %vm2866_vm1, %v10377_v5, 0.0  ;;  %3378 = vadd.xlane.f32.xlu0 %v3377_v34 }
 0x1da   :  { %12051 = vst [vmem:[#allocation2_spill] sm:$0xff] %v10381_v49  ;;  %v3025_v9 = vpop.xlane.xlu0 %3024  ;;  %9061 = vpow2.f32 %v3225_v54  ;;  %v3112_v8 = vsub.f32 %v12052_v22, %v3028_v46  ;;  %3387 = vadd.xlane.f32.xlu1 %v3386_v10  ;;  %v3383_v19 = vsel %vm2866_vm1, %v10381_v49, 0.0  ;;  %v12056_v54 = vld [vmem:[#allocation7_spill] sm:$0xff]  ;;  %v12057_v46 = vld [vmem:[#allocation8_spill] sm:$0xff] }
 0x1db   :  { %v3111_v45 = vsub.f32 %v12053_v50, %v3025_v9  ;;  %9063 = vpow2.f32 %v3223_v38 }
 0x1dc   :  { %v10387_v48 = vpop.eup %9053  ;;  %v3229_v36 = vmul.f32 1.442695, %v3112_v8 }
 0x1dd   :  { %12054 = vst [vmem:[#allocation3_spill] sm:$0xff] %v10387_v48  ;;  %v3227_v15 = vmul.f32 1.442695, %v3111_v45  ;;  %v10391_v35 = vpop.eup %9055  ;;  %v3034_v59 = vpop.xlane.xlu1 %3033  ;;  %v3392_v62 = vsel %vm2866_vm1, %v10387_v48, 0.0  ;;  %3384 = vadd.xlane.f32.xlu0 %v3383_v19  ;;  %v12059_v19 = vld [vmem:[#allocation9_spill] sm:$0xff] }
 0x1de   :  { %12055 = vst [vmem:[#allocation4_spill] sm:$0xff] %v10391_v35  ;;  %v3031_v57 = vpop.xlane.xlu0 %3030  ;;  %9065 = vpow2.f32 %v3229_v36  ;;  %v3114_v34 = vsub.f32 %v12056_v54, %v3034_v59  ;;  %3393 = vadd.xlane.f32.xlu1 %v3392_v62  ;;  %v3389_v8 = vsel %vm2866_vm1, %v10391_v35, 0.0 }
 0x1df   :  { %v3113_v38 = vsub.f32 %v12057_v46, %v3031_v57  ;;  %9067 = vpow2.f32 %v3227_v15  ;;  %v12060_v57 = vld [vmem:[#allocation10_spill] sm:$0xff] }
 0x1e0   :  { %v10397_v9 = vpop.eup %9057  ;;  %v3233_v10 = vmul.f32 1.442695, %v3114_v34 }
 0x1e1   :  { %v3231_v22 = vmul.f32 1.442695, %v3113_v38  ;;  %v10401_v50 = vpop.eup %9059  ;;  %v3040_v45 = vpop.xlane.xlu1 %3039  ;;  %v3398_v36 = vsel %vm2866_vm1, %v10397_v9, 0.0  ;;  %3390 = vadd.xlane.f32.xlu0 %v3389_v8  ;;  %v12063_v8 = vld [vmem:[#allocation11_spill] sm:$0xff] }
 0x1e2   :  { %12058 = vst [vmem:[#allocation5_spill] sm:$0xff] %v10401_v50  ;;  %v3037_v49 = vpop.xlane.xlu0 %3036  ;;  %9069 = vpow2.f32 %v3233_v10  ;;  %v3116_v59 = vsub.f32 %v12059_v19, %v3040_v45  ;;  %3399 = vadd.xlane.f32.xlu1 %v3398_v36  ;;  %v3395_v46 = vsel %vm2866_vm1, %v10401_v50, 0.0  ;;  %v12064_v45 = vld [vmem:[#allocation12_spill] sm:$0xff] }
 0x1e3   :  { %v3115_v15 = vsub.f32 %v12060_v57, %v3037_v49  ;;  %9071 = vpow2.f32 %v3231_v22 }
 0x1e4   :  { %v10407_v62 = vpop.eup %9061  ;;  %v3237_v54 = vmul.f32 1.442695, %v3116_v59 }
 0x1e5   :  { %12061 = vst [vmem:[#allocation6_spill] sm:$0xff] %v10407_v62  ;;  %v3235_v34 = vmul.f32 1.442695, %v3115_v15  ;;  %v10411_v38 = vpop.eup %9063  ;;  %v3046_v35 = vpop.xlane.xlu1 %3045  ;;  %v3404_v10 = vsel %vm2866_vm1, %v10407_v62, 0.0  ;;  %3396 = vadd.xlane.f32.xlu0 %v3395_v46 }
 0x1e6   :  { %12062 = vst [vmem:[#allocation7_spill] sm:$0xff] %v10411_v38  ;;  %v3043_v48 = vpop.xlane.xlu0 %3042  ;;  %9073 = vpow2.f32 %v3237_v54  ;;  %v3118_v49 = vsub.f32 %v12063_v8, %v3046_v35  ;;  %3405 = vadd.xlane.f32.xlu1 %v3404_v10  ;;  %v3401_v57 = vsel %vm2866_vm1, %v10411_v38, 0.0  ;;  %v12066_v35 = vld [vmem:[#allocation13_spill] sm:$0xff] }
 0x1e7   :  { %v3117_v22 = vsub.f32 %v12064_v45, %v3043_v48  ;;  %9075 = vpow2.f32 %v3235_v34  ;;  %v12067_v34 = vld [vmem:[#allocation14_spill] sm:$0xff] }
 0x1e8   :  { %v10417_v36 = vpop.eup %9065  ;;  %v3241_v19 = vmul.f32 1.442695, %v3118_v49 }
 0x1e9   :  { %v3239_v59 = vmul.f32 1.442695, %v3117_v22  ;;  %v10421_v15 = vpop.eup %9067  ;;  %v3052_v50 = vpop.xlane.xlu1 %3051  ;;  %v3410_v46 = vsel %vm2866_vm1, %v10417_v36, 0.0  ;;  %3402 = vadd.xlane.f32.xlu0 %v3401_v57 }
 0x1ea   :  { %12065 = vst [vmem:[#allocation8_spill] sm:$0xff] %v10421_v15  ;;  %v3049_v54 = vpop.xlane.xlu0 %3048  ;;  %9077 = vpow2.f32 %v3241_v19  ;;  %v3120_v48 = vsub.f32 %v12066_v35, %v3052_v50  ;;  %3411 = vadd.xlane.f32.xlu1 %v3410_v46  ;;  %v3407_v22 = vsel %vm2866_vm1, %v10421_v15, 0.0  ;;  %v12068_v50 = vld [vmem:[#allocation15_spill] sm:$0xff] }
 0x1eb   :  { %v3119_v10 = vsub.f32 %v12067_v34, %v3049_v54  ;;  %9079 = vpow2.f32 %v3239_v59  ;;  %v12069_v59 = vld [vmem:[#allocation16_spill] sm:$0xff] }
 0x1ec   :  { %v10427_v8 = vpop.eup %9069  ;;  %v3245_v49 = vmul.f32 1.442695, %v3120_v48 }
 0x1ed   :  { %v3243_v45 = vmul.f32 1.442695, %v3119_v10  ;;  %v10431_v38 = vpop.eup %9071  ;;  %v3058_v62 = vpop.xlane.xlu1 %3057  ;;  %v3416_v57 = vsel %vm2866_vm1, %v10427_v8, 0.0  ;;  %3408 = vadd.xlane.f32.xlu0 %v3407_v22 }
 0x1ee   :  { %v3055_v19 = vpop.xlane.xlu0 %3054  ;;  %9081 = vpow2.f32 %v3245_v49  ;;  %v3122_v46 = vsub.f32 %v12068_v50, %v3058_v62  ;;  %3417 = vadd.xlane.f32.xlu1 %v3416_v57  ;;  %v3413_v10 = vsel %vm2866_vm1, %v10431_v38, 0.0 }
 0x1ef   :  { %v3121_v54 = vsub.f32 %v12069_v59, %v3055_v19  ;;  %9083 = vpow2.f32 %v3243_v45 }
 0x1f0   :  { %v10437_v35 = vpop.eup %9073  ;;  %v3249_v48 = vmul.f32 1.442695, %v3122_v46 }
 0x1f1   :  { %v3247_v34 = vmul.f32 1.442695, %v3121_v54  ;;  %v10441_v15 = vpop.eup %9075  ;;  %v3422_v22 = vsel %vm2866_vm1, %v10437_v35, 0.0  ;;  %3414 = vadd.xlane.f32.xlu0 %v3413_v10 }
 0x1f2   :  { %9085 = vpow2.f32 %v3249_v48  ;;  %3423 = vadd.xlane.f32.xlu1 %v3422_v22  ;;  %v3419_v49 = vsel %vm2866_vm1, %v10441_v15, 0.0 }
 0x1f3   :  { %9087 = vpow2.f32 %v3247_v34 }
 0x1f4   :  { %v10445_v62 = vpop.eup %9077 }
 0x1f5   :  { %12070 = vst [vmem:[#allocation9_spill] sm:$0xff] %v10445_v62  ;;  %v10449_v45 = vpop.eup %9079  ;;  %v3428_v57 = vsel %vm2866_vm1, %v10445_v62, 0.0  ;;  %3420 = vadd.xlane.f32.xlu0 %v3419_v49 }
 0x1f6   :  { %12071 = vst [vmem:[#allocation10_spill] sm:$0xff] %v10449_v45  ;;  %3429 = vadd.xlane.f32.xlu1 %v3428_v57  ;;  %v3425_v50 = vsel %vm2866_vm1, %v10449_v45, 0.0 }
 0x1f8   :  { %v10453_v19 = vpop.eup %9081 }
 0x1f9   :  { %12072 = vst [vmem:[#allocation11_spill] sm:$0xff] %v10453_v19  ;;  %v10457_v46 = vpop.eup %9083  ;;  %v3434_v59 = vsel %vm2866_vm1, %v10453_v19, 0.0  ;;  %3426 = vadd.xlane.f32.xlu0 %v3425_v50 }
 0x1fa   :  { %12073 = vst [vmem:[#allocation12_spill] sm:$0xff] %v10457_v46  ;;  %3435 = vadd.xlane.f32.xlu1 %v3434_v59  ;;  %v3431_v48 = vsel %vm2866_vm1, %v10457_v46, 0.0 }
 0x1fc   :  { %v10461_v54 = vpop.eup %9085 }
 0x1fd   :  { %12074 = vst [vmem:[#allocation13_spill] sm:$0xff] %v10461_v54  ;;  %v10465_v34 = vpop.eup %9087  ;;  %v3440_v10 = vsel %vm2866_vm1, %v10461_v54, 0.0  ;;  %3432 = vadd.xlane.f32.xlu0 %v3431_v48 }
 0x1fe   :  { %12075 = vst [vmem:[#allocation14_spill] sm:$0xff] %v10465_v34  ;;  %3441 = vadd.xlane.f32.xlu1 %v3440_v10  ;;  %v3437_v22 = vsel %vm2866_vm1, %v10465_v34, 0.0 }
 0x201   :  { %3438 = vadd.xlane.f32.xlu0 %v3437_v22 }
 0x20e   :  { %v3256_v49 = vpop.xlane.xlu1 %3255 }
 0x20f   :  { %9089 = vrcp.f32 %v3256_v49 }
 0x212   :  { %v3262_v57 = vpop.xlane.xlu1 %3261  ;;  %v3253_v50 = vpop.xlane.xlu0 %3252 }
 0x213   :  { %9091 = vrcp.f32 %v3262_v57 }
 0x214   :  { %9093 = vrcp.f32 %v3253_v50 }
 0x216   :  { %v3259_v59 = vpop.xlane.xlu0 %3258 }
 0x217   :  { %v3268_v19 = vpop.xlane.xlu1 %3267  ;;  %9095 = vrcp.f32 %v3259_v59 }
 0x218   :  { %9097 = vrcp.f32 %v3268_v19 }
 0x219   :  { %v9090_v46 = vpop.eup %9089 }
 0x21a   :  { %v3265_v45 = vpop.xlane.xlu0 %3264  ;;  %v3446_v54 = vmul.f32 %v9090_v46, %v10151_v51 }
 0x21b   :  { %v3274_v48 = vpop.xlane.xlu1 %3273  ;;  %9099 = vrcp.f32 %v3265_v45 }
 0x21c   :  { %9101 = vrcp.f32 %v3274_v48  ;;  %3572 = vst.msk [vmem:[%s12002_s3 + $0x8] sm:$0xff] %vm2866_vm1, %v3446_v54 }
 0x21d   :  { %v9092_v10 = vpop.eup %9091 }
 0x21e   :  { %v9094_v22 = vpop.eup %9093  ;;  %v3271_v49 = vpop.xlane.xlu0 %3270  ;;  %v3450_v57 = vmul.f32 %v9092_v10, %v10155_v31  ;;  %v3636_v31 = vsel %vm2866_vm1, %v3446_v54, 0.0 }
 0x21f   :  { %v3280_v50 = vpop.xlane.xlu1 %3279  ;;  %9103 = vrcp.f32 %v3271_v49  ;;  %v3444_v19 = vmul.f32 %v9094_v22, %v10159_v30 }
 0x220   :  { %9105 = vrcp.f32 %v3280_v50  ;;  %3574 = vst.msk [vmem:[%s12002_s3 + $0x18] sm:$0xff] %vm2866_vm1, %v3450_v57  ;;  %v3645_v49 = vsel %vm2866_vm1, %v3450_v57, 0.0 }
 0x221   :  { %v9096_v51 = vpop.eup %9095  ;;  %3571 = vst.msk [vmem:[%s12002_s3] sm:$0xff] %vm2866_vm1, %v3444_v19  ;;  %v3635_v45 = vsel %vm2866_vm1, %v3444_v19, 0.0  ;;  %v8833_v46 = vpack.c.bf16 %v3446_v54, %v3444_v19 }
 0x222   :  { %v9098_v59 = vpop.eup %9097  ;;  %v3637_v48 = vadd.f32 %v3636_v31, %v3635_v45  ;;  %v3277_v30 = vpop.xlane.xlu0 %3276  ;;  %v3448_v10 = vmul.f32 %v9096_v51, %v10165_v3  ;;  %v3957_v3 = vld [vmem:[%s12001_s1 + $0x8] sm:$0xff] }
 0x223   :  { %v3286_v22 = vpop.xlane.xlu1 %3285  ;;  %8834 = vmatprep.subr.bf16.mxu0 %v8833_v46  ;;  %9107 = vrcp.f32 %v3277_v30  ;;  %v3454_v50 = vmul.f32 %v9098_v59, %v10169_v4  ;;  %v3958_v4 = vld [vmem:[%s12001_s1 + $0x10] sm:$0xff] }
 0x224   :  { %9109 = vrcp.f32 %v3286_v22  ;;  %v3638_v34 = vrot.slane %v3637_v48, 4  ;;  %8836 = vmatpush3.bf16.msra.mxu0 %v8833_v46  ;;  %3573 = vst.msk [vmem:[%s12002_s3 + $0x10] sm:$0xff] %vm2866_vm1, %v3448_v10  ;;  %v3644_v54 = vsel %vm2866_vm1, %v3448_v10, 0.0  ;;  %v8837_v19 = vpack.c.bf16 %v3450_v57, %v3448_v10 }
 0x225   :  { %v9100_v51 = vpop.eup %9099  ;;  %v3646_v45 = vadd.f32 %v3645_v49, %v3644_v54  ;;  %3576 = vst.msk [vmem:[%s12002_s3 + $0x28] sm:$0xff] %vm2866_vm1, %v3454_v50  ;;  %v3654_v22 = vsel %vm2866_vm1, %v3454_v50, 0.0  ;;  %v3961_v49 = vld [vmem:[%s12001_s1 + $0x28] sm:$0xff] }
 0x226   :  { %v9102_v31 = vpop.eup %9101  ;;  %v3639_v46 = vadd.f32 %v3638_v34, %v3637_v48  ;;  %8838 = vmatprep.subr.bf16.mxu1 %v8837_v19  ;;  %v3283_v59 = vpop.xlane.xlu0 %3282  ;;  %v3452_v57 = vmul.f32 %v9100_v51, %v10173_v6  ;;  %v3962_v48 = vld [vmem:[%s12001_s1 + $0x30] sm:$0xff] }
 0x227   :  { %v3292_v30 = vpop.xlane.xlu1 %3291  ;;  %v3647_v10 = vrot.slane %v3646_v45, 4  ;;  %9111 = vrcp.f32 %v3283_v59  ;;  %8840 = vmatpush3.bf16.msra.mxu1 %v8837_v19  ;;  %8262 = vmatmul.mubr.msk.f32.vlgmr.msra.gmra.mrb[32].mxu0 %vm4084_vm2, %v3957_v3  ;;  %v3458_v54 = vmul.f32 %v9102_v31, %v10179_v13  ;;  %v3959_v13 = vld [vmem:[%s12001_s1 + $0x18] sm:$0xff] }
 0x228   :  { %v3640_v62 = vrot.slane %v3639_v46, 2  ;;  %9113 = vrcp.f32 %v3292_v30  ;;  %3575 = vst.msk [vmem:[%s12002_s3 + $0x20] sm:$0xff] %vm2866_vm1, %v3452_v57  ;;  %v3653_v6 = vsel %vm2866_vm1, %v3452_v57, 0.0  ;;  %v8841_v34 = vpack.c.bf16 %v3454_v50, %v3452_v57  ;;  %8264 = vmatprep.mubr.msk.f32.mxu0 %vm4084_vm2, %v3958_v4  ;;  %v3964_v57 = vld [vmem:[%s12001_s1 + $0x40] sm:$0xff] }
 0x229   :  { %v9104_v19 = vpop.eup %9103  ;;  %v3648_v3 = vadd.f32 %v3647_v10, %v3646_v45  ;;  %v3655_v51 = vadd.f32 %v3654_v22, %v3653_v6  ;;  %3578 = vst.msk [vmem:[%s12002_s3 + $0x38] sm:$0xff] %vm2866_vm1, %v3458_v54  ;;  %v3663_v45 = vsel %vm2866_vm1, %v3458_v54, 0.0 }
 0x22a   :  { %v9106_v31 = vpop.eup %9105  ;;  %v3641_v50 = vadd.f32 %v3640_v62, %v3639_v46  ;;  %8842 = vmatprep.subr.bf16.mxu0 %v8841_v34  ;;  %v3289_v4 = vpop.xlane.xlu0 %3288  ;;  %8272 = vmatmul.mubr.msk.f32.vlgmr.msra.gmra.mrb[32].mxu1 %vm4084_vm2, %v3961_v49  ;;  %v3456_v59 = vmul.f32 %v9104_v19, %v10183_v17  ;;  %v3963_v62 = vld [vmem:[%s12001_s1 + $0x38] sm:$0xff] }
 0x22b   :  { %v3649_v30 = vrot.slane %v3648_v3, 2  ;;  %v3298_v10 = vpop.xlane.xlu1 %3297  ;;  %v3656_v22 = vrot.slane %v3655_v51, 4  ;;  %9115 = vrcp.f32 %v3289_v4  ;;  %8844 = vmatpush3.bf16.msra.mxu0 %v8841_v34  ;;  %8274 = vmatprep.mubr.msk.f32.mxu1 %vm4084_vm2, %v3962_v48  ;;  %v3462_v46 = vmul.f32 %v9106_v31, %v10189_v63  ;;  %v3968_v34 = vld [vmem:[%s12001_s1 + $0x60] sm:$0xff] }
 0x22c   :  { %v3642_v17 = vrot.slane %v3641_v50, 1  ;;  %9117 = vrcp.f32 %v3298_v10  ;;  %3577 = vst.msk [vmem:[%s12002_s3 + $0x30] sm:$0xff] %vm2866_vm1, %v3456_v59  ;;  %v3662_v49 = vsel %vm2866_vm1, %v3456_v59, 0.0  ;;  %v8845_v6 = vpack.c.bf16 %v3458_v54, %v3456_v59  ;;  %8265 = vmatmul.mubr.msk.f32.gmra.mrb[34].mxu0 %vm4084_vm2, %v3959_v13  ;;  %v3965_v54 = vld [vmem:[%s12001_s1 + $0x48] sm:$0xff] }
 0x22d   :  { %v9108_v48 = vpop.eup %9107  ;;  %v3650_v19 = vadd.f32 %v3649_v30, %v3648_v3  ;;  %v3657_v63 = vadd.f32 %v3656_v22, %v3655_v51  ;;  %v3664_v31 = vadd.f32 %v3663_v45, %v3662_v49  ;;  %8281 = vmatprep.mubr.msk.f32.mxu0 %vm4084_vm2, %v3964_v57  ;;  %3580 = vst.msk [vmem:[%s12002_s3 + $0x48] sm:$0xff] %vm2866_vm1, %v3462_v46  ;;  %v3672_v51 = vsel %vm2866_vm1, %v3462_v46, 0.0  ;;  %v3966_v45 = vld [vmem:[%s12001_s1 + $0x50] sm:$0xff] }
 0x22e   :  { %v9110_v13 = vpop.eup %9109  ;;  %v3643_v4 = vadd.f32 %v3642_v17, %v3641_v50  ;;  %8846 = vmatprep.subr.bf16.mxu1 %v8845_v6  ;;  %v3295_v59 = vpop.xlane.xlu0 %3294  ;;  %8275 = vmatmul.mubr.msk.f32.gmra.mrb[34].mxu1 %vm4084_vm2, %v3963_v62  ;;  %v3460_v3 = vmul.f32 %v9108_v48, %v10193_v28  ;;  %v3969_v50 = vld [vmem:[%s12001_s1 + $0x68] sm:$0xff]  ;;  %v3970_v49 = vld [vmem:[%s12001_s1 + $0x70] sm:$0xff] }
 0x22f   :  { %v3651_v57 = vrot.slane %v3650_v19, 1  ;;  %v3658_v30 = vrot.slane %v3657_v63, 2  ;;  %v3304_v10 = vpop.xlane.xlu1 %3303  ;;  %v3665_v22 = vrot.slane %v3664_v31, 4  ;;  %9119 = vrcp.f32 %v3295_v59  ;;  %8848 = vmatpush3.bf16.msra.mxu1 %v8845_v6  ;;  %8291 = vmatprep.mubr.msk.f32.mxu1 %vm4084_vm2, %v3968_v34 }
 0x230   :  { %3924 = vst.msk [vmem:[%s12003_s4] sm:$0x1] %vm3923_vm3, %v3643_v4  ;;  %9121 = vrcp.f32 %v3304_v10  ;;  %v3671_v28 = vsel %vm2866_vm1, %v3460_v3, 0.0  ;;  %v8849_v62 = vpack.c.bf16 %v3462_v46, %v3460_v3  ;;  %8282 = vmatmul.mubr.msk.f32.vlgmr.msra.gmra.mrb[36].mxu0 %vm4084_vm2, %v3965_v54  ;;  %v3466_v17 = vmul.f32 %v9110_v13, %v10199_v7  ;;  %v3967_v10 = vld [vmem:[%s12001_s1 + $0x58] sm:$0xff] }
 0x231   :  { %3579 = vst.msk [vmem:[%s12002_s3 + $0x40] sm:$0xff] %vm2866_vm1, %v3460_v3  ;;  %v9112_v6 = vpop.eup %9111  ;;  %v3652_v34 = vadd.f32 %v3651_v57, %v3650_v19  ;;  %v3659_v48 = vadd.f32 %v3658_v30, %v3657_v63  ;;  %v3666_v4 = vadd.f32 %v3665_v22, %v3664_v31  ;;  %v3673_v59 = vadd.f32 %v3672_v51, %v3671_v28  ;;  %v3972_v63 = vld [vmem:[%s12001_s1 + $0x80] sm:$0xff]  ;;  %v3971_v51 = vld [vmem:[%s12001_s1 + $0x78] sm:$0xff] }
 0x232   :  { %8284 = vmatprep.mubr.msk.f32.mxu0 %vm4084_vm2, %v3966_v45  ;;  %v9114_v46 = vpop.eup %9113  ;;  %8850 = vmatprep.subr.bf16.mxu0 %v8849_v62  ;;  %v3301_v54 = vpop.xlane.xlu0 %3300  ;;  %v3464_v7 = vmul.f32 %v9112_v6, %v10203_v32  ;;  %3582 = vst.msk [vmem:[%s12002_s3 + $0x58] sm:$0xff] %vm2866_vm1, %v3466_v17  ;;  %v3681_v19 = vsel %vm2866_vm1, %v3466_v17, 0.0  ;;  %v3976_v22 = vld [vmem:[%s12001_s1 + $0xa0] sm:$0xff] }
 0x233   :  { %8292 = vmatmul.mubr.msk.f32.vlgmr.msra.gmra.mrb[36].mxu1 %vm4084_vm2, %v3969_v50  ;;  %3925 = vst.msk [vmem:[%s12003_s4 + $0x1] sm:$0x1] %vm3923_vm3, %v3652_v34  ;;  %v3660_v31 = vrot.slane %v3659_v48, 1  ;;  %v3667_v13 = vrot.slane %v3666_v4, 2  ;;  %v3310_v3 = vpop.xlane.xlu1 %3309  ;;  %v3674_v32 = vrot.slane %v3673_v59, 4  ;;  %9123 = vrcp.f32 %v3301_v54  ;;  %8852 = vmatpush3.bf16.msra.mxu0 %v8849_v62  ;;  %v3973_v34 = vld [vmem:[%s12001_s1 + $0x88] sm:$0xff] }
 0x234   :  { %8294 = vmatprep.mubr.msk.f32.mxu1 %vm4084_vm2, %v3970_v49  ;;  %9125 = vrcp.f32 %v3310_v3  ;;  %3581 = vst.msk [vmem:[%s12002_s3 + $0x50] sm:$0xff] %vm2866_vm1, %v3464_v7  ;;  %v3680_v45 = vsel %vm2866_vm1, %v3464_v7, 0.0  ;;  %v8853_v57 = vpack.c.bf16 %v3466_v17, %v3464_v7  ;;  %8285 = vmatmul.mubr.msk.f32.gmra.mrb[38].mxu0 %vm4084_vm2, %v3967_v10  ;;  %v3470_v30 = vmul.f32 %v9114_v46, %v10209_v20  ;;  %v3977_v7 = vld [vmem:[%s12001_s1 + $0xa8] sm:$0xff] }
 0x235   :  { %v9116_v50 = vpop.eup %9115  ;;  %v3661_v28 = vadd.f32 %v3660_v31, %v3659_v48  ;;  %v3668_v62 = vadd.f32 %v3667_v13, %v3666_v4  ;;  %v3675_v49 = vadd.f32 %v3674_v32, %v3673_v59  ;;  %v3682_v6 = vadd.f32 %v3681_v19, %v3680_v45  ;;  %8301 = vmatprep.mubr.msk.f32.mxu0 %vm4084_vm2, %v3972_v63  ;;  %v3974_v4 = vld [vmem:[%s12001_s1 + $0x90] sm:$0xff] }
 0x236   :  { %v9118_v17 = vpop.eup %9117  ;;  %8854 = vmatprep.subr.bf16.mxu1 %v8853_v57  ;;  %v3307_v10 = vpop.xlane.xlu0 %3306  ;;  %v3468_v20 = vmul.f32 %v9116_v50, %v10213_v40  ;;  %3584 = vst.msk [vmem:[%s12002_s3 + $0x68] sm:$0xff] %vm2866_vm1, %v3470_v30  ;;  %v3690_v48 = vsel %vm2866_vm1, %v3470_v30, 0.0  ;;  %v3978_v13 = vld [vmem:[%s12001_s1 + $0xb0] sm:$0xff] }
 0x237   :  { %8295 = vmatmul.mubr.msk.f32.gmra.mrb[38].mxu1 %vm4084_vm2, %v3971_v51  ;;  %3926 = vst.msk [vmem:[%s12003_s4 + $0x2] sm:$0x1] %vm3923_vm3, %v3661_v28  ;;  %v3669_v59 = vrot.slane %v3668_v62, 1  ;;  %v3676_v46 = vrot.slane %v3675_v49, 2  ;;  %v3316_v54 = vpop.xlane.xlu1 %3315  ;;  %v3683_v40 = vrot.slane %v3682_v6, 4  ;;  %9127 = vrcp.f32 %v3307_v10 }
 0x238   :  { %8856 = vmatpush3.bf16.msra.mxu1 %v8853_v57  ;;  %8311 = vmatprep.mubr.msk.f32.mxu1 %vm4084_vm2, %v3976_v22  ;;  %9129 = vrcp.f32 %v3316_v54  ;;  %3583 = vst.msk [vmem:[%s12002_s3 + $0x60] sm:$0xff] %vm2866_vm1, %v3468_v20  ;;  %v3689_v19 = vsel %vm2866_vm1, %v3468_v20, 0.0  ;;  %v8857_v63 = vpack.c.bf16 %v3470_v30, %v3468_v20  ;;  %v3474_v31 = vmul.f32 %v9118_v17, %v10219_v27  ;;  %v3975_v22 = vld [vmem:[%s12001_s1 + $0x98] sm:$0xff] }
 0x239   :  { %8302 = vmatmul.mubr.msk.f32.vlgmr.msra.gmra.mrb[40].mxu0 %vm4084_vm2, %v3973_v34  ;;  %v9120_v3 = vpop.eup %9119  ;;  %v3670_v32 = vadd.f32 %v3669_v59, %v3668_v62  ;;  %v3677_v51 = vadd.f32 %v3676_v46, %v3675_v49  ;;  %v3684_v45 = vadd.f32 %v3683_v40, %v3682_v6  ;;  %v3691_v57 = vadd.f32 %v3690_v48, %v3689_v19  ;;  %v3980_v62 = vld [vmem:[%s12001_s1 + $0xc0] sm:$0xff]  ;;  %v3979_v17 = vld [vmem:[%s12001_s1 + $0xb8] sm:$0xff]  ;;  %v3981_v19 = vld [vmem:[%s12001_s1 + $0xc8] sm:$0xff] }
 0x23a   :  { %8304 = vmatprep.mubr.msk.f32.mxu0 %vm4084_vm2, %v3974_v4  ;;  %v9122_v30 = vpop.eup %9121  ;;  %8858 = vmatprep.subr.bf16.mxu0 %v8857_v63  ;;  %v3313_v50 = vpop.xlane.xlu0 %3312  ;;  %v3472_v27 = vmul.f32 %v9120_v3, %v10223_v44  ;;  %3586 = vst.msk [vmem:[%s12002_s3 + $0x78] sm:$0xff] %vm2866_vm1, %v3474_v31  ;;  %v3699_v28 = vsel %vm2866_vm1, %v3474_v31, 0.0  ;;  %v3984_v4 = vld [vmem:[%s12001_s1 + $0xe0] sm:$0xff]  ;;  %v3982_v3 = vld [vmem:[%s12001_s1 + $0xd0] sm:$0xff] }
 0x23b   :  { %8312 = vmatmul.mubr.msk.f32.vlgmr.msra.gmra.mrb[40].mxu1 %vm4084_vm2, %v3977_v7  ;;  %3927 = vst.msk [vmem:[%s12003_s4 + $0x3] sm:$0x1] %vm3923_vm3, %v3670_v32  ;;  %v3678_v49 = vrot.slane %v3677_v51, 1  ;;  %v3685_v6 = vrot.slane %v3684_v45, 2  ;;  %v3322_v34 = vpop.xlane.xlu1 %3321  ;;  %v3692_v44 = vrot.slane %v3691_v57, 4  ;;  %9131 = vrcp.f32 %v3313_v50  ;;  %8860 = vmatpush3.bf16.msra.mxu0 %v8857_v63 }
 0x23c   :  { %8314 = vmatprep.mubr.msk.f32.mxu1 %vm4084_vm2, %v3978_v13  ;;  %9133 = vrcp.f32 %v3322_v34  ;;  %3585 = vst.msk [vmem:[%s12002_s3 + $0x70] sm:$0xff] %vm2866_vm1, %v3472_v27  ;;  %v3698_v10 = vsel %vm2866_vm1, %v3472_v27, 0.0  ;;  %v8861_v20 = vpack.c.bf16 %v3474_v31, %v3472_v27  ;;  %v3478_v48 = vmul.f32 %v9122_v30, %v10229_v16  ;;  %v3986_v27 = vld [vmem:[%s12001_s1 + $0xf0] sm:$0xff] }
 0x23d   :  { %8305 = vmatmul.mubr.msk.f32.gmra.mrb[42].mxu0 %vm4084_vm2, %v3975_v22  ;;  %v9124_v59 = vpop.eup %9123  ;;  %v3679_v46 = vadd.f32 %v3678_v49, %v3677_v51  ;;  %v3686_v54 = vadd.f32 %v3685_v6, %v3684_v45  ;;  %v3693_v40 = vadd.f32 %v3692_v44, %v3691_v57  ;;  %v3700_v7 = vadd.f32 %v3699_v28, %v3698_v10  ;;  %v3985_v57 = vld [vmem:[%s12001_s1 + $0xe8] sm:$0xff]  ;;  %v3983_v44 = vld [vmem:[%s12001_s1 + $0xd8] sm:$0xff] }
 0x23e   :  { %8321 = vmatprep.mubr.msk.f32.mxu0 %vm4084_vm2, %v3980_v62  ;;  %v9126_v63 = vpop.eup %9125  ;;  %8862 = vmatprep.subr.bf16.mxu1 %v8861_v20  ;;  %v3319_v31 = vpop.xlane.xlu0 %3318  ;;  %v3476_v16 = vmul.f32 %v9124_v59, %v10233_v52  ;;  %3588 = vst.msk [vmem:[%s12002_s3 + $0x88] sm:$0xff] %vm2866_vm1, %v3478_v48  ;;  %v3708_v13 = vsel %vm2866_vm1, %v3478_v48, 0.0 }
 0x23f   :  { %8315 = vmatmul.mubr.msk.f32.gmra.mrb[42].mxu1 %vm4084_vm2, %v3979_v17  ;;  %3928 = vst.msk [vmem:[%s12003_s4 + $0x4] sm:$0x1] %vm3923_vm3, %v3679_v46  ;;  %v3687_v32 = vrot.slane %v3686_v54, 1  ;;  %v3694_v51 = vrot.slane %v3693_v40, 2  ;;  %v3328_v45 = vpop.xlane.xlu1 %3327  ;;  %v3701_v52 = vrot.slane %v3700_v7, 4  ;;  %9135 = vrcp.f32 %v3319_v31 }
 0x240   :  { %8864 = vmatpush3.bf16.msra.mxu1 %v8861_v20  ;;  %8331 = vmatprep.mubr.msk.f32.mxu1 %vm4084_vm2, %v3984_v4  ;;  %9137 = vrcp.f32 %v3328_v45  ;;  %3587 = vst.msk [vmem:[%s12002_s3 + $0x80] sm:$0xff] %vm2866_vm1, %v3476_v16  ;;  %v3707_v22 = vsel %vm2866_vm1, %v3476_v16, 0.0  ;;  %v8865_v30 = vpack.c.bf16 %v3478_v48, %v3476_v16  ;;  %v3482_v50 = vmul.f32 %v9126_v63, %v10239_v11  ;;  %v3988_v48 = vld [vmem:[%s12001_s1 + $0x100] sm:$0xff] }
 0x241   :  { %8322 = vmatmul.mubr.msk.f32.vlgmr.msra.gmra.mrb[44].mxu0 %vm4084_vm2, %v3981_v19  ;;  %v9128_v28 = vpop.eup %9127  ;;  %v3688_v62 = vadd.f32 %v3687_v32, %v3686_v54  ;;  %v3695_v49 = vadd.f32 %v3694_v51, %v3693_v40  ;;  %v3702_v6 = vadd.f32 %v3701_v52, %v3700_v7  ;;  %v3709_v34 = vadd.f32 %v3708_v13, %v3707_v22  ;;  %v3987_v54 = vld [vmem:[%s12001_s1 + $0xf8] sm:$0xff]  ;;  %v3992_v63 = vld [vmem:[%s12001_s1 + $0x120] sm:$0xff]  ;;  %v3989_v51 = vld [vmem:[%s12001_s1 + $0x108] sm:$0xff] }
 0x242   :  { %8324 = vmatprep.mubr.msk.f32.mxu0 %vm4084_vm2, %v3982_v3  ;;  %v9130_v17 = vpop.eup %9129  ;;  %8866 = vmatprep.subr.bf16.mxu0 %v8865_v30  ;;  %v3325_v10 = vpop.xlane.xlu0 %3324  ;;  %v3480_v11 = vmul.f32 %v9128_v28, %v10243_v56  ;;  %3590 = vst.msk [vmem:[%s12002_s3 + $0x98] sm:$0xff] %vm2866_vm1, %v3482_v50  ;;  %v3717_v20 = vsel %vm2866_vm1, %v3482_v50, 0.0  ;;  %v3990_v22 = vld [vmem:[%s12001_s1 + $0x110] sm:$0xff]  ;;  %v3993_v28 = vld [vmem:[%s12001_s1 + $0x128] sm:$0xff] }
 0x243   :  { %8332 = vmatmul.mubr.msk.f32.vlgmr.msra.gmra.mrb[44].mxu1 %vm4084_vm2, %v3985_v57  ;;  %3929 = vst.msk [vmem:[%s12003_s4 + $0x5] sm:$0x1] %vm3923_vm3, %v3688_v62  ;;  %v3696_v4 = vrot.slane %v3695_v49, 1  ;;  %v3703_v59 = vrot.slane %v3702_v6, 2  ;;  %v3334_v46 = vpop.xlane.xlu1 %3333  ;;  %v3710_v56 = vrot.slane %v3709_v34, 4  ;;  %9139 = vrcp.f32 %v3325_v10  ;;  %8868 = vmatpush3.bf16.msra.mxu0 %v8865_v30 }
 0x244   :  { %8334 = vmatprep.mubr.msk.f32.mxu1 %vm4084_vm2, %v3986_v27  ;;  %9141 = vrcp.f32 %v3334_v46  ;;  %3589 = vst.msk [vmem:[%s12002_s3 + $0x90] sm:$0xff] %vm2866_vm1, %v3480_v11  ;;  %v3716_v40 = vsel %vm2866_vm1, %v3480_v11, 0.0  ;;  %v8869_v7 = vpack.c.bf16 %v3482_v50, %v3480_v11  ;;  %v3486_v19 = vmul.f32 %v9130_v17, %v10251_v39 }
 0x245   :  { %8325 = vmatmul.mubr.msk.f32.gmra.mrb[46].mxu0 %vm4084_vm2, %v3983_v44  ;;  %v9132_v31 = vpop.eup %9131  ;;  %v3697_v16 = vadd.f32 %v3696_v4, %v3695_v49  ;;  %v3704_v13 = vadd.f32 %v3703_v59, %v3702_v6  ;;  %v3711_v3 = vadd.f32 %v3710_v56, %v3709_v34  ;;  %v3718_v32 = vadd.f32 %v3717_v20, %v3716_v40  ;;  %v3994_v34 = vld [vmem:[%s12001_s1 + $0x130] sm:$0xff]  ;;  %v3996_v56 = vld [vmem:[%s12001_s1 + $0x140] sm:$0xff] }
 0x246   :  { %8341 = vmatprep.mubr.msk.f32.mxu0 %vm4084_vm2, %v3988_v48  ;;  %v9134_v45 = vpop.eup %9133  ;;  %8870 = vmatprep.subr.bf16.mxu1 %v8869_v7  ;;  %v3331_v52 = vpop.xlane.xlu0 %3330  ;;  %v3484_v39 = vmul.f32 %v9132_v31, %v10256_v47  ;;  %3592 = vst.msk [vmem:[%s12002_s3 + $0xa8] sm:$0xff] %vm2866_vm1, %v3486_v19  ;;  %v3726_v57 = vsel %vm2866_vm1, %v3486_v19, 0.0  ;;  %v3991_v48 = vld [vmem:[%s12001_s1 + $0x118] sm:$0xff] }
 0x247   :  { %8335 = vmatmul.mubr.msk.f32.gmra.mrb[46].mxu1 %vm4084_vm2, %v3987_v54  ;;  %3930 = vst.msk [vmem:[%s12003_s4 + $0x6] sm:$0x1] %vm3923_vm3, %v3697_v16  ;;  %v3705_v30 = vrot.slane %v3704_v13, 1  ;;  %v3712_v50 = vrot.slane %v3711_v3, 2  ;;  %v3340_v27 = vpop.xlane.xlu1 %3339  ;;  %v3719_v47 = vrot.slane %v3718_v32, 4  ;;  %9143 = vrcp.f32 %v3331_v52 }
 0x248   :  { %8872 = vmatpush3.bf16.msra.mxu1 %v8869_v7  ;;  %8351 = vmatprep.mubr.msk.f32.mxu1 %vm4084_vm2, %v3992_v63  ;;  %9145 = vrcp.f32 %v3340_v27  ;;  %3591 = vst.msk [vmem:[%s12002_s3 + $0xa0] sm:$0xff] %vm2866_vm1, %v3484_v39  ;;  %v3725_v62 = vsel %vm2866_vm1, %v3484_v39, 0.0  ;;  %v8873_v49 = vpack.c.bf16 %v3486_v19, %v3484_v39  ;;  %v3490_v6 = vmul.f32 %v9134_v45, %v10267_v37  ;;  %v3995_v19 = vld [vmem:[%s12001_s1 + $0x138] sm:$0xff]  ;;  %v3997_v39 = vld [vmem:[%s12001_s1 + $0x148] sm:$0xff] }
 0x249   :  { %8342 = vmatmul.mubr.msk.f32.vlgmr.msra.gmra.mrb[48].mxu0 %vm4084_vm2, %v3989_v51  ;;  %v9136_v44 = vpop.eup %9135  ;;  %v3706_v17 = vadd.f32 %v3705_v30, %v3704_v13  ;;  %v3713_v10 = vadd.f32 %v3712_v50, %v3711_v3  ;;  %v3720_v11 = vadd.f32 %v3719_v47, %v3718_v32  ;;  %v3727_v20 = vadd.f32 %v3726_v57, %v3725_v62  ;;  %v4000_v13 = vld [vmem:[%s12001_s1 + $0x160] sm:$0xff]  ;;  %v3998_v50 = vld [vmem:[%s12001_s1 + $0x150] sm:$0xff]  ;;  %v4001_v62 = vld [vmem:[%s12001_s1 + $0x168] sm:$0xff] }
 0x24a   :  { %8344 = vmatprep.mubr.msk.f32.mxu0 %vm4084_vm2, %v3990_v22  ;;  %v9138_v4 = vpop.eup %9137  ;;  %8874 = vmatprep.subr.bf16.mxu0 %v8873_v49  ;;  %v3337_v59 = vpop.xlane.xlu0 %3336  ;;  %v3488_v37 = vmul.f32 %v9136_v44, %v10271_v25  ;;  %3594 = vst.msk [vmem:[%s12002_s3 + $0xb8] sm:$0xff] %vm2866_vm1, %v3490_v6  ;;  %v3735_v46 = vsel %vm2866_vm1, %v3490_v6, 0.0  ;;  %v4002_v44 = vld [vmem:[%s12001_s1 + $0x170] sm:$0xff] }
 0x24b   :  { %8352 = vmatmul.mubr.msk.f32.vlgmr.msra.gmra.mrb[48].mxu1 %vm4084_vm2, %v3993_v28  ;;  %3931 = vst.msk [vmem:[%s12003_s4 + $0x7] sm:$0x1] %vm3923_vm3, %v3706_v17  ;;  %v3714_v54 = vrot.slane %v3713_v10, 1  ;;  %v3721_v40 = vrot.slane %v3720_v11, 2  ;;  %v3346_v7 = vpop.xlane.xlu1 %3345  ;;  %v3728_v25 = vrot.slane %v3727_v20, 4  ;;  %9147 = vrcp.f32 %v3337_v59  ;;  %8876 = vmatpush3.bf16.msra.mxu0 %v8873_v49 }
 0x24c   :  { %8354 = vmatprep.mubr.msk.f32.mxu1 %vm4084_vm2, %v3994_v34  ;;  %9149 = vrcp.f32 %v3346_v7  ;;  %3593 = vst.msk [vmem:[%s12002_s3 + $0xb0] sm:$0xff] %vm2866_vm1, %v3488_v37  ;;  %v3734_v63 = vsel %vm2866_vm1, %v3488_v37, 0.0  ;;  %v8877_v31 = vpack.c.bf16 %v3490_v6, %v3488_v37  ;;  %v3494_v16 = vmul.f32 %v9138_v4, %v10277_v41  ;;  %v3999_v4 = vld [vmem:[%s12001_s1 + $0x158] sm:$0xff] }
 0x24d   :  { %8345 = vmatmul.mubr.msk.f32.gmra.mrb[50].mxu0 %vm4084_vm2, %v3991_v48  ;;  %v9140_v3 = vpop.eup %9139  ;;  %v3715_v32 = vadd.f32 %v3714_v54, %v3713_v10  ;;  %v3722_v51 = vadd.f32 %v3721_v40, %v3720_v11  ;;  %v3729_v45 = vadd.f32 %v3728_v25, %v3727_v20  ;;  %v3736_v52 = vadd.f32 %v3735_v46, %v3734_v63  ;;  %v4003_v25 = vld [vmem:[%s12001_s1 + $0x178] sm:$0xff] }
 0x24e   :  { %8361 = vmatprep.mubr.msk.f32.mxu0 %vm4084_vm2, %v3996_v56  ;;  %v9142_v57 = vpop.eup %9141  ;;  %8878 = vmatprep.subr.bf16.mxu1 %v8877_v31  ;;  %v3343_v22 = vpop.xlane.xlu0 %3342  ;;  %v3492_v41 = vmul.f32 %v9140_v3, %v10281_v29  ;;  %3596 = vst.msk [vmem:[%s12002_s3 + $0xc8] sm:$0xff] %vm2866_vm1, %v3494_v16  ;;  %v3744_v30 = vsel %vm2866_vm1, %v3494_v16, 0.0  ;;  %v4004_v56 = vld [vmem:[%s12001_s1 + $0x180] sm:$0xff] }
 0x24f   :  { %8355 = vmatmul.mubr.msk.f32.gmra.mrb[50].mxu1 %vm4084_vm2, %v3995_v19  ;;  %3932 = vst.msk [vmem:[%s12003_s4 + $0x8] sm:$0x1] %vm3923_vm3, %v3715_v32  ;;  %v3723_v27 = vrot.slane %v3722_v51, 1  ;;  %v3730_v47 = vrot.slane %v3729_v45, 2  ;;  %v3352_v28 = vpop.xlane.xlu1 %3351  ;;  %v3737_v29 = vrot.slane %v3736_v52, 4  ;;  %9151 = vrcp.f32 %v3343_v22 }
 0x250   :  { %8880 = vmatpush3.bf16.msra.mxu1 %v8877_v31  ;;  %8371 = vmatprep.mubr.msk.f32.mxu1 %vm4084_vm2, %v4000_v13  ;;  %9153 = vrcp.f32 %v3352_v28  ;;  %3595 = vst.msk [vmem:[%s12002_s3 + $0xc0] sm:$0xff] %vm2866_vm1, %v3492_v41  ;;  %v3743_v49 = vsel %vm2866_vm1, %v3492_v41, 0.0  ;;  %v8881_v6 = vpack.c.bf16 %v3494_v16, %v3492_v41  ;;  %v3498_v34 = vmul.f32 %v9142_v57, %v10287_v21  ;;  %v4008_v16 = vld [vmem:[%s12001_s1 + $0x1a0] sm:$0xff]  ;;  %v4006_v41 = vld [vmem:[%s12001_s1 + $0x190] sm:$0xff] }
 0x251   :  { %8362 = vmatmul.mubr.msk.f32.vlgmr.msra.gmra.mrb[52].mxu0 %vm4084_vm2, %v3997_v39  ;;  %v9144_v17 = vpop.eup %9143  ;;  %v3724_v10 = vadd.f32 %v3723_v27, %v3722_v51  ;;  %v3731_v11 = vadd.f32 %v3730_v47, %v3729_v45  ;;  %v3738_v20 = vadd.f32 %v3737_v29, %v3736_v52  ;;  %v3745_v48 = vadd.f32 %v3744_v30, %v3743_v49  ;;  %v4005_v52 = vld [vmem:[%s12001_s1 + $0x188] sm:$0xff]  ;;  %v4010_v49 = vld [vmem:[%s12001_s1 + $0x1b0] sm:$0xff] }
 0x252   :  { %8364 = vmatprep.mubr.msk.f32.mxu0 %vm4084_vm2, %v3998_v50  ;;  %v9146_v59 = vpop.eup %9145  ;;  %8882 = vmatprep.subr.bf16.mxu0 %v8881_v6  ;;  %v3349_v37 = vpop.xlane.xlu0 %3348  ;;  %v3496_v21 = vmul.f32 %v9144_v17, %v10291_v58  ;;  %3598 = vst.msk [vmem:[%s12002_s3 + $0xd8] sm:$0xff] %vm2866_vm1, %v3498_v34  ;;  %v3753_v46 = vsel %vm2866_vm1, %v3498_v34, 0.0  ;;  %v4009_v47 = vld [vmem:[%s12001_s1 + $0x1a8] sm:$0xff] }
 0x253   :  { %8372 = vmatmul.mubr.msk.f32.vlgmr.msra.gmra.mrb[52].mxu1 %vm4084_vm2, %v4001_v62  ;;  %3933 = vst.msk [vmem:[%s12003_s4 + $0x9] sm:$0x1] %vm3923_vm3, %v3724_v10  ;;  %v3732_v54 = vrot.slane %v3731_v11, 1  ;;  %v3739_v40 = vrot.slane %v3738_v20, 2  ;;  %v3358_v7 = vpop.xlane.xlu1 %3357  ;;  %v3746_v58 = vrot.slane %v3745_v48, 4  ;;  %9155 = vrcp.f32 %v3349_v37  ;;  %8884 = vmatpush3.bf16.msra.mxu0 %v8881_v6 }
 0x254   :  { %8374 = vmatprep.mubr.msk.f32.mxu1 %vm4084_vm2, %v4002_v44  ;;  %9157 = vrcp.f32 %v3358_v7  ;;  %3597 = vst.msk [vmem:[%s12002_s3 + $0xd0] sm:$0xff] %vm2866_vm1, %v3496_v21  ;;  %v3752_v19 = vsel %vm2866_vm1, %v3496_v21, 0.0  ;;  %v8885_v63 = vpack.c.bf16 %v3498_v34, %v3496_v21  ;;  %v3502_v31 = vmul.f32 %v9146_v59, %v10297_v53  ;;  %v4012_v59 = vld [vmem:[%s12001_s1 + $0x1c0] sm:$0xff] }
 0x255   :  { %8365 = vmatmul.mubr.msk.f32.gmra.mrb[54].mxu0 %vm4084_vm2, %v3999_v4  ;;  %v9148_v13 = vpop.eup %9147  ;;  %v3733_v3 = vadd.f32 %v3732_v54, %v3731_v11  ;;  %v3740_v32 = vadd.f32 %v3739_v40, %v3738_v20  ;;  %v3747_v51 = vadd.f32 %v3746_v58, %v3745_v48  ;;  %v3754_v45 = vadd.f32 %v3753_v46, %v3752_v19  ;;  %v4007_v11 = vld [vmem:[%s12001_s1 + $0x198] sm:$0xff]  ;;  %v4016_v58 = vld [vmem:[%s12001_s1 + $0x1e0] sm:$0xff] }
 0x256   :  { %8381 = vmatprep.mubr.msk.f32.mxu0 %vm4084_vm2, %v4004_v56  ;;  %v9150_v39 = vpop.eup %9149  ;;  %8886 = vmatprep.subr.bf16.mxu1 %v8885_v63  ;;  %v3355_v57 = vpop.xlane.xlu0 %3354  ;;  %v3500_v53 = vmul.f32 %v9148_v13, %v10301_v26  ;;  %3600 = vst.msk [vmem:[%s12002_s3 + $0xe8] sm:$0xff] %vm2866_vm1, %v3502_v31  ;;  %v3762_v22 = vsel %vm2866_vm1, %v3502_v31, 0.0  ;;  %v4011_v56 = vld [vmem:[%s12001_s1 + $0x1b8] sm:$0xff]  ;;  %v4013_v13 = vld [vmem:[%s12001_s1 + $0x1c8] sm:$0xff] }
 0x257   :  { %8375 = vmatmul.mubr.msk.f32.gmra.mrb[54].mxu1 %vm4084_vm2, %v4003_v25  ;;  %3934 = vst.msk [vmem:[%s12003_s4 + $0xa] sm:$0x1] %vm3923_vm3, %v3733_v3  ;;  %v3741_v30 = vrot.slane %v3740_v32, 1  ;;  %v3748_v50 = vrot.slane %v3747_v51, 2  ;;  %v3364_v27 = vpop.xlane.xlu1 %3363  ;;  %v3755_v26 = vrot.slane %v3754_v45, 4  ;;  %9159 = vrcp.f32 %v3355_v57 }
 0x258   :  { %8888 = vmatpush3.bf16.msra.mxu1 %v8885_v63  ;;  %8391 = vmatprep.mubr.msk.f32.mxu1 %vm4084_vm2, %v4008_v16  ;;  %9161 = vrcp.f32 %v3364_v27  ;;  %3599 = vst.msk [vmem:[%s12002_s3 + $0xe0] sm:$0xff] %vm2866_vm1, %v3500_v53  ;;  %v3761_v28 = vsel %vm2866_vm1, %v3500_v53, 0.0  ;;  %v8889_v29 = vpack.c.bf16 %v3502_v31, %v3500_v53  ;;  %v3506_v62 = vmul.f32 %v9150_v39, %v10307_v61  ;;  %v4017_v53 = vld [vmem:[%s12001_s1 + $0x1e8] sm:$0xff] }
 0x259   :  { %8382 = vmatmul.mubr.msk.f32.vlgmr.msra.gmra.mrb[56].mxu0 %vm4084_vm2, %v4005_v52  ;;  %v9152_v6 = vpop.eup %9151  ;;  %v3742_v34 = vadd.f32 %v3741_v30, %v3740_v32  ;;  %v3749_v44 = vadd.f32 %v3748_v50, %v3747_v51  ;;  %v3756_v17 = vadd.f32 %v3755_v26, %v3754_v45  ;;  %v3763_v10 = vadd.f32 %v3762_v22, %v3761_v28  ;;  %v4014_v45 = vld [vmem:[%s12001_s1 + $0x1d0] sm:$0xff] }
 0x25a   :  { %8384 = vmatprep.mubr.msk.f32.mxu0 %vm4084_vm2, %v4006_v41  ;;  %v9154_v20 = vpop.eup %9153  ;;  %8890 = vmatprep.subr.bf16.mxu0 %v8889_v29  ;;  %v3361_v48 = vpop.xlane.xlu0 %3360  ;;  %v3504_v61 = vmul.f32 %v9152_v6, %v10311_v43  ;;  %3602 = vst.msk [vmem:[%s12002_s3 + $0xf8] sm:$0xff] %vm2866_vm1, %v3506_v62  ;;  %v3771_v4 = vsel %vm2866_vm1, %v3506_v62, 0.0  ;;  %v4018_v50 = vld [vmem:[%s12001_s1 + $0x1f0] sm:$0xff] }
 0x25b   :  { %8392 = vmatmul.mubr.msk.f32.vlgmr.msra.gmra.mrb[56].mxu1 %vm4084_vm2, %v4009_v47  ;;  %3935 = vst.msk [vmem:[%s12003_s4 + $0xb] sm:$0x1] %vm3923_vm3, %v3742_v34  ;;  %v3750_v37 = vrot.slane %v3749_v44, 1  ;;  %v3757_v21 = vrot.slane %v3756_v17, 2  ;;  %v3370_v46 = vpop.xlane.xlu1 %3369  ;;  %v3764_v43 = vrot.slane %v3763_v10, 4  ;;  %9163 = vrcp.f32 %v3361_v48  ;;  %8892 = vmatpush3.bf16.msra.mxu0 %v8889_v29 }
 0x25c   :  { %8394 = vmatprep.mubr.msk.f32.mxu1 %vm4084_vm2, %v4010_v49  ;;  %9165 = vrcp.f32 %v3370_v46  ;;  %3601 = vst.msk [vmem:[%s12002_s3 + $0xf0] sm:$0xff] %vm2866_vm1, %v3504_v61  ;;  %v3770_v54 = vsel %vm2866_vm1, %v3504_v61, 0.0  ;;  %v8893_v40 = vpack.c.bf16 %v3506_v62, %v3504_v61  ;;  %v3510_v7 = vmul.f32 %v9154_v20, %v10317_v2  ;;  %v4015_v62 = vld [vmem:[%s12001_s1 + $0x1d8] sm:$0xff] }
 0x25d   :  { %8385 = vmatmul.mubr.msk.f32.gmra.mrb[58].mxu0 %vm4084_vm2, %v4007_v11  ;;  %v9156_v25 = vpop.eup %9155  ;;  %v3751_v19 = vadd.f32 %v3750_v37, %v3749_v44  ;;  %v3758_v63 = vadd.f32 %v3757_v21, %v3756_v17  ;;  %v3765_v31 = vadd.f32 %v3764_v43, %v3763_v10  ;;  %v3772_v16 = vadd.f32 %v3771_v4, %v3770_v54  ;;  %v4020_v44 = vld [vmem:[%s12001_s1 + $0x200] sm:$0xff]  ;;  %v4019_v20 = vld [vmem:[%s12001_s1 + $0x1f8] sm:$0xff]  ;;  %v4021_v54 = vld [vmem:[%s12001_s1 + $0x208] sm:$0xff] }
 0x25e   :  { %8401 = vmatprep.mubr.msk.f32.mxu0 %vm4084_vm2, %v4012_v59  ;;  %v9158_v3 = vpop.eup %9157  ;;  %8894 = vmatprep.subr.bf16.mxu1 %v8893_v40  ;;  %v3367_v32 = vpop.xlane.xlu0 %3366  ;;  %v3508_v2 = vmul.f32 %v9156_v25, %v10321_v55  ;;  %3604 = vst.msk [vmem:[%s12002_s3 + $0x108] sm:$0xff] %vm2866_vm1, %v3510_v7  ;;  %v3780_v51 = vsel %vm2866_vm1, %v3510_v7, 0.0  ;;  %v4024_v59 = vld [vmem:[%s12001_s1 + $0x220] sm:$0xff]  ;;  %v4022_v25 = vld [vmem:[%s12001_s1 + $0x210] sm:$0xff] }
 0x25f   :  { %8395 = vmatmul.mubr.msk.f32.gmra.mrb[58].mxu1 %vm4084_vm2, %v4011_v56  ;;  %3936 = vst.msk [vmem:[%s12003_s4 + $0xc] sm:$0x1] %vm3923_vm3, %v3751_v19  ;;  %v3759_v52 = vrot.slane %v3758_v63, 1  ;;  %v3766_v39 = vrot.slane %v3765_v31, 2  ;;  %v3376_v57 = vpop.xlane.xlu1 %3375  ;;  %v3773_v55 = vrot.slane %v3772_v16, 4  ;;  %9167 = vrcp.f32 %v3367_v32 }
 0x260   :  { %8896 = vmatpush3.bf16.msra.mxu1 %v8893_v40  ;;  %8411 = vmatprep.mubr.msk.f32.mxu1 %vm4084_vm2, %v4016_v58  ;;  %9169 = vrcp.f32 %v3376_v57  ;;  %3603 = vst.msk [vmem:[%s12002_s3 + $0x100] sm:$0xff] %vm2866_vm1, %v3508_v2  ;;  %v3779_v22 = vsel %vm2866_vm1, %v3508_v2, 0.0  ;;  %v8897_v41 = vpack.c.bf16 %v3510_v7, %v3508_v2  ;;  %v3514_v30 = vmul.f32 %v9158_v3, %v10327_v14  ;;  %v4026_v2 = vld [vmem:[%s12001_s1 + $0x230] sm:$0xff] }
 0x261   :  { %8402 = vmatmul.mubr.msk.f32.vlgmr.msra.gmra.mrb[60].mxu0 %vm4084_vm2, %v4013_v13  ;;  %v9160_v27 = vpop.eup %9159  ;;  %v3760_v26 = vadd.f32 %v3759_v52, %v3758_v63  ;;  %v3767_v47 = vadd.f32 %v3766_v39, %v3765_v31  ;;  %v3774_v28 = vadd.f32 %v3773_v55, %v3772_v16  ;;  %v3781_v29 = vadd.f32 %v3780_v51, %v3779_v22  ;;  %v4025_v16 = vld [vmem:[%s12001_s1 + $0x228] sm:$0xff]  ;;  %v4023_v55 = vld [vmem:[%s12001_s1 + $0x218] sm:$0xff] }
 0x262   :  { %8404 = vmatprep.mubr.msk.f32.mxu0 %vm4084_vm2, %v4014_v45  ;;  %v9162_v49 = vpop.eup %9161  ;;  %8898 = vmatprep.subr.bf16.mxu0 %v8897_v41  ;;  %v3373_v6 = vpop.xlane.xlu0 %3372  ;;  %v3512_v14 = vmul.f32 %v9160_v27, %v10331_v60  ;;  %3606 = vst.msk [vmem:[%s12002_s3 + $0x118] sm:$0xff] %vm2866_vm1, %v3514_v30  ;;  %v3789_v34 = vsel %vm2866_vm1, %v3514_v30, 0.0 }
 0x263   :  { %8412 = vmatmul.mubr.msk.f32.vlgmr.msra.gmra.mrb[60].mxu1 %vm4084_vm2, %v4017_v53  ;;  %3937 = vst.msk [vmem:[%s12003_s4 + $0xd] sm:$0x1] %vm3923_vm3, %v3760_v26  ;;  %v3768_v17 = vrot.slane %v3767_v47, 1  ;;  %v3775_v10 = vrot.slane %v3774_v28, 2  ;;  %v3382_v11 = vpop.xlane.xlu1 %3381  ;;  %v3782_v60 = vrot.slane %v3781_v29, 4  ;;  %9171 = vrcp.f32 %v3373_v6  ;;  %8900 = vmatpush3.bf16.msra.mxu0 %v8897_v41 }
 0x264   :  { %8414 = vmatprep.mubr.msk.f32.mxu1 %vm4084_vm2, %v4018_v50  ;;  %9173 = vrcp.f32 %v3382_v11  ;;  %3605 = vst.msk [vmem:[%s12002_s3 + $0x110] sm:$0xff] %vm2866_vm1, %v3512_v14  ;;  %v3788_v48 = vsel %vm2866_vm1, %v3512_v14, 0.0  ;;  %v8901_v61 = vpack.c.bf16 %v3514_v30, %v3512_v14  ;;  %v3518_v4 = vmul.f32 %v9162_v49, %v10337_v24  ;;  %v4028_v30 = vld [vmem:[%s12001_s1 + $0x240] sm:$0xff] }
 0x265   :  { %8405 = vmatmul.mubr.msk.f32.gmra.mrb[62].mxu0 %vm4084_vm2, %v4015_v62  ;;  %v9164_v37 = vpop.eup %9163  ;;  %v3769_v21 = vadd.f32 %v3768_v17, %v3767_v47  ;;  %v3776_v46 = vadd.f32 %v3775_v10, %v3774_v28  ;;  %v3783_v43 = vadd.f32 %v3782_v60, %v3781_v29  ;;  %v3790_v56 = vadd.f32 %v3789_v34, %v3788_v48  ;;  %v4027_v47 = vld [vmem:[%s12001_s1 + $0x238] sm:$0xff]  ;;  %v4032_v49 = vld [vmem:[%s12001_s1 + $0x260] sm:$0xff]  ;;  %v4029_v10 = vld [vmem:[%s12001_s1 + $0x248] sm:$0xff] }
 0x266   :  { %8421 = vmatprep.mubr.msk.f32.mxu0 %vm4084_vm2, %v4020_v44  ;;  %v9166_v40 = vpop.eup %9165  ;;  %8902 = vmatprep.subr.bf16.mxu1 %v8901_v61  ;;  %v3379_v7 = vpop.xlane.xlu0 %3378  ;;  %v3516_v24 = vmul.f32 %v9164_v37, %v10341_v12  ;;  %3608 = vst.msk [vmem:[%s12002_s3 + $0x128] sm:$0xff] %vm2866_vm1, %v3518_v4  ;;  %v3798_v58 = vsel %vm2866_vm1, %v3518_v4, 0.0  ;;  %v4030_v48 = vld [vmem:[%s12001_s1 + $0x250] sm:$0xff]  ;;  %v4033_v37 = vld [vmem:[%s12001_s1 + $0x268] sm:$0xff] }
 0x267   :  { %8415 = vmatmul.mubr.msk.f32.gmra.mrb[62].mxu1 %vm4084_vm2, %v4019_v20  ;;  %3938 = vst.msk [vmem:[%s12003_s4 + $0xe] sm:$0x1] %vm3923_vm3, %v3769_v21  ;;  %v3777_v19 = vrot.slane %v3776_v46, 1  ;;  %v3784_v63 = vrot.slane %v3783_v43, 2  ;;  %v3388_v31 = vpop.xlane.xlu1 %3387  ;;  %v3791_v12 = vrot.slane %v3790_v56, 4  ;;  %9175 = vrcp.f32 %v3379_v7 }
 0x268   :  { %8904 = vmatpush3.bf16.msra.mxu1 %v8901_v61  ;;  %8431 = vmatprep.mubr.msk.f32.mxu1 %vm4084_vm2, %v4024_v59  ;;  %9177 = vrcp.f32 %v3388_v31  ;;  %3607 = vst.msk [vmem:[%s12002_s3 + $0x120] sm:$0xff] %vm2866_vm1, %v3516_v24  ;;  %v3797_v13 = vsel %vm2866_vm1, %v3516_v24, 0.0  ;;  %v8905_v3 = vpack.c.bf16 %v3518_v4, %v3516_v24  ;;  %v3522_v32 = vmul.f32 %v9166_v40, %v10347_v18 }
 0x269   :  { %8422 = vmatmul.mubr.msk.f32.vlgmr.msra.gmra.mrb[64].mxu0 %vm4084_vm2, %v4021_v54  ;;  %v9168_v51 = vpop.eup %9167  ;;  %v3778_v45 = vadd.f32 %v3777_v19, %v3776_v46  ;;  %v3785_v52 = vadd.f32 %v3784_v63, %v3783_v43  ;;  %v3792_v39 = vadd.f32 %v3791_v12, %v3790_v56  ;;  %v3799_v57 = vadd.f32 %v3798_v58, %v3797_v13  ;;  %v4034_v56 = vld [vmem:[%s12001_s1 + $0x270] sm:$0xff]  ;;  %v4036_v12 = vld [vmem:[%s12001_s1 + $0x280] sm:$0xff] }
 0x26a   :  { %8424 = vmatprep.mubr.msk.f32.mxu0 %vm4084_vm2, %v4022_v25  ;;  %v9170_v53 = vpop.eup %9169  ;;  %8906 = vmatprep.subr.bf16.mxu0 %v8905_v3  ;;  %v3385_v22 = vpop.xlane.xlu0 %3384  ;;  %v3520_v18 = vmul.f32 %v9168_v51, %v10351_v23  ;;  %3610 = vst.msk [vmem:[%s12002_s3 + $0x138] sm:$0xff] %vm2866_vm1, %v3522_v32  ;;  %v3807_v41 = vsel %vm2866_vm1, %v3522_v32, 0.0  ;;  %v4031_v25 = vld [vmem:[%s12001_s1 + $0x258] sm:$0xff] }
 0x26b   :  { %8432 = vmatmul.mubr.msk.f32.vlgmr.msra.gmra.mrb[64].mxu1 %vm4084_vm2, %v4025_v16  ;;  %3939 = vst.msk [vmem:[%s12003_s4 + $0xf] sm:$0x1] %vm3923_vm3, %v3778_v45  ;;  %v3786_v50 = vrot.slane %v3785_v52, 1  ;;  %v3793_v27 = vrot.slane %v3792_v39, 2  ;;  %v3394_v26 = vpop.xlane.xlu1 %3393  ;;  %v3800_v23 = vrot.slane %v3799_v57, 4  ;;  %9179 = vrcp.f32 %v3385_v22  ;;  %8908 = vmatpush3.bf16.msra.mxu0 %v8905_v3 }
 0x26c   :  { %8434 = vmatprep.mubr.msk.f32.mxu1 %vm4084_vm2, %v4026_v2  ;;  %9181 = vrcp.f32 %v3394_v26  ;;  %3609 = vst.msk [vmem:[%s12002_s3 + $0x130] sm:$0xff] %vm2866_vm1, %v3520_v18  ;;  %v3806_v28 = vsel %vm2866_vm1, %v3520_v18, 0.0  ;;  %v8909_v29 = vpack.c.bf16 %v3522_v32, %v3520_v18  ;;  %v3526_v62 = vmul.f32 %v9170_v53, %v10357_v0  ;;  %v4035_v32 = vld [vmem:[%s12001_s1 + $0x278] sm:$0xff]  ;;  %v4037_v18 = vld [vmem:[%s12001_s1 + $0x288] sm:$0xff]  ;;  %v4038_v26 = vld [vmem:[%s12001_s1 + $0x290] sm:$0xff] }
 0x26d   :  { %8425 = vmatmul.mubr.msk.f32.gmra.mrb[66].mxu0 %vm4084_vm2, %v4023_v55  ;;  %v9172_v6 = vpop.eup %9171  ;;  %v3787_v14 = vadd.f32 %v3786_v50, %v3785_v52  ;;  %v3794_v34 = vadd.f32 %v3793_v27, %v3792_v39  ;;  %v3801_v44 = vadd.f32 %v3800_v23, %v3799_v57  ;;  %v3808_v17 = vadd.f32 %v3807_v41, %v3806_v28  ;;  %v4040_v52 = vld [vmem:[%s12001_s1 + $0x2a0] sm:$0xff] }
 0x26e   :  { %8441 = vmatprep.mubr.msk.f32.mxu0 %vm4084_vm2, %v4028_v30  ;;  %v9174_v11 = vpop.eup %9173  ;;  %8910 = vmatprep.subr.bf16.mxu1 %v8909_v29  ;;  %v3391_v60 = vpop.xlane.xlu0 %3390  ;;  %v3524_v0 = vmul.f32 %v9172_v6, %v10361_v42  ;;  %3612 = vst.msk [vmem:[%s12002_s3 + $0x148] sm:$0xff] %vm2866_vm1, %v3526_v62  ;;  %v3816_v20 = vsel %vm2866_vm1, %v3526_v62, 0.0 }
 0x26f   :  { %8435 = vmatmul.mubr.msk.f32.gmra.mrb[66].mxu1 %vm4084_vm2, %v4027_v47  ;;  %3940 = vst.msk [vmem:[%s12003_s4 + $0x10] sm:$0x1] %vm3923_vm3, %v3787_v14  ;;  %v3795_v61 = vrot.slane %v3794_v34, 1  ;;  %v3802_v4 = vrot.slane %v3801_v44, 2  ;;  %v3400_v59 = vpop.xlane.xlu1 %3399  ;;  %v3809_v42 = vrot.slane %v3808_v17, 4  ;;  %9183 = vrcp.f32 %v3391_v60  ;;  %v12077_v14 = vld [vmem:[#allocation3_spill] sm:$0xff] }
 0x270   :  { %8912 = vmatpush3.bf16.msra.mxu1 %v8909_v29  ;;  %8451 = vmatprep.mubr.msk.f32.mxu1 %vm4084_vm2, %v4032_v49  ;;  %9185 = vrcp.f32 %v3400_v59  ;;  %3611 = vst.msk [vmem:[%s12002_s3 + $0x140] sm:$0xff] %vm2866_vm1, %v3524_v0  ;;  %v3815_v21 = vsel %vm2866_vm1, %v3524_v0, 0.0  ;;  %v8913_v46 = vpack.c.bf16 %v3526_v62, %v3524_v0  ;;  %v3530_v43 = vmul.f32 %v9174_v11, %v10367_v1  ;;  %v4041_v62 = vld [vmem:[%s12001_s1 + $0x2a8] sm:$0xff] }
 0x271   :  { %8442 = vmatmul.mubr.msk.f32.vlgmr.msra.gmra.mrb[68].mxu0 %vm4084_vm2, %v4029_v10  ;;  %v9176_v54 = vpop.eup %9175  ;;  %v3796_v40 = vadd.f32 %v3795_v61, %v3794_v34  ;;  %v3803_v7 = vadd.f32 %v3802_v4, %v3801_v44  ;;  %v3810_v24 = vadd.f32 %v3809_v42, %v3808_v17  ;;  %v3817_v58 = vadd.f32 %v3816_v20, %v3815_v21  ;;  %v4042_v44 = vld [vmem:[%s12001_s1 + $0x2b0] sm:$0xff]  ;;  %v4039_v20 = vld [vmem:[%s12001_s1 + $0x298] sm:$0xff] }
 0x272   :  { %8444 = vmatprep.mubr.msk.f32.mxu0 %vm4084_vm2, %v4030_v48  ;;  %v9178_v19 = vpop.eup %9177  ;;  %8914 = vmatprep.subr.bf16.mxu0 %v8913_v46  ;;  %v3397_v63 = vpop.xlane.xlu0 %3396  ;;  %v3528_v1 = vmul.f32 %v9176_v54, %v10371_v33  ;;  %3614 = vst.msk [vmem:[%s12002_s3 + $0x158] sm:$0xff] %vm2866_vm1, %v3530_v43  ;;  %v3825_v31 = vsel %vm2866_vm1, %v3530_v43, 0.0  ;;  %v12078_v4 = vld [vmem:[#allocation4_spill] sm:$0xff]  ;;  %v4043_v54 = vld [vmem:[%s12001_s1 + $0x2b8] sm:$0xff] }
 0x273   :  { %8452 = vmatmul.mubr.msk.f32.vlgmr.msra.gmra.mrb[68].mxu1 %vm4084_vm2, %v4033_v37  ;;  %3941 = vst.msk [vmem:[%s12003_s4 + $0x11] sm:$0x1] %vm3923_vm3, %v3796_v40  ;;  %v3804_v16 = vrot.slane %v3803_v7, 1  ;;  %v3811_v13 = vrot.slane %v3810_v24, 2  ;;  %v3406_v3 = vpop.xlane.xlu1 %3405  ;;  %v3818_v33 = vrot.slane %v3817_v58, 4  ;;  %9187 = vrcp.f32 %v3397_v63  ;;  %8916 = vmatpush3.bf16.msra.mxu0 %v8913_v46  ;;  %v4044_v37 = vld [vmem:[%s12001_s1 + $0x2c0] sm:$0xff] }
 0x274   :  { %8454 = vmatprep.mubr.msk.f32.mxu1 %vm4084_vm2, %v4034_v56  ;;  %9189 = vrcp.f32 %v3406_v3  ;;  %3613 = vst.msk [vmem:[%s12002_s3 + $0x150] sm:$0xff] %vm2866_vm1, %v3528_v1  ;;  %v3824_v2 = vsel %vm2866_vm1, %v3528_v1, 0.0  ;;  %v8917_v51 = vpack.c.bf16 %v3530_v43, %v3528_v1  ;;  %v3534_v45 = vmul.f32 %v9178_v19, %v10377_v5  ;;  %v12076_v5 = vld [vmem:[#allocation2_spill] sm:$0xff] }
 0x275   :  { %8445 = vmatmul.mubr.msk.f32.gmra.mrb[70].mxu0 %vm4084_vm2, %v4031_v25  ;;  %v9180_v39 = vpop.eup %9179  ;;  %v3805_v57 = vadd.f32 %v3804_v16, %v3803_v7  ;;  %v3812_v55 = vadd.f32 %v3811_v13, %v3810_v24  ;;  %v3819_v53 = vadd.f32 %v3818_v33, %v3817_v58  ;;  %v3826_v22 = vadd.f32 %v3825_v31, %v3824_v2  ;;  %v4048_v58 = vld [vmem:[%s12001_s1 + $0x2e0] sm:$0xff] }
 0x276   :  { %8461 = vmatprep.mubr.msk.f32.mxu0 %vm4084_vm2, %v4036_v12  ;;  %v9182_v41 = vpop.eup %9181  ;;  %8918 = vmatprep.subr.bf16.mxu1 %v8917_v51  ;;  %v3403_v30 = vpop.xlane.xlu0 %3402  ;;  %v3532_v50 = vmul.f32 %v9180_v39, %v12076_v5  ;;  %3616 = vst.msk [vmem:[%s12002_s3 + $0x168] sm:$0xff] %vm2866_vm1, %v3534_v45  ;;  %v3834_v27 = vsel %vm2866_vm1, %v3534_v45, 0.0  ;;  %v4045_v12 = vld [vmem:[%s12001_s1 + $0x2c8] sm:$0xff] }
 0x277   :  { %8455 = vmatmul.mubr.msk.f32.gmra.mrb[70].mxu1 %vm4084_vm2, %v4035_v32  ;;  %3942 = vst.msk [vmem:[%s12003_s4 + $0x12] sm:$0x1] %vm3923_vm3, %v3805_v57  ;;  %v3813_v23 = vrot.slane %v3812_v55, 1  ;;  %v3820_v47 = vrot.slane %v3819_v53, 2  ;;  %v3412_v28 = vpop.xlane.xlu1 %3411  ;;  %v3827_v29 = vrot.slane %v3826_v22, 4  ;;  %9191 = vrcp.f32 %v3403_v30  ;;  %v4046_v32 = vld [vmem:[%s12001_s1 + $0x2d0] sm:$0xff] }
 0x278   :  { %8920 = vmatpush3.bf16.msra.mxu1 %v8917_v51  ;;  %8471 = vmatprep.mubr.msk.f32.mxu1 %vm4084_vm2, %v4040_v52  ;;  %9193 = vrcp.f32 %v3412_v28  ;;  %3615 = vst.msk [vmem:[%s12002_s3 + $0x160] sm:$0xff] %vm2866_vm1, %v3532_v50  ;;  %v3833_v49 = vsel %vm2866_vm1, %v3532_v50, 0.0  ;;  %v8921_v6 = vpack.c.bf16 %v3534_v45, %v3532_v50  ;;  %v3538_v34 = vmul.f32 %v9182_v41, %v12077_v14  ;;  %v4049_v39 = vld [vmem:[%s12001_s1 + $0x2e8] sm:$0xff] }
 0x279   :  { %8462 = vmatmul.mubr.msk.f32.vlgmr.msra.gmra.mrb[72].mxu0 %vm4084_vm2, %v4037_v18  ;;  %v9184_v17 = vpop.eup %9183  ;;  %v3814_v10 = vadd.f32 %v3813_v23, %v3812_v55  ;;  %v3821_v11 = vadd.f32 %v3820_v47, %v3819_v53  ;;  %v3828_v60 = vadd.f32 %v3827_v29, %v3826_v22  ;;  %v3835_v0 = vadd.f32 %v3834_v27, %v3833_v49  ;;  %v12080_v53 = vld [vmem:[#allocation6_spill] sm:$0xff]  ;;  %v4050_v18 = vld [vmem:[%s12001_s1 + $0x2f0] sm:$0xff]  ;;  %v12081_v28 = vld [vmem:[#allocation7_spill] sm:$0xff] }
 0x27a   :  { %8464 = vmatprep.mubr.msk.f32.mxu0 %vm4084_vm2, %v4038_v26  ;;  %v9186_v48 = vpop.eup %9185  ;;  %8922 = vmatprep.subr.bf16.mxu0 %v8921_v6  ;;  %v3409_v61 = vpop.xlane.xlu0 %3408  ;;  %v3536_v59 = vmul.f32 %v9184_v17, %v12078_v4  ;;  %3618 = vst.msk [vmem:[%s12002_s3 + $0x178] sm:$0xff] %vm2866_vm1, %v3538_v34  ;;  %v3843_v42 = vsel %vm2866_vm1, %v3538_v34, 0.0  ;;  %v4047_v26 = vld [vmem:[%s12001_s1 + $0x2d8] sm:$0xff]  ;;  %v4052_v49 = vld [vmem:[%s12001_s1 + $0x300] sm:$0xff] }
 0x27b   :  { %8472 = vmatmul.mubr.msk.f32.vlgmr.msra.gmra.mrb[72].mxu1 %vm4084_vm2, %v4041_v62  ;;  %3943 = vst.msk [vmem:[%s12003_s4 + $0x13] sm:$0x1] %vm3923_vm3, %v3814_v10  ;;  %v3822_v21 = vrot.slane %v3821_v11, 1  ;;  %v3829_v46 = vrot.slane %v3828_v60, 2  ;;  %v3418_v43 = vpop.xlane.xlu1 %3417  ;;  %v3836_v56 = vrot.slane %v3835_v0, 4  ;;  %9195 = vrcp.f32 %v3409_v61  ;;  %8924 = vmatpush3.bf16.msra.mxu0 %v8921_v6  ;;  %v4051_v17 = vld [vmem:[%s12001_s1 + $0x2f8] sm:$0xff] }
 0x27c   :  { %8474 = vmatprep.mubr.msk.f32.mxu1 %vm4084_vm2, %v4042_v44  ;;  %9197 = vrcp.f32 %v3418_v43  ;;  %3617 = vst.msk [vmem:[%s12002_s3 + $0x170] sm:$0xff] %vm2866_vm1, %v3536_v59  ;;  %v3842_v40 = vsel %vm2866_vm1, %v3536_v59, 0.0  ;;  %v8925_v7 = vpack.c.bf16 %v3538_v34, %v3536_v59  ;;  %v3542_v24 = vmul.f32 %v9186_v48, %v10397_v9  ;;  %v12079_v9 = vld [vmem:[#allocation5_spill] sm:$0xff] }
 0x27d   :  { %8465 = vmatmul.mubr.msk.f32.gmra.mrb[74].mxu0 %vm4084_vm2, %v4039_v20  ;;  %v9188_v25 = vpop.eup %9187  ;;  %v3823_v19 = vadd.f32 %v3822_v21, %v3821_v11  ;;  %v3830_v63 = vadd.f32 %v3829_v46, %v3828_v60  ;;  %v3837_v1 = vadd.f32 %v3836_v56, %v3835_v0  ;;  %v3844_v31 = vadd.f32 %v3843_v42, %v3842_v40  ;;  %v4056_v0 = vld [vmem:[%s12001_s1 + $0x320] sm:$0xff]  ;;  %v4053_v42 = vld [vmem:[%s12001_s1 + $0x308] sm:$0xff]  ;;  %v4054_v56 = vld [vmem:[%s12001_s1 + $0x310] sm:$0xff] }
 0x27e   :  { %8481 = vmatprep.mubr.msk.f32.mxu0 %vm4084_vm2, %v4044_v37  ;;  %v9190_v16 = vpop.eup %9189  ;;  %8926 = vmatprep.subr.bf16.mxu1 %v8925_v7  ;;  %v3415_v13 = vpop.xlane.xlu0 %3414  ;;  %v3540_v3 = vmul.f32 %v9188_v25, %v12079_v9  ;;  %3620 = vst.msk [vmem:[%s12002_s3 + $0x188] sm:$0xff] %vm2866_vm1, %v3542_v24  ;;  %v3852_v33 = vsel %vm2866_vm1, %v3542_v24, 0.0 }
 0x27f   :  { %8475 = vmatmul.mubr.msk.f32.gmra.mrb[74].mxu1 %vm4084_vm2, %v4043_v54  ;;  %3944 = vst.msk [vmem:[%s12003_s4 + $0x14] sm:$0x1] %vm3923_vm3, %v3823_v19  ;;  %v3831_v2 = vrot.slane %v3830_v63, 1  ;;  %v3838_v51 = vrot.slane %v3837_v1, 2  ;;  %v3424_v45 = vpop.xlane.xlu1 %3423  ;;  %v3845_v52 = vrot.slane %v3844_v31, 4  ;;  %9199 = vrcp.f32 %v3415_v13 }
 0x280   :  { %8928 = vmatpush3.bf16.msra.mxu1 %v8925_v7  ;;  %8491 = vmatprep.mubr.msk.f32.mxu1 %vm4084_vm2, %v4048_v58  ;;  %9201 = vrcp.f32 %v3424_v45  ;;  %3619 = vst.msk [vmem:[%s12002_s3 + $0x180] sm:$0xff] %vm2866_vm1, %v3540_v3  ;;  %v3851_v57 = vsel %vm2866_vm1, %v3540_v3, 0.0  ;;  %v8929_v55 = vpack.c.bf16 %v3542_v24, %v3540_v3  ;;  %v3546_v22 = vmul.f32 %v9190_v16, %v12080_v53  ;;  %v4057_v58 = vld [vmem:[%s12001_s1 + $0x328] sm:$0xff]  ;;  %v4055_v3 = vld [vmem:[%s12001_s1 + $0x318] sm:$0xff] }
 0x281   :  { %8482 = vmatmul.mubr.msk.f32.vlgmr.msra.gmra.mrb[76].mxu0 %vm4084_vm2, %v4045_v12  ;;  %v9192_v41 = vpop.eup %9191  ;;  %v3832_v30 = vadd.f32 %v3831_v2, %v3830_v63  ;;  %v3839_v5 = vadd.f32 %v3838_v51, %v3837_v1  ;;  %v3846_v50 = vadd.f32 %v3845_v52, %v3844_v31  ;;  %v3853_v27 = vadd.f32 %v3852_v33, %v3851_v57  ;;  %v4058_v1 = vld [vmem:[%s12001_s1 + $0x330] sm:$0xff]  ;;  %v4060_v51 = vld [vmem:[%s12001_s1 + $0x340] sm:$0xff]  ;;  %v4059_v57 = vld [vmem:[%s12001_s1 + $0x338] sm:$0xff] }
 0x282   :  { %8484 = vmatprep.mubr.msk.f32.mxu0 %vm4084_vm2, %v4046_v32  ;;  %v9194_v23 = vpop.eup %9193  ;;  %8930 = vmatprep.subr.bf16.mxu0 %v8929_v55  ;;  %v3421_v47 = vpop.xlane.xlu0 %3420  ;;  %v3544_v29 = vmul.f32 %v9192_v41, %v12081_v28  ;;  %3622 = vst.msk [vmem:[%s12002_s3 + $0x198] sm:$0xff] %vm2866_vm1, %v3546_v22  ;;  %v3861_v62 = vsel %vm2866_vm1, %v3546_v22, 0.0  ;;  %v4062_v28 = vld [vmem:[%s12001_s1 + $0x350] sm:$0xff] }
 0x283   :  { %8492 = vmatmul.mubr.msk.f32.vlgmr.msra.gmra.mrb[76].mxu1 %vm4084_vm2, %v4049_v39  ;;  %3945 = vst.msk [vmem:[%s12003_s4 + $0x15] sm:$0x1] %vm3923_vm3, %v3832_v30  ;;  %v3840_v6 = vrot.slane %v3839_v5, 1  ;;  %v3847_v14 = vrot.slane %v3846_v50, 2  ;;  %v3430_v34 = vpop.xlane.xlu1 %3429  ;;  %v3854_v44 = vrot.slane %v3853_v27, 4  ;;  %9203 = vrcp.f32 %v3421_v47  ;;  %8932 = vmatpush3.bf16.msra.mxu0 %v8929_v55 }
 0x284   :  { %8494 = vmatprep.mubr.msk.f32.mxu1 %vm4084_vm2, %v4050_v18  ;;  %9205 = vrcp.f32 %v3430_v34  ;;  %3621 = vst.msk [vmem:[%s12002_s3 + $0x190] sm:$0xff] %vm2866_vm1, %v3544_v29  ;;  %v3860_v10 = vsel %vm2866_vm1, %v3544_v29, 0.0  ;;  %v8933_v11 = vpack.c.bf16 %v3546_v22, %v3544_v29  ;;  %v3550_v60 = vmul.f32 %v9194_v23, %v10417_v36  ;;  %v12082_v36 = vld [vmem:[#allocation8_spill] sm:$0xff]  ;;  %v4064_v18 = vld [vmem:[%s12001_s1 + $0x360] sm:$0xff] }
 0x285   :  { %8485 = vmatmul.mubr.msk.f32.gmra.mrb[78].mxu0 %vm4084_vm2, %v4047_v26  ;;  %v9196_v20 = vpop.eup %9195  ;;  %v3841_v48 = vadd.f32 %v3840_v6, %v3839_v5  ;;  %v3848_v61 = vadd.f32 %v3847_v14, %v3846_v50  ;;  %v3855_v4 = vadd.f32 %v3854_v44, %v3853_v27  ;;  %v3862_v59 = vadd.f32 %v3861_v62, %v3860_v10  ;;  %v4061_v26 = vld [vmem:[%s12001_s1 + $0x348] sm:$0xff]  ;;  %v12083_v44 = vld [vmem:[#allocation9_spill] sm:$0xff]  ;;  %v4066_v10 = vld [vmem:[%s12001_s1 + $0x370] sm:$0xff] }
 0x286   :  { %8501 = vmatprep.mubr.msk.f32.mxu0 %vm4084_vm2, %v4052_v49  ;;  %v9198_v37 = vpop.eup %9197  ;;  %8934 = vmatprep.subr.bf16.mxu1 %v8933_v11  ;;  %v3427_v21 = vpop.xlane.xlu0 %3426  ;;  %v3548_v46 = vmul.f32 %v9196_v20, %v12082_v36  ;;  %3624 = vst.msk [vmem:[%s12002_s3 + $0x1a8] sm:$0xff] %vm2866_vm1, %v3550_v60  ;;  %v3870_v43 = vsel %vm2866_vm1, %v3550_v60, 0.0 }
 0x287   :  { %8495 = vmatmul.mubr.msk.f32.gmra.mrb[78].mxu1 %vm4084_vm2, %v4051_v17  ;;  %3946 = vst.msk [vmem:[%s12003_s4 + $0x16] sm:$0x1] %vm3923_vm3, %v3841_v48  ;;  %v3849_v54 = vrot.slane %v3848_v61, 1  ;;  %v3856_v40 = vrot.slane %v3855_v4, 2  ;;  %v3436_v7 = vpop.xlane.xlu1 %3435  ;;  %v3863_v24 = vrot.slane %v3862_v59, 4  ;;  %9207 = vrcp.f32 %v3427_v21 }
 0x288   :  { %8936 = vmatpush3.bf16.msra.mxu1 %v8933_v11  ;;  %8511 = vmatprep.mubr.msk.f32.mxu1 %vm4084_vm2, %v4056_v0  ;;  %9209 = vrcp.f32 %v3436_v7  ;;  %3623 = vst.msk [vmem:[%s12002_s3 + $0x1a0] sm:$0xff] %vm2866_vm1, %v3548_v46  ;;  %v3869_v25 = vsel %vm2866_vm1, %v3548_v46, 0.0  ;;  %v8937_v19 = vpack.c.bf16 %v3550_v60, %v3548_v46  ;;  %v3554_v63 = vmul.f32 %v9198_v37, %v10427_v8  ;;  %v4068_v37 = vld [vmem:[%s12001_s1 + $0x380] sm:$0xff] }
 0x289   :  { %8502 = vmatmul.mubr.msk.f32.vlgmr.msra.gmra.mrb[80].mxu0 %vm4084_vm2, %v4053_v42  ;;  %v9200_v31 = vpop.eup %9199  ;;  %v3850_v12 = vadd.f32 %v3849_v54, %v3848_v61  ;;  %v3857_v16 = vadd.f32 %v3856_v40, %v3855_v4  ;;  %v3864_v13 = vadd.f32 %v3863_v24, %v3862_v59  ;;  %v3871_v9 = vadd.f32 %v3870_v43, %v3869_v25  ;;  %v4063_v61 = vld [vmem:[%s12001_s1 + $0x358] sm:$0xff]  ;;  %v12084_v59 = vld [vmem:[#allocation10_spill] sm:$0xff] }
 0x28a   :  { %8504 = vmatprep.mubr.msk.f32.mxu0 %vm4084_vm2, %v4054_v56  ;;  %v9202_v33 = vpop.eup %9201  ;;  %8938 = vmatprep.subr.bf16.mxu0 %v8937_v19  ;;  %v3433_v32 = vpop.xlane.xlu0 %3432  ;;  %v3552_v8 = vmul.f32 %v9200_v31, %v10431_v38  ;;  %3626 = vst.msk [vmem:[%s12002_s3 + $0x1b8] sm:$0xff] %vm2866_vm1, %v3554_v63  ;;  %v3879_v2 = vsel %vm2866_vm1, %v3554_v63, 0.0  ;;  %v4067_v43 = vld [vmem:[%s12001_s1 + $0x378] sm:$0xff]  ;;  %v12085_v56 = vld [vmem:[#allocation11_spill] sm:$0xff] }
 0x28b   :  { %8512 = vmatmul.mubr.msk.f32.vlgmr.msra.gmra.mrb[80].mxu1 %vm4084_vm2, %v4057_v58  ;;  %3947 = vst.msk [vmem:[%s12003_s4 + $0x17] sm:$0x1] %vm3923_vm3, %v3850_v12  ;;  %v3858_v45 = vrot.slane %v3857_v16, 1  ;;  %v3865_v52 = vrot.slane %v3864_v13, 2  ;;  %v3442_v39 = vpop.xlane.xlu1 %3441  ;;  %v3872_v38 = vrot.slane %v3871_v9, 4  ;;  %9211 = vrcp.f32 %v3433_v32  ;;  %8940 = vmatpush3.bf16.msra.mxu0 %v8937_v19  ;;  %v4072_v58 = vld [vmem:[%s12001_s1 + $0x3a0] sm:$0xff] }
 0x28c   :  { %8514 = vmatprep.mubr.msk.f32.mxu1 %vm4084_vm2, %v4058_v1  ;;  %9213 = vrcp.f32 %v3442_v39  ;;  %3625 = vst.msk [vmem:[%s12002_s3 + $0x1b0] sm:$0xff] %vm2866_vm1, %v3552_v8  ;;  %v3878_v55 = vsel %vm2866_vm1, %v3552_v8, 0.0  ;;  %v8941_v53 = vpack.c.bf16 %v3554_v63, %v3552_v8  ;;  %v3558_v22 = vmul.f32 %v9202_v33, %v10437_v35  ;;  %v4069_v12 = vld [vmem:[%s12001_s1 + $0x388] sm:$0xff] }
 0x28d   :  { %8505 = vmatmul.mubr.msk.f32.gmra.mrb[82].mxu0 %vm4084_vm2, %v4055_v3  ;;  %v9204_v41 = vpop.eup %9203  ;;  %v3859_v30 = vadd.f32 %v3858_v45, %v3857_v16  ;;  %v3866_v5 = vadd.f32 %v3865_v52, %v3864_v13  ;;  %v3873_v50 = vadd.f32 %v3872_v38, %v3871_v9  ;;  %v3880_v27 = vadd.f32 %v3879_v2, %v3878_v55  ;;  %v12086_v13 = vld [vmem:[#allocation12_spill] sm:$0xff]  ;;  %v4073_v2 = vld [vmem:[%s12001_s1 + $0x3a8] sm:$0xff] }
 0x28e   :  { %8521 = vmatprep.mubr.msk.f32.mxu0 %vm4084_vm2, %v4060_v51  ;;  %v9206_v23 = vpop.eup %9205  ;;  %8942 = vmatprep.subr.bf16.mxu1 %v8941_v53  ;;  %v3439_v47 = vpop.xlane.xlu0 %3438  ;;  %v3556_v35 = vmul.f32 %v9204_v41, %v10441_v15  ;;  %3628 = vst.msk [vmem:[%s12002_s3 + $0x1c8] sm:$0xff] %vm2866_vm1, %v3558_v22  ;;  %v4065_v15 = vld [vmem:[%s12001_s1 + $0x368] sm:$0xff]  ;;  %v3888_v14 = vsel %vm2866_vm1, %v3558_v22, 0.0  ;;  %v4070_v3 = vld [vmem:[%s12001_s1 + $0x390] sm:$0xff]  ;;  %v12087_v51 = vld [vmem:[#allocation13_spill] sm:$0xff] }
 0x28f   :  { %8515 = vmatmul.mubr.msk.f32.gmra.mrb[82].mxu1 %vm4084_vm2, %v4059_v57  ;;  %3948 = vst.msk [vmem:[%s12003_s4 + $0x18] sm:$0x1] %vm3923_vm3, %v3859_v30  ;;  %v3867_v29 = vrot.slane %v3866_v5, 1  ;;  %v3874_v62 = vrot.slane %v3873_v50, 2  ;;  %v3881_v49 = vrot.slane %v3880_v27, 4  ;;  %9215 = vrcp.f32 %v3439_v47  ;;  %v4074_v57 = vld [vmem:[%s12001_s1 + $0x3b0] sm:$0xff] }
 0x290   :  { %8944 = vmatpush3.bf16.msra.mxu1 %v8941_v53  ;;  %8531 = vmatprep.mubr.msk.f32.mxu1 %vm4084_vm2, %v4064_v18  ;;  %3627 = vst.msk [vmem:[%s12002_s3 + $0x1c0] sm:$0xff] %vm2866_vm1, %v3556_v35  ;;  %v3887_v6 = vsel %vm2866_vm1, %v3556_v35, 0.0  ;;  %v8945_v34 = vpack.c.bf16 %v3558_v22, %v3556_v35  ;;  %v3562_v17 = vmul.f32 %v9206_v23, %v12083_v44  ;;  %v4071_v30 = vld [vmem:[%s12001_s1 + $0x398] sm:$0xff]  ;;  %v4077_v44 = vld [vmem:[%s12001_s1 + $0x3c8] sm:$0xff] }
 0x291   :  { %8522 = vmatmul.mubr.msk.f32.vlgmr.msra.gmra.mrb[84].mxu0 %vm4084_vm2, %v4061_v26  ;;  %v9208_v11 = vpop.eup %9207  ;;  %v3868_v60 = vadd.f32 %v3867_v29, %v3866_v5  ;;  %v3875_v0 = vadd.f32 %v3874_v62, %v3873_v50  ;;  %v3882_v20 = vadd.f32 %v3881_v49, %v3880_v27  ;;  %v3889_v48 = vadd.f32 %v3888_v14, %v3887_v6  ;;  %v12088_v5 = vld [vmem:[#allocation14_spill] sm:$0xff]  ;;  %v4075_v35 = vld [vmem:[%s12001_s1 + $0x3b8] sm:$0xff] }
 0x292   :  { %8524 = vmatprep.mubr.msk.f32.mxu0 %vm4084_vm2, %v4062_v28  ;;  %v9210_v4 = vpop.eup %9209  ;;  %8946 = vmatprep.subr.bf16.mxu0 %v8945_v34  ;;  %v3560_v42 = vmul.f32 %v9208_v11, %v12084_v59  ;;  %3630 = vst.msk [vmem:[%s12002_s3 + $0x1d8] sm:$0xff] %vm2866_vm1, %v3562_v17  ;;  %v3897_v7 = vsel %vm2866_vm1, %v3562_v17, 0.0  ;;  %v4076_v27 = vld [vmem:[%s12001_s1 + $0x3c0] sm:$0xff]  ;;  %v4079_v59 = vld [vmem:[%s12001_s1 + $0x3d8] sm:$0xff] }
 0x293   :  { %8532 = vmatmul.mubr.msk.f32.vlgmr.msra.gmra.mrb[84].mxu1 %vm4084_vm2, %v4065_v15  ;;  %3949 = vst.msk [vmem:[%s12003_s4 + $0x19] sm:$0x1] %vm3923_vm3, %v3868_v60  ;;  %v3876_v21 = vrot.slane %v3875_v0, 1  ;;  %v3883_v36 = vrot.slane %v3882_v20, 2  ;;  %v3890_v46 = vrot.slane %v3889_v48, 4  ;;  %8948 = vmatpush3.bf16.msra.mxu0 %v8945_v34  ;;  %v3566_v54 = vmul.f32 %v9210_v4, %v12085_v56  ;;  %v4080_v49 = vld [vmem:[%s12001_s1 + $0x3e0] sm:$0xff] }
 0x294   :  { %8534 = vmatprep.mubr.msk.f32.mxu1 %vm4084_vm2, %v4066_v10  ;;  %3629 = vst.msk [vmem:[%s12002_s3 + $0x1d0] sm:$0xff] %vm2866_vm1, %v3560_v42  ;;  %v3896_v40 = vsel %vm2866_vm1, %v3560_v42, 0.0  ;;  %v8949_v24 = vpack.c.bf16 %v3562_v17, %v3560_v42  ;;  %v4078_v17 = vld [vmem:[%s12001_s1 + $0x3d0] sm:$0xff] }
 0x295   :  { %8525 = vmatmul.mubr.msk.f32.gmra.mrb[86].mxu0 %vm4084_vm2, %v4063_v61  ;;  %v9212_v25 = vpop.eup %9211  ;;  %v3877_v19 = vadd.f32 %v3876_v21, %v3875_v0  ;;  %v3884_v63 = vadd.f32 %v3883_v36, %v3882_v20  ;;  %v3891_v1 = vadd.f32 %v3890_v46, %v3889_v48  ;;  %v3898_v31 = vadd.f32 %v3897_v7, %v3896_v40  ;;  %v4081_v0 = vld [vmem:[%s12001_s1 + $0x3e8] sm:$0xff]  ;;  %v4082_v20 = vld [vmem:[%s12001_s1 + $0x3f0] sm:$0xff]  ;;  %v4083_v21 = vld [vmem:[%s12001_s1 + $0x3f8] sm:$0xff] }
 0x296   :  { %8541 = vmatprep.mubr.msk.f32.mxu0 %vm4084_vm2, %v4068_v37  ;;  %3632 = vst.msk [vmem:[%s12002_s3 + $0x1e8] sm:$0xff] %vm2866_vm1, %v3566_v54  ;;  %v9214_v16 = vpop.eup %9213  ;;  %8950 = vmatprep.subr.bf16.mxu1 %v8949_v24  ;;  %v3564_v9 = vmul.f32 %v9212_v25, %v12086_v13  ;;  %v3906_v39 = vsel %vm2866_vm1, %v3566_v54, 0.0 }
 0x297   :  { %8535 = vmatmul.mubr.msk.f32.gmra.mrb[86].mxu1 %vm4084_vm2, %v4067_v43  ;;  %3950 = vst.msk [vmem:[%s12003_s4 + $0x1a] sm:$0x1] %vm3923_vm3, %v3877_v19  ;;  %v3885_v33 = vrot.slane %v3884_v63, 1  ;;  %v3892_v32 = vrot.slane %v3891_v1, 2  ;;  %v3899_v8 = vrot.slane %v3898_v31, 4  ;;  %v3570_v45 = vmul.f32 %v9214_v16, %v12087_v51 }
 0x298   :  { %8952 = vmatpush3.bf16.msra.mxu1 %v8949_v24  ;;  %8551 = vmatprep.mubr.msk.f32.mxu1 %vm4084_vm2, %v4072_v58  ;;  %3631 = vst.msk [vmem:[%s12002_s3 + $0x1e0] sm:$0xff] %vm2866_vm1, %v3564_v9  ;;  %v3905_v52 = vsel %vm2866_vm1, %v3564_v9, 0.0  ;;  %v8953_v38 = vpack.c.bf16 %v3566_v54, %v3564_v9 }
 0x299   :  { %8542 = vmatmul.mubr.msk.f32.vlgmr.msra.gmra.mrb[88].mxu0 %vm4084_vm2, %v4069_v12  ;;  %v9216_v55 = vpop.eup %9215  ;;  %v3886_v53 = vadd.f32 %v3885_v33, %v3884_v63  ;;  %v3893_v22 = vadd.f32 %v3892_v32, %v3891_v1  ;;  %v3900_v18 = vadd.f32 %v3899_v8, %v3898_v31  ;;  %v3907_v41 = vadd.f32 %v3906_v39, %v3905_v52 }
 0x29a   :  { %3634 = vst.msk [vmem:[%s12002_s3 + $0x1f8] sm:$0xff] %vm2866_vm1, %v3570_v45  ;;  %8544 = vmatprep.mubr.msk.f32.mxu0 %vm4084_vm2, %v4070_v3  ;;  %8954 = vmatprep.subr.bf16.mxu0 %v8953_v38  ;;  %v3568_v50 = vmul.f32 %v9216_v55, %v12088_v5  ;;  %v3915_v29 = vsel %vm2866_vm1, %v3570_v45, 0.0 }
 0x29b   :  { %8552 = vmatmul.mubr.msk.f32.vlgmr.msra.gmra.mrb[88].mxu1 %vm4084_vm2, %v4073_v2  ;;  %3951 = vst.msk [vmem:[%s12003_s4 + $0x1b] sm:$0x1] %vm3923_vm3, %v3886_v53  ;;  %v3894_v26 = vrot.slane %v3893_v22, 1  ;;  %v3901_v23 = vrot.slane %v3900_v18, 2  ;;  %v3908_v47 = vrot.slane %v3907_v41, 4  ;;  %8956 = vmatpush3.bf16.msra.mxu0 %v8953_v38 }
 0x29c   :  { %8554 = vmatprep.mubr.msk.f32.mxu1 %vm4084_vm2, %v4074_v57  ;;  %3633 = vst.msk [vmem:[%s12002_s3 + $0x1f0] sm:$0xff] %vm2866_vm1, %v3568_v50  ;;  %v3914_v28 = vsel %vm2866_vm1, %v3568_v50, 0.0  ;;  %v8957_v62 = vpack.c.bf16 %v3570_v45, %v3568_v50 }
 0x29d   :  { %8545 = vmatmul.mubr.msk.f32.gmra.mrb[90].mxu0 %vm4084_vm2, %v4071_v30  ;;  %v3895_v15 = vadd.f32 %v3894_v26, %v3893_v22  ;;  %v3902_v6 = vadd.f32 %v3901_v23, %v3900_v18  ;;  %v3909_v14 = vadd.f32 %v3908_v47, %v3907_v41  ;;  %v3916_v34 = vadd.f32 %v3915_v29, %v3914_v28 }
 0x29e   :  { %8561 = vmatprep.mubr.msk.f32.mxu0 %vm4084_vm2, %v4076_v27  ;;  %8958 = vmatprep.subr.bf16.mxu1 %v8957_v62 }
 0x29f   :  { %8555 = vmatmul.mubr.msk.f32.gmra.mrb[90].mxu1 %vm4084_vm2, %v4075_v35  ;;  %3952 = vst.msk [vmem:[%s12003_s4 + $0x1c] sm:$0x1] %vm3923_vm3, %v3895_v15  ;;  %v3903_v10 = vrot.slane %v3902_v6, 1  ;;  %v3910_v11 = vrot.slane %v3909_v14, 2  ;;  %v3917_v60 = vrot.slane %v3916_v34, 4 }
 0x2a0   :  { %8960 = vmatpush3.bf16.msra.mxu1 %v8957_v62  ;;  %8571 = vmatprep.mubr.msk.f32.mxu1 %vm4084_vm2, %v4080_v49 }
 0x2a1   :  { %8562 = vmatmul.mubr.msk.f32.vlgmr.msra.gmra.mrb[92].mxu0 %vm4084_vm2, %v4077_v44  ;;  %v3904_v48 = vadd.f32 %v3903_v10, %v3902_v6  ;;  %v3911_v61 = vadd.f32 %v3910_v11, %v3909_v14  ;;  %v3918_v4 = vadd.f32 %v3917_v60, %v3916_v34 }
 0x2a2   :  { %8564 = vmatprep.mubr.msk.f32.mxu0 %vm4084_vm2, %v4078_v17 }
 0x2a3   :  { %8572 = vmatmul.mubr.msk.f32.vlgmr.msra.gmra.mrb[92].mxu1 %vm4084_vm2, %v4081_v0  ;;  %3953 = vst.msk [vmem:[%s12003_s4 + $0x1d] sm:$0x1] %vm3923_vm3, %v3904_v48  ;;  %v3912_v42 = vrot.slane %v3911_v61, 1  ;;  %v3919_v37 = vrot.slane %v3918_v4, 2 }
 0x2a4   :  { %8574 = vmatprep.mubr.msk.f32.mxu1 %vm4084_vm2, %v4082_v20 }
 0x2a5   :  { %8565 = vmatmul.mubr.msk.f32.gmra.mrb[94].mxu0 %vm4084_vm2, %v4079_v59  ;;  %v3913_v36 = vadd.f32 %v3912_v42, %v3911_v61  ;;  %v3920_v46 = vadd.f32 %v3919_v37, %v3918_v4 }
 0x2a7   :  { %8575 = vmatmul.mubr.msk.f32.gmra.mrb[94].mxu1 %vm4084_vm2, %v4083_v21  ;;  %3954 = vst.msk [vmem:[%s12003_s4 + $0x1e] sm:$0x1] %vm3923_vm3, %v3913_v36  ;;  %v3921_v43 = vrot.slane %v3920_v46, 1 }
 0x2a9   :  { %v3922_v56 = vadd.f32 %v3921_v43, %v3920_v46 }
 0x2ab   :  { %3955 = vst.msk [vmem:[%s12003_s4 + $0x1f] sm:$0x1] %vm3923_vm3, %v3922_v56 }
 0x2fa   :  { %v8263_v54 = vpop.f32.mrb[32].mxu0 }
 0x2fb   :  { %7190 = vst.msk [vmem:[%s12004_s5 + $0x8] sm:$0xff] %vm2866_vm1, %v8263_v54  ;;  %v4163_v40 = vpop.f32.mrb[33].mxu0 }
 0x2fc   :  { %7189 = vst.msk [vmem:[%s12004_s5] sm:$0xff] %vm2866_vm1, %v4163_v40 }
 0x2fd   :  { %v8273_v7 = vpop.f32.mrb[32].mxu1 }
 0x2fe   :  { %7194 = vst.msk [vmem:[%s12004_s5 + $0x28] sm:$0xff] %vm2866_vm1, %v8273_v7  ;;  %v4260_v24 = vpop.f32.mrb[33].mxu1 }
 0x2ff   :  { %7193 = vst.msk [vmem:[%s12004_s5 + $0x20] sm:$0xff] %vm2866_vm1, %v4260_v24  ;;  %v8266_v58 = vpop.f32.mrb[34].mxu0 }
 0x300   :  { %7192 = vst.msk [vmem:[%s12004_s5 + $0x18] sm:$0xff] %vm2866_vm1, %v8266_v58  ;;  %v4173_v25 = vpop.f32.mrb[35].mxu0 }
 0x301   :  { %v8276_v19 = vpop.f32.mrb[34].mxu1  ;;  %7191 = vst.msk [vmem:[%s12004_s5 + $0x10] sm:$0xff] %vm2866_vm1, %v4173_v25 }
 0x302   :  { %7196 = vst.msk [vmem:[%s12004_s5 + $0x38] sm:$0xff] %vm2866_vm1, %v8276_v19  ;;  %v4270_v63 = vpop.f32.mrb[35].mxu1 }
 0x303   :  { %7195 = vst.msk [vmem:[%s12004_s5 + $0x30] sm:$0xff] %vm2866_vm1, %v4270_v63  ;;  %v8283_v1 = vpop.f32.mrb[36].mxu0 }
 0x304   :  { %7198 = vst.msk [vmem:[%s12004_s5 + $0x48] sm:$0xff] %vm2866_vm1, %v8283_v1  ;;  %v4357_v31 = vpop.f32.mrb[37].mxu0 }
 0x305   :  { %7197 = vst.msk [vmem:[%s12004_s5 + $0x40] sm:$0xff] %vm2866_vm1, %v4357_v31 }
 0x306   :  { %v8293_v12 = vpop.f32.mrb[36].mxu1 }
 0x307   :  { %7202 = vst.msk [vmem:[%s12004_s5 + $0x68] sm:$0xff] %vm2866_vm1, %v8293_v12  ;;  %v4454_v16 = vpop.f32.mrb[37].mxu1  ;;  %v8286_v13 = vpop.f32.mrb[38].mxu0 }
 0x308   :  { %7201 = vst.msk [vmem:[%s12004_s5 + $0x60] sm:$0xff] %vm2866_vm1, %v4454_v16  ;;  %7200 = vst.msk [vmem:[%s12004_s5 + $0x58] sm:$0xff] %vm2866_vm1, %v8286_v13  ;;  %v4367_v9 = vpop.f32.mrb[39].mxu0 }
 0x309   :  { %7199 = vst.msk [vmem:[%s12004_s5 + $0x50] sm:$0xff] %vm2866_vm1, %v4367_v9 }
 0x30a   :  { %v8296_v3 = vpop.f32.mrb[38].mxu1 }
 0x30b   :  { %7204 = vst.msk [vmem:[%s12004_s5 + $0x78] sm:$0xff] %vm2866_vm1, %v8296_v3  ;;  %v4464_v33 = vpop.f32.mrb[39].mxu1 }
 0x30c   :  { %7203 = vst.msk [vmem:[%s12004_s5 + $0x70] sm:$0xff] %vm2866_vm1, %v4464_v33  ;;  %v8303_v32 = vpop.f32.mrb[40].mxu0 }
 0x30d   :  { %7206 = vst.msk [vmem:[%s12004_s5 + $0x88] sm:$0xff] %vm2866_vm1, %v8303_v32  ;;  %v4551_v8 = vpop.f32.mrb[41].mxu0 }
 0x30e   :  { %v8313_v2 = vpop.f32.mrb[40].mxu1  ;;  %7205 = vst.msk [vmem:[%s12004_s5 + $0x80] sm:$0xff] %vm2866_vm1, %v4551_v8 }
 0x30f   :  { %7210 = vst.msk [vmem:[%s12004_s5 + $0xa8] sm:$0xff] %vm2866_vm1, %v8313_v2  ;;  %v4648_v51 = vpop.f32.mrb[41].mxu1 }
 0x310   :  { %7209 = vst.msk [vmem:[%s12004_s5 + $0xa0] sm:$0xff] %vm2866_vm1, %v4648_v51  ;;  %v8306_v45 = vpop.f32.mrb[42].mxu0 }
 0x311   :  { %7208 = vst.msk [vmem:[%s12004_s5 + $0x98] sm:$0xff] %vm2866_vm1, %v8306_v45  ;;  %v4561_v52 = vpop.f32.mrb[43].mxu0 }
 0x312   :  { %v8316_v39 = vpop.f32.mrb[42].mxu1  ;;  %7207 = vst.msk [vmem:[%s12004_s5 + $0x90] sm:$0xff] %vm2866_vm1, %v4561_v52 }
 0x313   :  { %7212 = vst.msk [vmem:[%s12004_s5 + $0xb8] sm:$0xff] %vm2866_vm1, %v8316_v39  ;;  %v4658_v38 = vpop.f32.mrb[43].mxu1 }
 0x314   :  { %7211 = vst.msk [vmem:[%s12004_s5 + $0xb0] sm:$0xff] %vm2866_vm1, %v4658_v38  ;;  %v8323_v57 = vpop.f32.mrb[44].mxu0 }
 0x315   :  { %7214 = vst.msk [vmem:[%s12004_s5 + $0xc8] sm:$0xff] %vm2866_vm1, %v8323_v57  ;;  %v4745_v55 = vpop.f32.mrb[45].mxu0 }
 0x316   :  { %v8333_v53 = vpop.f32.mrb[44].mxu1  ;;  %7213 = vst.msk [vmem:[%s12004_s5 + $0xc0] sm:$0xff] %vm2866_vm1, %v4745_v55 }
 0x317   :  { %7218 = vst.msk [vmem:[%s12004_s5 + $0xe8] sm:$0xff] %vm2866_vm1, %v8333_v53  ;;  %v4842_v22 = vpop.f32.mrb[45].mxu1 }
 0x318   :  { %7217 = vst.msk [vmem:[%s12004_s5 + $0xe0] sm:$0xff] %vm2866_vm1, %v4842_v22  ;;  %v8326_v18 = vpop.f32.mrb[46].mxu0 }
 0x319   :  { %7216 = vst.msk [vmem:[%s12004_s5 + $0xd8] sm:$0xff] %vm2866_vm1, %v8326_v18  ;;  %v4755_v41 = vpop.f32.mrb[47].mxu0 }
 0x31a   :  { %v8336_v30 = vpop.f32.mrb[46].mxu1  ;;  %7215 = vst.msk [vmem:[%s12004_s5 + $0xd0] sm:$0xff] %vm2866_vm1, %v4755_v41 }
 0x31b   :  { %7220 = vst.msk [vmem:[%s12004_s5 + $0xf8] sm:$0xff] %vm2866_vm1, %v8336_v30  ;;  %v4852_v5 = vpop.f32.mrb[47].mxu1 }
 0x31c   :  { %7219 = vst.msk [vmem:[%s12004_s5 + $0xf0] sm:$0xff] %vm2866_vm1, %v4852_v5  ;;  %v8343_v50 = vpop.f32.mrb[48].mxu0 }
 0x31d   :  { %7222 = vst.msk [vmem:[%s12004_s5 + $0x108] sm:$0xff] %vm2866_vm1, %v8343_v50  ;;  %v4939_v27 = vpop.f32.mrb[49].mxu0 }
 0x31e   :  { %v8353_v26 = vpop.f32.mrb[48].mxu1  ;;  %7221 = vst.msk [vmem:[%s12004_s5 + $0x100] sm:$0xff] %vm2866_vm1, %v4939_v27 }
 0x31f   :  { %7226 = vst.msk [vmem:[%s12004_s5 + $0x128] sm:$0xff] %vm2866_vm1, %v8353_v26  ;;  %v5036_v23 = vpop.f32.mrb[49].mxu1 }
 0x320   :  { %7225 = vst.msk [vmem:[%s12004_s5 + $0x120] sm:$0xff] %vm2866_vm1, %v5036_v23  ;;  %v8346_v47 = vpop.f32.mrb[50].mxu0 }
 0x321   :  { %7224 = vst.msk [vmem:[%s12004_s5 + $0x118] sm:$0xff] %vm2866_vm1, %v8346_v47  ;;  %v4949_v35 = vpop.f32.mrb[51].mxu0 }
 0x322   :  { %v8356_v28 = vpop.f32.mrb[50].mxu1  ;;  %7223 = vst.msk [vmem:[%s12004_s5 + $0x110] sm:$0xff] %vm2866_vm1, %v4949_v35 }
 0x323   :  { %7228 = vst.msk [vmem:[%s12004_s5 + $0x138] sm:$0xff] %vm2866_vm1, %v8356_v28  ;;  %v5046_v29 = vpop.f32.mrb[51].mxu1 }
 0x324   :  { %7227 = vst.msk [vmem:[%s12004_s5 + $0x130] sm:$0xff] %vm2866_vm1, %v5046_v29  ;;  %v8363_v62 = vpop.f32.mrb[52].mxu0 }
 0x325   :  { %7230 = vst.msk [vmem:[%s12004_s5 + $0x148] sm:$0xff] %vm2866_vm1, %v8363_v62  ;;  %v5133_v49 = vpop.f32.mrb[53].mxu0 }
 0x326   :  { %v8373_v15 = vpop.f32.mrb[52].mxu1  ;;  %7229 = vst.msk [vmem:[%s12004_s5 + $0x140] sm:$0xff] %vm2866_vm1, %v5133_v49 }
 0x327   :  { %7234 = vst.msk [vmem:[%s12004_s5 + $0x168] sm:$0xff] %vm2866_vm1, %v8373_v15  ;;  %v5230_v6 = vpop.f32.mrb[53].mxu1 }
 0x328   :  { %7233 = vst.msk [vmem:[%s12004_s5 + $0x160] sm:$0xff] %vm2866_vm1, %v5230_v6  ;;  %v8366_v14 = vpop.f32.mrb[54].mxu0 }
 0x329   :  { %7232 = vst.msk [vmem:[%s12004_s5 + $0x158] sm:$0xff] %vm2866_vm1, %v8366_v14  ;;  %v5143_v34 = vpop.f32.mrb[55].mxu0 }
 0x32a   :  { %v8376_v44 = vpop.f32.mrb[54].mxu1  ;;  %7231 = vst.msk [vmem:[%s12004_s5 + $0x150] sm:$0xff] %vm2866_vm1, %v5143_v34 }
 0x32b   :  { %7236 = vst.msk [vmem:[%s12004_s5 + $0x178] sm:$0xff] %vm2866_vm1, %v8376_v44  ;;  %v5240_v17 = vpop.f32.mrb[55].mxu1 }
 0x32c   :  { %7235 = vst.msk [vmem:[%s12004_s5 + $0x170] sm:$0xff] %vm2866_vm1, %v5240_v17  ;;  %v8383_v10 = vpop.f32.mrb[56].mxu0 }
 0x32d   :  { %7238 = vst.msk [vmem:[%s12004_s5 + $0x188] sm:$0xff] %vm2866_vm1, %v8383_v10  ;;  %v5327_v11 = vpop.f32.mrb[57].mxu0 }
 0x32e   :  { %v8393_v60 = vpop.f32.mrb[56].mxu1  ;;  %7237 = vst.msk [vmem:[%s12004_s5 + $0x180] sm:$0xff] %vm2866_vm1, %v5327_v11 }
 0x32f   :  { %7242 = vst.msk [vmem:[%s12004_s5 + $0x1a8] sm:$0xff] %vm2866_vm1, %v8393_v60  ;;  %v5424_v0 = vpop.f32.mrb[57].mxu1 }
 0x330   :  { %7241 = vst.msk [vmem:[%s12004_s5 + $0x1a0] sm:$0xff] %vm2866_vm1, %v5424_v0  ;;  %v8386_v20 = vpop.f32.mrb[58].mxu0 }
 0x331   :  { %7240 = vst.msk [vmem:[%s12004_s5 + $0x198] sm:$0xff] %vm2866_vm1, %v8386_v20  ;;  %v5337_v48 = vpop.f32.mrb[59].mxu0 }
 0x332   :  { %v8396_v61 = vpop.f32.mrb[58].mxu1  ;;  %7239 = vst.msk [vmem:[%s12004_s5 + $0x190] sm:$0xff] %vm2866_vm1, %v5337_v48 }
 0x333   :  { %7244 = vst.msk [vmem:[%s12004_s5 + $0x1b8] sm:$0xff] %vm2866_vm1, %v8396_v61  ;;  %v5434_v4 = vpop.f32.mrb[59].mxu1 }
 0x334   :  { %7243 = vst.msk [vmem:[%s12004_s5 + $0x1b0] sm:$0xff] %vm2866_vm1, %v5434_v4  ;;  %v8403_v59 = vpop.f32.mrb[60].mxu0 }
 0x335   :  { %7246 = vst.msk [vmem:[%s12004_s5 + $0x1c8] sm:$0xff] %vm2866_vm1, %v8403_v59  ;;  %v5521_v42 = vpop.f32.mrb[61].mxu0 }
 0x336   :  { %v8413_v37 = vpop.f32.mrb[60].mxu1  ;;  %7245 = vst.msk [vmem:[%s12004_s5 + $0x1c0] sm:$0xff] %vm2866_vm1, %v5521_v42 }
 0x337   :  { %7250 = vst.msk [vmem:[%s12004_s5 + $0x1e8] sm:$0xff] %vm2866_vm1, %v8413_v37  ;;  %v5618_v21 = vpop.f32.mrb[61].mxu1 }
 0x338   :  { %7249 = vst.msk [vmem:[%s12004_s5 + $0x1e0] sm:$0xff] %vm2866_vm1, %v5618_v21  ;;  %v8406_v36 = vpop.f32.mrb[62].mxu0 }
 0x339   :  { %7248 = vst.msk [vmem:[%s12004_s5 + $0x1d8] sm:$0xff] %vm2866_vm1, %v8406_v36  ;;  %v5531_v46 = vpop.f32.mrb[63].mxu0 }
 0x33a   :  { %v8416_v43 = vpop.f32.mrb[62].mxu1  ;;  %7247 = vst.msk [vmem:[%s12004_s5 + $0x1d0] sm:$0xff] %vm2866_vm1, %v5531_v46 }
 0x33b   :  { %7252 = vst.msk [vmem:[%s12004_s5 + $0x1f8] sm:$0xff] %vm2866_vm1, %v8416_v43  ;;  %v5628_v56 = vpop.f32.mrb[63].mxu1 }
 0x33c   :  { %7251 = vst.msk [vmem:[%s12004_s5 + $0x1f0] sm:$0xff] %vm2866_vm1, %v5628_v56  ;;  %v8423_v54 = vpop.f32.mrb[64].mxu0 }
 0x33d   :  { %7254 = vst.msk [vmem:[%s12004_s5 + $0x208] sm:$0xff] %vm2866_vm1, %v8423_v54  ;;  %v5715_v40 = vpop.f32.mrb[65].mxu0 }
 0x33e   :  { %v8433_v7 = vpop.f32.mrb[64].mxu1  ;;  %7253 = vst.msk [vmem:[%s12004_s5 + $0x200] sm:$0xff] %vm2866_vm1, %v5715_v40 }
 0x33f   :  { %7258 = vst.msk [vmem:[%s12004_s5 + $0x228] sm:$0xff] %vm2866_vm1, %v8433_v7  ;;  %v5812_v24 = vpop.f32.mrb[65].mxu1 }
 0x340   :  { %7257 = vst.msk [vmem:[%s12004_s5 + $0x220] sm:$0xff] %vm2866_vm1, %v5812_v24  ;;  %v8426_v58 = vpop.f32.mrb[66].mxu0 }
 0x341   :  { %7256 = vst.msk [vmem:[%s12004_s5 + $0x218] sm:$0xff] %vm2866_vm1, %v8426_v58  ;;  %v5725_v25 = vpop.f32.mrb[67].mxu0 }
 0x342   :  { %v8436_v19 = vpop.f32.mrb[66].mxu1  ;;  %7255 = vst.msk [vmem:[%s12004_s5 + $0x210] sm:$0xff] %vm2866_vm1, %v5725_v25 }
 0x343   :  { %7260 = vst.msk [vmem:[%s12004_s5 + $0x238] sm:$0xff] %vm2866_vm1, %v8436_v19  ;;  %v5822_v63 = vpop.f32.mrb[67].mxu1 }
 0x344   :  { %7259 = vst.msk [vmem:[%s12004_s5 + $0x230] sm:$0xff] %vm2866_vm1, %v5822_v63  ;;  %v8443_v1 = vpop.f32.mrb[68].mxu0 }
 0x345   :  { %7262 = vst.msk [vmem:[%s12004_s5 + $0x248] sm:$0xff] %vm2866_vm1, %v8443_v1  ;;  %v5909_v31 = vpop.f32.mrb[69].mxu0 }
 0x346   :  { %v8453_v12 = vpop.f32.mrb[68].mxu1  ;;  %7261 = vst.msk [vmem:[%s12004_s5 + $0x240] sm:$0xff] %vm2866_vm1, %v5909_v31 }
 0x347   :  { %7266 = vst.msk [vmem:[%s12004_s5 + $0x268] sm:$0xff] %vm2866_vm1, %v8453_v12  ;;  %v6006_v16 = vpop.f32.mrb[69].mxu1 }
 0x348   :  { %7265 = vst.msk [vmem:[%s12004_s5 + $0x260] sm:$0xff] %vm2866_vm1, %v6006_v16  ;;  %v8446_v13 = vpop.f32.mrb[70].mxu0 }
 0x349   :  { %7264 = vst.msk [vmem:[%s12004_s5 + $0x258] sm:$0xff] %vm2866_vm1, %v8446_v13  ;;  %v5919_v9 = vpop.f32.mrb[71].mxu0 }
 0x34a   :  { %v8456_v3 = vpop.f32.mrb[70].mxu1  ;;  %7263 = vst.msk [vmem:[%s12004_s5 + $0x250] sm:$0xff] %vm2866_vm1, %v5919_v9 }
 0x34b   :  { %7268 = vst.msk [vmem:[%s12004_s5 + $0x278] sm:$0xff] %vm2866_vm1, %v8456_v3  ;;  %v6016_v33 = vpop.f32.mrb[71].mxu1 }
 0x34c   :  { %7267 = vst.msk [vmem:[%s12004_s5 + $0x270] sm:$0xff] %vm2866_vm1, %v6016_v33  ;;  %v8463_v32 = vpop.f32.mrb[72].mxu0 }
 0x34d   :  { %7270 = vst.msk [vmem:[%s12004_s5 + $0x288] sm:$0xff] %vm2866_vm1, %v8463_v32  ;;  %v6103_v8 = vpop.f32.mrb[73].mxu0 }
 0x34e   :  { %v8473_v2 = vpop.f32.mrb[72].mxu1  ;;  %7269 = vst.msk [vmem:[%s12004_s5 + $0x280] sm:$0xff] %vm2866_vm1, %v6103_v8 }
 0x34f   :  { %7274 = vst.msk [vmem:[%s12004_s5 + $0x2a8] sm:$0xff] %vm2866_vm1, %v8473_v2  ;;  %v6200_v51 = vpop.f32.mrb[73].mxu1 }
 0x350   :  { %7273 = vst.msk [vmem:[%s12004_s5 + $0x2a0] sm:$0xff] %vm2866_vm1, %v6200_v51  ;;  %v8466_v45 = vpop.f32.mrb[74].mxu0 }
 0x351   :  { %7272 = vst.msk [vmem:[%s12004_s5 + $0x298] sm:$0xff] %vm2866_vm1, %v8466_v45  ;;  %v6113_v52 = vpop.f32.mrb[75].mxu0 }
 0x352   :  { %v8476_v39 = vpop.f32.mrb[74].mxu1  ;;  %7271 = vst.msk [vmem:[%s12004_s5 + $0x290] sm:$0xff] %vm2866_vm1, %v6113_v52 }
 0x353   :  { %7276 = vst.msk [vmem:[%s12004_s5 + $0x2b8] sm:$0xff] %vm2866_vm1, %v8476_v39  ;;  %v6210_v38 = vpop.f32.mrb[75].mxu1 }
 0x354   :  { %7275 = vst.msk [vmem:[%s12004_s5 + $0x2b0] sm:$0xff] %vm2866_vm1, %v6210_v38  ;;  %v8483_v57 = vpop.f32.mrb[76].mxu0 }
 0x355   :  { %7278 = vst.msk [vmem:[%s12004_s5 + $0x2c8] sm:$0xff] %vm2866_vm1, %v8483_v57  ;;  %v6297_v55 = vpop.f32.mrb[77].mxu0 }
 0x356   :  { %v8493_v53 = vpop.f32.mrb[76].mxu1  ;;  %7277 = vst.msk [vmem:[%s12004_s5 + $0x2c0] sm:$0xff] %vm2866_vm1, %v6297_v55 }
 0x357   :  { %7282 = vst.msk [vmem:[%s12004_s5 + $0x2e8] sm:$0xff] %vm2866_vm1, %v8493_v53  ;;  %v6394_v22 = vpop.f32.mrb[77].mxu1 }
 0x358   :  { %7281 = vst.msk [vmem:[%s12004_s5 + $0x2e0] sm:$0xff] %vm2866_vm1, %v6394_v22  ;;  %v8486_v18 = vpop.f32.mrb[78].mxu0 }
 0x359   :  { %7280 = vst.msk [vmem:[%s12004_s5 + $0x2d8] sm:$0xff] %vm2866_vm1, %v8486_v18  ;;  %v6307_v41 = vpop.f32.mrb[79].mxu0 }
 0x35a   :  { %v8496_v30 = vpop.f32.mrb[78].mxu1  ;;  %7279 = vst.msk [vmem:[%s12004_s5 + $0x2d0] sm:$0xff] %vm2866_vm1, %v6307_v41 }
 0x35b   :  { %7284 = vst.msk [vmem:[%s12004_s5 + $0x2f8] sm:$0xff] %vm2866_vm1, %v8496_v30  ;;  %v6404_v5 = vpop.f32.mrb[79].mxu1 }
 0x35c   :  { %7283 = vst.msk [vmem:[%s12004_s5 + $0x2f0] sm:$0xff] %vm2866_vm1, %v6404_v5  ;;  %v8503_v50 = vpop.f32.mrb[80].mxu0 }
 0x35d   :  { %7286 = vst.msk [vmem:[%s12004_s5 + $0x308] sm:$0xff] %vm2866_vm1, %v8503_v50  ;;  %v6491_v27 = vpop.f32.mrb[81].mxu0 }
 0x35e   :  { %v8513_v26 = vpop.f32.mrb[80].mxu1  ;;  %7285 = vst.msk [vmem:[%s12004_s5 + $0x300] sm:$0xff] %vm2866_vm1, %v6491_v27 }
 0x35f   :  { %7290 = vst.msk [vmem:[%s12004_s5 + $0x328] sm:$0xff] %vm2866_vm1, %v8513_v26  ;;  %v6588_v23 = vpop.f32.mrb[81].mxu1 }
 0x360   :  { %7289 = vst.msk [vmem:[%s12004_s5 + $0x320] sm:$0xff] %vm2866_vm1, %v6588_v23  ;;  %v8506_v47 = vpop.f32.mrb[82].mxu0 }
 0x361   :  { %7288 = vst.msk [vmem:[%s12004_s5 + $0x318] sm:$0xff] %vm2866_vm1, %v8506_v47  ;;  %v6501_v35 = vpop.f32.mrb[83].mxu0 }
 0x362   :  { %v8516_v28 = vpop.f32.mrb[82].mxu1  ;;  %7287 = vst.msk [vmem:[%s12004_s5 + $0x310] sm:$0xff] %vm2866_vm1, %v6501_v35 }
 0x363   :  { %7292 = vst.msk [vmem:[%s12004_s5 + $0x338] sm:$0xff] %vm2866_vm1, %v8516_v28  ;;  %v6598_v29 = vpop.f32.mrb[83].mxu1 }
 0x364   :  { %7291 = vst.msk [vmem:[%s12004_s5 + $0x330] sm:$0xff] %vm2866_vm1, %v6598_v29  ;;  %v8523_v62 = vpop.f32.mrb[84].mxu0 }
 0x365   :  { %7294 = vst.msk [vmem:[%s12004_s5 + $0x348] sm:$0xff] %vm2866_vm1, %v8523_v62  ;;  %v6685_v49 = vpop.f32.mrb[85].mxu0 }
 0x366   :  { %v8533_v15 = vpop.f32.mrb[84].mxu1  ;;  %7293 = vst.msk [vmem:[%s12004_s5 + $0x340] sm:$0xff] %vm2866_vm1, %v6685_v49 }
 0x367   :  { %7298 = vst.msk [vmem:[%s12004_s5 + $0x368] sm:$0xff] %vm2866_vm1, %v8533_v15  ;;  %v6782_v6 = vpop.f32.mrb[85].mxu1 }
 0x368   :  { %7297 = vst.msk [vmem:[%s12004_s5 + $0x360] sm:$0xff] %vm2866_vm1, %v6782_v6  ;;  %v8526_v14 = vpop.f32.mrb[86].mxu0 }
 0x369   :  { %7296 = vst.msk [vmem:[%s12004_s5 + $0x358] sm:$0xff] %vm2866_vm1, %v8526_v14  ;;  %v6695_v34 = vpop.f32.mrb[87].mxu0 }
 0x36a   :  { %v8536_v44 = vpop.f32.mrb[86].mxu1  ;;  %7295 = vst.msk [vmem:[%s12004_s5 + $0x350] sm:$0xff] %vm2866_vm1, %v6695_v34 }
 0x36b   :  { %7300 = vst.msk [vmem:[%s12004_s5 + $0x378] sm:$0xff] %vm2866_vm1, %v8536_v44  ;;  %v6792_v17 = vpop.f32.mrb[87].mxu1 }
 0x36c   :  { %7299 = vst.msk [vmem:[%s12004_s5 + $0x370] sm:$0xff] %vm2866_vm1, %v6792_v17  ;;  %v8543_v10 = vpop.f32.mrb[88].mxu0 }
 0x36d   :  { %7302 = vst.msk [vmem:[%s12004_s5 + $0x388] sm:$0xff] %vm2866_vm1, %v8543_v10  ;;  %v6879_v11 = vpop.f32.mrb[89].mxu0 }
 0x36e   :  { %v8553_v60 = vpop.f32.mrb[88].mxu1  ;;  %7301 = vst.msk [vmem:[%s12004_s5 + $0x380] sm:$0xff] %vm2866_vm1, %v6879_v11 }
 0x36f   :  { %7306 = vst.msk [vmem:[%s12004_s5 + $0x3a8] sm:$0xff] %vm2866_vm1, %v8553_v60  ;;  %v6976_v0 = vpop.f32.mrb[89].mxu1 }
 0x370   :  { %7305 = vst.msk [vmem:[%s12004_s5 + $0x3a0] sm:$0xff] %vm2866_vm1, %v6976_v0  ;;  %v8546_v20 = vpop.f32.mrb[90].mxu0 }
 0x371   :  { %7304 = vst.msk [vmem:[%s12004_s5 + $0x398] sm:$0xff] %vm2866_vm1, %v8546_v20  ;;  %v6889_v48 = vpop.f32.mrb[91].mxu0 }
 0x372   :  { %v8556_v61 = vpop.f32.mrb[90].mxu1  ;;  %7303 = vst.msk [vmem:[%s12004_s5 + $0x390] sm:$0xff] %vm2866_vm1, %v6889_v48 }
 0x373   :  { %7308 = vst.msk [vmem:[%s12004_s5 + $0x3b8] sm:$0xff] %vm2866_vm1, %v8556_v61  ;;  %v6986_v4 = vpop.f32.mrb[91].mxu1 }
 0x374   :  { %7307 = vst.msk [vmem:[%s12004_s5 + $0x3b0] sm:$0xff] %vm2866_vm1, %v6986_v4  ;;  %v8563_v59 = vpop.f32.mrb[92].mxu0 }
 0x375   :  { %7310 = vst.msk [vmem:[%s12004_s5 + $0x3c8] sm:$0xff] %vm2866_vm1, %v8563_v59  ;;  %v7073_v42 = vpop.f32.mrb[93].mxu0 }
 0x376   :  { %v8573_v37 = vpop.f32.mrb[92].mxu1  ;;  %7309 = vst.msk [vmem:[%s12004_s5 + $0x3c0] sm:$0xff] %vm2866_vm1, %v7073_v42 }
 0x377   :  { %7314 = vst.msk [vmem:[%s12004_s5 + $0x3e8] sm:$0xff] %vm2866_vm1, %v8573_v37  ;;  %v7170_v21 = vpop.f32.mrb[93].mxu1 }
 0x378   :  { %7313 = vst.msk [vmem:[%s12004_s5 + $0x3e0] sm:$0xff] %vm2866_vm1, %v7170_v21  ;;  %v8566_v36 = vpop.f32.mrb[94].mxu0 }
 0x379   :  { %7312 = vst.msk [vmem:[%s12004_s5 + $0x3d8] sm:$0xff] %vm2866_vm1, %v8566_v36  ;;  %v7083_v46 = vpop.f32.mrb[95].mxu0 }
 0x37a   :  { %v8576_v43 = vpop.f32.mrb[94].mxu1  ;;  %7311 = vst.msk [vmem:[%s12004_s5 + $0x3d0] sm:$0xff] %vm2866_vm1, %v7083_v46 }
 0x37b   :  { %7316 = vst.msk [vmem:[%s12004_s5 + $0x3f8] sm:$0xff] %vm2866_vm1, %v8576_v43  ;;  %v7180_v56 = vpop.f32.mrb[95].mxu1 }
 0x37c   :  { %7315 = vst.msk [vmem:[%s12004_s5 + $0x3f0] sm:$0xff] %vm2866_vm1, %v7180_v56 }

</bundles_post_ra>
